<compile_context>
chip_gen: v6e
topology: v6e:2x2x1
jax: 0.10.0
libtpu: 0.0.40
codegen_flags: <defaults>
</compile_context>

<pallas_src>
import functools

import jax
import jax.numpy as jnp
from jax.experimental import pallas as pl
from jax.experimental.pallas import tpu as pltpu


def _round_up(x, m):
    return ((x + m - 1) // m) * m


def _mlp_kernel(x_ref,
                w1_ref, b1_ref,
                w2_ref, b2_ref,
                w3_ref, b3_ref,
                w4_ref, b4_ref,
                o_ref):
    # x arrives in its HBM dtype (f32 here) and is cast to bf16 in VMEM (VPU, no HBM pass).
    # Weights are pre-cast bf16 (native MXU input); accumulate in f32 via
    # preferred_element_type, bias-add + ReLU in f32 on the VPU, requantize to bf16 only
    # to feed the next matmul.
    x = x_ref[...].astype(jnp.bfloat16)

    h = jnp.dot(x, w1_ref[...], preferred_element_type=jnp.float32) + b1_ref[...]
    h = jnp.maximum(h, 0.0).astype(jnp.bfloat16)

    h = jnp.dot(h, w2_ref[...], preferred_element_type=jnp.float32) + b2_ref[...]
    h = jnp.maximum(h, 0.0).astype(jnp.bfloat16)

    h = jnp.dot(h, w3_ref[...], preferred_element_type=jnp.float32) + b3_ref[...]
    h = jnp.maximum(h, 0.0).astype(jnp.bfloat16)

    out = jnp.dot(h, w4_ref[...], preferred_element_type=jnp.float32) + b4_ref[...]
    # Output feature dim is padded to a multiple of 128 -> lane-dense, unmasked stores.
    o_ref[...] = out.astype(o_ref.dtype)


def prepare_params(params):
    """One-time (hoisted) padding + bf16 cast of the Linear layers.

    params: list of (W, b) with W: [in, out] (f32), b: [1, out] (f32).
    Returns (flat_prepared_arrays, meta). Padded rows/cols are zero, padded biases are
    zero, so padded hidden units stay exactly 0 through ReLU and never affect the result.
    """
    (w1, b1), (w2, b2), (w3, b3), (w4, b4) = params
    in_size, hidden = w1.shape
    out_size = w4.shape[1]

    in_pad = _round_up(in_size, 128)
    h_pad = _round_up(hidden, 128)
    out_pad = _round_up(out_size, 128)

    def pad2(a, rows, cols):
        return jnp.pad(a, ((0, rows - a.shape[0]), (0, cols - a.shape[1])))

    w1p = pad2(w1, in_pad, h_pad).astype(jnp.bfloat16)
    w2p = pad2(w2, h_pad, h_pad).astype(jnp.bfloat16)
    w3p = pad2(w3, h_pad, h_pad).astype(jnp.bfloat16)
    w4p = pad2(w4, h_pad, out_pad).astype(jnp.bfloat16)
    b1p = pad2(b1.astype(jnp.float32), 1, h_pad)
    b2p = pad2(b2.astype(jnp.float32), 1, h_pad)
    b3p = pad2(b3.astype(jnp.float32), 1, h_pad)
    b4p = pad2(b4.astype(jnp.float32), 1, out_pad)

    prepared = (w1p, b1p, w2p, b2p, w3p, b3p, w4p, b4p)
    meta = dict(in_size=in_size, in_pad=in_pad, h_pad=h_pad,
                out_size=out_size, out_pad=out_pad)
    return prepared, meta


def _vmem_capacity_bytes():
    """Generation-aware VMEM capacity (falls back to v7x's 64 MiB/core if unknown)."""
    try:
        info = pltpu.get_tpu_info()
        return int(getattr(info, "vmem_capacity_bytes", 64 << 20))
    except Exception:
        return 64 << 20


def ff_network_pallas(x, prepared, meta, *, tile_b=512):
    """Fused MLP forward. x: [B, input_size]; prepared/meta from prepare_params."""
    w1, b1, w2, b2, w3, b3, w4, b4 = prepared
    B, in_size = x.shape
    assert in_size == meta["in_size"], (in_size, meta["in_size"])
    in_pad, h_pad = meta["in_pad"], meta["h_pad"]
    out_size, out_pad = meta["out_size"], meta["out_pad"]

    # Lane-dense input: only pad feature columns when input_size isn't 128-aligned.
    if in_pad != in_size:
        x = jnp.pad(x, ((0, 0), (0, in_pad - in_size)))

    # Batch tile: multiple of 16 (bf16 sublane packing). No batch padding: the grid uses
    # cdiv and Pallas masks the final partial block's out-of-range rows on writeback
    # (compute is row-independent, so garbage rows never contaminate valid rows).
    tile_b = _round_up(max(16, min(tile_b, _round_up(B, 16))), 16)
    grid = (pl.cdiv(B, tile_b),)

    def resident(shape):
        # Constant-index operands: stay VMEM-resident across grid steps, single-buffered.
        return pl.BlockSpec(shape, lambda i: (0, 0),
                            pipeline_mode=pl.Buffered(buffer_count=1))

    in_specs = [
        pl.BlockSpec((tile_b, in_pad), lambda i: (i, 0)),
        resident(w1.shape), resident(b1.shape),
        resident(w2.shape), resident(b2.shape),
        resident(w3.shape), resident(b3.shape),
        resident(w4.shape), resident(b4.shape),
    ]
    out_specs = pl.BlockSpec((tile_b, out_pad), lambda i: (i, 0))

    # Advisory cost estimate for XLA scheduling around the custom call.
    flops = 2 * B * (in_pad * h_pad + 2 * h_pad * h_pad + h_pad * out_pad)
    x_itemsize = jnp.dtype(x.dtype).itemsize
    bytes_accessed = (
        B * in_pad * x_itemsize + B * out_pad * 4
        + sum(int(a.size) * jnp.dtype(a.dtype).itemsize
              for a in (w1, b1, w2, b2, w3, b3, w4, b4))
    )
    cost = pl.CostEstimate(flops=int(flops), transcendentals=0,
                           bytes_accessed=int(bytes_accessed))

    # VMEM budget: single-buffered resident weights/biases, double-buffered x/out tiles,
    # plus the in-kernel f32 activations, their bf16 requantized copies, and MXU staging.
    weight_bytes = sum(int(a.size) * jnp.dtype(a.dtype).itemsize
                       for a in (w1, b1, w2, b2, w3, b3, w4, b4))
    io_tile_bytes = 2 * tile_b * in_pad * x_itemsize + 2 * tile_b * out_pad * 4
    interm_bytes = tile_b * h_pad * (4 + 2) + tile_b * max(h_pad, out_pad) * 4
    needed = weight_bytes + io_tile_bytes + interm_bytes
    cap = _vmem_capacity_bytes()
    vmem_limit = int(min(max(2 * needed, 16 << 20), (3 * cap) // 4))

    out_padded = pl.pallas_call(
        _mlp_kernel,
        out_shape=jax.ShapeDtypeStruct((B, out_pad), jnp.float32),
        grid=grid,
        in_specs=in_specs,
        out_specs=out_specs,
        compiler_params=pltpu.CompilerParams(
            dimension_semantics=("parallel",),
            vmem_limit_bytes=vmem_limit,
        ),
        cost_estimate=cost,
    )(x, w1, b1, w2, b2, w3, b3, w4, b4)

    return out_padded[:, :out_size]


def init_params(key, input_size, hidden_size, output_size):
    """Deterministic parameter init (uniform fan-in scaling, like torch defaults)."""
    dims = [(input_size, hidden_size),
            (hidden_size, hidden_size),
            (hidden_size, hidden_size),
            (hidden_size, output_size)]
    params = []
    for (fan_in, fan_out) in dims:
        key, kw, kb = jax.random.split(key, 3)
        bound = 1.0 / jnp.sqrt(fan_in)
        W = jax.random.uniform(kw, (fan_in, fan_out), jnp.float32, -bound, bound)
        b = jax.random.uniform(kb, (1, fan_out), jnp.float32, -bound, bound)
        params.append((W, b))
    return params


def ff_network_reference(x, params):
    """Pure-JAX reference matching the kernel's numerics (bf16 matmul inputs,
    f32 accumulation, f32 bias + ReLU)."""
    h = x.astype(jnp.bfloat16)
    for i, (W, b) in enumerate(params):
        h = jnp.dot(h, W.astype(jnp.bfloat16),
                    preferred_element_type=jnp.float32) + b
        if i < len(params) - 1:
            h = jnp.maximum(h, 0.0).astype(jnp.bfloat16)
    return h


if __name__ == "__main__":
    # Small demo consistent with the module: hidden_size=600 (as in the spec; internally
    # padded to 640 for lane density), batch not a multiple of tile_b to exercise the
    # masked partial block, input/output dims not 128-aligned to exercise feature padding.
    batch = 384
    input_size = 64
    hidden_size = 600
    output_size = 10
    tile_b = 256   # grid = (2,), second block is partial (rows 256..383 valid)

    key = jax.random.PRNGKey(0)
    key, kx = jax.random.split(key)
    x = jax.random.normal(kx, (batch, input_size), jnp.float32)

    params = init_params(key, input_size, hidden_size, output_size)

    # Hoist padding + bf16 casts out of the per-call path (done once).
    prepared, meta = prepare_params(params)

    fwd = jax.jit(lambda xx, pp: ff_network_pallas(xx, pp, meta, tile_b=tile_b))
    out = fwd(x, prepared)
    out = jax.block_until_ready(out)

    ref = ff_network_reference(x, params)
    assert out.shape == (batch, output_size), out.shape
    assert jnp.allclose(out, ref, atol=1e-2, rtol=1e-2), "mismatch vs reference"

    print("KERNEL_OK")
</pallas_src>

<mosaic_0001>
module attributes {stable_mosaic.version = 11 : i64} {
  func.func @_mlp_kernel(%arg0: i32, %arg1: memref<256x128xf32, #tpu.memory_space<vmem>>, %arg2: memref<128x640xbf16, #tpu.memory_space<vmem>>, %arg3: memref<1x640xf32, #tpu.memory_space<vmem>>, %arg4: memref<640x640xbf16, #tpu.memory_space<vmem>>, %arg5: memref<1x640xf32, #tpu.memory_space<vmem>>, %arg6: memref<640x640xbf16, #tpu.memory_space<vmem>>, %arg7: memref<1x640xf32, #tpu.memory_space<vmem>>, %arg8: memref<640x128xbf16, #tpu.memory_space<vmem>>, %arg9: memref<1x128xf32, #tpu.memory_space<vmem>>, %arg10: memref<256x128xf32, #tpu.memory_space<vmem>>) attributes {dimension_semantics = [#tpu.dimension_semantics<parallel>], iteration_bounds = array<i64: 2>, scalar_prefetch = 0 : i64, scratch_operands = 0 : i64, tpu.core_type = #tpu.core_type<tc>, window_params = [{transform_indices = @transform_0, window_bounds = array<i64: 256, 128>}, {pipeline_mode = #tpu.pipeline_mode<synchronous>, transform_indices = @transform_1, window_bounds = array<i64: 128, 640>}, {pipeline_mode = #tpu.pipeline_mode<synchronous>, transform_indices = @transform_2, window_bounds = array<i64: 1, 640>}, {pipeline_mode = #tpu.pipeline_mode<synchronous>, transform_indices = @transform_3, window_bounds = array<i64: 640, 640>}, {pipeline_mode = #tpu.pipeline_mode<synchronous>, transform_indices = @transform_4, window_bounds = array<i64: 1, 640>}, {pipeline_mode = #tpu.pipeline_mode<synchronous>, transform_indices = @transform_5, window_bounds = array<i64: 640, 640>}, {pipeline_mode = #tpu.pipeline_mode<synchronous>, transform_indices = @transform_6, window_bounds = array<i64: 1, 640>}, {pipeline_mode = #tpu.pipeline_mode<synchronous>, transform_indices = @transform_7, window_bounds = array<i64: 640, 128>}, {pipeline_mode = #tpu.pipeline_mode<synchronous>, transform_indices = @transform_8, window_bounds = array<i64: 1, 128>}, {transform_indices = @transform_9, window_bounds = array<i64: 256, 128>}]} {
    %c0 = arith.constant 0 : index
    %c0_0 = arith.constant 0 : index
    %0 = vector.load %arg1[%c0, %c0_0] : memref<256x128xf32, #tpu.memory_space<vmem>>, vector<256x128xf32>
    %1 = arith.truncf %0 : vector<256x128xf32> to vector<256x128xbf16>
    %c0_1 = arith.constant 0 : index
    %c0_2 = arith.constant 0 : index
    %2 = vector.load %arg2[%c0_1, %c0_2] : memref<128x640xbf16, #tpu.memory_space<vmem>>, vector<128x640xbf16>
    %cst = arith.constant dense<0.000000e+00> : vector<256x640xf32>
    %3 = tpu.matmul %1, %2, %cst {dimension_numbers = #tpu.dot_dimension_numbers<[1], [0], [0], [1], [0, 0, 1, 1], [], []>} : vector<256x128xbf16>, vector<128x640xbf16>, vector<256x640xf32> -> vector<256x640xf32>
    %c0_3 = arith.constant 0 : index
    %c0_4 = arith.constant 0 : index
    %4 = vector.load %arg3[%c0_3, %c0_4] : memref<1x640xf32, #tpu.memory_space<vmem>>, vector<1x640xf32>
    %5 = vector.broadcast %4 : vector<1x640xf32> to vector<256x640xf32>
    %6 = arith.addf %3, %5 : vector<256x640xf32>
    %cst_5 = arith.constant 0.000000e+00 : f32
    %7 = vector.broadcast %cst_5 : f32 to vector<256x640xf32>
    %8 = arith.maximumf %6, %7 : vector<256x640xf32>
    %9 = arith.truncf %8 : vector<256x640xf32> to vector<256x640xbf16>
    %c0_6 = arith.constant 0 : index
    %c0_7 = arith.constant 0 : index
    %10 = vector.load %arg4[%c0_6, %c0_7] : memref<640x640xbf16, #tpu.memory_space<vmem>>, vector<640x640xbf16>
    %cst_8 = arith.constant dense<0.000000e+00> : vector<256x640xf32>
    %11 = tpu.matmul %9, %10, %cst_8 {dimension_numbers = #tpu.dot_dimension_numbers<[1], [0], [0], [1], [0, 0, 1, 1], [], []>} : vector<256x640xbf16>, vector<640x640xbf16>, vector<256x640xf32> -> vector<256x640xf32>
    %c0_9 = arith.constant 0 : index
    %c0_10 = arith.constant 0 : index
    %12 = vector.load %arg5[%c0_9, %c0_10] : memref<1x640xf32, #tpu.memory_space<vmem>>, vector<1x640xf32>
    %13 = vector.broadcast %12 : vector<1x640xf32> to vector<256x640xf32>
    %14 = arith.addf %11, %13 : vector<256x640xf32>
    %cst_11 = arith.constant 0.000000e+00 : f32
    %15 = vector.broadcast %cst_11 : f32 to vector<256x640xf32>
    %16 = arith.maximumf %14, %15 : vector<256x640xf32>
    %17 = arith.truncf %16 : vector<256x640xf32> to vector<256x640xbf16>
    %c0_12 = arith.constant 0 : index
    %c0_13 = arith.constant 0 : index
    %18 = vector.load %arg6[%c0_12, %c0_13] : memref<640x640xbf16, #tpu.memory_space<vmem>>, vector<640x640xbf16>
    %cst_14 = arith.constant dense<0.000000e+00> : vector<256x640xf32>
    %19 = tpu.matmul %17, %18, %cst_14 {dimension_numbers = #tpu.dot_dimension_numbers<[1], [0], [0], [1], [0, 0, 1, 1], [], []>} : vector<256x640xbf16>, vector<640x640xbf16>, vector<256x640xf32> -> vector<256x640xf32>
    %c0_15 = arith.constant 0 : index
    %c0_16 = arith.constant 0 : index
    %20 = vector.load %arg7[%c0_15, %c0_16] : memref<1x640xf32, #tpu.memory_space<vmem>>, vector<1x640xf32>
    %21 = vector.broadcast %20 : vector<1x640xf32> to vector<256x640xf32>
    %22 = arith.addf %19, %21 : vector<256x640xf32>
    %cst_17 = arith.constant 0.000000e+00 : f32
    %23 = vector.broadcast %cst_17 : f32 to vector<256x640xf32>
    %24 = arith.maximumf %22, %23 : vector<256x640xf32>
    %25 = arith.truncf %24 : vector<256x640xf32> to vector<256x640xbf16>
    %c0_18 = arith.constant 0 : index
    %c0_19 = arith.constant 0 : index
    %26 = vector.load %arg8[%c0_18, %c0_19] : memref<640x128xbf16, #tpu.memory_space<vmem>>, vector<640x128xbf16>
    %cst_20 = arith.constant dense<0.000000e+00> : vector<256x128xf32>
    %27 = tpu.matmul %25, %26, %cst_20 {dimension_numbers = #tpu.dot_dimension_numbers<[1], [0], [0], [1], [0, 0, 1, 1], [], []>} : vector<256x640xbf16>, vector<640x128xbf16>, vector<256x128xf32> -> vector<256x128xf32>
    %c0_21 = arith.constant 0 : index
    %c0_22 = arith.constant 0 : index
    %28 = vector.load %arg9[%c0_21, %c0_22] : memref<1x128xf32, #tpu.memory_space<vmem>>, vector<1x128xf32>
    %29 = vector.broadcast %28 : vector<1x128xf32> to vector<256x128xf32>
    %30 = arith.addf %27, %29 : vector<256x128xf32>
    %c0_23 = arith.constant 0 : index
    %c0_24 = arith.constant 0 : index
    %31 = vector.load %arg10[%c0_23, %c0_24] : memref<256x128xf32, #tpu.memory_space<vmem>>, vector<256x128xf32>
    tpu.vector_store %arg10[%c0_23, %c0_24], %30 {strides = array<i32>} : memref<256x128xf32, #tpu.memory_space<vmem>>, vector<256x128xf32>,
    return
  }
  func.func @transform_0(%arg0: i32) -> (i32, i32) {
    %c0_i32 = arith.constant 0 : i32
    %c0_i32_0 = arith.constant 0 : i32
    return %arg0, %c0_i32 : i32, i32
  }
  func.func @transform_1(%arg0: i32) -> (i32, i32) {
    %c0_i32 = arith.constant 0 : i32
    %c0_i32_0 = arith.constant 0 : i32
    %c0_i32_1 = arith.constant 0 : i32
    return %c0_i32, %c0_i32_0 : i32, i32
  }
  func.func @transform_2(%arg0: i32) -> (i32, i32) {
    %c0_i32 = arith.constant 0 : i32
    %c0_i32_0 = arith.constant 0 : i32
    %c0_i32_1 = arith.constant 0 : i32
    return %c0_i32, %c0_i32_0 : i32, i32
  }
  func.func @transform_3(%arg0: i32) -> (i32, i32) {
    %c0_i32 = arith.constant 0 : i32
    %c0_i32_0 = arith.constant 0 : i32
    %c0_i32_1 = arith.constant 0 : i32
    return %c0_i32, %c0_i32_0 : i32, i32
  }
  func.func @transform_4(%arg0: i32) -> (i32, i32) {
    %c0_i32 = arith.constant 0 : i32
    %c0_i32_0 = arith.constant 0 : i32
    %c0_i32_1 = arith.constant 0 : i32
    return %c0_i32, %c0_i32_0 : i32, i32
  }
  func.func @transform_5(%arg0: i32) -> (i32, i32) {
    %c0_i32 = arith.constant 0 : i32
    %c0_i32_0 = arith.constant 0 : i32
    %c0_i32_1 = arith.constant 0 : i32
    return %c0_i32, %c0_i32_0 : i32, i32
  }
  func.func @transform_6(%arg0: i32) -> (i32, i32) {
    %c0_i32 = arith.constant 0 : i32
    %c0_i32_0 = arith.constant 0 : i32
    %c0_i32_1 = arith.constant 0 : i32
    return %c0_i32, %c0_i32_0 : i32, i32
  }
  func.func @transform_7(%arg0: i32) -> (i32, i32) {
    %c0_i32 = arith.constant 0 : i32
    %c0_i32_0 = arith.constant 0 : i32
    %c0_i32_1 = arith.constant 0 : i32
    return %c0_i32, %c0_i32_0 : i32, i32
  }
  func.func @transform_8(%arg0: i32) -> (i32, i32) {
    %c0_i32 = arith.constant 0 : i32
    %c0_i32_0 = arith.constant 0 : i32
    %c0_i32_1 = arith.constant 0 : i32
    return %c0_i32, %c0_i32_0 : i32, i32
  }
  func.func @transform_9(%arg0: i32) -> (i32, i32) {
    %c0_i32 = arith.constant 0 : i32
    %c0_i32_0 = arith.constant 0 : i32
    return %arg0, %c0_i32 : i32, i32
  }
}

</mosaic_0001>

<bundles_post_ra>
// kernel: _lambda_.1
= control target key start
LH: loop header
LB: loop body
LE: loop exit
PB: predicated region body
PF: predicated region fallthrough
CT: control target
= control target key end

     0   :  { %14 = vsyncpa [#allocation3], 0  ;;  %s15676_s0 = inlined_call_operand.vmem [shape: f32[384,128], index: 0, kind: input, shape index: {}]   ;;  %s15677_s1 = inlined_call_operand.vmem [shape: bf16[128,640], index: 1, kind: input, shape index: {}]   ;;  %s15678_s2 = inlined_call_operand.vmem [shape: f32[1,640], index: 2, kind: input, shape index: {}]   ;;  %s15679_s3 = inlined_call_operand.hbm [shape: bf16[640,640], index: 3, kind: input, shape index: {}]   ;;  %s15680_s4 = inlined_call_operand.vmem [shape: f32[1,640], index: 4, kind: input, shape index: {}]   ;;  %s15681_s5 = inlined_call_operand.hbm [shape: bf16[640,640], index: 5, kind: input, shape index: {}]   ;;  %s15682_s6 = inlined_call_operand.vmem [shape: f32[1,640], index: 6, kind: input, shape index: {}]   ;;  %s15683_s7 = inlined_call_operand.vmem [shape: bf16[640,128], index: 7, kind: input, shape index: {}]   ;;  %s15684_s8 = inlined_call_operand.vmem [shape: f32[1,128], index: 8, kind: input, shape index: {}]   ;;  %s15685_s9 = inlined_call_operand.vmem [shape: f32[384,128], index: 9, kind: output, shape index: {}]  }
   0x1   :  { %15 = vsyncpa [#allocation5], 0  ;;  %s11531_s30 = smov 0   ;;  %s11533_s10 = smov 0  }
   0x2   :  { %s11535_s11 = smov 0  }
   0x3 LB: > { %s11544_s12 = sadd.s32 4294967295, %s11442_s11   ;;  %s11546_s13 = sadd.s32 1, %s11442_s11   ;;  %s11442_s11 = sphi %s11535_s11, %s16928_s11   ;;  %s11438_s10 = sphi %s11533_s10, %s16927_s10   ;;  %s11434_s30 = sphi %s11531_s30, %s16926_s30  }
   0x4   : > { %s219_s14 = ssub.s32 %s11442_s11, %s11546_s13  ;;  %s222_s15 = sadd.s32 1, %s11438_s10 }
   0x5   : > { %p220_p0 = scmp.eq.s32.totalorder %s219_s14, 0  ;;  %p232_p1 = scmp.ne.s32.totalorder %s11438_s10, %s11434_s30 }
   0x6   : > { %p233_p2 = scmp.eq.s32.totalorder %s11544_s12, 1  ;;  %p9084_p3 = scmp.ge.s32.totalorder %s11442_s11, 1 }
   0x7   : > { %s11554_s16 = scalar_select %p220_p0, %s11438_s10, %s222_s15  }
   0x8   : > { %p11556_p4 = por %p233_p2, %p232_p1  ;;  %p246_p5 = scmp.lt.s32.totalorder %s11442_s11, 3 }
   0x9   : > { %p15686_p6 = scmp.eq.s32.totalorder %s11544_s12, 0  ;;  %s11476_s19 = smov [#allocation2]  }
   0xa   : > { %p11561_p7 = pnand %p9084_p3, %p246_p5  ;;  %s264_s20 = sshll.u32 %s11476_s19, 4  ;;  %s265_s20 = int_to_ptr.vmem [resolvable:$true] %s264_s20 }
   0xb   : > { %s11477_s22 = smov [#allocation4]   ;;  %s11339_s24 = scalar_lea.vmem %s265_s20, 25600 }
   0xc   : > { %p10563_p8 = pneg %p11561_p7  ;;  %s280_s23 = sshll.u32 %s11477_s22, 4  ;;  %s281_s23 = int_to_ptr.vmem [resolvable:$true] %s280_s23 }
   0xd   : > { %p11340_p11 = scmp.ne.s32.totalorder %s265_s20, %s11339_s24  ;;  %p11347_p0 = scmp.lt.s32.totalorder %s265_s20, %s265_s20 }
   0xe   : > { %p11569_p9 = pnand %p15686_p6, %p10563_p8  ;;  %p11348_p1 = scmp.lt.s32.totalorder %s11339_s24, %s11339_s24 }
  0x10   : > { %p11330_p10 = pneg %p11569_p9  ;;  %p11349_p2 = por %p11348_p1, %p11347_p0 }
  0x12   : > { %p11342_p12 = pnand %p11340_p11, %p11330_p10 }
  0x14   : > { %p11343_p13 = pneg %p11342_p12 }
  0x16   : > { %p11350_p3 = pnand %p11349_p2, %p11343_p13 }
  0x18   : > { %11353 = shalt.err (!%p11350_p3)
}
  0x19   : > { %s11478_s25 = smov 320   ;;  %s11479_s26 = smov 20  }
  0x1a   : > { %10566 = dma.hbm_to_vmem [thread:$0]  (!%p11569_p9), %s15679_s3, 25600, %s265_s20, [#allocation3], %s11478_s25, %s11478_s25, %s11479_s26  }
  0x1b   : > { %s11365_s29 = scalar_lea.vmem %s281_s23, 25600  ;;  %p11373_p12 = scmp.lt.s32.totalorder %s281_s23, %s281_s23 }
  0x1c   : > { %p11366_p5 = scmp.ne.s32.totalorder %s281_s23, %s11365_s29  ;;  %p11374_p6 = scmp.lt.s32.totalorder %s11365_s29, %s11365_s29 }
  0x1e   : > { %p11368_p8 = pnand %p11366_p5, %p11330_p10  ;;  %p11375_p0 = por %p11374_p6, %p11373_p12 }
  0x20   : > { %p11369_p11 = pneg %p11368_p8 }
  0x22   : > { %p11376_p13 = pnand %p11375_p0, %p11369_p11 }
  0x24   : > { %11379 = shalt.err (!%p11376_p13)
}
  0x25   : > { %10569 = dma.hbm_to_vmem [thread:$0]  (!%p11569_p9), %s15681_s5, 25600, %s281_s23, [#allocation5], %s11478_s25, %s11478_s25, %s11479_s26  }
  0x26   : > { %322 = sbr.rel (%p11561_p7) target bundleno = 1903 (0x76f), region = 56 }
  0x2b   : > { %p15930_p1 = scmp.eq.s32.totalorder %s11544_s12, 0 }
  0x2d   : > { %11425 = dma.done.wait (%p15930_p1), [#allocation3], 25600   ;;  %p15931_p10 = pmov %p15930_p1 }
  0x2e   : > { %p15932_p2 = pmov %p15930_p1 }
  0x2f   : > { %11427 = vsyncadd (%p15931_p10), [#allocation3], 4294941696 }
  0x30   : > { %11429 = dma.done.wait (%p15932_p2), [#allocation5], 25600   ;;  %p15933_p6 = pmov %p15930_p1 }
  0x31   : > { %v15687_v0 = vmov 0   ;;  %v10667_v1 = vld [vmem:[%s15677_s1 + $0x11c] ss:$20 sps:$4 sm:$0xff]   ;;  %v10669_v2 = vld [vmem:[%s15677_s1 + $0x124] ss:$20 sps:$4 sm:$0xff]   ;;  %s11649_s15 = sshll.u32 %s11544_s12, 5 }
  0x32   : > { %11431 = vsyncadd (%p15933_p6), [#allocation5], 4294941696  ;;  %748 = vmatprep.mubr.bf16.mxu0 %v15687_v0  ;;  %941 = vmatprep.mubr.bf16.mxu1 %v15687_v0  ;;  %v10671_v3 = vld [vmem:[%s15677_s1 + $0x118] ss:$20 sps:$4 sm:$0xff]   ;;  %v10672_v4 = vld [vmem:[%s15677_s1 + $0x120] ss:$20 sps:$4 sm:$0xff]  }
  0x33   : > { %716 = vmatprep.subr.bf16.mxu0 %v10667_v1  ;;  %909 = vmatprep.subr.bf16.mxu1 %v10669_v2  ;;  %v10673_v5 = vld [vmem:[%s15677_s1 + $0xf4] ss:$20 sps:$4 sm:$0xff]   ;;  %v10675_v6 = vld [vmem:[%s15677_s1 + $0xfc] ss:$20 sps:$4 sm:$0xff]   ;;  %v10678_v8 = vld [vmem:[%s15677_s1 + $0xf8] ss:$20 sps:$4 sm:$0xff]  }
  0x34   : > { %717 = vmatpush1.bf16.msra.mxu0 %v10671_v3  ;;  %910 = vmatpush1.bf16.msra.mxu1 %v10672_v4  ;;  %v10677_v7 = vld [vmem:[%s15677_s1 + $0xf0] ss:$20 sps:$4 sm:$0xff]   ;;  %v10679_v9 = vld [vmem:[%s15677_s1 + $0xcc] ss:$20 sps:$4 sm:$0xff]   ;;  %v10681_v10 = vld [vmem:[%s15677_s1 + $0xd4] ss:$20 sps:$4 sm:$0xff]  }
  0x35   : > { %718 = vmatprep.subr.bf16.mxu0 %v10673_v5  ;;  %911 = vmatprep.subr.bf16.mxu1 %v10675_v6  ;;  %v10683_v11 = vld [vmem:[%s15677_s1 + $0xc8] ss:$20 sps:$4 sm:$0xff]   ;;  %v10684_v12 = vld [vmem:[%s15677_s1 + $0xd0] ss:$20 sps:$4 sm:$0xff]   ;;  %v10687_v14 = vld [vmem:[%s15677_s1 + $0xac] ss:$20 sps:$4 sm:$0xff]  }
  0x36   : > { %v10685_v13 = vld [vmem:[%s15677_s1 + $0xa4] ss:$20 sps:$4 sm:$0xff]   ;;  %v10689_v15 = vld [vmem:[%s15677_s1 + $0xa0] ss:$20 sps:$4 sm:$0xff]   ;;  %v10690_v16 = vld [vmem:[%s15677_s1 + $0xa8] ss:$20 sps:$4 sm:$0xff]  }
  0x37   : > { %v10691_v17 = vld [vmem:[%s15677_s1 + $0x7c] ss:$20 sps:$4 sm:$0xff]   ;;  %v10693_v18 = vld [vmem:[%s15677_s1 + $0x84] ss:$20 sps:$4 sm:$0xff]   ;;  %p370_p7 = scmp.lt.s32.totalorder %s11649_s15, 47  ;;  %s8729_s20 = ssub.s32 (%p11556_p4), 48, %s11649_s15 }
  0x38   : > { %719 = vmatpush1.bf16.msra.mxu0 %v10677_v7  ;;  %912 = vmatpush1.bf16.msra.mxu1 %v10678_v8  ;;  %v10695_v19 = vld [vmem:[%s15677_s1 + $0x78] ss:$20 sps:$4 sm:$0xff]   ;;  %v10696_v20 = vld [vmem:[%s15677_s1 + $0x80] ss:$20 sps:$4 sm:$0xff]   ;;  %v10699_v22 = vld [vmem:[%s15677_s1 + $0x5c] ss:$20 sps:$4 sm:$0xff]  }
  0x39   : > { %720 = vmatprep.subr.bf16.mxu0 %v10679_v9  ;;  %913 = vmatprep.subr.bf16.mxu1 %v10681_v10  ;;  %v10697_v21 = vld [vmem:[%s15677_s1 + $0x54] ss:$20 sps:$4 sm:$0xff]   ;;  %s371_s18 = scalar_select %p370_p7, %s11649_s15, 47  ;;  %v10701_v23 = vld [vmem:[%s15677_s1 + $0x50] ss:$20 sps:$4 sm:$0xff]  }
  0x3a   : > { %v10702_v24 = vld [vmem:[%s15677_s1 + $0x58] ss:$20 sps:$4 sm:$0xff]   ;;  %v10705_v26 = vld [vmem:[%s15677_s1 + $0x34] ss:$20 sps:$4 sm:$0xff]   ;;  %v10708_v28 = vld [vmem:[%s15677_s1 + $0x30] ss:$20 sps:$4 sm:$0xff]  }
  0x3b   : > { %v10703_v25 = vld [vmem:[%s15677_s1 + $0x2c] ss:$20 sps:$4 sm:$0xff]   ;;  %s9093_s27 = sshll.u32 %s371_s18, 3  ;;  %v10707_v27 = vld [vmem:[%s15677_s1 + $0x28] ss:$20 sps:$4 sm:$0xff]   ;;  %s9592_s21 = sshll.u32 (%p11556_p4), %s11544_s12, 8 }
  0x3c   : > { %721 = vmatpush1.bf16.msra.mxu0 %v10683_v11  ;;  %914 = vmatpush1.bf16.msra.mxu1 %v10684_v12  ;;  %v10709_v29 = vld [vmem:[%s15677_s1 + $0x4] ss:$20 sps:$4 sm:$0xff]   ;;  %v10711_v30 = vld [vmem:[%s15677_s1 + $0xc] ss:$20 sps:$4 sm:$0xff]   ;;  %s11701_s24 = scalar_lea.vmem %s15676_s0, %s9093_s27  ;;  %v10714_v32 = vld [vmem:[%s15677_s1 + $0x8] ss:$20 sps:$4 sm:$0xff]   ;;  %s15544_s23 = scalar_lea.vmem (%p11556_p4), %s15685_s9, %s9592_s21  }
  0x3d   : > { %722 = vmatprep.subr.bf16.mxu0 %v10685_v13  ;;  %915 = vmatprep.subr.bf16.mxu1 %v10687_v14  ;;  %v10713_v31 = vld [vmem:[%s15677_s1] ss:$20 sps:$4 sm:$0xff]   ;;  %v386_v34 = vld [vmem:[%s11701_s24 + $0x8] sm:$0xff]  ;;  %v10722_v39 = vld [vmem:[#allocation2 + $0x11c] ss:$20 sps:$4 sm:$0xff]   ;;  %p8730_p9 = scmp.lt.s32.totalorder (%p11556_p4), %s8729_s20, 32 }
  0x3e   : > { %v385_v33 = vld [vmem:[%s11701_s24] sm:$0xff]  ;;  %v10715_v35 = vld [vmem:[%s15677_s1 + $0x128] ss:$20 sps:$4 sm:$0xff]   ;;  %v387_v38 = vld [vmem:[%s11701_s24 + $0x10] sm:$0xff] }
  0x3f   : > { %v11714_v36 = vpack.c.bf16 %v386_v34, %v385_v33  ;;  %v10716_v37 = vld [vmem:[%s15677_s1 + $0x100] ss:$20 sps:$4 sm:$0xff]   ;;  %v10720_v40 = vld [vmem:[#allocation2 + $0x118] ss:$20 sps:$4 sm:$0xff]   ;;  %v10724_v45 = vld [vmem:[#allocation2 + $0xf0] ss:$20 sps:$4 sm:$0xff]  }
  0x40   : > { %723 = vmatpush1.bf16.msra.mxu0 %v10689_v15  ;;  %916 = vmatpush1.bf16.msra.mxu1 %v10690_v16  ;;  %v388_v41 = vld [vmem:[%s11701_s24 + $0x18] sm:$0xff]  ;;  %v10726_v43 = vld [vmem:[#allocation2 + $0xf4] ss:$20 sps:$4 sm:$0xff]   ;;  %v10718_v46 = vld [vmem:[%s15677_s1 + $0xb0] ss:$20 sps:$4 sm:$0xff]  }
  0x41   : > { %724 = vmatprep.subr.bf16.mxu0 %v10691_v17  ;;  %917 = vmatprep.subr.bf16.mxu1 %v10693_v18  ;;  %v10717_v42 = vld [vmem:[%s15677_s1 + $0xd8] ss:$20 sps:$4 sm:$0xff]   ;;  %v11728_v44 = vpack.c.bf16 %v388_v41, %v387_v38  ;;  %v389_v48 = vld [vmem:[%s11701_s24 + $0x20] sm:$0xff]  ;;  %v10719_v50 = vld [vmem:[%s15677_s1 + $0x88] ss:$20 sps:$4 sm:$0xff]  }
  0x42   : > { %v10729_v47 = vld [vmem:[#allocation2 + $0xcc] ss:$20 sps:$4 sm:$0xff]   ;;  %v10727_v51 = vld [vmem:[#allocation2 + $0xc8] ss:$20 sps:$4 sm:$0xff]   ;;  %v10733_v52 = vld [vmem:[#allocation2 + $0xa4] ss:$20 sps:$4 sm:$0xff]  }
  0x43   : > { %v390_v49 = vld [vmem:[%s11701_s24 + $0x28] sm:$0xff]  ;;  %v10731_v54 = vld [vmem:[#allocation2 + $0xa0] ss:$20 sps:$4 sm:$0xff]   ;;  %v10736_v56 = vld [vmem:[#allocation2 + $0x7c] ss:$20 sps:$4 sm:$0xff]  }
  0x44   : > { %725 = vmatpush1.bf16.msra.mxu0 %v10695_v19  ;;  %918 = vmatpush1.bf16.msra.mxu1 %v10696_v20  ;;  %v11742_v53 = vpack.c.bf16 %v390_v49, %v389_v48  ;;  %v10723_v55 = vld [vmem:[%s15677_s1 + $0x60] ss:$20 sps:$4 sm:$0xff]   ;;  %v392_v58 = vld [vmem:[%s11701_s24 + $0x38] sm:$0xff]  ;;  %v10738_v63 = vld [vmem:[#allocation2 + $0x50] ss:$20 sps:$4 sm:$0xff]  }
  0x45   : > { %726 = vmatprep.subr.bf16.mxu0 %v10697_v21  ;;  %919 = vmatprep.subr.bf16.mxu1 %v10699_v22  ;;  %v391_v57 = vld [vmem:[%s11701_s24 + $0x30] sm:$0xff]  ;;  %v10734_v59 = vld [vmem:[#allocation2 + $0x78] ss:$20 sps:$4 sm:$0xff]   ;;  %v393_v3 = vld [vmem:[%s11701_s24 + $0x40] sm:$0xff] }
  0x46   : > { %v10730_v60 = vld [vmem:[%s15677_s1 + $0x38] ss:$20 sps:$4 sm:$0xff]   ;;  %v10740_v61 = vld [vmem:[#allocation2 + $0x54] ss:$20 sps:$4 sm:$0xff]   ;;  %v11756_v62 = vpack.c.bf16 %v392_v58, %v391_v57  ;;  %v10737_v1 = vld [vmem:[%s15677_s1 + $0x10] ss:$20 sps:$4 sm:$0xff]  }
  0x47   : > { %v10743_v2 = vld [vmem:[#allocation2 + $0x2c] ss:$20 sps:$4 sm:$0xff]   ;;  %v10741_v5 = vld [vmem:[#allocation2 + $0x28] ss:$20 sps:$4 sm:$0xff]   ;;  %v10746_v6 = vld [vmem:[#allocation2 + $0x4] ss:$20 sps:$4 sm:$0xff]  }
  0x48   : > { %727 = vmatpush1.bf16.msra.mxu0 %v10701_v23  ;;  %920 = vmatpush1.bf16.msra.mxu1 %v10702_v24  ;;  %v394_v4 = vld [vmem:[%s11701_s24 + $0x48] sm:$0xff]  ;;  %v10752_v7 = vld [vmem:[#allocation2 + $0x39c] ss:$20 sps:$4 sm:$0xff]   ;;  %v10744_v9 = vld [vmem:[#allocation2] ss:$20 sps:$4 sm:$0xff]  }
  0x49   : > { %728 = vmatprep.subr.bf16.mxu0 %v10703_v25  ;;  %921 = vmatprep.subr.bf16.mxu1 %v10705_v26  ;;  %v11767_v8 = vpack.c.bf16 %v394_v4, %v393_v3  ;;  %v10749_v10 = vld [vmem:[#allocation2 + $0x25c] ss:$20 sps:$4 sm:$0xff]   ;;  %v10747_v13 = vld [vmem:[#allocation2 + $0x258] ss:$20 sps:$4 sm:$0xff]   ;;  %v10758_v14 = vld [vmem:[#allocation2 + $0x234] ss:$20 sps:$4 sm:$0xff]  }
  0x4a   : > { %v395_v11 = vld [vmem:[%s11701_s24 + $0x50] sm:$0xff]  ;;  %v396_v12 = vld [vmem:[%s11701_s24 + $0x58] sm:$0xff]  ;;  %v10767_v17 = vld [vmem:[#allocation2 + $0x20c] ss:$20 sps:$4 sm:$0xff]  }
  0x4b   : > { %v11775_v15 = vpack.c.bf16 %v396_v12, %v395_v11  ;;  %v10756_v16 = vld [vmem:[#allocation2 + $0x230] ss:$20 sps:$4 sm:$0xff]   ;;  %v398_v19 = vld [vmem:[%s11701_s24 + $0x68] sm:$0xff]  ;;  %v10774_v23 = vld [vmem:[#allocation2 + $0x1e0] ss:$20 sps:$4 sm:$0xff]  }
  0x4c   : > { %729 = vmatpush1.bf16.msra.mxu0 %v10707_v27  ;;  %922 = vmatpush1.bf16.msra.mxu1 %v10708_v28  ;;  %v397_v18 = vld [vmem:[%s11701_s24 + $0x60] sm:$0xff]  ;;  %v10765_v20 = vld [vmem:[#allocation2 + $0x208] ss:$20 sps:$4 sm:$0xff]   ;;  %v399_v25 = vld [vmem:[%s11701_s24 + $0x70] sm:$0xff] }
  0x4d   : > { %730 = vmatprep.subr.bf16.mxu0 %v10709_v29  ;;  %923 = vmatprep.subr.bf16.mxu1 %v10711_v30  ;;  %v10776_v21 = vld [vmem:[#allocation2 + $0x1e4] ss:$20 sps:$4 sm:$0xff]   ;;  %v11783_v22 = vpack.c.bf16 %v398_v19, %v397_v18  ;;  %v10785_v24 = vld [vmem:[#allocation2 + $0x1bc] ss:$20 sps:$4 sm:$0xff]   ;;  %v10794_v28 = vld [vmem:[#allocation2 + $0x194] ss:$20 sps:$4 sm:$0xff]  }
  0x4e   : > { %v400_v26 = vld [vmem:[%s11701_s24 + $0x78] sm:$0xff]  ;;  %v10792_v30 = vld [vmem:[#allocation2 + $0x190] ss:$20 sps:$4 sm:$0xff]   ;;  %v402_v33 = vld [vmem:[%s11701_s24 + $0x88] sm:$0xff] }
  0x4f   : > { %v10783_v27 = vld [vmem:[#allocation2 + $0x1b8] ss:$20 sps:$4 sm:$0xff]   ;;  %v11791_v29 = vpack.c.bf16 %v400_v26, %v399_v25  ;;  %v10801_v34 = vld [vmem:[#allocation2 + $0x168] ss:$20 sps:$4 sm:$0xff]   ;;  %v413_v57 = vld [vmem:[%s11701_s24 + $0xe0] sm:$0xff] }
  0x50   : > { %731 = vmatpush1.bf16.msra.mxu0 %v10713_v31  ;;  %924 = vmatpush1.bf16.msra.mxu1 %v10714_v32  ;;  %v10803_v31 = vld [vmem:[#allocation2 + $0x16c] ss:$20 sps:$4 sm:$0xff]   ;;  %v404_v38 = vld [vmem:[%s11701_s24 + $0x98] sm:$0xff]  ;;  %v10753_v3 = vld [vmem:[#allocation2 + $0x370] ss:$20 sps:$4 sm:$0xff]  }
  0x51   : > { %10363 = vmatprep.subr.bf16.mxu0 %v10715_v35  ;;  %2810 = vmatprep.subr.bf16.mxu1 %v10722_v39  ;;  %v401_v32 = vld [vmem:[%s11701_s24 + $0x80] sm:$0xff]  ;;  %v10821_v48 = vld [vmem:[#allocation2 + $0x61c] ss:$20 sps:$4 sm:$0xff]   ;;  %v414_v58 = vld [vmem:[%s11701_s24 + $0xe8] sm:$0xff] }
  0x52   : > { %v10812_v41 = vld [vmem:[#allocation2 + $0x144] ss:$20 sps:$4 sm:$0xff]   ;;  %v10761_v4 = vld [vmem:[#allocation2 + $0x34c] ss:$20 sps:$4 sm:$0xff]   ;;  %v10777_v11 = vld [vmem:[#allocation2 + $0x2a8] ss:$20 sps:$4 sm:$0xff]  }
  0x53   : > { %749 = vmatmul.mubr.bf16.vlgmr.msra.gmra.mxu0 %v11714_v36  ;;  %942 = vmatmul.mubr.bf16.vlgmr.msra.gmra.mxu1 %v11714_v36  ;;  %v10788_v12 = vld [vmem:[#allocation2 + $0x4dc] ss:$20 sps:$4 sm:$0xff]   ;;  %v10800_v18 = vld [vmem:[#allocation2 + $0x464] ss:$20 sps:$4 sm:$0xff]   ;;  %v10798_v19 = vld [vmem:[#allocation2 + $0x460] ss:$20 sps:$4 sm:$0xff]  }
  0x54   : > { %10364 = vmatpush3.bf16.msra.mxu0 %v10715_v35  ;;  %758 = vmatprep.mubr.bf16.mxu0 %v15687_v0  ;;  %v11799_v35 = vpack.c.bf16 %v402_v33, %v401_v32  ;;  %v10836_v32 = vld [vmem:[#allocation2 + $0x124] ss:$20 sps:$4 sm:$0xff]  }
  0x55   : > { %951 = vmatprep.mubr.bf16.mxu1 %v15687_v0  ;;  %10365 = vmatprep.subr.bf16.mxu0 %v10716_v37  ;;  %v481_v33 = vld [vmem:[%s15678_s2] sm:$0x1f] }
  0x56   : > { %2811 = vmatpush1.bf16.msra.mxu1 %v10720_v40  ;;  %v405_v40 = vld [vmem:[%s11701_s24 + $0xa0] sm:$0xff] }
  0x57   : > { %2812 = vmatprep.subr.bf16.mxu1 %v10726_v43  ;;  %v10810_v43 = vld [vmem:[#allocation2 + $0x140] ss:$20 sps:$4 sm:$0xff]  }
  0x58   : > { %10366 = vmatpush3.bf16.msra.mxu0 %v10716_v37  ;;  %v403_v37 = vld [vmem:[%s11701_s24 + $0x90] sm:$0xff] }
  0x59   : > { %10367 = vmatprep.subr.bf16.mxu0 %v10717_v42  ;;  %v11807_v39 = vpack.c.bf16 %v404_v38, %v403_v37 }
  0x5a   : > { %2813 = vmatpush1.bf16.msra.mxu1 %v10724_v45 }
  0x5b   : > { %759 = vmatmul.mubr.bf16.gmra.mxu0 %v11728_v44  ;;  %952 = vmatmul.mubr.bf16.gmra.mxu1 %v11728_v44 }
  0x5c   : > { %768 = vmatprep.mubr.bf16.mxu0 %v15687_v0  ;;  %961 = vmatprep.mubr.bf16.mxu1 %v15687_v0 }
  0x5d   : > { %10368 = vmatpush3.bf16.msra.mxu0 %v10717_v42  ;;  %2814 = vmatprep.subr.bf16.mxu1 %v10729_v47  ;;  %v406_v42 = vld [vmem:[%s11701_s24 + $0xa8] sm:$0xff]  ;;  %v408_v47 = vld [vmem:[%s11701_s24 + $0xb8] sm:$0xff] }
  0x5e   : > { %10369 = vmatprep.subr.bf16.mxu0 %v10718_v46  ;;  %2815 = vmatpush1.bf16.msra.mxu1 %v10727_v51  ;;  %v11815_v45 = vpack.c.bf16 %v406_v42, %v405_v40  ;;  %v410_v51 = vld [vmem:[%s11701_s24 + $0xc8] sm:$0xff] }
  0x5f   : > { %2816 = vmatprep.subr.bf16.mxu1 %v10733_v52 }
  0x61   : > { %10370 = vmatpush3.bf16.msra.mxu0 %v10718_v46  ;;  %v407_v46 = vld [vmem:[%s11701_s24 + $0xb0] sm:$0xff] }
  0x62   : > { %10371 = vmatprep.subr.bf16.mxu0 %v10719_v50  ;;  %2817 = vmatpush1.bf16.msra.mxu1 %v10731_v54  ;;  %v11823_v49 = vpack.c.bf16 %v408_v47, %v407_v46  ;;  %v411_v54 = vld [vmem:[%s11701_s24 + $0xd0] sm:$0xff] }
  0x63   : > { %769 = vmatmul.mubr.bf16.gmra.mxu0 %v11742_v53  ;;  %962 = vmatmul.mubr.bf16.gmra.mxu1 %v11742_v53 }
  0x64   : > { %778 = vmatprep.mubr.bf16.mxu0 %v15687_v0  ;;  %971 = vmatprep.mubr.bf16.mxu1 %v15687_v0 }
  0x65   : > { %10372 = vmatpush3.bf16.msra.mxu0 %v10719_v50  ;;  %2818 = vmatprep.subr.bf16.mxu1 %v10736_v56  ;;  %v409_v50 = vld [vmem:[%s11701_s24 + $0xc0] sm:$0xff] }
  0x66   : > { %10373 = vmatprep.subr.bf16.mxu0 %v10723_v55  ;;  %2819 = vmatpush1.bf16.msra.mxu1 %v10734_v59  ;;  %v11831_v52 = vpack.c.bf16 %v410_v51, %v409_v50  ;;  %v11847_v59 = vpack.c.bf16 %v414_v58, %v413_v57 }
  0x67   : > { %2820 = vmatprep.subr.bf16.mxu1 %v10740_v61  ;;  %v416_v61 = vld [vmem:[%s11701_s24 + $0xf8] sm:$0xff] }
  0x69   : > { %10374 = vmatpush3.bf16.msra.mxu0 %v10723_v55  ;;  %v412_v55 = vld [vmem:[%s11701_s24 + $0xd8] sm:$0xff] }
  0x6a   : > { %10375 = vmatprep.subr.bf16.mxu0 %v10730_v60  ;;  %2821 = vmatpush1.bf16.msra.mxu1 %v10738_v63  ;;  %v11839_v56 = vpack.c.bf16 %v412_v55, %v411_v54 }
  0x6b   : > { %779 = vmatmul.mubr.bf16.gmra.mxu0 %v11756_v62  ;;  %972 = vmatmul.mubr.bf16.gmra.mxu1 %v11756_v62 }
  0x6c   : > { %788 = vmatprep.mubr.bf16.mxu0 %v15687_v0  ;;  %981 = vmatprep.mubr.bf16.mxu1 %v15687_v0 }
  0x6d   : > { %10376 = vmatpush3.bf16.msra.mxu0 %v10730_v60  ;;  %2822 = vmatprep.subr.bf16.mxu1 %v10743_v2  ;;  %v415_v60 = vld [vmem:[%s11701_s24 + $0xf0] sm:$0xff]  ;;  %s362_s24 = sand.u32 1, %s11434_s30  }
  0x6e   : > { %10377 = vmatprep.subr.bf16.mxu0 %v10737_v1  ;;  %2823 = vmatpush1.bf16.msra.mxu1 %v10741_v5  ;;  %v11855_v63 = vpack.c.bf16 %v416_v61, %v415_v60  ;;  %v10755_v2 = vld [vmem:[#allocation2 + $0x374] ss:$20 sps:$4 sm:$0xff]   ;;  %s9091_s19 = sshll.u32 %s362_s24, 8 }
  0x6f   : > { %2824 = vmatprep.subr.bf16.mxu1 %v10746_v6  ;;  %v10759_v5 = vld [vmem:[#allocation2 + $0x348] ss:$20 sps:$4 sm:$0xff]   ;;  %v10764_v6 = vld [vmem:[#allocation2 + $0x324] ss:$20 sps:$4 sm:$0xff]   ;;  %s15375_s30 = scalar_lea.vmem [#allocation6], %s9091_s19  }
  0x71   : > { %10378 = vmatpush3.bf16.msra.mxu0 %v10737_v1  ;;  %v10750_v1 = vld [vmem:[#allocation2 + $0x398] ss:$20 sps:$4 sm:$0xff]  }
  0x72   : > { %3003 = vmatprep.subr.bf16.mxu0 %v10752_v7  ;;  %2825 = vmatpush1.bf16.msra.mxu1 %v10744_v9  ;;  %v10762_v7 = vld [vmem:[#allocation2 + $0x320] ss:$20 sps:$4 sm:$0xff]   ;;  %v10770_v9 = vld [vmem:[#allocation2 + $0x2fc] ss:$20 sps:$4 sm:$0xff]  }
  0x73   : > { %789 = vmatmul.mubr.bf16.gmra.mxu0 %v11767_v8  ;;  %982 = vmatmul.mubr.bf16.gmra.mxu1 %v11767_v8 }
  0x74   : > { %798 = vmatprep.mubr.bf16.mxu0 %v15687_v0  ;;  %991 = vmatprep.mubr.bf16.mxu1 %v15687_v0 }
  0x75   : > { %2826 = vmatprep.subr.bf16.mxu1 %v10749_v10  ;;  %v10779_v10 = vld [vmem:[#allocation2 + $0x2ac] ss:$20 sps:$4 sm:$0xff]  }
  0x76   : > { %2827 = vmatpush2.bf16.msra.mxu1 %v10747_v13  ;;  %v10786_v13 = vld [vmem:[#allocation2 + $0x4d8] ss:$20 sps:$4 sm:$0xff]  }
  0x77   : > { %2828 = vmatprep.subr.bf16.mxu1 %v10758_v14  ;;  %v10791_v14 = vld [vmem:[#allocation2 + $0x4b4] ss:$20 sps:$4 sm:$0xff]  }
  0x7a   : > { %2829 = vmatpush2.bf16.msra.mxu1 %v10756_v16  ;;  %v10797_v16 = vld [vmem:[#allocation2 + $0x48c] ss:$20 sps:$4 sm:$0xff]  }
  0x7b   : > { %799 = vmatmul.mubr.bf16.gmra.mxu0 %v11775_v15  ;;  %992 = vmatmul.mubr.bf16.gmra.mxu1 %v11775_v15 }
  0x7c   : > { %808 = vmatprep.mubr.bf16.mxu0 %v15687_v0  ;;  %1001 = vmatprep.mubr.bf16.mxu1 %v15687_v0 }
  0x7d   : > { %2830 = vmatprep.subr.bf16.mxu1 %v10767_v17  ;;  %v10795_v17 = vld [vmem:[#allocation2 + $0x488] ss:$20 sps:$4 sm:$0xff]  }
  0x7e   : > { %2831 = vmatpush2.bf16.msra.mxu1 %v10765_v20  ;;  %v483_v20 = vlaneseq }
  0x7f   : > { %2832 = vmatprep.subr.bf16.mxu1 %v10776_v21  ;;  %v10806_v21 = vld [vmem:[#allocation2 + $0x43c] ss:$20 sps:$4 sm:$0xff]  }
  0x82   : > { %2833 = vmatpush2.bf16.msra.mxu1 %v10774_v23  ;;  %v11872_v23 = vshrl.u32 %v483_v20, 7 }
  0x83   : > { %809 = vmatmul.mubr.bf16.gmra.mxu0 %v11783_v22  ;;  %1002 = vmatmul.mubr.bf16.gmra.mxu1 %v11783_v22 }
  0x84   : > { %818 = vmatprep.mubr.bf16.mxu0 %v15687_v0  ;;  %1011 = vmatprep.mubr.bf16.mxu1 %v15687_v0  ;;  %v11876_v25 = vsub.s32 2, %v11872_v23  ;;  %v11879_v26 = vsub.s32 3, %v11872_v23 }
  0x85   : > { %2834 = vmatprep.subr.bf16.mxu1 %v10785_v24  ;;  %v10809_v24 = vld [vmem:[#allocation2 + $0x414] ss:$20 sps:$4 sm:$0xff]  }
  0x86   : > { %2835 = vmatpush2.bf16.msra.mxu1 %v10783_v27  ;;  %15934 = vst [vmem:[#allocation9_spill] sm:$0xff] %v11876_v25  ;;  %15935 = vst [vmem:[#allocation10_spill] sm:$0xff] %v11879_v26  ;;  %v10807_v27 = vld [vmem:[#allocation2 + $0x410] ss:$20 sps:$4 sm:$0xff]   ;;  %v11893_v37 = vrot.slane %v481_v33, %v11876_v25  ;;  %v11896_v38 = vrot.slane %v481_v33, %v11879_v26 }
  0x87   : > { %2836 = vmatprep.subr.bf16.mxu1 %v10794_v28  ;;  %v10815_v28 = vld [vmem:[#allocation2 + $0x3ec] ss:$20 sps:$4 sm:$0xff]  }
  0x8a   : > { %2837 = vmatpush2.bf16.msra.mxu1 %v10792_v30  ;;  %v10818_v30 = vld [vmem:[#allocation2 + $0x3c4] ss:$20 sps:$4 sm:$0xff]  }
  0x8b   : > { %819 = vmatmul.mubr.bf16.gmra.mxu0 %v11791_v29  ;;  %1012 = vmatmul.mubr.bf16.gmra.mxu1 %v11791_v29 }
  0x8c   : > { %828 = vmatprep.mubr.bf16.mxu0 %v15687_v0  ;;  %1021 = vmatprep.mubr.bf16.mxu1 %v15687_v0 }
  0x8d   : > { %2838 = vmatprep.subr.bf16.mxu1 %v10803_v31  ;;  %v10816_v31 = vld [vmem:[#allocation2 + $0x3c0] ss:$20 sps:$4 sm:$0xff]  }
  0x8e   : > { %2839 = vmatpush2.bf16.msra.mxu1 %v10801_v34  ;;  %v11887_v34 = vsub.s32 1, %v11872_v23 }
  0x8f   : > { %2840 = vmatprep.subr.bf16.mxu1 %v10812_v41 }
  0x90   : > { %15936 = vst [vmem:[#allocation11_spill] sm:$0xff] %v11887_v34  ;;  %v11899_v41 = vrot.slane %v481_v33, %v11887_v34 }
  0x92   : > { %2841 = vmatpush2.bf16.msra.mxu1 %v10810_v43 }
  0x93   : > { %829 = vmatmul.mubr.bf16.gmra.mxu0 %v11799_v35  ;;  %1022 = vmatmul.mubr.bf16.gmra.mxu1 %v11799_v35 }
  0x94   : > { %838 = vmatprep.mubr.bf16.mxu0 %v15687_v0  ;;  %1031 = vmatprep.mubr.bf16.mxu1 %v15687_v0 }
  0x95   : > { %3196 = vmatprep.subr.bf16.mxu1 %v10821_v48 }
  0x9b   : > { %839 = vmatmul.mubr.bf16.gmra.mxu0 %v11807_v39  ;;  %1032 = vmatmul.mubr.bf16.gmra.mxu1 %v11807_v39 }
  0x9c   : > { %848 = vmatprep.mubr.bf16.mxu0 %v15687_v0  ;;  %1041 = vmatprep.mubr.bf16.mxu1 %v15687_v0 }
  0xa3   : > { %849 = vmatmul.mubr.bf16.gmra.mxu0 %v11815_v45  ;;  %1042 = vmatmul.mubr.bf16.gmra.mxu1 %v11815_v45 }
  0xa4   : > { %858 = vmatprep.mubr.bf16.mxu0 %v15687_v0  ;;  %1051 = vmatprep.mubr.bf16.mxu1 %v15687_v0 }
  0xab   : > { %859 = vmatmul.mubr.bf16.gmra.mxu0 %v11823_v49  ;;  %1052 = vmatmul.mubr.bf16.gmra.mxu1 %v11823_v49 }
  0xac   : > { %868 = vmatprep.mubr.bf16.mxu0 %v15687_v0  ;;  %1061 = vmatprep.mubr.bf16.mxu1 %v15687_v0 }
  0xb3   : > { %869 = vmatmul.mubr.bf16.gmra.mxu0 %v11831_v52  ;;  %1062 = vmatmul.mubr.bf16.gmra.mxu1 %v11831_v52 }
  0xb4   : > { %878 = vmatprep.mubr.bf16.mxu0 %v15687_v0  ;;  %1071 = vmatprep.mubr.bf16.mxu1 %v15687_v0 }
  0xbb   : > { %879 = vmatmul.mubr.bf16.gmra.mxu0 %v11839_v56  ;;  %1072 = vmatmul.mubr.bf16.gmra.mxu1 %v11839_v56 }
  0xbc   : > { %888 = vmatprep.mubr.bf16.mxu0 %v15687_v0  ;;  %1081 = vmatprep.mubr.bf16.mxu1 %v15687_v0 }
  0xc3   : > { %889 = vmatmul.mubr.bf16.gmra.mxu0 %v11847_v59  ;;  %1082 = vmatmul.mubr.bf16.gmra.mxu1 %v11847_v59 }
  0xc4   : > { %898 = vmatprep.mubr.bf16.mxu0 %v15687_v0  ;;  %1091 = vmatprep.mubr.bf16.mxu1 %v15687_v0 }
  0xcb   : > { %899 = vmatmul.mubr.bf16.gmra.mxu0 %v11855_v63  ;;  %1092 = vmatmul.mubr.bf16.gmra.mxu1 %v11855_v63 }
  0xcc   : > { %10379 = vmatprep.mubr.bf16.mxu0 %v11714_v36  ;;  %v10768_v36 = vld [vmem:[#allocation2 + $0x2f8] ss:$20 sps:$4 sm:$0xff]  }
  0xd3   : > { %10380 = vmatmul.mubr.bf16.vlgmr.msra.gmra.mxu0 %v11728_v44  ;;  %v10773_v44 = vld [vmem:[#allocation2 + $0x2d4] ss:$20 sps:$4 sm:$0xff]  }
  0xd4   : > { %10383 = vmatprep.mubr.bf16.mxu0 %v11742_v53  ;;  %3004 = vmatpush1.bf16.msra.mxu0 %v10750_v1  ;;  %v10771_v53 = vld [vmem:[#allocation2 + $0x2d0] ss:$20 sps:$4 sm:$0xff]  }
  0xd5   : > { %3005 = vmatprep.subr.bf16.mxu0 %v10755_v2 }
  0xd8   : > { %3006 = vmatpush1.bf16.msra.mxu0 %v10753_v3 }
  0xd9   : > { %3007 = vmatprep.subr.bf16.mxu0 %v10761_v4 }
  0xdb   : > { %10384 = vmatmul.mubr.bf16.gmra.mxu0 %v11756_v62  ;;  %v10782_v62 = vld [vmem:[#allocation2 + $0x284] ss:$20 sps:$4 sm:$0xff]  }
  0xdc   : > { %3008 = vmatpush1.bf16.msra.mxu0 %v10759_v5  ;;  %10387 = vmatprep.mubr.bf16.mxu0 %v11767_v8  ;;  %v10780_v8 = vld [vmem:[#allocation2 + $0x280] ss:$20 sps:$4 sm:$0xff]  }
  0xdd   : > { %3009 = vmatprep.subr.bf16.mxu0 %v10764_v6  ;;  %v10819_v6 = vld [vmem:[#allocation2 + $0x618] ss:$20 sps:$4 sm:$0xff]  }
  0xe0   : > { %3010 = vmatpush1.bf16.msra.mxu0 %v10762_v7  ;;  %v10834_v7 = vld [vmem:[#allocation2 + $0x120] ss:$20 sps:$4 sm:$0xff]  }
  0xe1   : > { %3011 = vmatprep.subr.bf16.mxu0 %v10770_v9 }
  0xe3   : > { %10388 = vmatmul.mubr.bf16.gmra.mxu0 %v11775_v15  ;;  %v10789_v15 = vld [vmem:[#allocation2 + $0x4b0] ss:$20 sps:$4 sm:$0xff]  }
  0xe4   : > { %3012 = vmatpush1.bf16.msra.mxu0 %v10768_v36  ;;  %10391 = vmatprep.mubr.bf16.mxu0 %v11783_v22  ;;  %v10804_v22 = vld [vmem:[#allocation2 + $0x438] ss:$20 sps:$4 sm:$0xff]  }
  0xe5   : > { %3013 = vmatprep.subr.bf16.mxu0 %v10773_v44 }
  0xe8   : > { %3014 = vmatpush1.bf16.msra.mxu0 %v10771_v53 }
  0xe9   : > { %3015 = vmatprep.subr.bf16.mxu0 %v10779_v10 }
  0xeb   : > { %10392 = vmatmul.mubr.bf16.gmra.mxu0 %v11791_v29  ;;  %v10813_v29 = vld [vmem:[#allocation2 + $0x3e8] ss:$20 sps:$4 sm:$0xff]  }
  0xec   : > { %3016 = vmatpush1.bf16.msra.mxu0 %v10777_v11  ;;  %10395 = vmatprep.mubr.bf16.mxu0 %v11799_v35  ;;  %v11890_v35 = vsub.s32 0, %v11872_v23 }
  0xed   : > { %3017 = vmatprep.subr.bf16.mxu0 %v10782_v62  ;;  %v10824_v62 = vld [vmem:[#allocation2 + $0x5f4] ss:$20 sps:$4 sm:$0xff]  }
  0xee   : > { %15937 = vst [vmem:[#allocation12_spill] sm:$0xff] %v11890_v35  ;;  %v11902_v42 = vrot.slane %v481_v33, %v11890_v35 }
  0xf0   : > { %3018 = vmatpush1.bf16.msra.mxu0 %v10780_v8  ;;  %v10839_v8 = vld [vmem:[#allocation2 + $0xfc] ss:$20 sps:$4 sm:$0xff]  }
  0xf1   : > { %3019 = vmatprep.subr.bf16.mxu0 %v10788_v12 }
  0xf3   : > { %10396 = vmatmul.mubr.bf16.gmra.mxu0 %v11807_v39 }
  0xf4   : > { %3020 = vmatpush2.bf16.msra.mxu0 %v10786_v13  ;;  %10399 = vmatprep.mubr.bf16.mxu0 %v11815_v45 }
  0xf5   : > { %3021 = vmatprep.subr.bf16.mxu0 %v10791_v14 }
  0xf8   : > { %3022 = vmatpush2.bf16.msra.mxu0 %v10789_v15 }
  0xf9   : > { %3023 = vmatprep.subr.bf16.mxu0 %v10797_v16 }
  0xfb   : > { %10400 = vmatmul.mubr.bf16.gmra.mxu0 %v11823_v49 }
  0xfc   : > { %3024 = vmatpush2.bf16.msra.mxu0 %v10795_v17  ;;  %10403 = vmatprep.mubr.bf16.mxu0 %v11831_v52 }
  0xfd   : > { %3025 = vmatprep.subr.bf16.mxu0 %v10800_v18 }
 0x100   : > { %3026 = vmatpush2.bf16.msra.mxu0 %v10798_v19 }
 0x101   : > { %3027 = vmatprep.subr.bf16.mxu0 %v10806_v21 }
 0x103   : > { %10404 = vmatmul.mubr.bf16.gmra.mxu0 %v11839_v56 }
 0x104   : > { %3028 = vmatpush2.bf16.msra.mxu0 %v10804_v22  ;;  %10407 = vmatprep.mubr.bf16.mxu0 %v11847_v59 }
 0x105   : > { %3029 = vmatprep.subr.bf16.mxu0 %v10809_v24 }
 0x108   : > { %3030 = vmatpush2.bf16.msra.mxu0 %v10807_v27 }
 0x109   : > { %3031 = vmatprep.subr.bf16.mxu0 %v10815_v28  ;;  %v10822_v28 = vld [vmem:[#allocation2 + $0x5f0] ss:$20 sps:$4 sm:$0xff]  }
 0x10b   : > { %10408 = vmatmul.mubr.bf16.gmra.mxu0 %v11855_v63 }
 0x10c   : > { %3032 = vmatpush2.bf16.msra.mxu0 %v10813_v29 }
 0x10d   : > { %3033 = vmatprep.subr.bf16.mxu0 %v10818_v30 }
 0x110   : > { %3034 = vmatpush2.bf16.msra.mxu0 %v10816_v31  ;;  %v10827_v31 = vld [vmem:[#allocation2 + $0x5cc] ss:$20 sps:$4 sm:$0xff]  }
 0x111   : > { %3389 = vmatprep.subr.bf16.mxu0 %v10836_v32  ;;  %v10837_v32 = vld [vmem:[#allocation2 + $0xf8] ss:$20 sps:$4 sm:$0xff]  }
 0x113   : > { %v750_v39 = vpop.f32.mrf.mxu0  ;;  %v943_v40 = vpop.f32.mrf.mxu1 }
 0x114   : > { %v944_v43 = vadd.f32 %v943_v40, %v11893_v37  ;;  %v751_v54 = vadd.f32 %v750_v39, %v11902_v42 }
 0x115   : > { %v752_v45 = vpop.f32.mrf.mxu0  ;;  %v945_v46 = vpop.f32.mrf.mxu1 }
 0x116   : > { %v946_v47 = vadd.f32 %v945_v46, %v11896_v38  ;;  %v753_v50 = vadd.f32 %v752_v45, %v11899_v41  ;;  %v1265_v55 = vmax.f32 %v944_v43, 0.0  ;;  %v1263_v9 = vmax.f32 %v751_v54, 0.0 }
 0x117   : > { %v754_v48 = vpop.f32.mrf.mxu0  ;;  %v947_v49 = vpop.f32.mrf.mxu1 }
 0x118   : > { %v755_v51 = vadd.f32 %v754_v48, %v11902_v42  ;;  %v948_v52 = vadd.f32 %v947_v49, %v11893_v37  ;;  %v1266_v56 = vmax.f32 %v946_v47, 0.0  ;;  %v1264_v3 = vmax.f32 %v753_v50, 0.0  ;;  %v10825_v49 = vld [vmem:[#allocation2 + $0x5c8] ss:$20 sps:$4 sm:$0xff]  }
 0x119   : > { %v756_v57 = vpop.f32.mrf.mxu0  ;;  %v949_v58 = vpop.f32.mrf.mxu1  ;;  %v10842_v50 = vld [vmem:[#allocation2 + $0xd4] ss:$20 sps:$4 sm:$0xff]  }
 0x11a   : > { %v1268_v59 = vmax.f32 %v755_v51, 0.0  ;;  %v1270_v60 = vmax.f32 %v948_v52, 0.0  ;;  %v757_v61 = vadd.f32 %v756_v57, %v11899_v41  ;;  %v950_v63 = vadd.f32 %v949_v58, %v11896_v38  ;;  %v10830_v57 = vld [vmem:[#allocation2 + $0x5a4] ss:$20 sps:$4 sm:$0xff]  }
 0x11b   : > { %v760_v1 = vpop.f32.mrf.mxu0  ;;  %v953_v2 = vpop.f32.mrf.mxu1 }
 0x11c   : > { %v1269_v4 = vmax.f32 %v757_v61, 0.0  ;;  %v1271_v5 = vmax.f32 %v950_v63, 0.0  ;;  %v11912_v36 = vpack.c.bf16 %v1270_v60, %v1265_v55  ;;  %v761_v44 = vadd.f32 %v760_v1, %v11902_v42  ;;  %v10840_v63 = vld [vmem:[#allocation2 + $0xd0] ss:$20 sps:$4 sm:$0xff]   ;;  %v10845_v1 = vld [vmem:[#allocation2 + $0xac] ss:$20 sps:$4 sm:$0xff]  }
 0x11d   : > { %v954_v53 = vadd.f32 %v953_v2, %v11893_v37  ;;  %v762_v10 = vpop.f32.mrf.mxu0  ;;  %v955_v11 = vpop.f32.mrf.mxu1  ;;  %v11922_v16 = vpack.c.bf16 %v1268_v59, %v1263_v9 }
 0x11e   : > { %15938 = vst [vmem:[#allocation13_spill] sm:$0xff] %v11912_v36  ;;  %v763_v12 = vadd.f32 %v762_v10, %v11899_v41  ;;  %v956_v13 = vadd.f32 %v955_v11, %v11896_v38  ;;  %v11918_v14 = vpack.c.bf16 %v1269_v4, %v1264_v3  ;;  %v11920_v15 = vpack.c.bf16 %v1271_v5, %v1266_v56  ;;  %v10828_v10 = vld [vmem:[#allocation2 + $0x5a0] ss:$20 sps:$4 sm:$0xff]  }
 0x11f   : > { %15941 = vst [vmem:[#allocation16_spill] sm:$0xff] %v11922_v16  ;;  %v1273_v17 = vmax.f32 %v761_v44, 0.0  ;;  %v1275_v18 = vmax.f32 %v954_v53, 0.0  ;;  %v764_v19 = vpop.f32.mrf.mxu0  ;;  %v957_v20 = vpop.f32.mrf.mxu1 }
 0x120   : > { %15939 = vst [vmem:[#allocation14_spill] sm:$0xff] %v11918_v14  ;;  %15940 = vst [vmem:[#allocation15_spill] sm:$0xff] %v11920_v15  ;;  %v1274_v21 = vmax.f32 %v763_v12, 0.0  ;;  %v1276_v22 = vmax.f32 %v956_v13, 0.0  ;;  %v765_v24 = vadd.f32 %v764_v19, %v11902_v42  ;;  %v958_v27 = vadd.f32 %v957_v20, %v11893_v37  ;;  %2842 = vmatprep.mubr.bf16.mxu1 %v11918_v14  ;;  %v10843_v19 = vld [vmem:[#allocation2 + $0xa8] ss:$20 sps:$4 sm:$0xff]  }
 0x121   : > { %3035 = vmatprep.mubr.bf16.mxu0 %v11920_v15  ;;  %v766_v29 = vpop.f32.mrf.mxu0  ;;  %v959_v30 = vpop.f32.mrf.mxu1  ;;  %2843 = vmatmul.mubr.bf16.vlgmr.msra.gmra.mxu1 %v11922_v16 }
 0x122   : > { %3036 = vmatmul.mubr.bf16.vlgmr.msra.gmra.mxu0 %v11912_v36  ;;  %v1278_v33 = vmax.f32 %v765_v24, 0.0  ;;  %v1280_v39 = vmax.f32 %v958_v27, 0.0  ;;  %v767_v40 = vadd.f32 %v766_v29, %v11899_v41  ;;  %v960_v43 = vadd.f32 %v959_v30, %v11896_v38  ;;  %3197 = vmatpush1.bf16.msra.mxu1 %v10819_v6  ;;  %v10831_v27 = vld [vmem:[#allocation2 + $0x578] ss:$20 sps:$4 sm:$0xff]  }
 0x123   : > { %3390 = vmatpush1.bf16.msra.mxu0 %v10834_v7  ;;  %v770_v45 = vpop.f32.mrf.mxu0  ;;  %v963_v46 = vpop.f32.mrf.mxu1  ;;  %3198 = vmatprep.subr.bf16.mxu1 %v10824_v62 }
 0x124   : > { %3391 = vmatprep.subr.bf16.mxu0 %v10839_v8  ;;  %v1279_v47 = vmax.f32 %v767_v40, 0.0  ;;  %v1281_v48 = vmax.f32 %v960_v43, 0.0  ;;  %v11932_v51 = vpack.c.bf16 %v1280_v39, %v1275_v18  ;;  %v771_v52 = vadd.f32 %v770_v45, %v11902_v42  ;;  %v10833_v18 = vld [vmem:[#allocation2 + $0x57c] ss:$20 sps:$4 sm:$0xff]   ;;  %v10848_v39 = vld [vmem:[#allocation2 + $0x554] ss:$20 sps:$4 sm:$0xff]  }
 0x125   : > { %v964_v54 = vadd.f32 %v963_v46, %v11893_v37  ;;  %v772_v55 = vpop.f32.mrf.mxu0  ;;  %v965_v56 = vpop.f32.mrf.mxu1  ;;  %v11942_v2 = vpack.c.bf16 %v1278_v33, %v1273_v17  ;;  %v10849_v40 = vld [vmem:[#allocation2 + $0x80] ss:$20 sps:$4 sm:$0xff]  }
 0x126   : > { %15942 = vst [vmem:[#allocation17_spill] sm:$0xff] %v11932_v51  ;;  %v773_v58 = vadd.f32 %v772_v55, %v11899_v41  ;;  %v966_v59 = vadd.f32 %v965_v56, %v11896_v38  ;;  %v11938_v60 = vpack.c.bf16 %v1279_v47, %v1274_v21  ;;  %v11940_v61 = vpack.c.bf16 %v1281_v48, %v1276_v22  ;;  %v10854_v48 = vld [vmem:[#allocation2 + $0x5c] ss:$20 sps:$4 sm:$0xff]  }
 0x127   : > { %3199 = vmatpush1.bf16.msra.mxu1 %v10822_v28  ;;  %15945 = vst [vmem:[#allocation20_spill] sm:$0xff] %v11942_v2  ;;  %v1283_v3 = vmax.f32 %v771_v52, 0.0  ;;  %v1285_v4 = vmax.f32 %v964_v54, 0.0  ;;  %v774_v5 = vpop.f32.mrf.mxu0  ;;  %v967_v6 = vpop.f32.mrf.mxu1  ;;  %3392 = vmatpush1.bf16.msra.mxu0 %v10837_v32  ;;  %v10851_v28 = vld [vmem:[#allocation2 + $0x84] ss:$20 sps:$4 sm:$0xff]  }
 0x128   : > { %15943 = vst [vmem:[#allocation18_spill] sm:$0xff] %v11938_v60  ;;  %15944 = vst [vmem:[#allocation19_spill] sm:$0xff] %v11940_v61  ;;  %3200 = vmatprep.subr.bf16.mxu1 %v10827_v31  ;;  %v1284_v7 = vmax.f32 %v773_v58, 0.0  ;;  %v1286_v9 = vmax.f32 %v966_v59, 0.0  ;;  %v775_v44 = vadd.f32 %v774_v5, %v11902_v42  ;;  %v968_v53 = vadd.f32 %v967_v6, %v11893_v37 }
 0x129   : > { %2852 = vmatprep.mubr.bf16.mxu1 %v11938_v60  ;;  %3045 = vmatprep.mubr.bf16.mxu0 %v11940_v61  ;;  %v776_v11 = vpop.f32.mrf.mxu0  ;;  %v969_v62 = vpop.f32.mrf.mxu1 }
 0x12a   : > { %2853 = vmatmul.mubr.bf16.gmra.mxu1 %v11942_v2  ;;  %3046 = vmatmul.mubr.bf16.gmra.mxu0 %v11932_v51  ;;  %v1288_v8 = vmax.f32 %v775_v44, 0.0  ;;  %v1290_v12 = vmax.f32 %v968_v53, 0.0  ;;  %v777_v13 = vadd.f32 %v776_v11, %v11899_v41  ;;  %v970_v17 = vadd.f32 %v969_v62, %v11896_v38  ;;  %v10863_v44 = vld [vmem:[#allocation2 + $0x52c] ss:$20 sps:$4 sm:$0xff]  }
 0x12b   : > { %3201 = vmatpush1.bf16.msra.mxu1 %v10825_v49  ;;  %3393 = vmatprep.subr.bf16.mxu0 %v10842_v50  ;;  %v780_v20 = vpop.f32.mrf.mxu0  ;;  %v973_v21 = vpop.f32.mrf.mxu1 }
 0x12c   : > { %3202 = vmatprep.subr.bf16.mxu1 %v10830_v57  ;;  %3394 = vmatpush1.bf16.msra.mxu0 %v10840_v63  ;;  %v1289_v22 = vmax.f32 %v777_v13, 0.0  ;;  %v1291_v24 = vmax.f32 %v970_v17, 0.0  ;;  %v11952_v29 = vpack.c.bf16 %v1290_v12, %v1285_v4  ;;  %v781_v30 = vadd.f32 %v780_v20, %v11902_v42  ;;  %v10846_v63 = vld [vmem:[#allocation2 + $0x550] ss:$20 sps:$4 sm:$0xff]   ;;  %v10861_v12 = vld [vmem:[#allocation2 + $0x528] ss:$20 sps:$4 sm:$0xff]  }
 0x12d   : > { %3395 = vmatprep.subr.bf16.mxu0 %v10845_v1  ;;  %v974_v31 = vadd.f32 %v973_v21, %v11893_v37  ;;  %v782_v32 = vpop.f32.mrf.mxu0  ;;  %v975_v33 = vpop.f32.mrf.mxu1  ;;  %v11962_v49 = vpack.c.bf16 %v1288_v8, %v1283_v3  ;;  %v10857_v8 = vld [vmem:[#allocation2 + $0x34] ss:$20 sps:$4 sm:$0xff]   ;;  %v10855_v21 = vld [vmem:[#allocation2 + $0x30] ss:$20 sps:$4 sm:$0xff]  }
 0x12e   : > { %15946 = vst [vmem:[#allocation21_spill] sm:$0xff] %v11952_v29  ;;  %v783_v43 = vadd.f32 %v782_v32, %v11899_v41  ;;  %v976_v45 = vadd.f32 %v975_v33, %v11896_v38  ;;  %v11958_v46 = vpack.c.bf16 %v1289_v22, %v1284_v7  ;;  %v11960_v47 = vpack.c.bf16 %v1291_v24, %v1286_v9  ;;  %v10852_v9 = vld [vmem:[#allocation2 + $0x58] ss:$20 sps:$4 sm:$0xff]  }
 0x12f   : > { %3203 = vmatpush1.bf16.msra.mxu1 %v10828_v10  ;;  %15949 = vst [vmem:[#allocation24_spill] sm:$0xff] %v11962_v49  ;;  %v1293_v50 = vmax.f32 %v781_v30, 0.0  ;;  %v1295_v52 = vmax.f32 %v974_v31, 0.0  ;;  %v784_v54 = vpop.f32.mrf.mxu0  ;;  %v977_v55 = vpop.f32.mrf.mxu1  ;;  %v10878_v22 = vld [vmem:[#allocation2 + $0x504] ss:$20 sps:$4 sm:$0xff]  }
 0x130   : > { %15947 = vst [vmem:[#allocation22_spill] sm:$0xff] %v11958_v46  ;;  %15948 = vst [vmem:[#allocation23_spill] sm:$0xff] %v11960_v47  ;;  %3204 = vmatprep.subr.bf16.mxu1 %v10833_v18  ;;  %3396 = vmatpush1.bf16.msra.mxu0 %v10843_v19  ;;  %v1294_v56 = vmax.f32 %v783_v43, 0.0  ;;  %v1296_v57 = vmax.f32 %v976_v45, 0.0  ;;  %v785_v58 = vadd.f32 %v784_v54, %v11902_v42  ;;  %v10860_v31 = vld [vmem:[#allocation2 + $0xc] ss:$20 sps:$4 sm:$0xff]  }
 0x131   : > { %v978_v59 = vadd.f32 %v977_v55, %v11893_v37  ;;  %2862 = vmatprep.mubr.bf16.mxu1 %v11958_v46  ;;  %3055 = vmatprep.mubr.bf16.mxu0 %v11960_v47  ;;  %v786_v1 = vpop.f32.mrf.mxu0  ;;  %v979_v3 = vpop.f32.mrf.mxu1 }
 0x132   : > { %2863 = vmatmul.mubr.bf16.gmra.mxu1 %v11962_v49  ;;  %3056 = vmatmul.mubr.bf16.gmra.mxu0 %v11952_v29  ;;  %v1298_v4 = vmax.f32 %v785_v58, 0.0  ;;  %v787_v6 = vadd.f32 %v786_v1, %v11899_v41  ;;  %v980_v7 = vadd.f32 %v979_v3, %v11896_v38  ;;  %v10876_v1 = vld [vmem:[#allocation2 + $0x500] ss:$20 sps:$4 sm:$0xff]   ;;  %v10893_v3 = vld [vmem:[#allocation2 + $0x3a4] ss:$20 sps:$4 sm:$0xff]  }
 0x133   : > { %v1300_v5 = vmax.f32 %v978_v59, 0.0  ;;  %3205 = vmatpush1.bf16.msra.mxu1 %v10831_v27  ;;  %3397 = vmatprep.subr.bf16.mxu0 %v10851_v28  ;;  %v790_v53 = vpop.f32.mrf.mxu0  ;;  %v983_v10 = vpop.f32.mrf.mxu1 }
 0x134   : > { %3206 = vmatprep.subr.bf16.mxu1 %v10848_v39  ;;  %3398 = vmatpush1.bf16.msra.mxu0 %v10849_v40  ;;  %v1299_v11 = vmax.f32 %v787_v6, 0.0  ;;  %v1301_v62 = vmax.f32 %v980_v7, 0.0  ;;  %v791_v17 = vadd.f32 %v790_v53, %v11902_v42  ;;  %v984_v18 = vadd.f32 %v983_v10, %v11893_v37 }
 0x135   : > { %3399 = vmatprep.subr.bf16.mxu0 %v10854_v48  ;;  %v11972_v13 = vpack.c.bf16 %v1300_v5, %v1295_v52  ;;  %v792_v19 = vpop.f32.mrf.mxu0  ;;  %v985_v20 = vpop.f32.mrf.mxu1  ;;  %v11982_v32 = vpack.c.bf16 %v1298_v4, %v1293_v50  ;;  %v10858_v50 = vld [vmem:[#allocation2 + $0x8] ss:$20 sps:$4 sm:$0xff]  }
 0x136   : > { %v793_v24 = vadd.f32 %v792_v19, %v11899_v41  ;;  %v986_v27 = vadd.f32 %v985_v20, %v11896_v38  ;;  %v11978_v28 = vpack.c.bf16 %v1299_v11, %v1294_v56  ;;  %v11980_v30 = vpack.c.bf16 %v1301_v62, %v1296_v57  ;;  %v10864_v62 = vld [vmem:[#allocation2 + $0x260] ss:$20 sps:$4 sm:$0xff]  }
 0x137   : > { %15950 = vst [vmem:[#allocation25_spill] sm:$0xff] %v11972_v13  ;;  %3207 = vmatpush1.bf16.msra.mxu1 %v10846_v63  ;;  %15953 = vst [vmem:[#allocation28_spill] sm:$0xff] %v11982_v32  ;;  %v1303_v33 = vmax.f32 %v791_v17, 0.0  ;;  %v1305_v39 = vmax.f32 %v984_v18, 0.0  ;;  %v794_v40 = vpop.f32.mrf.mxu0  ;;  %v987_v43 = vpop.f32.mrf.mxu1 }
 0x138   : > { %15951 = vst [vmem:[#allocation26_spill] sm:$0xff] %v11978_v28  ;;  %15952 = vst [vmem:[#allocation27_spill] sm:$0xff] %v11980_v30  ;;  %3400 = vmatpush1.bf16.msra.mxu0 %v10852_v9  ;;  %3208 = vmatprep.subr.bf16.mxu1 %v10863_v44  ;;  %v1304_v45 = vmax.f32 %v793_v24, 0.0  ;;  %v1306_v48 = vmax.f32 %v986_v27, 0.0  ;;  %v795_v52 = vadd.f32 %v794_v40, %v11902_v42  ;;  %v10866_v9 = vld [vmem:[#allocation2 + $0x264] ss:$20 sps:$4 sm:$0xff]  }
 0x139   : > { %v988_v54 = vadd.f32 %v987_v43, %v11893_v37  ;;  %2872 = vmatprep.mubr.bf16.mxu1 %v11978_v28  ;;  %3065 = vmatprep.mubr.bf16.mxu0 %v11980_v30  ;;  %v796_v55 = vpop.f32.mrf.mxu0  ;;  %v989_v56 = vpop.f32.mrf.mxu1 }
 0x13a   : > { %2873 = vmatmul.mubr.bf16.gmra.mxu1 %v11982_v32  ;;  %3066 = vmatmul.mubr.bf16.gmra.mxu0 %v11972_v13  ;;  %v1308_v57 = vmax.f32 %v795_v52, 0.0  ;;  %v797_v59 = vadd.f32 %v796_v55, %v11899_v41  ;;  %v990_v63 = vadd.f32 %v989_v56, %v11896_v38  ;;  %v10867_v55 = vld [vmem:[#allocation2 + $0x238] ss:$20 sps:$4 sm:$0xff]  }
 0x13b   : > { %v1310_v58 = vmax.f32 %v988_v54, 0.0  ;;  %3401 = vmatprep.subr.bf16.mxu0 %v10857_v8  ;;  %3209 = vmatpush1.bf16.msra.mxu1 %v10861_v12  ;;  %v800_v4 = vpop.f32.mrf.mxu0  ;;  %v993_v5 = vpop.f32.mrf.mxu1 }
 0x13c   : > { %3402 = vmatpush1.bf16.msra.mxu0 %v10855_v21  ;;  %3210 = vmatprep.subr.bf16.mxu1 %v10878_v22  ;;  %v1309_v6 = vmax.f32 %v797_v59, 0.0  ;;  %v1311_v7 = vmax.f32 %v990_v63, 0.0  ;;  %v994_v53 = vadd.f32 %v993_v5, %v11893_v37  ;;  %v12000_v18 = vpack.c.bf16 %v1308_v57, %v1303_v33  ;;  %v10869_v22 = vld [vmem:[#allocation2 + $0x23c] ss:$20 sps:$4 sm:$0xff]  }
 0x13d   : > { %3403 = vmatprep.subr.bf16.mxu0 %v10860_v31  ;;  %v11992_v44 = vpack.c.bf16 %v1310_v58, %v1305_v39  ;;  %v802_v10 = vpop.f32.mrf.mxu0  ;;  %v995_v11 = vpop.f32.mrf.mxu1  ;;  %v801_v33 = vadd.f32 %v800_v4, %v11902_v42 }
 0x13e   : > { %v996_v8 = vadd.f32 %v995_v11, %v11896_v38  ;;  %v11996_v12 = vpack.c.bf16 %v1309_v6, %v1304_v45  ;;  %v11998_v17 = vpack.c.bf16 %v1311_v7, %v1306_v48  ;;  %15957 = vst [vmem:[#allocation32_spill] sm:$0xff] %v12000_v18  ;;  %v803_v19 = vadd.f32 %v802_v10, %v11899_v41 }
 0x13f   : > { %15954 = vst [vmem:[#allocation29_spill] sm:$0xff] %v11992_v44  ;;  %3211 = vmatpush1.bf16.msra.mxu1 %v10876_v1  ;;  %v804_v20 = vpop.f32.mrf.mxu0  ;;  %v997_v21 = vpop.f32.mrf.mxu1  ;;  %v1315_v24 = vmax.f32 %v994_v53, 0.0  ;;  %v1313_v63 = vmax.f32 %v801_v33, 0.0  ;;  %v10872_v53 = vld [vmem:[#allocation2 + $0x214] ss:$20 sps:$4 sm:$0xff]  }
 0x140   : > { %15955 = vst [vmem:[#allocation30_spill] sm:$0xff] %v11996_v12  ;;  %15956 = vst [vmem:[#allocation31_spill] sm:$0xff] %v11998_v17  ;;  %3404 = vmatpush1.bf16.msra.mxu0 %v10858_v50  ;;  %3582 = vmatprep.subr.bf16.mxu1 %v10893_v3  ;;  %v1316_v27 = vmax.f32 %v996_v8, 0.0  ;;  %v805_v31 = vadd.f32 %v804_v20, %v11902_v42  ;;  %v998_v39 = vadd.f32 %v997_v21, %v11893_v37  ;;  %v10870_v8 = vld [vmem:[#allocation2 + $0x210] ss:$20 sps:$4 sm:$0xff]  }
 0x141   : > { %2882 = vmatprep.mubr.bf16.mxu1 %v11996_v12  ;;  %3075 = vmatprep.mubr.bf16.mxu0 %v11998_v17  ;;  %v806_v40 = vpop.f32.mrf.mxu0  ;;  %v999_v43 = vpop.f32.mrf.mxu1  ;;  %v1314_v57 = vmax.f32 %v803_v19, 0.0 }
 0x142   : > { %2883 = vmatmul.mubr.bf16.gmra.mxu1 %v12000_v18  ;;  %3076 = vmatmul.mubr.bf16.gmra.mxu0 %v11992_v44  ;;  %v1318_v45 = vmax.f32 %v805_v31, 0.0  ;;  %v1320_v48 = vmax.f32 %v998_v39, 0.0  ;;  %v807_v52 = vadd.f32 %v806_v40, %v11899_v41  ;;  %v1000_v54 = vadd.f32 %v999_v43, %v11896_v38 }
 0x143   : > { %3405 = vmatprep.subr.bf16.mxu0 %v10866_v9  ;;  %v810_v56 = vpop.f32.mrf.mxu0  ;;  %v1003_v50 = vpop.f32.mrf.mxu1 }
 0x144   : > { %3406 = vmatpush2.bf16.msra.mxu0 %v10864_v62  ;;  %v1319_v58 = vmax.f32 %v807_v52, 0.0  ;;  %v1321_v59 = vmax.f32 %v1000_v54, 0.0  ;;  %v12012_v1 = vpack.c.bf16 %v1320_v48, %v1315_v24  ;;  %v1004_v3 = vadd.f32 %v1003_v50, %v11893_v37 }
 0x145   : > { %3407 = vmatprep.subr.bf16.mxu0 %v10869_v22  ;;  %v812_v4 = vpop.f32.mrf.mxu0  ;;  %v1005_v5 = vpop.f32.mrf.mxu1  ;;  %v12020_v10 = vpack.c.bf16 %v1318_v45, %v1313_v63  ;;  %v10875_v22 = vld [vmem:[#allocation2 + $0x1ec] ss:$20 sps:$4 sm:$0xff]   ;;  %v811_v24 = vadd.f32 %v810_v56, %v11902_v42 }
 0x146   : > { %15958 = vst [vmem:[#allocation33_spill] sm:$0xff] %v12012_v1  ;;  %v1006_v6 = vadd.f32 %v1005_v5, %v11896_v38  ;;  %v12016_v7 = vpack.c.bf16 %v1319_v58, %v1314_v57  ;;  %v12018_v9 = vpack.c.bf16 %v1321_v59, %v1316_v27  ;;  %v813_v19 = vadd.f32 %v812_v4, %v11899_v41 }
 0x147   : > { %15961 = vst [vmem:[#allocation36_spill] sm:$0xff] %v12020_v10  ;;  %v814_v11 = vpop.f32.mrf.mxu0  ;;  %v1007_v62 = vpop.f32.mrf.mxu1  ;;  %v1325_v27 = vmax.f32 %v1004_v3, 0.0  ;;  %v1323_v58 = vmax.f32 %v811_v24, 0.0 }
 0x148   : > { %15959 = vst [vmem:[#allocation34_spill] sm:$0xff] %v12016_v7  ;;  %15960 = vst [vmem:[#allocation35_spill] sm:$0xff] %v12018_v9  ;;  %3408 = vmatpush2.bf16.msra.mxu0 %v10867_v55  ;;  %v815_v20 = vadd.f32 %v814_v11, %v11902_v42  ;;  %v1008_v21 = vadd.f32 %v1007_v62, %v11893_v37  ;;  %2892 = vmatprep.mubr.bf16.mxu1 %v12016_v7  ;;  %v1326_v33 = vmax.f32 %v1006_v6, 0.0  ;;  %v10873_v55 = vld [vmem:[#allocation2 + $0x1e8] ss:$20 sps:$4 sm:$0xff]  }
 0x149   : > { %3085 = vmatprep.mubr.bf16.mxu0 %v12018_v9  ;;  %v816_v31 = vpop.f32.mrf.mxu0  ;;  %v1009_v39 = vpop.f32.mrf.mxu1  ;;  %3409 = vmatprep.subr.bf16.mxu0 %v10872_v53  ;;  %v1324_v56 = vmax.f32 %v813_v19, 0.0  ;;  %v10881_v11 = vld [vmem:[#allocation2 + $0x1c4] ss:$20 sps:$4 sm:$0xff]  }
 0x14a   : > { %2893 = vmatmul.mubr.bf16.gmra.mxu1 %v12020_v10  ;;  %3086 = vmatmul.mubr.bf16.gmra.mxu0 %v12012_v1  ;;  %v1330_v40 = vmax.f32 %v1008_v21, 0.0  ;;  %v817_v43 = vadd.f32 %v816_v31, %v11899_v41  ;;  %v1010_v45 = vadd.f32 %v1009_v39, %v11896_v38  ;;  %v1328_v48 = vmax.f32 %v815_v20, 0.0  ;;  %v10879_v20 = vld [vmem:[#allocation2 + $0x1c0] ss:$20 sps:$4 sm:$0xff]  }
 0x14b   : > { %v820_v52 = vpop.f32.mrf.mxu0  ;;  %v1013_v54 = vpop.f32.mrf.mxu1 }
 0x14c   : > { %3410 = vmatpush2.bf16.msra.mxu0 %v10870_v8  ;;  %v1329_v50 = vmax.f32 %v817_v43, 0.0  ;;  %v1331_v57 = vmax.f32 %v1010_v45, 0.0  ;;  %v12032_v59 = vpack.c.bf16 %v1330_v40, %v1325_v27  ;;  %v1014_v63 = vadd.f32 %v1013_v54, %v11893_v37  ;;  %v10884_v27 = vld [vmem:[#allocation2 + $0x19c] ss:$20 sps:$4 sm:$0xff]  }
 0x14d   : > { %3411 = vmatprep.subr.bf16.mxu0 %v10875_v22  ;;  %v822_v3 = vpop.f32.mrf.mxu0  ;;  %v1015_v4 = vpop.f32.mrf.mxu1  ;;  %v12040_v62 = vpack.c.bf16 %v1328_v48, %v1323_v58  ;;  %v821_v31 = vadd.f32 %v820_v52, %v11902_v42 }
 0x14e   : > { %15962 = vst [vmem:[#allocation37_spill] sm:$0xff] %v12032_v59  ;;  %v1016_v5 = vadd.f32 %v1015_v4, %v11896_v38  ;;  %v12036_v6 = vpack.c.bf16 %v1329_v50, %v1324_v56  ;;  %v12038_v53 = vpack.c.bf16 %v1331_v57, %v1326_v33  ;;  %v823_v21 = vadd.f32 %v822_v3, %v11899_v41  ;;  %v10882_v57 = vld [vmem:[#allocation2 + $0x198] ss:$20 sps:$4 sm:$0xff]  }
 0x14f   : > { %15965 = vst [vmem:[#allocation40_spill] sm:$0xff] %v12040_v62  ;;  %v824_v8 = vpop.f32.mrf.mxu0  ;;  %v1017_v19 = vpop.f32.mrf.mxu1  ;;  %v1335_v39 = vmax.f32 %v1014_v63, 0.0  ;;  %v1333_v3 = vmax.f32 %v821_v31, 0.0 }
 0x150   : > { %15963 = vst [vmem:[#allocation38_spill] sm:$0xff] %v12036_v6  ;;  %15964 = vst [vmem:[#allocation39_spill] sm:$0xff] %v12038_v53  ;;  %3412 = vmatpush2.bf16.msra.mxu0 %v10873_v55  ;;  %v825_v22 = vadd.f32 %v824_v8, %v11902_v42  ;;  %v1018_v24 = vadd.f32 %v1017_v19, %v11893_v37  ;;  %2902 = vmatprep.mubr.bf16.mxu1 %v12036_v6  ;;  %v1336_v43 = vmax.f32 %v1016_v5, 0.0 }
 0x151   : > { %3095 = vmatprep.mubr.bf16.mxu0 %v12038_v53  ;;  %v826_v33 = vpop.f32.mrf.mxu0  ;;  %v1019_v40 = vpop.f32.mrf.mxu1  ;;  %3413 = vmatprep.subr.bf16.mxu0 %v10881_v11  ;;  %v1334_v52 = vmax.f32 %v823_v21, 0.0 }
 0x152   : > { %2903 = vmatmul.mubr.bf16.gmra.mxu1 %v12040_v62  ;;  %3096 = vmatmul.mubr.bf16.gmra.mxu0 %v12032_v59  ;;  %v1340_v45 = vmax.f32 %v1018_v24, 0.0  ;;  %v827_v48 = vadd.f32 %v826_v33, %v11899_v41  ;;  %v1020_v54 = vadd.f32 %v1019_v40, %v11896_v38  ;;  %v1338_v55 = vmax.f32 %v825_v22, 0.0  ;;  %v10887_v22 = vld [vmem:[#allocation2 + $0x174] ss:$20 sps:$4 sm:$0xff]  }
 0x153   : > { %v830_v56 = vpop.f32.mrf.mxu0  ;;  %v1023_v50 = vpop.f32.mrf.mxu1 }
 0x154   : > { %3414 = vmatpush2.bf16.msra.mxu0 %v10879_v20  ;;  %v1339_v58 = vmax.f32 %v827_v48, 0.0  ;;  %v1341_v63 = vmax.f32 %v1020_v54, 0.0  ;;  %v12052_v4 = vpack.c.bf16 %v1340_v45, %v1335_v39  ;;  %v1024_v5 = vadd.f32 %v1023_v50, %v11893_v37  ;;  %v10890_v48 = vld [vmem:[#allocation2 + $0x14c] ss:$20 sps:$4 sm:$0xff]  }
 0x155   : > { %3415 = vmatprep.subr.bf16.mxu0 %v10884_v27  ;;  %v832_v8 = vpop.f32.mrf.mxu0  ;;  %v1025_v19 = vpop.f32.mrf.mxu1  ;;  %v12060_v20 = vpack.c.bf16 %v1338_v55, %v1333_v3  ;;  %v10885_v27 = vld [vmem:[#allocation2 + $0x170] ss:$20 sps:$4 sm:$0xff]  }
 0x156   : > { %15966 = vst [vmem:[#allocation41_spill] sm:$0xff] %v12052_v4  ;;  %v1026_v24 = vadd.f32 %v1025_v19, %v11896_v38  ;;  %v12056_v33 = vpack.c.bf16 %v1339_v58, %v1334_v52  ;;  %v12058_v11 = vpack.c.bf16 %v1341_v63, %v1336_v43  ;;  %v833_v31 = vadd.f32 %v832_v8, %v11899_v41 }
 0x157   : > { %15969 = vst [vmem:[#allocation44_spill] sm:$0xff] %v12060_v20  ;;  %v834_v21 = vpop.f32.mrf.mxu0  ;;  %v1027_v40 = vpop.f32.mrf.mxu1  ;;  %v831_v43 = vadd.f32 %v830_v56, %v11902_v42  ;;  %v1345_v54 = vmax.f32 %v1024_v5, 0.0 }
 0x158   : > { %15967 = vst [vmem:[#allocation42_spill] sm:$0xff] %v12056_v33  ;;  %15968 = vst [vmem:[#allocation43_spill] sm:$0xff] %v12058_v11  ;;  %3416 = vmatpush2.bf16.msra.mxu0 %v10882_v57  ;;  %v835_v39 = vadd.f32 %v834_v21, %v11902_v42  ;;  %v1028_v45 = vadd.f32 %v1027_v40, %v11893_v37  ;;  %2912 = vmatprep.mubr.bf16.mxu1 %v12056_v33  ;;  %v1346_v57 = vmax.f32 %v1026_v24, 0.0  ;;  %v10888_v21 = vld [vmem:[#allocation2 + $0x148] ss:$20 sps:$4 sm:$0xff]  }
 0x159   : > { %3105 = vmatprep.mubr.bf16.mxu0 %v12058_v11  ;;  %v836_v55 = vpop.f32.mrf.mxu0  ;;  %v1029_v50 = vpop.f32.mrf.mxu1  ;;  %3417 = vmatprep.subr.bf16.mxu0 %v10887_v22  ;;  %v1344_v56 = vmax.f32 %v833_v31, 0.0  ;;  %v1343_v0 = vmax.f32 %v831_v43, 0.0 }
 0x15a   : > { %2913 = vmatmul.mubr.bf16.gmra.mxu1 %v12060_v20  ;;  %3106 = vmatmul.mubr.bf16.gmra.mxu0 %v12052_v4  ;;  %v1350_v52 = vmax.f32 %v1028_v45, 0.0  ;;  %v837_v58 = vadd.f32 %v836_v55, %v11899_v41  ;;  %v1030_v63 = vadd.f32 %v1029_v50, %v11896_v38  ;;  %v1348_v3 = vmax.f32 %v835_v39, 0.0 }
 0x15b   : > { %v840_v8 = vpop.f32.mrf.mxu0  ;;  %v1033_v19 = vpop.f32.mrf.mxu1 }
 0x15c   : > { %3418 = vmatpush2.bf16.msra.mxu0 %v10885_v27  ;;  %v1349_v5 = vmax.f32 %v837_v58, 0.0  ;;  %v1351_v40 = vmax.f32 %v1030_v63, 0.0  ;;  %v12072_v26 = vpack.c.bf16 %v1350_v52, %v1345_v54  ;;  %v1034_v24 = vadd.f32 %v1033_v19, %v11893_v37 }
 0x15d   : > { %3419 = vmatprep.subr.bf16.mxu0 %v10890_v48  ;;  %v842_v45 = vpop.f32.mrf.mxu0  ;;  %v1035_v25 = vpop.f32.mrf.mxu1  ;;  %v12080_v39 = vpack.c.bf16 %v1348_v3, %v1343_v0 }
 0x15e   : > { %15970 = vst [vmem:[#allocation45_spill] sm:$0xff] %v12072_v26  ;;  %v1036_v55 = vadd.f32 %v1035_v25, %v11896_v38  ;;  %v12076_v50 = vpack.c.bf16 %v1349_v5, %v1344_v56  ;;  %v12078_v22 = vpack.c.bf16 %v1351_v40, %v1346_v57  ;;  %v843_v48 = vadd.f32 %v842_v45, %v11899_v41 }
 0x15f   : > { %15973 = vst [vmem:[#allocation48_spill] sm:$0xff] %v12080_v39  ;;  %v844_v27 = vpop.f32.mrf.mxu0  ;;  %v1037_v31 = vpop.f32.mrf.mxu1  ;;  %v841_v25 = vadd.f32 %v840_v8, %v11902_v42  ;;  %v1355_v52 = vmax.f32 %v1034_v24, 0.0 }
 0x160   : > { %15971 = vst [vmem:[#allocation46_spill] sm:$0xff] %v12076_v50  ;;  %15972 = vst [vmem:[#allocation47_spill] sm:$0xff] %v12078_v22  ;;  %3420 = vmatpush2.bf16.msra.mxu0 %v10888_v21  ;;  %v845_v43 = vadd.f32 %v844_v27, %v11902_v42  ;;  %v1038_v54 = vadd.f32 %v1037_v31, %v11893_v37  ;;  %2922 = vmatprep.mubr.bf16.mxu1 %v12076_v50  ;;  %v1356_v0 = vmax.f32 %v1036_v55, 0.0 }
 0x161   : > { %3115 = vmatprep.mubr.bf16.mxu0 %v12078_v22  ;;  %v846_v57 = vpop.f32.mrf.mxu0  ;;  %v1039_v58 = vpop.f32.mrf.mxu1  ;;  %v1354_v40 = vmax.f32 %v843_v48, 0.0  ;;  %v1353_v8 = vmax.f32 %v841_v25, 0.0 }
 0x162   : > { %2923 = vmatmul.mubr.bf16.gmra.mxu1 %v12080_v39  ;;  %3116 = vmatmul.mubr.bf16.gmra.mxu0 %v12072_v26  ;;  %v1360_v63 = vmax.f32 %v1038_v54, 0.0  ;;  %v847_v3 = vadd.f32 %v846_v57, %v11899_v41  ;;  %v1040_v19 = vadd.f32 %v1039_v58, %v11896_v38  ;;  %v1358_v21 = vmax.f32 %v845_v43, 0.0 }
 0x163   : > { %v850_v56 = vpop.f32.mrf.mxu0  ;;  %v1043_v5 = vpop.f32.mrf.mxu1 }
 0x164   : > { %v1359_v45 = vmax.f32 %v847_v3, 0.0  ;;  %v1361_v27 = vmax.f32 %v1040_v19, 0.0  ;;  %v12092_v24 = vpack.c.bf16 %v1360_v63, %v1355_v52  ;;  %v1044_v31 = vadd.f32 %v1043_v5, %v11893_v37 }
 0x165   : > { %v852_v22 = vpop.f32.mrf.mxu0  ;;  %v1045_v4 = vpop.f32.mrf.mxu1  ;;  %v12100_v58 = vpack.c.bf16 %v1358_v21, %v1353_v8 }
 0x166   : > { %15974 = vst [vmem:[#allocation49_spill] sm:$0xff] %v12092_v24  ;;  %v1046_v55 = vadd.f32 %v1045_v4, %v11896_v38  ;;  %v12096_v54 = vpack.c.bf16 %v1359_v45, %v1354_v40  ;;  %v12098_v57 = vpack.c.bf16 %v1361_v27, %v1356_v0  ;;  %v853_v48 = vadd.f32 %v852_v22, %v11899_v41 }
 0x167   : > { %15977 = vst [vmem:[#allocation52_spill] sm:$0xff] %v12100_v58  ;;  %v854_v43 = vpop.f32.mrf.mxu0  ;;  %v1047_v26 = vpop.f32.mrf.mxu1  ;;  %v851_v4 = vadd.f32 %v850_v56, %v11902_v42  ;;  %v1365_v63 = vmax.f32 %v1044_v31, 0.0 }
 0x168   : > { %15975 = vst [vmem:[#allocation50_spill] sm:$0xff] %v12096_v54  ;;  %15976 = vst [vmem:[#allocation51_spill] sm:$0xff] %v12098_v57  ;;  %v855_v25 = vadd.f32 %v854_v43, %v11902_v42  ;;  %v1048_v52 = vadd.f32 %v1047_v26, %v11893_v37  ;;  %2932 = vmatprep.mubr.bf16.mxu1 %v12096_v54  ;;  %3125 = vmatprep.mubr.bf16.mxu0 %v12098_v57  ;;  %v1366_v19 = vmax.f32 %v1046_v55, 0.0 }
 0x169   : > { %v856_v3 = vpop.f32.mrf.mxu0  ;;  %v1049_v0 = vpop.f32.mrf.mxu1  ;;  %v1364_v27 = vmax.f32 %v853_v48, 0.0  ;;  %v1363_v56 = vmax.f32 %v851_v4, 0.0 }
 0x16a   : > { %2933 = vmatmul.mubr.bf16.gmra.mxu1 %v12100_v58  ;;  %3126 = vmatmul.mubr.bf16.gmra.mxu0 %v12092_v24  ;;  %v1370_v21 = vmax.f32 %v1048_v52, 0.0  ;;  %v857_v22 = vadd.f32 %v856_v3, %v11899_v41  ;;  %v1050_v5 = vadd.f32 %v1049_v0, %v11896_v38  ;;  %v1368_v26 = vmax.f32 %v855_v25, 0.0 }
 0x16b   : > { %v860_v40 = vpop.f32.mrf.mxu0  ;;  %v1053_v45 = vpop.f32.mrf.mxu1 }
 0x16c   : > { %v1369_v8 = vmax.f32 %v857_v22, 0.0  ;;  %v1371_v43 = vmax.f32 %v1050_v5, 0.0  ;;  %v12112_v31 = vpack.c.bf16 %v1370_v21, %v1365_v63  ;;  %v1054_v57 = vadd.f32 %v1053_v45, %v11893_v37  ;;  %v10923_v21 = vld [vmem:[#allocation2 + $0x624] ss:$20 sps:$4 sm:$0xff]  }
 0x16d   : > { %v862_v11 = vpop.f32.mrf.mxu0  ;;  %v1055_v59 = vpop.f32.mrf.mxu1  ;;  %v12120_v0 = vpack.c.bf16 %v1368_v26, %v1363_v56  ;;  %3775 = vmatprep.subr.bf16.mxu0 %v10923_v21 }
 0x16e   : > { %15978 = vst [vmem:[#allocation53_spill] sm:$0xff] %v12112_v31  ;;  %v1056_v55 = vadd.f32 %v1055_v59, %v11896_v38  ;;  %v12116_v52 = vpack.c.bf16 %v1369_v8, %v1364_v27  ;;  %v12118_v3 = vpack.c.bf16 %v1371_v43, %v1366_v19  ;;  %v863_v48 = vadd.f32 %v862_v11, %v11899_v41 }
 0x16f   : > { %15981 = vst [vmem:[#allocation56_spill] sm:$0xff] %v12120_v0  ;;  %v864_v25 = vpop.f32.mrf.mxu0  ;;  %v1057_v24 = vpop.f32.mrf.mxu1  ;;  %v861_v59 = vadd.f32 %v860_v40, %v11902_v42  ;;  %v1375_v22 = vmax.f32 %v1054_v57, 0.0 }
 0x170   : > { %15979 = vst [vmem:[#allocation54_spill] sm:$0xff] %v12116_v52  ;;  %15980 = vst [vmem:[#allocation55_spill] sm:$0xff] %v12118_v3  ;;  %v865_v4 = vadd.f32 %v864_v25, %v11902_v42  ;;  %v1058_v63 = vadd.f32 %v1057_v24, %v11893_v37  ;;  %2942 = vmatprep.mubr.bf16.mxu1 %v12116_v52  ;;  %3135 = vmatprep.mubr.bf16.mxu0 %v12118_v3  ;;  %v1376_v26 = vmax.f32 %v1056_v55, 0.0 }
 0x171   : > { %v866_v19 = vpop.f32.mrf.mxu0  ;;  %v1059_v5 = vpop.f32.mrf.mxu1  ;;  %v1374_v56 = vmax.f32 %v863_v48, 0.0  ;;  %v1373_v57 = vmax.f32 %v861_v59, 0.0 }
 0x172   : > { %2943 = vmatmul.mubr.bf16.gmra.mxu1 %v12120_v0  ;;  %3136 = vmatmul.mubr.bf16.gmra.mxu0 %v12112_v31  ;;  %v1380_v11 = vmax.f32 %v1058_v63, 0.0  ;;  %v867_v45 = vadd.f32 %v866_v19, %v11899_v41  ;;  %v1060_v24 = vadd.f32 %v1059_v5, %v11896_v38  ;;  %v1378_v27 = vmax.f32 %v865_v4, 0.0 }
 0x173   : > { %v870_v8 = vpop.f32.mrf.mxu0  ;;  %v1063_v43 = vpop.f32.mrf.mxu1 }
 0x174   : > { %v1379_v25 = vmax.f32 %v867_v45, 0.0  ;;  %v1381_v40 = vmax.f32 %v1060_v24, 0.0  ;;  %v12132_v3 = vpack.c.bf16 %v1380_v11, %v1375_v22  ;;  %v1064_v53 = vadd.f32 %v1063_v43, %v11893_v37 }
 0x175   : > { %v872_v1 = vpop.f32.mrf.mxu0  ;;  %v1065_v31 = vpop.f32.mrf.mxu1  ;;  %v12140_v21 = vpack.c.bf16 %v1378_v27, %v1373_v57 }
 0x176   : > { %15982 = vst [vmem:[#allocation57_spill] sm:$0xff] %v12132_v3  ;;  %v1066_v55 = vadd.f32 %v1065_v31, %v11896_v38  ;;  %v12136_v63 = vpack.c.bf16 %v1379_v25, %v1374_v56  ;;  %v12138_v19 = vpack.c.bf16 %v1381_v40, %v1376_v26  ;;  %v873_v48 = vadd.f32 %v872_v1, %v11899_v41 }
 0x177   : > { %15985 = vst [vmem:[#allocation60_spill] sm:$0xff] %v12140_v21  ;;  %v874_v4 = vpop.f32.mrf.mxu0  ;;  %v1067_v5 = vpop.f32.mrf.mxu1  ;;  %v871_v31 = vadd.f32 %v870_v8, %v11902_v42  ;;  %v1385_v11 = vmax.f32 %v1064_v53, 0.0 }
 0x178   : > { %15983 = vst [vmem:[#allocation58_spill] sm:$0xff] %v12136_v63  ;;  %15984 = vst [vmem:[#allocation59_spill] sm:$0xff] %v12138_v19  ;;  %v875_v59 = vadd.f32 %v874_v4, %v11902_v42  ;;  %v1068_v22 = vadd.f32 %v1067_v5, %v11893_v37  ;;  %2952 = vmatprep.mubr.bf16.mxu1 %v12136_v63  ;;  %3145 = vmatprep.mubr.bf16.mxu0 %v12138_v19  ;;  %v1386_v24 = vmax.f32 %v1066_v55, 0.0 }
 0x179   : > { %v876_v45 = vpop.f32.mrf.mxu0  ;;  %v1069_v26 = vpop.f32.mrf.mxu1  ;;  %v1384_v57 = vmax.f32 %v873_v48, 0.0  ;;  %v1383_v8 = vmax.f32 %v871_v31, 0.0 }
 0x17a   : > { %2953 = vmatmul.mubr.bf16.gmra.mxu1 %v12140_v21  ;;  %3146 = vmatmul.mubr.bf16.gmra.mxu0 %v12132_v3  ;;  %v1390_v27 = vmax.f32 %v1068_v22, 0.0  ;;  %v877_v1 = vadd.f32 %v876_v45, %v11899_v41  ;;  %v1070_v43 = vadd.f32 %v1069_v26, %v11896_v38  ;;  %v1388_v56 = vmax.f32 %v875_v59, 0.0 }
 0x17b   : > { %v880_v25 = vpop.f32.mrf.mxu0  ;;  %v1073_v40 = vpop.f32.mrf.mxu1 }
 0x17c   : > { %v1389_v4 = vmax.f32 %v877_v1, 0.0  ;;  %v1391_v5 = vmax.f32 %v1070_v43, 0.0  ;;  %v12152_v53 = vpack.c.bf16 %v1390_v27, %v1385_v11  ;;  %v1074_v19 = vadd.f32 %v1073_v40, %v11893_v37 }
 0x17d   : > { %v882_v9 = vpop.f32.mrf.mxu0  ;;  %v1075_v44 = vpop.f32.mrf.mxu1  ;;  %v12160_v26 = vpack.c.bf16 %v1388_v56, %v1383_v8 }
 0x17e   : > { %15986 = vst [vmem:[#allocation61_spill] sm:$0xff] %v12152_v53  ;;  %v1076_v55 = vadd.f32 %v1075_v44, %v11896_v38  ;;  %v12156_v22 = vpack.c.bf16 %v1389_v4, %v1384_v57  ;;  %v12158_v45 = vpack.c.bf16 %v1391_v5, %v1386_v24  ;;  %v883_v48 = vadd.f32 %v882_v9, %v11899_v41 }
 0x17f   : > { %15989 = vst [vmem:[#allocation64_spill] sm:$0xff] %v12160_v26  ;;  %v884_v59 = vpop.f32.mrf.mxu0  ;;  %v1077_v3 = vpop.f32.mrf.mxu1  ;;  %v881_v44 = vadd.f32 %v880_v25, %v11902_v42  ;;  %v1395_v27 = vmax.f32 %v1074_v19, 0.0 }
 0x180   : > { %15987 = vst [vmem:[#allocation62_spill] sm:$0xff] %v12156_v22  ;;  %15988 = vst [vmem:[#allocation63_spill] sm:$0xff] %v12158_v45  ;;  %v885_v31 = vadd.f32 %v884_v59, %v11902_v42  ;;  %v1078_v11 = vadd.f32 %v1077_v3, %v11893_v37  ;;  %2962 = vmatprep.mubr.bf16.mxu1 %v12156_v22  ;;  %3155 = vmatprep.mubr.bf16.mxu0 %v12158_v45  ;;  %v1396_v43 = vmax.f32 %v1076_v55, 0.0 }
 0x181   : > { %v886_v1 = vpop.f32.mrf.mxu0  ;;  %v1079_v24 = vpop.f32.mrf.mxu1  ;;  %v1394_v5 = vmax.f32 %v883_v48, 0.0  ;;  %v1393_v25 = vmax.f32 %v881_v44, 0.0 }
 0x182   : > { %2963 = vmatmul.mubr.bf16.gmra.mxu1 %v12160_v26  ;;  %3156 = vmatmul.mubr.bf16.gmra.mxu0 %v12152_v53  ;;  %v1400_v56 = vmax.f32 %v1078_v11, 0.0  ;;  %v887_v9 = vadd.f32 %v886_v1, %v11899_v41  ;;  %v1080_v40 = vadd.f32 %v1079_v24, %v11896_v38  ;;  %v1398_v3 = vmax.f32 %v885_v31, 0.0 }
 0x183   : > { %v890_v57 = vpop.f32.mrf.mxu0  ;;  %v1083_v4 = vpop.f32.mrf.mxu1 }
 0x184   : > { %v1399_v8 = vmax.f32 %v887_v9, 0.0  ;;  %v1401_v59 = vmax.f32 %v1080_v40, 0.0  ;;  %v12172_v19 = vpack.c.bf16 %v1400_v56, %v1395_v27  ;;  %v1084_v45 = vadd.f32 %v1083_v4, %v11893_v37 }
 0x185   : > { %v892_v17 = vpop.f32.mrf.mxu0  ;;  %v1085_v13 = vpop.f32.mrf.mxu1  ;;  %v12180_v24 = vpack.c.bf16 %v1398_v3, %v1393_v25 }
 0x186   : > { %15990 = vst [vmem:[#allocation65_spill] sm:$0xff] %v12172_v19  ;;  %v1086_v55 = vadd.f32 %v1085_v13, %v11896_v38  ;;  %v12176_v11 = vpack.c.bf16 %v1399_v8, %v1394_v5  ;;  %v12178_v1 = vpack.c.bf16 %v1401_v59, %v1396_v43  ;;  %v893_v48 = vadd.f32 %v892_v17, %v11899_v41 }
 0x187   : > { %15993 = vst [vmem:[#allocation68_spill] sm:$0xff] %v12180_v24  ;;  %v894_v31 = vpop.f32.mrf.mxu0  ;;  %v1087_v53 = vpop.f32.mrf.mxu1  ;;  %v891_v13 = vadd.f32 %v890_v57, %v11902_v42  ;;  %v1405_v56 = vmax.f32 %v1084_v45, 0.0 }
 0x188   : > { %15991 = vst [vmem:[#allocation66_spill] sm:$0xff] %v12176_v11  ;;  %15992 = vst [vmem:[#allocation67_spill] sm:$0xff] %v12178_v1  ;;  %v895_v44 = vadd.f32 %v894_v31, %v11902_v42  ;;  %v1088_v27 = vadd.f32 %v1087_v53, %v11893_v37  ;;  %2972 = vmatprep.mubr.bf16.mxu1 %v12176_v11  ;;  %3165 = vmatprep.mubr.bf16.mxu0 %v12178_v1  ;;  %v1406_v40 = vmax.f32 %v1086_v55, 0.0 }
 0x189   : > { %v896_v9 = vpop.f32.mrf.mxu0  ;;  %v1089_v43 = vpop.f32.mrf.mxu1  ;;  %v1404_v59 = vmax.f32 %v893_v48, 0.0  ;;  %v1403_v57 = vmax.f32 %v891_v13, 0.0 }
 0x18a   : > { %2973 = vmatmul.mubr.bf16.gmra.mxu1 %v12180_v24  ;;  %3166 = vmatmul.mubr.bf16.gmra.mxu0 %v12172_v19  ;;  %v1410_v3 = vmax.f32 %v1088_v27, 0.0  ;;  %v897_v17 = vadd.f32 %v896_v9, %v11899_v41  ;;  %v1090_v4 = vadd.f32 %v1089_v43, %v11896_v38  ;;  %v1408_v53 = vmax.f32 %v895_v44, 0.0 }
 0x18b   : > { %v900_v5 = vpop.f32.mrf.mxu0  ;;  %v1093_v8 = vpop.f32.mrf.mxu1 }
 0x18c   : > { %v1409_v25 = vmax.f32 %v897_v17, 0.0  ;;  %v1411_v31 = vmax.f32 %v1090_v4, 0.0  ;;  %v12192_v45 = vpack.c.bf16 %v1410_v3, %v1405_v56  ;;  %v1094_v1 = vadd.f32 %v1093_v8, %v11893_v37 }
 0x18d   : > { %v902_v30 = vpop.f32.mrf.mxu0  ;;  %v1095_v29 = vpop.f32.mrf.mxu1  ;;  %v12200_v43 = vpack.c.bf16 %v1408_v53, %v1403_v57 }
 0x18e   : > { %15994 = vst [vmem:[#allocation69_spill] sm:$0xff] %v12192_v45  ;;  %v1096_v55 = vadd.f32 %v1095_v29, %v11896_v38  ;;  %v12196_v27 = vpack.c.bf16 %v1409_v25, %v1404_v59  ;;  %v12198_v9 = vpack.c.bf16 %v1411_v31, %v1406_v40  ;;  %v903_v48 = vadd.f32 %v902_v30, %v11899_v41 }
 0x18f   : > { %15997 = vst [vmem:[#allocation72_spill] sm:$0xff] %v12200_v43  ;;  %v904_v44 = vpop.f32.mrf.mxu0  ;;  %v1097_v19 = vpop.f32.mrf.mxu1  ;;  %v12208_v29 = vsub.s32 4, %v11872_v23  ;;  %v901_v40 = vadd.f32 %v900_v5, %v11902_v42  ;;  %v1415_v3 = vmax.f32 %v1094_v1, 0.0 }
 0x190   : > { %15995 = vst [vmem:[#allocation70_spill] sm:$0xff] %v12196_v27  ;;  %15996 = vst [vmem:[#allocation71_spill] sm:$0xff] %v12198_v9  ;;  %v905_v13 = vadd.f32 %v904_v44, %v11902_v42  ;;  %v1098_v56 = vadd.f32 %v1097_v19, %v11893_v37  ;;  %2982 = vmatprep.mubr.bf16.mxu1 %v12196_v27  ;;  %3175 = vmatprep.mubr.bf16.mxu0 %v12198_v9  ;;  %v1416_v30 = vmax.f32 %v1096_v55, 0.0  ;;  %v11323_v42 = vld [vmem:[%s15678_s2] sm:$0x1f] }
 0x191   : > { %15998 = vst [vmem:[#allocation73_spill] sm:$0xff] %v12208_v29  ;;  %v906_v17 = vpop.f32.mrf.mxu0  ;;  %v1099_v4 = vpop.f32.mrf.mxu1  ;;  %v1414_v25 = vmax.f32 %v903_v48, 0.0  ;;  %v12219_v1 = vrot.slane %v11323_v42, %v12208_v29  ;;  %v1413_v5 = vmax.f32 %v901_v40, 0.0 }
 0x192   : > { %2983 = vmatmul.mubr.bf16.gmra.mxu1 %v12200_v43  ;;  %3176 = vmatmul.mubr.bf16.gmra.mxu0 %v12192_v45  ;;  %v1420_v53 = vmax.f32 %v1098_v56, 0.0  ;;  %v907_v37 = vadd.f32 %v906_v17, %v11899_v41  ;;  %v1100_v19 = vadd.f32 %v1099_v4, %v11896_v38  ;;  %v1418_v8 = vmax.f32 %v905_v13, 0.0 }
 0x193   : > { %v10381_v59 = vpop.f32.mrf.mxu0 }
 0x194   : > { %v1419_v23 = vmax.f32 %v907_v37, 0.0  ;;  %v1421_v31 = vmax.f32 %v1100_v19, 0.0  ;;  %v12221_v57 = vpack.c.bf16 %v1420_v53, %v1415_v3  ;;  %v12227_v38 = vpack.c.bf16 %v1418_v8, %v1413_v5  ;;  %v10891_v19 = vld [vmem:[#allocation2 + $0x3a0] ss:$20 sps:$4 sm:$0xff]  }
 0x195   : > { %v1136_v55 = vpop.f32.mrf.mxu0  ;;  %v16003_v3 = vmov 0   ;;  %v1145_v42 = vadd.f32 %v10381_v59, %v12219_v1 }
 0x196   : > { %15999 = vst [vmem:[#allocation74_spill] sm:$0xff] %v12221_v57  ;;  %v12223_v44 = vpack.c.bf16 %v1419_v23, %v1414_v25  ;;  %v12225_v41 = vpack.c.bf16 %v1421_v31, %v1416_v30  ;;  %16002 = vst [vmem:[#allocation77_spill] sm:$0xff] %v12227_v38  ;;  %v1137_v13 = vadd.f32 %v1136_v55, %v12219_v1  ;;  %v10896_v23 = vld [vmem:[#allocation2 + $0x37c] ss:$20 sps:$4 sm:$0xff]   ;;  %v10921_v31 = vld [vmem:[#allocation2 + $0x620] ss:$20 sps:$4 sm:$0xff]  }
 0x197   : > { %v10382_v48 = vpop.f32.mrf.mxu0  ;;  %v10932_v55 = vld [vmem:[#allocation2 + $0x5fc] ss:$20 sps:$4 sm:$0xff]   ;;  %v1277_v59 = vmax.f32 %v1145_v42, 0.0  ;;  %v10944_v42 = vld [vmem:[#allocation2 + $0x5ac] ss:$20 sps:$4 sm:$0xff]  }
 0x198   : > { %16000 = vst [vmem:[#allocation75_spill] sm:$0xff] %v12223_v44  ;;  %16001 = vst [vmem:[#allocation76_spill] sm:$0xff] %v12225_v41  ;;  %2992 = vmatprep.mubr.bf16.mxu1 %v12223_v44  ;;  %3185 = vmatprep.mubr.bf16.mxu0 %v12225_v41  ;;  %v1267_v4 = vmax.f32 %v1137_v13, 0.0  ;;  %v1148_v8 = vadd.f32 %v10382_v48, %v12219_v1  ;;  %v10894_v13 = vld [vmem:[#allocation2 + $0x378] ss:$20 sps:$4 sm:$0xff]  }
 0x199   : > { %v1139_v56 = vpop.f32.mrf.mxu0 }
 0x19a   : > { %2993 = vmatmul.mubr.bf16.gmra.mxu1 %v12227_v38  ;;  %3186 = vmatmul.mubr.bf16.gmra.mxu0 %v12221_v57  ;;  %v1140_v40 = vadd.f32 %v1139_v56, %v12219_v1  ;;  %v1282_v56 = vmax.f32 %v1148_v8, 0.0  ;;  %v10939_v57 = vld [vmem:[#allocation2 + $0x5d0] ss:$20 sps:$4 sm:$0xff]  }
 0x19b   : > { %3421 = vmatprep.mubr.bf16.mxu0 %v11918_v14  ;;  %3228 = vmatprep.mubr.bf16.mxu1 %v16003_v3  ;;  %v10385_v17 = vpop.f32.mrf.mxu0  ;;  %v10902_v14 = vld [vmem:[#allocation2 + $0x32c] ss:$20 sps:$4 sm:$0xff]  }
 0x19c   : > { %v1272_v30 = vmax.f32 %v1140_v40, 0.0  ;;  %v10899_v40 = vld [vmem:[#allocation2 + $0x354] ss:$20 sps:$4 sm:$0xff]   ;;  %v12247_v29 = vpack.c.bf16 %v1282_v56, %v1277_v59  ;;  %v10905_v56 = vld [vmem:[#allocation2 + $0x304] ss:$20 sps:$4 sm:$0xff]   ;;  %v1161_v59 = vadd.f32 %v10385_v17, %v12219_v1 }
 0x19d   : > { %v1152_v53 = vpop.f32.mrf.mxu0  ;;  %v10953_v17 = vld [vmem:[#allocation2 + $0x55c] ss:$20 sps:$4 sm:$0xff]  }
 0x19e   : > { %v12237_v37 = vpack.c.bf16 %v1272_v30, %v1267_v4  ;;  %v10930_v4 = vld [vmem:[#allocation2 + $0x5f8] ss:$20 sps:$4 sm:$0xff]   ;;  %16005 = vst [vmem:[#allocation79_spill] sm:$0xff] %v12247_v29 }
 0x19f   : > { %v10386_v25 = vpop.f32.mrf.mxu0 }
 0x1a0   : > { %16004 = vst [vmem:[#allocation78_spill] sm:$0xff] %v12237_v37 }
 0x1a1   : > { %v1155_v5 = vpop.f32.mrf.mxu0 }
 0x1a2   : > { %3229 = vmatmul.mubr.bf16.vlgmr.msra.gmra.mxu1 %v12237_v37  ;;  %3422 = vmatmul.mubr.bf16.vlgmr.msra.gmra.mxu0 %v11922_v16  ;;  %v10897_v16 = vld [vmem:[#allocation2 + $0x350] ss:$20 sps:$4 sm:$0xff]  }
 0x1a3   : > { %3583 = vmatpush1.bf16.msra.mxu1 %v10891_v19  ;;  %3431 = vmatprep.mubr.bf16.mxu0 %v11938_v60  ;;  %v12245_v48 = vpop.f32.mrf.mxu0  ;;  %v1153_v19 = vadd.f32 %v1152_v53, %v12219_v1  ;;  %v1156_v60 = vadd.f32 %v1155_v5, %v12219_v1 }
 0x1a4   : > { %3238 = vmatprep.mubr.bf16.mxu1 %v16003_v3  ;;  %3584 = vmatprep.subr.bf16.mxu1 %v10896_v23  ;;  %v10941_v23 = vld [vmem:[#allocation2 + $0x5d4] ss:$20 sps:$4 sm:$0xff]  }
 0x1a5   : > { %3776 = vmatpush1.bf16.msra.mxu0 %v10921_v31  ;;  %v1168_v30 = vpop.f32.mrf.mxu0  ;;  %v1287_v53 = vmax.f32 %v1153_v19, 0.0  ;;  %v1292_v5 = vmax.f32 %v1156_v60, 0.0  ;;  %v10950_v19 = vld [vmem:[#allocation2 + $0x584] ss:$20 sps:$4 sm:$0xff]  }
 0x1a6   : > { %3777 = vmatprep.subr.bf16.mxu0 %v10932_v55  ;;  %v10900_v55 = vld [vmem:[#allocation2 + $0x328] ss:$20 sps:$4 sm:$0xff]  }
 0x1a7   : > { %3585 = vmatpush1.bf16.msra.mxu1 %v10894_v13  ;;  %v12251_v8 = vpop.f32.mrf.mxu0 }
 0x1a8   : > { %3586 = vmatprep.subr.bf16.mxu1 %v10899_v40  ;;  %v10942_v40 = vld [vmem:[#allocation2 + $0x5a8] ss:$20 sps:$4 sm:$0xff]  }
 0x1a9   : > { %3778 = vmatpush1.bf16.msra.mxu0 %v10930_v4  ;;  %v1171_v31 = vpop.f32.mrf.mxu0 }
 0x1aa   : > { %3239 = vmatmul.mubr.bf16.gmra.mxu1 %v12247_v29  ;;  %3432 = vmatmul.mubr.bf16.gmra.mxu0 %v11942_v2  ;;  %v12263_v2 = vpack.c.bf16 %v1292_v5, %v1287_v53  ;;  %v10906_v5 = vld [vmem:[#allocation2 + $0x2d8] ss:$20 sps:$4 sm:$0xff]   ;;  %v1172_v41 = vadd.f32 %v1171_v31, %v12219_v1 }
 0x1ab   : > { %3441 = vmatprep.mubr.bf16.mxu0 %v11958_v46  ;;  %3248 = vmatprep.mubr.bf16.mxu1 %v16003_v3  ;;  %v12257_v13 = vpop.f32.mrf.mxu0  ;;  %v1164_v46 = vadd.f32 %v10386_v25, %v12219_v1  ;;  %v1297_v25 = vmax.f32 %v1161_v59, 0.0 }
 0x1ac   : > { %3587 = vmatpush1.bf16.msra.mxu1 %v10897_v16  ;;  %3779 = vmatprep.subr.bf16.mxu0 %v10941_v23  ;;  %16006 = vst [vmem:[#allocation80_spill] sm:$0xff] %v12263_v2  ;;  %v10903_v16 = vld [vmem:[#allocation2 + $0x300] ss:$20 sps:$4 sm:$0xff]   ;;  %v10908_v23 = vld [vmem:[#allocation2 + $0x2dc] ss:$20 sps:$4 sm:$0xff]   ;;  %v1312_v31 = vmax.f32 %v1172_v41, 0.0 }
 0x1ad   : > { %3588 = vmatprep.subr.bf16.mxu1 %v10902_v14  ;;  %3780 = vmatpush1.bf16.msra.mxu0 %v10939_v57  ;;  %v12259_v4 = vpop.f32.mrf.mxu0  ;;  %v10948_v14 = vld [vmem:[#allocation2 + $0x580] ss:$20 sps:$4 sm:$0xff]  }
 0x1ae   : > { %3781 = vmatprep.subr.bf16.mxu0 %v10944_v42  ;;  %v1302_v42 = vmax.f32 %v1164_v46, 0.0  ;;  %v10909_v46 = vld [vmem:[#allocation2 + $0x2b0] ss:$20 sps:$4 sm:$0xff]  }
 0x1af   : > { %v12265_v60 = vpop.f32.mrf.mxu0 }
 0x1b0   : > { %3589 = vmatpush1.bf16.msra.mxu1 %v10900_v55  ;;  %v10911_v55 = vld [vmem:[#allocation2 + $0x2b4] ss:$20 sps:$4 sm:$0xff]  }
 0x1b1   : > { %3590 = vmatprep.subr.bf16.mxu1 %v10905_v56  ;;  %3782 = vmatpush1.bf16.msra.mxu0 %v10942_v40  ;;  %v12269_v57 = vpop.f32.mrf.mxu0  ;;  %v10951_v56 = vld [vmem:[#allocation2 + $0x558] ss:$20 sps:$4 sm:$0xff]  }
 0x1b2   : > { %3249 = vmatmul.mubr.bf16.gmra.mxu1 %v12263_v2  ;;  %3442 = vmatmul.mubr.bf16.gmra.mxu0 %v11962_v49  ;;  %v12277_v49 = vpack.c.bf16 %v1302_v42, %v1297_v25  ;;  %v10912_v42 = vld [vmem:[#allocation2 + $0x288] ss:$20 sps:$4 sm:$0xff]  }
 0x1b3   : > { %3451 = vmatprep.mubr.bf16.mxu0 %v11978_v28  ;;  %3258 = vmatprep.mubr.bf16.mxu1 %v16003_v3  ;;  %v12273_v53 = vpop.f32.mrf.mxu0  ;;  %v1169_v28 = vadd.f32 %v1168_v30, %v12219_v1 }
 0x1b4   : > { %3591 = vmatpush1.bf16.msra.mxu1 %v10903_v16  ;;  %3783 = vmatprep.subr.bf16.mxu0 %v10950_v19  ;;  %16007 = vst [vmem:[#allocation81_spill] sm:$0xff] %v12277_v49  ;;  %v10959_v16 = vld [vmem:[#allocation2 + $0x534] ss:$20 sps:$4 sm:$0xff]   ;;  %v10914_v19 = vld [vmem:[#allocation2 + $0x28c] ss:$20 sps:$4 sm:$0xff]  }
 0x1b5   : > { %3592 = vmatprep.subr.bf16.mxu1 %v10908_v23  ;;  %3784 = vmatpush1.bf16.msra.mxu0 %v10948_v14  ;;  %v12275_v40 = vpop.f32.mrf.mxu0  ;;  %v10957_v23 = vld [vmem:[#allocation2 + $0x530] ss:$20 sps:$4 sm:$0xff]   ;;  %v1307_v30 = vmax.f32 %v1169_v28, 0.0 }
 0x1b6   : > { %3785 = vmatprep.subr.bf16.mxu0 %v10953_v17  ;;  %v10962_v17 = vld [vmem:[#allocation2 + $0x50c] ss:$20 sps:$4 sm:$0xff]  }
 0x1b7   : > { %v12281_v59 = vpop.f32.mrf.mxu0  ;;  %v12297_v28 = vpack.c.bf16 %v1312_v31, %v1307_v30  ;;  %v10926_v30 = vld [vmem:[#allocation2 + $0x494] ss:$20 sps:$4 sm:$0xff]  }
 0x1b8   : > { %3593 = vmatpush1.bf16.msra.mxu1 %v10906_v5  ;;  %v10917_v5 = vld [vmem:[#allocation2 + $0x4e4] ss:$20 sps:$4 sm:$0xff]  }
 0x1b9   : > { %3594 = vmatprep.subr.bf16.mxu1 %v10911_v55  ;;  %3786 = vmatpush1.bf16.msra.mxu0 %v10951_v56  ;;  %v12285_v14 = vpop.f32.mrf.mxu0  ;;  %v10960_v55 = vld [vmem:[#allocation2 + $0x508] ss:$20 sps:$4 sm:$0xff]   ;;  %16008 = vst [vmem:[#allocation82_spill] sm:$0xff] %v12297_v28 }
 0x1ba   : > { %3259 = vmatmul.mubr.bf16.gmra.mxu1 %v12277_v49  ;;  %3452 = vmatmul.mubr.bf16.gmra.mxu0 %v11982_v32  ;;  %v1177_v32 = vadd.f32 %v12245_v48, %v12219_v1 }
 0x1bb   : > { %3461 = vmatprep.mubr.bf16.mxu0 %v11996_v12  ;;  %3268 = vmatprep.mubr.bf16.mxu1 %v16003_v3  ;;  %v12289_v25 = vpop.f32.mrf.mxu0  ;;  %v1180_v12 = vadd.f32 %v12251_v8, %v12219_v1 }
 0x1bc   : > { %3595 = vmatpush1.bf16.msra.mxu1 %v10909_v46  ;;  %3787 = vmatprep.subr.bf16.mxu0 %v10959_v16  ;;  %v10915_v46 = vld [vmem:[#allocation2 + $0x4e0] ss:$20 sps:$4 sm:$0xff]   ;;  %v10920_v16 = vld [vmem:[#allocation2 + $0x4bc] ss:$20 sps:$4 sm:$0xff]   ;;  %v1317_v48 = vmax.f32 %v1177_v32, 0.0 }
 0x1bd   : > { %3596 = vmatprep.subr.bf16.mxu1 %v10914_v19  ;;  %3788 = vmatpush1.bf16.msra.mxu0 %v10957_v23  ;;  %v12291_v56 = vpop.f32.mrf.mxu0  ;;  %v1322_v8 = vmax.f32 %v1180_v12, 0.0  ;;  %v10929_v32 = vld [vmem:[#allocation2 + $0x46c] ss:$20 sps:$4 sm:$0xff]  }
 0x1be   : > { %3789 = vmatprep.subr.bf16.mxu0 %v10962_v17  ;;  %v10918_v17 = vld [vmem:[#allocation2 + $0x4b8] ss:$20 sps:$4 sm:$0xff]  }
 0x1bf   : > { %v12299_v41 = vpop.f32.mrf.mxu0 }
 0x1c0   : > { %3597 = vmatpush1.bf16.msra.mxu1 %v10912_v42  ;;  %v12311_v42 = vpack.c.bf16 %v1322_v8, %v1317_v48  ;;  %v1193_v8 = vadd.f32 %v12257_v13, %v12219_v1 }
 0x1c1   : > { %3598 = vmatprep.subr.bf16.mxu1 %v10917_v5  ;;  %3790 = vmatpush1.bf16.msra.mxu0 %v10960_v55  ;;  %v12303_v19 = vpop.f32.mrf.mxu0  ;;  %v1185_v5 = vadd.f32 %v12259_v4, %v12219_v1  ;;  %v1188_v55 = vadd.f32 %v12269_v57, %v12219_v1  ;;  %v10927_v4 = vld [vmem:[#allocation2 + $0x468] ss:$20 sps:$4 sm:$0xff]   ;;  %v10935_v57 = vld [vmem:[#allocation2 + $0x444] ss:$20 sps:$4 sm:$0xff]  }
 0x1c2   : > { %3269 = vmatmul.mubr.bf16.gmra.mxu1 %v12297_v28  ;;  %3462 = vmatmul.mubr.bf16.gmra.mxu0 %v12000_v18  ;;  %16009 = vst [vmem:[#allocation83_spill] sm:$0xff] %v12311_v42  ;;  %v1337_v13 = vmax.f32 %v1193_v8, 0.0 }
 0x1c3   : > { %3471 = vmatprep.mubr.bf16.mxu0 %v12016_v7  ;;  %3278 = vmatprep.mubr.bf16.mxu1 %v16003_v3  ;;  %v12307_v23 = vpop.f32.mrf.mxu0  ;;  %v10924_v7 = vld [vmem:[#allocation2 + $0x490] ss:$20 sps:$4 sm:$0xff]  }
 0x1c4   : > { %3599 = vmatpush2.bf16.msra.mxu1 %v10915_v46  ;;  %v1327_v46 = vmax.f32 %v1185_v5, 0.0 }
 0x1c5   : > { %3600 = vmatprep.subr.bf16.mxu1 %v10920_v16  ;;  %v12309_v31 = vpop.f32.mrf.mxu0  ;;  %v1332_v16 = vmax.f32 %v1188_v55, 0.0  ;;  %v10947_v55 = vld [vmem:[#allocation2 + $0x3f4] ss:$20 sps:$4 sm:$0xff]  }
 0x1c7   : > { %v12319_v12 = vpop.f32.mrf.mxu0 }
 0x1c8   : > { %3601 = vmatpush2.bf16.msra.mxu1 %v10918_v17  ;;  %v1196_v17 = vadd.f32 %v12265_v60, %v12219_v1  ;;  %v10936_v60 = vld [vmem:[#allocation2 + $0x418] ss:$20 sps:$4 sm:$0xff]  }
 0x1c9   : > { %3602 = vmatprep.subr.bf16.mxu1 %v10926_v30  ;;  %v12323_v48 = vpop.f32.mrf.mxu0  ;;  %v12329_v30 = vpack.c.bf16 %v1332_v16, %v1327_v46  ;;  %v1201_v16 = vadd.f32 %v12275_v40, %v12219_v1  ;;  %v1743_v40 = vld [vmem:[%s15680_s4] sm:$0x1f] }
 0x1ca   : > { %3279 = vmatmul.mubr.bf16.gmra.mxu1 %v12311_v42  ;;  %3472 = vmatmul.mubr.bf16.gmra.mxu0 %v12020_v10  ;;  %v10938_v10 = vld [vmem:[#allocation2 + $0x41c] ss:$20 sps:$4 sm:$0xff]   ;;  %v1342_v5 = vmax.f32 %v1196_v17, 0.0 }
 0x1cb   : > { %3481 = vmatprep.mubr.bf16.mxu0 %v12036_v6  ;;  %3288 = vmatprep.mubr.bf16.mxu1 %v16003_v3  ;;  %16010 = vst [vmem:[#allocation84_spill] sm:$0xff] %v12329_v30  ;;  %v10933_v6 = vld [vmem:[#allocation2 + $0x440] ss:$20 sps:$4 sm:$0xff]   ;;  %v10963_v17 = vld [vmem:[#allocation2 + $0x268] ss:$20 sps:$4 sm:$0xff]  }
 0x1cc   : > { %3603 = vmatpush2.bf16.msra.mxu1 %v10924_v7  ;;  %v12333_v7 = vpop.f32.mrf.mxu0  ;;  %v12339_v46 = vpack.c.bf16 %v1342_v5, %v1337_v13  ;;  %v12357_v5 = vrot.slane %v1743_v40, %v11890_v35 }
 0x1cd   : > { %3604 = vmatprep.subr.bf16.mxu1 %v10929_v32 }
 0x1ce   : > { %v12337_v32 = vpop.f32.mrf.mxu0  ;;  %16011 = vst [vmem:[#allocation85_spill] sm:$0xff] %v12339_v46 }
 0x1d0   : > { %3605 = vmatpush2.bf16.msra.mxu1 %v10927_v4  ;;  %v1204_v4 = vadd.f32 %v12285_v14, %v12219_v1  ;;  %v10954_v14 = vld [vmem:[#allocation2 + $0x3c8] ss:$20 sps:$4 sm:$0xff]  }
 0x1d1   : > { %3606 = vmatprep.subr.bf16.mxu1 %v10935_v57  ;;  %v10945_v57 = vld [vmem:[#allocation2 + $0x3f0] ss:$20 sps:$4 sm:$0xff]  }
 0x1d2   : > { %3289 = vmatmul.mubr.bf16.gmra.mxu1 %v12329_v30  ;;  %3482 = vmatmul.mubr.bf16.gmra.mxu0 %v12040_v62  ;;  %v1352_v8 = vmax.f32 %v1204_v4, 0.0  ;;  %v12366_v4 = vrot.slane %v1743_v40, %v11887_v34 }
 0x1d3   : > { %3491 = vmatprep.mubr.bf16.mxu0 %v12056_v33  ;;  %3298 = vmatprep.mubr.bf16.mxu1 %v16003_v3  ;;  %v10956_v33 = vld [vmem:[#allocation2 + $0x3cc] ss:$20 sps:$4 sm:$0xff]  }
 0x1d4   : > { %3607 = vmatpush2.bf16.msra.mxu1 %v10933_v6  ;;  %v1347_v6 = vmax.f32 %v1201_v16, 0.0 }
 0x1d5   : > { %3608 = vmatprep.subr.bf16.mxu1 %v10938_v10  ;;  %v12347_v10 = vpop.f32.mrf.mxu0 }
 0x1d6   : > { %v12363_v16 = vpack.c.bf16 %v1352_v8, %v1347_v6 }
 0x1d7   : > { %v12354_v13 = vpop.f32.mrf.mxu0 }
 0x1d8   : > { %3609 = vmatpush2.bf16.msra.mxu1 %v10936_v60  ;;  %v1209_v60 = vadd.f32 %v12273_v53, %v12219_v1  ;;  %16012 = vst [vmem:[#allocation86_spill] sm:$0xff] %v12363_v16 }
 0x1d9   : > { %3610 = vmatprep.subr.bf16.mxu1 %v10947_v55  ;;  %v1212_v55 = vadd.f32 %v12281_v59, %v12219_v1 }
 0x1da   : > { %3299 = vmatmul.mubr.bf16.gmra.mxu1 %v12339_v46  ;;  %3492 = vmatmul.mubr.bf16.gmra.mxu0 %v12060_v20  ;;  %v1357_v53 = vmax.f32 %v1209_v60, 0.0  ;;  %v1220_v60 = vadd.f32 %v12303_v19, %v12219_v1 }
 0x1db   : > { %3501 = vmatprep.mubr.bf16.mxu0 %v12076_v50  ;;  %3308 = vmatprep.mubr.bf16.mxu1 %v16003_v3  ;;  %v1362_v59 = vmax.f32 %v1212_v55, 0.0 }
 0x1dc   : > { %3611 = vmatpush2.bf16.msra.mxu1 %v10945_v57  ;;  %v1372_v19 = vmax.f32 %v1220_v60, 0.0 }
 0x1dd   : > { %3612 = vmatprep.subr.bf16.mxu1 %v10956_v33  ;;  %v12379_v20 = vpack.c.bf16 %v1362_v59, %v1357_v53 }
 0x1df   : > { %16013 = vst [vmem:[#allocation87_spill] sm:$0xff] %v12379_v20 }
 0x1e0   : > { %3613 = vmatpush2.bf16.msra.mxu1 %v10954_v14 }
 0x1e1   : > { %9619 = vmatprep.subr.bf16.mxu1 %v10963_v17  ;;  %v2844_v33 = vpop.f32.mrf.mxu1 }
 0x1e2   : > { %v3037_v57 = vpop.f32.mrf.mxu0  ;;  %3309 = vmatmul.mubr.bf16.gmra.mxu1 %v12363_v16  ;;  %3502 = vmatmul.mubr.bf16.gmra.mxu0 %v12080_v39  ;;  %v2845_v35 = vadd.f32 %v2844_v33, %v12357_v5  ;;  %v1217_v33 = vadd.f32 %v12291_v56, %v12219_v1 }
 0x1e3   : > { %3511 = vmatprep.mubr.bf16.mxu0 %v12096_v54  ;;  %3318 = vmatprep.mubr.bf16.mxu1 %v16003_v3  ;;  %v2846_v6 = vpop.f32.mrf.mxu1 }
 0x1e4   : > { %v3039_v8 = vpop.f32.mrf.mxu0  ;;  %v12373_v14 = vadd.f32 %v3037_v57, %v2845_v35  ;;  %v2847_v40 = vadd.f32 %v2846_v6, %v12366_v4  ;;  %v1367_v56 = vmax.f32 %v1217_v33, 0.0 }
 0x1e5   : > { %v2848_v17 = vpop.f32.mrf.mxu1 }
 0x1e6   : > { %v3041_v34 = vpop.f32.mrf.mxu0  ;;  %v12376_v50 = vadd.f32 %v3039_v8, %v2847_v40  ;;  %v2849_v39 = vadd.f32 %v2848_v17, %v12357_v5  ;;  %v12405_v33 = vpack.c.bf16 %v1372_v19, %v1367_v56 }
 0x1e7   : > { %v2850_v55 = vpop.f32.mrf.mxu1 }
 0x1e8   : > { %v3043_v54 = vpop.f32.mrf.mxu0  ;;  %v12385_v35 = vadd.f32 %v3041_v34, %v2849_v39  ;;  %v2851_v57 = vadd.f32 %v2850_v55, %v12366_v4  ;;  %16014 = vst [vmem:[#allocation88_spill] sm:$0xff] %v12405_v33 }
 0x1ea   : > { %v2854_v6 = vpop.f32.mrf.mxu1  ;;  %v3047_v62 = vpop.f32.mrf.mxu0  ;;  %3319 = vmatmul.mubr.bf16.gmra.mxu1 %v12379_v20  ;;  %3512 = vmatmul.mubr.bf16.gmra.mxu0 %v12100_v58  ;;  %v12390_v53 = vadd.f32 %v3043_v54, %v2851_v57  ;;  %v1225_v57 = vadd.f32 %v12289_v25, %v12219_v1 }
 0x1eb   : > { %v2855_v59 = vadd.f32 %v2854_v6, %v12357_v5  ;;  %3521 = vmatprep.mubr.bf16.mxu0 %v12116_v52  ;;  %3328 = vmatprep.mubr.bf16.mxu1 %v16003_v3  ;;  %v1228_v6 = vadd.f32 %v12299_v41, %v12219_v1  ;;  %v10973_v41 = vld [vmem:[#allocation2 + $0x4e8] ss:$20 sps:$4 sm:$0xff]  }
 0x1ec   : > { %v2856_v34 = vpop.f32.mrf.mxu1  ;;  %v3049_v39 = vpop.f32.mrf.mxu0  ;;  %v1377_v56 = vmax.f32 %v1225_v57, 0.0  ;;  %9731 = vmatprep.subr.bf16.mxu0 %v10973_v41  ;;  %v1236_v57 = vadd.f32 %v12323_v48, %v12219_v1 }
 0x1ed   : > { %v12395_v8 = vadd.f32 %v3047_v62, %v2855_v59  ;;  %v2857_v40 = vadd.f32 %v2856_v34, %v12366_v4  ;;  %v1382_v19 = vmax.f32 %v1228_v6, 0.0 }
 0x1ee   : > { %v2858_v17 = vpop.f32.mrf.mxu1  ;;  %v3051_v55 = vpop.f32.mrf.mxu0  ;;  %v1392_v48 = vmax.f32 %v1236_v57, 0.0 }
 0x1ef   : > { %v12398_v18 = vadd.f32 %v3049_v39, %v2857_v40  ;;  %v2859_v54 = vadd.f32 %v2858_v17, %v12357_v5 }
 0x1f0   : > { %v2860_v60 = vpop.f32.mrf.mxu1  ;;  %v3053_v52 = vpop.f32.mrf.mxu0 }
 0x1f1   : > { %v12407_v62 = vadd.f32 %v3051_v55, %v2859_v54  ;;  %v2861_v59 = vadd.f32 %v2860_v60, %v12366_v4 }
 0x1f2   : > { %v2864_v34 = vpop.f32.mrf.mxu1  ;;  %v3057_v58 = vpop.f32.mrf.mxu0  ;;  %3329 = vmatmul.mubr.bf16.gmra.mxu1 %v12405_v33  ;;  %3522 = vmatmul.mubr.bf16.gmra.mxu0 %v12120_v0 }
 0x1f3   : > { %v12412_v39 = vadd.f32 %v3053_v52, %v2861_v59  ;;  %v2865_v25 = vadd.f32 %v2864_v34, %v12357_v5  ;;  %3531 = vmatprep.mubr.bf16.mxu0 %v12136_v63  ;;  %3338 = vmatprep.mubr.bf16.mxu1 %v16003_v3  ;;  %v12423_v34 = vpack.c.bf16 %v1382_v19, %v1377_v56 }
 0x1f4   : > { %v2866_v40 = vpop.f32.mrf.mxu1  ;;  %v3059_v17 = vpop.f32.mrf.mxu0  ;;  %v1233_v63 = vadd.f32 %v12309_v31, %v12219_v1 }
 0x1f5   : > { %v12417_v55 = vadd.f32 %v3057_v58, %v2865_v25  ;;  %v2867_v54 = vadd.f32 %v2866_v40, %v12366_v4  ;;  %16015 = vst [vmem:[#allocation89_spill] sm:$0xff] %v12423_v34 }
 0x1f6   : > { %v2868_v60 = vpop.f32.mrf.mxu1  ;;  %v3061_v0 = vpop.f32.mrf.mxu0  ;;  %v1387_v31 = vmax.f32 %v1233_v63, 0.0 }
 0x1f7   : > { %v12420_v52 = vadd.f32 %v3059_v17, %v2867_v54  ;;  %v2869_v59 = vadd.f32 %v2868_v60, %v12357_v5 }
 0x1f8   : > { %v2870_v6 = vpop.f32.mrf.mxu1  ;;  %v3063_v58 = vpop.f32.mrf.mxu0  ;;  %v12449_v63 = vpack.c.bf16 %v1392_v48, %v1387_v31 }
 0x1f9   : > { %v12429_v25 = vadd.f32 %v3061_v0, %v2869_v59  ;;  %v2871_v41 = vadd.f32 %v2870_v6, %v12366_v4 }
 0x1fa   : > { %v2874_v40 = vpop.f32.mrf.mxu1  ;;  %v3067_v45 = vpop.f32.mrf.mxu0  ;;  %3339 = vmatmul.mubr.bf16.gmra.mxu1 %v12423_v34  ;;  %3532 = vmatmul.mubr.bf16.gmra.mxu0 %v12140_v21  ;;  %16016 = vst [vmem:[#allocation90_spill] sm:$0xff] %v12449_v63 }
 0x1fb   : > { %v12434_v56 = vadd.f32 %v3063_v58, %v2871_v41  ;;  %v2875_v19 = vadd.f32 %v2874_v40, %v12357_v5  ;;  %3541 = vmatprep.mubr.bf16.mxu0 %v12156_v22  ;;  %3348 = vmatprep.mubr.bf16.mxu1 %v16003_v3  ;;  %v1241_v41 = vadd.f32 %v12307_v23, %v12219_v1 }
 0x1fc   : > { %v2876_v0 = vpop.f32.mrf.mxu1  ;;  %v3069_v17 = vpop.f32.mrf.mxu0  ;;  %v1244_v40 = vadd.f32 %v12319_v12, %v12219_v1 }
 0x1fd   : > { %v12439_v54 = vadd.f32 %v3067_v45, %v2875_v19  ;;  %v2877_v60 = vadd.f32 %v2876_v0, %v12366_v4  ;;  %v1397_v12 = vmax.f32 %v1241_v41, 0.0  ;;  %v1252_v41 = vadd.f32 %v12354_v13, %v12219_v1 }
 0x1fe   : > { %v2878_v59 = vpop.f32.mrf.mxu1  ;;  %v3071_v6 = vpop.f32.mrf.mxu0  ;;  %v1402_v31 = vmax.f32 %v1244_v40, 0.0 }
 0x1ff   : > { %v12442_v9 = vadd.f32 %v3069_v17, %v2877_v60  ;;  %v2879_v58 = vadd.f32 %v2878_v59, %v12357_v5  ;;  %v1412_v13 = vmax.f32 %v1252_v41, 0.0 }
 0x200   : > { %v2880_v57 = vpop.f32.mrf.mxu1  ;;  %v3073_v22 = vpop.f32.mrf.mxu0 }
 0x201   : > { %v12451_v45 = vadd.f32 %v3071_v6, %v2879_v58  ;;  %v2881_v19 = vadd.f32 %v2880_v57, %v12366_v4 }
 0x202   : > { %v2884_v0 = vpop.f32.mrf.mxu1  ;;  %v3077_v21 = vpop.f32.mrf.mxu0  ;;  %3349 = vmatmul.mubr.bf16.gmra.mxu1 %v12449_v63  ;;  %3542 = vmatmul.mubr.bf16.gmra.mxu0 %v12160_v26 }
 0x203   : > { %v12456_v17 = vadd.f32 %v3073_v22, %v2881_v19  ;;  %v2885_v23 = vadd.f32 %v2884_v0, %v12357_v5  ;;  %3551 = vmatprep.mubr.bf16.mxu0 %v12176_v11  ;;  %3358 = vmatprep.mubr.bf16.mxu1 %v16003_v3  ;;  %v12467_v19 = vpack.c.bf16 %v1402_v31, %v1397_v12 }
 0x204   : > { %v2886_v48 = vpop.f32.mrf.mxu1  ;;  %v3079_v60 = vpop.f32.mrf.mxu0  ;;  %v1249_v0 = vadd.f32 %v12337_v32, %v12219_v1 }
 0x205   : > { %v12461_v59 = vadd.f32 %v3077_v21, %v2885_v23  ;;  %v2887_v6 = vadd.f32 %v2886_v48, %v12366_v4  ;;  %16017 = vst [vmem:[#allocation91_spill] sm:$0xff] %v12467_v19 }
 0x206   : > { %v2888_v58 = vpop.f32.mrf.mxu1  ;;  %v3081_v57 = vpop.f32.mrf.mxu0  ;;  %v1407_v32 = vmax.f32 %v1249_v0, 0.0 }
 0x207   : > { %v12464_v63 = vadd.f32 %v3079_v60, %v2887_v6  ;;  %v2889_v22 = vadd.f32 %v2888_v58, %v12357_v5 }
 0x208   : > { %v2890_v40 = vpop.f32.mrf.mxu1  ;;  %v3083_v11 = vpop.f32.mrf.mxu0  ;;  %v12493_v0 = vpack.c.bf16 %v1412_v13, %v1407_v32 }
 0x209   : > { %v12473_v21 = vadd.f32 %v3081_v57, %v2889_v22  ;;  %v2891_v23 = vadd.f32 %v2890_v40, %v12366_v4 }
 0x20a   : > { %v2894_v48 = vpop.f32.mrf.mxu1  ;;  %v3087_v26 = vpop.f32.mrf.mxu0  ;;  %3359 = vmatmul.mubr.bf16.gmra.mxu1 %v12467_v19  ;;  %3552 = vmatmul.mubr.bf16.gmra.mxu0 %v12180_v24  ;;  %16018 = vst [vmem:[#allocation92_spill] sm:$0xff] %v12493_v0 }
 0x20b   : > { %v12478_v12 = vadd.f32 %v3083_v11, %v2891_v23  ;;  %v2895_v31 = vadd.f32 %v2894_v48, %v12357_v5  ;;  %3561 = vmatprep.mubr.bf16.mxu0 %v12196_v27  ;;  %3368 = vmatprep.mubr.bf16.mxu1 %v16003_v3  ;;  %v1257_v23 = vadd.f32 %v12333_v7, %v12219_v1 }
 0x20c   : > { %v2896_v60 = vpop.f32.mrf.mxu1  ;;  %v3089_v6 = vpop.f32.mrf.mxu0  ;;  %v1260_v48 = vadd.f32 %v12347_v10, %v12219_v1 }
 0x20d   : > { %v12483_v58 = vadd.f32 %v3087_v26, %v2895_v31  ;;  %v2897_v57 = vadd.f32 %v2896_v60, %v12366_v4  ;;  %v1417_v1 = vmax.f32 %v1257_v23, 0.0 }
 0x20e   : > { %v2898_v22 = vpop.f32.mrf.mxu1  ;;  %v3091_v40 = vpop.f32.mrf.mxu0  ;;  %v1422_v10 = vmax.f32 %v1260_v48, 0.0 }
 0x20f   : > { %v12486_v19 = vadd.f32 %v3089_v6, %v2897_v57  ;;  %v2899_v11 = vadd.f32 %v2898_v22, %v12357_v5 }
 0x210   : > { %v2900_v41 = vpop.f32.mrf.mxu1  ;;  %v3093_v27 = vpop.f32.mrf.mxu0 }
 0x211   : > { %v12495_v26 = vadd.f32 %v3091_v40, %v2899_v11  ;;  %v2901_v31 = vadd.f32 %v2900_v41, %v12366_v4 }
 0x212   : > { %v2904_v60 = vpop.f32.mrf.mxu1  ;;  %v3097_v24 = vpop.f32.mrf.mxu0  ;;  %3369 = vmatmul.mubr.bf16.gmra.mxu1 %v12493_v0  ;;  %3562 = vmatmul.mubr.bf16.gmra.mxu0 %v12200_v43 }
 0x213   : > { %v12500_v6 = vadd.f32 %v3093_v27, %v2901_v31  ;;  %v2905_v7 = vadd.f32 %v2904_v60, %v12357_v5  ;;  %3571 = vmatprep.mubr.bf16.mxu0 %v12223_v44  ;;  %3378 = vmatprep.mubr.bf16.mxu1 %v16003_v3  ;;  %v12511_v31 = vpack.c.bf16 %v1422_v10, %v1417_v1 }
 0x214   : > { %v2906_v32 = vpop.f32.mrf.mxu1  ;;  %v3099_v13 = vpop.f32.mrf.mxu0 }
 0x215   : > { %v12505_v57 = vadd.f32 %v3097_v24, %v2905_v7  ;;  %v2907_v22 = vadd.f32 %v2906_v32, %v12366_v4  ;;  %16019 = vst [vmem:[#allocation93_spill] sm:$0xff] %v12511_v31 }
 0x216   : > { %v2908_v40 = vpop.f32.mrf.mxu1  ;;  %v3101_v11 = vpop.f32.mrf.mxu0 }
 0x217   : > { %v12508_v41 = vadd.f32 %v3099_v13, %v2907_v22  ;;  %v2909_v27 = vadd.f32 %v2908_v40, %v12357_v5 }
 0x218   : > { %v2910_v60 = vpop.f32.mrf.mxu1  ;;  %v3103_v44 = vpop.f32.mrf.mxu0 }
 0x219   : > { %v12513_v43 = vadd.f32 %v3101_v11, %v2909_v27  ;;  %v2911_v23 = vadd.f32 %v2910_v60, %v12366_v4 }
 0x21a   : > { %v2914_v48 = vpop.f32.mrf.mxu1  ;;  %v3107_v0 = vpop.f32.mrf.mxu0  ;;  %3379 = vmatmul.mubr.bf16.gmra.mxu1 %v12511_v31  ;;  %3572 = vmatmul.mubr.bf16.gmra.mxu0 %v12227_v38  ;;  %v10974_v31 = vld [vmem:[#allocation2 + $0x3a8] ss:$20 sps:$4 sm:$0xff]  }
 0x21b   : > { %v12518_v24 = vadd.f32 %v3103_v44, %v2911_v23  ;;  %v2915_v7 = vadd.f32 %v2914_v48, %v12357_v5  ;;  %3614 = vmatprep.mubr.bf16.mxu1 %v11920_v15  ;;  %3807 = vmatprep.mubr.bf16.mxu0 %v16003_v3  ;;  %v10964_v44 = vld [vmem:[#allocation2 + $0x128] ss:$20 sps:$4 sm:$0xff]   ;;  %v10965_v48 = vld [vmem:[#allocation2 + $0x240] ss:$20 sps:$4 sm:$0xff]  }
 0x21c   : > { %v2916_v1 = vpop.f32.mrf.mxu1  ;;  %v3109_v10 = vpop.f32.mrf.mxu0 }
 0x21d   : > { %16020 = vst [vmem:[#allocation94_spill] sm:$0xff] %v12518_v24  ;;  %v12523_v32 = vadd.f32 %v3107_v0, %v2915_v7  ;;  %v2917_v13 = vadd.f32 %v2916_v1, %v12366_v4  ;;  %v10977_v7 = vld [vmem:[#allocation2 + $0x4c0] ss:$20 sps:$4 sm:$0xff]  }
 0x21e   : > { %v2918_v22 = vpop.f32.mrf.mxu1  ;;  %v3111_v40 = vpop.f32.mrf.mxu0 }
 0x21f   : > { %v12526_v11 = vadd.f32 %v3109_v10, %v2917_v13  ;;  %v2919_v27 = vadd.f32 %v2918_v22, %v12357_v5  ;;  %v10966_v13 = vld [vmem:[#allocation2 + $0x100] ss:$20 sps:$4 sm:$0xff]  }
 0x220   : > { %v2920_v60 = vpop.f32.mrf.mxu1  ;;  %v3113_v23 = vpop.f32.mrf.mxu0 }
 0x221   : > { %16021 = vst [vmem:[#allocation95_spill] sm:$0xff] %v12526_v11  ;;  %v12529_v38 = vadd.f32 %v3111_v40, %v2919_v27  ;;  %v2921_v15 = vadd.f32 %v2920_v60, %v12366_v4  ;;  %v10967_v27 = vld [vmem:[#allocation2 + $0x218] ss:$20 sps:$4 sm:$0xff]  }
 0x222   : > { %v2924_v24 = vpop.f32.mrf.mxu1  ;;  %v3117_v0 = vpop.f32.mrf.mxu0  ;;  %3615 = vmatmul.mubr.bf16.vlgmr.msra.gmra.mxu1 %v11912_v36  ;;  %3808 = vmatmul.mubr.bf16.vlgmr.msra.gmra.mxu0 %v12237_v37  ;;  %v10978_v37 = vld [vmem:[#allocation2 + $0x380] ss:$20 sps:$4 sm:$0xff]  }
 0x223   : > { %16022 = vst [vmem:[#allocation96_spill] sm:$0xff] %v12529_v38  ;;  %v12534_v1 = vadd.f32 %v3113_v23, %v2921_v15  ;;  %v2925_v10 = vadd.f32 %v2924_v24, %v12357_v5  ;;  %9620 = vmatpush3.bf16.msra.mxu1 %v10964_v44  ;;  %3624 = vmatprep.mubr.bf16.mxu1 %v11940_v61  ;;  %v10968_v38 = vld [vmem:[#allocation2 + $0xd8] ss:$20 sps:$4 sm:$0xff]  }
 0x224   : > { %v2926_v22 = vpop.f32.mrf.mxu1  ;;  %v3119_v40 = vpop.f32.mrf.mxu0  ;;  %3817 = vmatprep.mubr.bf16.mxu0 %v16003_v3  ;;  %9621 = vmatprep.subr.bf16.mxu1 %v10965_v48  ;;  %v10981_v48 = vld [vmem:[#allocation2 + $0x498] ss:$20 sps:$4 sm:$0xff]  }
 0x225   : > { %16023 = vst [vmem:[#allocation97_spill] sm:$0xff] %v12534_v1  ;;  %v12539_v60 = vadd.f32 %v3117_v0, %v2925_v10  ;;  %v2927_v36 = vadd.f32 %v2926_v22, %v12366_v4  ;;  %9732 = vmatpush3.bf16.msra.mxu0 %v10974_v31  ;;  %v10969_v10 = vld [vmem:[#allocation2 + $0x1f0] ss:$20 sps:$4 sm:$0xff]   ;;  %v10982_v31 = vld [vmem:[#allocation2 + $0x358] ss:$20 sps:$4 sm:$0xff]  }
 0x226   : > { %v2928_v15 = vpop.f32.mrf.mxu1  ;;  %v3121_v23 = vpop.f32.mrf.mxu0  ;;  %9733 = vmatprep.subr.bf16.mxu0 %v10977_v7 }
 0x227   : > { %16024 = vst [vmem:[#allocation98_spill] sm:$0xff] %v12539_v60  ;;  %v12542_v24 = vadd.f32 %v3119_v40, %v2927_v36  ;;  %v2929_v44 = vadd.f32 %v2928_v15, %v12357_v5  ;;  %9622 = vmatpush3.bf16.msra.mxu1 %v10966_v13  ;;  %v10983_v36 = vld [vmem:[#allocation2 + $0x470] ss:$20 sps:$4 sm:$0xff]  }
 0x228   : > { %v2930_v61 = vpop.f32.mrf.mxu1  ;;  %v3123_v1 = vpop.f32.mrf.mxu0  ;;  %9623 = vmatprep.subr.bf16.mxu1 %v10967_v27 }
 0x229   : > { %v12545_v11 = vadd.f32 %v3121_v23, %v2929_v44  ;;  %v2931_v0 = vadd.f32 %v2930_v61, %v12366_v4  ;;  %9734 = vmatpush3.bf16.msra.mxu0 %v10978_v37  ;;  %v10970_v37 = vld [vmem:[#allocation2 + $0xb0] ss:$20 sps:$4 sm:$0xff]   ;;  %v10971_v23 = vld [vmem:[#allocation2 + $0x1c8] ss:$20 sps:$4 sm:$0xff]  }
 0x22a   : > { %v2934_v22 = vpop.f32.mrf.mxu1  ;;  %v3127_v60 = vpop.f32.mrf.mxu0  ;;  %3625 = vmatmul.mubr.bf16.gmra.mxu1 %v11932_v51  ;;  %3818 = vmatmul.mubr.bf16.gmra.mxu0 %v12247_v29 }
 0x22b   : > { %v12550_v7 = vadd.f32 %v3123_v1, %v2931_v0  ;;  %v2935_v13 = vadd.f32 %v2934_v22, %v12357_v5  ;;  %3634 = vmatprep.mubr.bf16.mxu1 %v11960_v47  ;;  %3827 = vmatprep.mubr.bf16.mxu0 %v16003_v3  ;;  %v10984_v1 = vld [vmem:[#allocation2 + $0x330] ss:$20 sps:$4 sm:$0xff]  }
 0x22c   : > { %v2936_v40 = vpop.f32.mrf.mxu1  ;;  %v3129_v61 = vpop.f32.mrf.mxu0  ;;  %9624 = vmatpush3.bf16.msra.mxu1 %v10968_v38  ;;  %9735 = vmatprep.subr.bf16.mxu0 %v10981_v48  ;;  %v10972_v38 = vld [vmem:[#allocation2 + $0x88] ss:$20 sps:$4 sm:$0xff]  }
 0x22d   : > { %v12555_v27 = vadd.f32 %v3127_v60, %v2935_v13  ;;  %v2937_v15 = vadd.f32 %v2936_v40, %v12366_v4  ;;  %9625 = vmatprep.subr.bf16.mxu1 %v10969_v10  ;;  %9736 = vmatpush3.bf16.msra.mxu0 %v10982_v31  ;;  %v10987_v48 = vld [vmem:[#allocation2 + $0x448] ss:$20 sps:$4 sm:$0xff]   ;;  %v10975_v10 = vld [vmem:[#allocation2 + $0x1a0] ss:$20 sps:$4 sm:$0xff]  }
 0x22e   : > { %v2938_v44 = vpop.f32.mrf.mxu1  ;;  %v3131_v0 = vpop.f32.mrf.mxu0  ;;  %9737 = vmatprep.subr.bf16.mxu0 %v10983_v36  ;;  %v10988_v31 = vld [vmem:[#allocation2 + $0x308] ss:$20 sps:$4 sm:$0xff]   ;;  %v16027_v36 = vld [vmem:[#allocation21_spill] sm:$0xff] }
 0x22f   : > { %16025 = vst [vmem:[#allocation99_spill] sm:$0xff] %v12555_v27  ;;  %v12558_v22 = vadd.f32 %v3129_v61, %v2937_v15  ;;  %v2939_v29 = vadd.f32 %v2938_v44, %v12357_v5  ;;  %v10989_v61 = vld [vmem:[#allocation2 + $0x420] ss:$20 sps:$4 sm:$0xff]  }
 0x230   : > { %v2940_v47 = vpop.f32.mrf.mxu1  ;;  %v3133_v51 = vpop.f32.mrf.mxu0  ;;  %9626 = vmatpush3.bf16.msra.mxu1 %v10970_v37  ;;  %v16029_v44 = vld [vmem:[#allocation27_spill] sm:$0xff] }
 0x231   : > { %v12561_v60 = vadd.f32 %v3131_v0, %v2939_v29  ;;  %v2941_v13 = vadd.f32 %v2940_v47, %v12366_v4  ;;  %9627 = vmatprep.subr.bf16.mxu1 %v10971_v23  ;;  %9738 = vmatpush3.bf16.msra.mxu0 %v10984_v1  ;;  %v10976_v23 = vld [vmem:[#allocation2 + $0x60] ss:$20 sps:$4 sm:$0xff]  }
 0x232   : > { %v2944_v40 = vpop.f32.mrf.mxu1  ;;  %v3137_v27 = vpop.f32.mrf.mxu0  ;;  %3635 = vmatmul.mubr.bf16.gmra.mxu1 %v16027_v36  ;;  %3828 = vmatmul.mubr.bf16.gmra.mxu0 %v12263_v2  ;;  %v10979_v2 = vld [vmem:[#allocation2 + $0x178] ss:$20 sps:$4 sm:$0xff]  }
 0x233   : > { %16026 = vst [vmem:[#allocation100_spill] sm:$0xff] %v12561_v60  ;;  %v12566_v15 = vadd.f32 %v3133_v51, %v2941_v13  ;;  %v2945_v37 = vadd.f32 %v2944_v40, %v12357_v5  ;;  %3644 = vmatprep.mubr.bf16.mxu1 %v16029_v44  ;;  %3837 = vmatprep.mubr.bf16.mxu0 %v16003_v3  ;;  %v10990_v51 = vld [vmem:[#allocation2 + $0x2e0] ss:$20 sps:$4 sm:$0xff]  }
 0x234   : > { %v2946_v47 = vpop.f32.mrf.mxu1  ;;  %v3139_v29 = vpop.f32.mrf.mxu0  ;;  %9628 = vmatpush3.bf16.msra.mxu1 %v10972_v38  ;;  %9739 = vmatprep.subr.bf16.mxu0 %v10987_v48  ;;  %v10980_v38 = vld [vmem:[#allocation2 + $0x38] ss:$20 sps:$4 sm:$0xff]  }
 0x235   : > { %16028 = vst [vmem:[#allocation101_spill] sm:$0xff] %v12566_v15  ;;  %v12571_v1 = vadd.f32 %v3137_v27, %v2945_v37  ;;  %v2947_v0 = vadd.f32 %v2946_v47, %v12366_v4  ;;  %9629 = vmatprep.subr.bf16.mxu1 %v10975_v10  ;;  %9740 = vmatpush3.bf16.msra.mxu0 %v10988_v31  ;;  %v10991_v48 = vld [vmem:[#allocation2 + $0x3f8] ss:$20 sps:$4 sm:$0xff]   ;;  %v10985_v10 = vld [vmem:[#allocation2 + $0x150] ss:$20 sps:$4 sm:$0xff]  }
 0x236   : > { %v2948_v13 = vpop.f32.mrf.mxu1  ;;  %v3141_v36 = vpop.f32.mrf.mxu0  ;;  %9741 = vmatprep.subr.bf16.mxu0 %v10989_v61  ;;  %v10992_v31 = vld [vmem:[#allocation2 + $0x2b8] ss:$20 sps:$4 sm:$0xff]   ;;  %v16031_v61 = vld [vmem:[#allocation25_spill] sm:$0xff] }
 0x237   : > { %16030 = vst [vmem:[#allocation102_spill] sm:$0xff] %v12571_v1  ;;  %v12574_v40 = vadd.f32 %v3139_v29, %v2947_v0  ;;  %v2949_v44 = vadd.f32 %v2948_v13, %v12357_v5  ;;  %v10993_v29 = vld [vmem:[#allocation2 + $0x3d0] ss:$20 sps:$4 sm:$0xff]  }
 0x238   : > { %v2950_v15 = vpop.f32.mrf.mxu1  ;;  %v3143_v60 = vpop.f32.mrf.mxu0  ;;  %9630 = vmatpush3.bf16.msra.mxu1 %v10976_v23  ;;  %v16033_v13 = vld [vmem:[#allocation31_spill] sm:$0xff] }
 0x239   : > { %v12577_v27 = vadd.f32 %v3141_v36, %v2949_v44  ;;  %v2951_v37 = vadd.f32 %v2950_v15, %v12366_v4  ;;  %9631 = vmatprep.subr.bf16.mxu1 %v10979_v2  ;;  %9742 = vmatpush3.bf16.msra.mxu0 %v10990_v51  ;;  %v10986_v15 = vld [vmem:[#allocation2 + $0x10] ss:$20 sps:$4 sm:$0xff]  }
 0x23a   : > { %v2954_v47 = vpop.f32.mrf.mxu1  ;;  %v3147_v1 = vpop.f32.mrf.mxu0  ;;  %3645 = vmatmul.mubr.bf16.gmra.mxu1 %v16031_v61  ;;  %3838 = vmatmul.mubr.bf16.gmra.mxu0 %v12277_v49  ;;  %v10994_v49 = vld [vmem:[#allocation2 + $0x290] ss:$20 sps:$4 sm:$0xff]  }
 0x23b   : > { %v12582_v0 = vadd.f32 %v3143_v60, %v2951_v37  ;;  %v2955_v23 = vadd.f32 %v2954_v47, %v12357_v5  ;;  %3654 = vmatprep.mubr.bf16.mxu1 %v16033_v13  ;;  %3847 = vmatprep.mubr.bf16.mxu0 %v16003_v3  ;;  %v12590_v60 = vld [vmem:[#allocation2 + $0x628] ss:$20 sps:$4 sm:$0xff]  }
 0x23c   : > { %v2956_v36 = vpop.f32.mrf.mxu1  ;;  %v3149_v2 = vpop.f32.mrf.mxu0  ;;  %9632 = vmatpush3.bf16.msra.mxu1 %v10980_v38  ;;  %9743 = vmatprep.subr.bf16.mxu0 %v10991_v48 }
 0x23d   : > { %16032 = vst [vmem:[#allocation103_spill] sm:$0xff] %v12582_v0  ;;  %v12587_v44 = vadd.f32 %v3147_v1, %v2955_v23  ;;  %v2957_v51 = vadd.f32 %v2956_v36, %v12366_v4  ;;  %9633 = vmatprep.subr.bf16.mxu1 %v10985_v10  ;;  %9744 = vmatpush3.bf16.msra.mxu0 %v10992_v31  ;;  %v16035_v23 = vld [vmem:[#allocation29_spill] sm:$0xff] }
 0x23e   : > { %v2958_v37 = vpop.f32.mrf.mxu1  ;;  %v3151_v47 = vpop.f32.mrf.mxu0  ;;  %9745 = vmatprep.subr.bf16.mxu0 %v10993_v29 }
 0x23f   : > { %v12592_v13 = vadd.f32 %v3149_v2, %v2957_v51  ;;  %v2959_v61 = vadd.f32 %v2958_v37, %v12357_v5  ;;  %v16037_v2 = vld [vmem:[#allocation35_spill] sm:$0xff] }
 0x240   : > { %v2960_v0 = vpop.f32.mrf.mxu1  ;;  %v3153_v38 = vpop.f32.mrf.mxu0  ;;  %9634 = vmatpush3.bf16.msra.mxu1 %v10986_v15 }
 0x241   : > { %v12595_v48 = vadd.f32 %v3151_v47, %v2959_v61  ;;  %v2961_v1 = vadd.f32 %v2960_v0, %v12366_v4  ;;  %9746 = vmatpush3.bf16.msra.mxu0 %v10994_v49  ;;  %10411 = vmatprep.subr.bf16.mxu1 %v12590_v60 }
 0x242   : > { %v2964_v10 = vpop.f32.mrf.mxu1  ;;  %v3157_v31 = vpop.f32.mrf.mxu0  ;;  %3655 = vmatmul.mubr.bf16.gmra.mxu1 %v16035_v23  ;;  %3848 = vmatmul.mubr.bf16.gmra.mxu0 %v12297_v28 }
 0x243   : > { %16034 = vst [vmem:[#allocation104_spill] sm:$0xff] %v12595_v48  ;;  %v12601_v29 = vadd.f32 %v3153_v38, %v2961_v1  ;;  %v2965_v36 = vadd.f32 %v2964_v10, %v12357_v5  ;;  %3664 = vmatprep.mubr.bf16.mxu1 %v16037_v2  ;;  %3857 = vmatprep.mubr.bf16.mxu0 %v16003_v3  ;;  %v16040_v48 = vld [vmem:[#allocation33_spill] sm:$0xff] }
 0x244   : > { %v2966_v61 = vpop.f32.mrf.mxu1  ;;  %v3159_v15 = vpop.f32.mrf.mxu0 }
 0x245   : > { %16036 = vst [vmem:[#allocation105_spill] sm:$0xff] %v12601_v29  ;;  %v12606_v0 = vadd.f32 %v3157_v31, %v2965_v36  ;;  %v2967_v49 = vadd.f32 %v2966_v61, %v12366_v4  ;;  %v16042_v61 = vld [vmem:[#allocation39_spill] sm:$0xff] }
 0x246   : > { %v2968_v51 = vpop.f32.mrf.mxu1  ;;  %v3161_v37 = vpop.f32.mrf.mxu0 }
 0x247   : > { %v12609_v47 = vadd.f32 %v3159_v15, %v2967_v49  ;;  %v2969_v28 = vadd.f32 %v2968_v51, %v12357_v5 }
 0x248   : > { %v2970_v38 = vpop.f32.mrf.mxu1  ;;  %v3163_v1 = vpop.f32.mrf.mxu0 }
 0x249   : > { %16038 = vst [vmem:[#allocation106_spill] sm:$0xff] %v12609_v47  ;;  %v12612_v23 = vadd.f32 %v3161_v37, %v2969_v28  ;;  %v2971_v10 = vadd.f32 %v2970_v38, %v12366_v4  ;;  %v16045_v47 = vld [vmem:[#allocation37_spill] sm:$0xff] }
 0x24a   : > { %v2974_v2 = vpop.f32.mrf.mxu1  ;;  %v3167_v29 = vpop.f32.mrf.mxu0  ;;  %3665 = vmatmul.mubr.bf16.gmra.mxu1 %v16040_v48  ;;  %3858 = vmatmul.mubr.bf16.gmra.mxu0 %v12311_v42 }
 0x24b   : > { %16039 = vst [vmem:[#allocation107_spill] sm:$0xff] %v12612_v23  ;;  %v12617_v31 = vadd.f32 %v3163_v1, %v2971_v10  ;;  %v2975_v36 = vadd.f32 %v2974_v2, %v12357_v5  ;;  %3674 = vmatprep.mubr.bf16.mxu1 %v16042_v61  ;;  %3867 = vmatprep.mubr.bf16.mxu0 %v16003_v3 }
 0x24c   : > { %v2976_v15 = vpop.f32.mrf.mxu1  ;;  %v3169_v49 = vpop.f32.mrf.mxu0 }
 0x24d   : > { %16041 = vst [vmem:[#allocation108_spill] sm:$0xff] %v12617_v31  ;;  %v12622_v28 = vadd.f32 %v3167_v29, %v2975_v36  ;;  %v2977_v51 = vadd.f32 %v2976_v15, %v12366_v4  ;;  %v16047_v15 = vld [vmem:[#allocation43_spill] sm:$0xff] }
 0x24e   : > { %v2978_v37 = vpop.f32.mrf.mxu1  ;;  %v3171_v38 = vpop.f32.mrf.mxu0 }
 0x24f   : > { %v12625_v23 = vadd.f32 %v3169_v49, %v2977_v51  ;;  %v2979_v42 = vadd.f32 %v2978_v37, %v12357_v5 }
 0x250   : > { %v2980_v1 = vpop.f32.mrf.mxu1  ;;  %v3173_v10 = vpop.f32.mrf.mxu0 }
 0x251   : > { %16043 = vst [vmem:[#allocation109_spill] sm:$0xff] %v12625_v23  ;;  %v12628_v48 = vadd.f32 %v3171_v38, %v2979_v42  ;;  %v2981_v2 = vadd.f32 %v2980_v1, %v12366_v4  ;;  %v16050_v23 = vld [vmem:[#allocation41_spill] sm:$0xff] }
 0x252   : > { %v2984_v61 = vpop.f32.mrf.mxu1  ;;  %v3177_v31 = vpop.f32.mrf.mxu0  ;;  %3675 = vmatmul.mubr.bf16.gmra.mxu1 %v16045_v47  ;;  %3868 = vmatmul.mubr.bf16.gmra.mxu0 %v12329_v30 }
 0x253   : > { %16044 = vst [vmem:[#allocation110_spill] sm:$0xff] %v12628_v48  ;;  %v12633_v29 = vadd.f32 %v3173_v10, %v2981_v2  ;;  %v2985_v36 = vadd.f32 %v2984_v61, %v12357_v5  ;;  %3684 = vmatprep.mubr.bf16.mxu1 %v16047_v15  ;;  %3877 = vmatprep.mubr.bf16.mxu0 %v16003_v3 }
 0x254   : > { %v2986_v49 = vpop.f32.mrf.mxu1  ;;  %v3179_v51 = vpop.f32.mrf.mxu0 }
 0x255   : > { %16046 = vst [vmem:[#allocation111_spill] sm:$0xff] %v12633_v29  ;;  %v12638_v42 = vadd.f32 %v3177_v31, %v2985_v36  ;;  %v2987_v37 = vadd.f32 %v2986_v49, %v12366_v4  ;;  %v16052_v49 = vld [vmem:[#allocation47_spill] sm:$0xff] }
 0x256   : > { %v2988_v38 = vpop.f32.mrf.mxu1  ;;  %v3181_v1 = vpop.f32.mrf.mxu0 }
 0x257   : > { %v12641_v48 = vadd.f32 %v3179_v51, %v2987_v37  ;;  %v2989_v30 = vadd.f32 %v2988_v38, %v12357_v5 }
 0x258   : > { %v2990_v10 = vpop.f32.mrf.mxu1  ;;  %v3183_v2 = vpop.f32.mrf.mxu0 }
 0x259   : > { %16048 = vst [vmem:[#allocation112_spill] sm:$0xff] %v12641_v48  ;;  %v12644_v47 = vadd.f32 %v3181_v1, %v2989_v30  ;;  %v2991_v61 = vadd.f32 %v2990_v10, %v12366_v4 }
 0x25a   : > { %v2994_v15 = vpop.f32.mrf.mxu1  ;;  %v3187_v29 = vpop.f32.mrf.mxu0  ;;  %3685 = vmatmul.mubr.bf16.gmra.mxu1 %v16050_v23  ;;  %3878 = vmatmul.mubr.bf16.gmra.mxu0 %v12339_v46 }
 0x25b   : > { %16049 = vst [vmem:[#allocation113_spill] sm:$0xff] %v12644_v47  ;;  %v12649_v31 = vadd.f32 %v3183_v2, %v2991_v61  ;;  %v2995_v36 = vadd.f32 %v2994_v15, %v12357_v5  ;;  %3694 = vmatprep.mubr.bf16.mxu1 %v16052_v49  ;;  %3887 = vmatprep.mubr.bf16.mxu0 %v16003_v3  ;;  %v11002_v49 = vld [vmem:[#allocation4 + $0x11c] ss:$20 sps:$4 sm:$0xff]  }
 0x25c   : > { %v2996_v51 = vpop.f32.mrf.mxu1  ;;  %v3189_v37 = vpop.f32.mrf.mxu0  ;;  %5998 = vmatprep.subr.bf16.mxu0 %v11002_v49 }
 0x25d   : > { %16051 = vst [vmem:[#allocation114_spill] sm:$0xff] %v12649_v31  ;;  %v12654_v30 = vadd.f32 %v3187_v29, %v2995_v36  ;;  %v2997_v38 = vadd.f32 %v2996_v51, %v12366_v4  ;;  %v16053_v29 = vld [vmem:[#allocation45_spill] sm:$0xff] }
 0x25e   : > { %v2998_v1 = vpop.f32.mrf.mxu1  ;;  %v3191_v10 = vpop.f32.mrf.mxu0 }
 0x25f   : > { %v12657_v47 = vadd.f32 %v3189_v37, %v2997_v38  ;;  %v2999_v46 = vadd.f32 %v2998_v1, %v12357_v5  ;;  %v16054_v37 = vld [vmem:[#allocation51_spill] sm:$0xff] }
 0x260   : > { %v3000_v2 = vpop.f32.mrf.mxu1  ;;  %v3193_v61 = vpop.f32.mrf.mxu0 }
 0x261   : > { %v12660_v23 = vadd.f32 %v3191_v10, %v2999_v46  ;;  %v3001_v15 = vadd.f32 %v3000_v2, %v12366_v4 }
 0x262   : > { %v3230_v31 = vpop.f32.mrf.mxu1  ;;  %v12663_v48 = vpop.f32.mrf.mxu0  ;;  %3695 = vmatmul.mubr.bf16.gmra.mxu1 %v16053_v29  ;;  %3888 = vmatmul.mubr.bf16.gmra.mxu0 %v12363_v16  ;;  %v16056_v29 = vld [vmem:[#allocation49_spill] sm:$0xff] }
 0x263   : > { %v12667_v36 = vadd.f32 %v3193_v61, %v3001_v15  ;;  %v3231_v51 = vadd.f32 %v3230_v31, %v12373_v14  ;;  %3704 = vmatprep.mubr.bf16.mxu1 %v16054_v37  ;;  %3897 = vmatprep.mubr.bf16.mxu0 %v16003_v3 }
 0x264   : > { %v3232_v46 = vpop.f32.mrf.mxu1  ;;  %v12672_v5 = vpop.f32.mrf.mxu0 }
 0x265   : > { %v3233_v4 = vadd.f32 %v3232_v46, %v12376_v50  ;;  %v4451_v15 = vmax.f32 %v3231_v51, 0.0 }
 0x266   : > { %v3234_v38 = vpop.f32.mrf.mxu1  ;;  %v12675_v1 = vpop.f32.mrf.mxu0 }
 0x267   : > { %v3235_v10 = vadd.f32 %v3234_v38, %v12385_v35  ;;  %v4452_v50 = vmax.f32 %v3233_v4, 0.0  ;;  %v16058_v38 = vld [vmem:[#allocation55_spill] sm:$0xff] }
 0x268   : > { %v3236_v2 = vpop.f32.mrf.mxu1  ;;  %v12678_v61 = vpop.f32.mrf.mxu0 }
 0x269   : > { %v4456_v14 = vmax.f32 %v3235_v10, 0.0  ;;  %v3237_v31 = vadd.f32 %v3236_v2, %v12390_v53 }
 0x26a   : > { %v3240_v16 = vpop.f32.mrf.mxu1  ;;  %v12681_v37 = vpop.f32.mrf.mxu0  ;;  %3705 = vmatmul.mubr.bf16.gmra.mxu1 %v16056_v29  ;;  %3898 = vmatmul.mubr.bf16.gmra.mxu0 %v12379_v20 }
 0x26b   : > { %16055 = vst [vmem:[#allocation115_spill] sm:$0xff] %v12681_v37  ;;  %v12685_v49 = vpack.c.bf16 %v4456_v14, %v4451_v15  ;;  %v4457_v46 = vmax.f32 %v3237_v31, 0.0  ;;  %v3241_v35 = vadd.f32 %v3240_v16, %v12395_v8  ;;  %3714 = vmatprep.mubr.bf16.mxu1 %v16058_v38  ;;  %3907 = vmatprep.mubr.bf16.mxu0 %v16003_v3  ;;  %v16060_v38 = vld [vmem:[#allocation53_spill] sm:$0xff] }
 0x26c   : > { %v3242_v51 = vpop.f32.mrf.mxu1  ;;  %v12690_v10 = vpop.f32.mrf.mxu0 }
 0x26d   : > { %16057 = vst [vmem:[#allocation116_spill] sm:$0xff] %v12685_v49  ;;  %v3243_v53 = vadd.f32 %v3242_v51, %v12398_v18  ;;  %v12693_v2 = vpack.c.bf16 %v4457_v46, %v4452_v50  ;;  %v4461_v16 = vmax.f32 %v3241_v35, 0.0 }
 0x26e   : > { %v3244_v29 = vpop.f32.mrf.mxu1  ;;  %v12695_v37 = vpop.f32.mrf.mxu0 }
 0x26f   : > { %16059 = vst [vmem:[#allocation117_spill] sm:$0xff] %v12693_v2  ;;  %v3245_v4 = vadd.f32 %v3244_v29, %v12407_v62  ;;  %v4462_v18 = vmax.f32 %v3243_v53, 0.0  ;;  %v16062_v29 = vld [vmem:[#allocation59_spill] sm:$0xff] }
 0x270   : > { %v3246_v15 = vpop.f32.mrf.mxu1  ;;  %v12698_v14 = vpop.f32.mrf.mxu0 }
 0x271   : > { %v4466_v8 = vmax.f32 %v3245_v4, 0.0  ;;  %v3247_v31 = vadd.f32 %v3246_v15, %v12412_v39 }
 0x272   : > { %v3250_v20 = vpop.f32.mrf.mxu1  ;;  %v12701_v49 = vpop.f32.mrf.mxu0  ;;  %3715 = vmatmul.mubr.bf16.gmra.mxu1 %v16060_v38  ;;  %3908 = vmatmul.mubr.bf16.gmra.mxu0 %v12405_v33 }
 0x273   : > { %v12705_v50 = vpack.c.bf16 %v4466_v8, %v4461_v16  ;;  %v4467_v46 = vmax.f32 %v3247_v31, 0.0  ;;  %v3251_v62 = vadd.f32 %v3250_v20, %v12417_v55  ;;  %3724 = vmatprep.mubr.bf16.mxu1 %v16062_v29  ;;  %3917 = vmatprep.mubr.bf16.mxu0 %v16003_v3  ;;  %v16064_v29 = vld [vmem:[#allocation57_spill] sm:$0xff] }
 0x274   : > { %v3252_v35 = vpop.f32.mrf.mxu1  ;;  %v12710_v51 = vpop.f32.mrf.mxu0 }
 0x275   : > { %16061 = vst [vmem:[#allocation53_spill] sm:$0xff] %v12705_v50  ;;  %v3253_v39 = vadd.f32 %v3252_v35, %v12420_v52  ;;  %v12713_v4 = vpack.c.bf16 %v4467_v46, %v4462_v18  ;;  %v4471_v20 = vmax.f32 %v3251_v62, 0.0  ;;  %v16066_v35 = vld [vmem:[#allocation63_spill] sm:$0xff] }
 0x276   : > { %v3254_v15 = vpop.f32.mrf.mxu1  ;;  %v12715_v2 = vpop.f32.mrf.mxu0 }
 0x277   : > { %16063 = vst [vmem:[#allocation118_spill] sm:$0xff] %v12713_v4  ;;  %v3255_v53 = vadd.f32 %v3254_v15, %v12429_v25  ;;  %v4472_v52 = vmax.f32 %v3253_v39, 0.0 }
 0x278   : > { %v3256_v16 = vpop.f32.mrf.mxu1  ;;  %v12718_v8 = vpop.f32.mrf.mxu0 }
 0x279   : > { %v4476_v55 = vmax.f32 %v3255_v53, 0.0  ;;  %v3257_v31 = vadd.f32 %v3256_v16, %v12434_v56 }
 0x27a   : > { %v3260_v33 = vpop.f32.mrf.mxu1  ;;  %v12721_v50 = vpop.f32.mrf.mxu0  ;;  %3725 = vmatmul.mubr.bf16.gmra.mxu1 %v16064_v29  ;;  %3918 = vmatmul.mubr.bf16.gmra.mxu0 %v12423_v34 }
 0x27b   : > { %v12725_v18 = vpack.c.bf16 %v4476_v55, %v4471_v20  ;;  %v4477_v46 = vmax.f32 %v3257_v31, 0.0  ;;  %v3261_v25 = vadd.f32 %v3260_v33, %v12439_v54  ;;  %3734 = vmatprep.mubr.bf16.mxu1 %v16066_v35  ;;  %3927 = vmatprep.mubr.bf16.mxu0 %v16003_v3  ;;  %v16068_v35 = vld [vmem:[#allocation61_spill] sm:$0xff] }
 0x27c   : > { %v3262_v62 = vpop.f32.mrf.mxu1  ;;  %v12730_v15 = vpop.f32.mrf.mxu0 }
 0x27d   : > { %16065 = vst [vmem:[#allocation57_spill] sm:$0xff] %v12725_v18  ;;  %v3263_v56 = vadd.f32 %v3262_v62, %v12442_v9  ;;  %v12733_v53 = vpack.c.bf16 %v4477_v46, %v4472_v52  ;;  %v4481_v33 = vmax.f32 %v3261_v25, 0.0  ;;  %v16069_v9 = vld [vmem:[#allocation90_spill] sm:$0xff] }
 0x27e   : > { %v3264_v16 = vpop.f32.mrf.mxu1  ;;  %v12735_v4 = vpop.f32.mrf.mxu0 }
 0x27f   : > { %16067 = vst [vmem:[#allocation119_spill] sm:$0xff] %v12733_v53  ;;  %v3265_v39 = vadd.f32 %v3264_v16, %v12451_v45  ;;  %v4482_v52 = vmax.f32 %v3263_v56, 0.0  ;;  %v16071_v16 = vld [vmem:[#allocation67_spill] sm:$0xff] }
 0x280   : > { %v3266_v20 = vpop.f32.mrf.mxu1  ;;  %v12738_v55 = vpop.f32.mrf.mxu0 }
 0x281   : > { %v4486_v54 = vmax.f32 %v3265_v39, 0.0  ;;  %v3267_v31 = vadd.f32 %v3266_v20, %v12456_v17 }
 0x282   : > { %v3270_v34 = vpop.f32.mrf.mxu1  ;;  %v12741_v18 = vpop.f32.mrf.mxu0  ;;  %3735 = vmatmul.mubr.bf16.gmra.mxu1 %v16068_v35  ;;  %3928 = vmatmul.mubr.bf16.gmra.mxu0 %v16069_v9 }
 0x283   : > { %v12745_v46 = vpack.c.bf16 %v4486_v54, %v4481_v33  ;;  %v4487_v62 = vmax.f32 %v3267_v31, 0.0  ;;  %v3271_v45 = vadd.f32 %v3270_v34, %v12461_v59  ;;  %3744 = vmatprep.mubr.bf16.mxu1 %v16071_v16  ;;  %3937 = vmatprep.mubr.bf16.mxu0 %v16003_v3  ;;  %v16073_v16 = vld [vmem:[#allocation65_spill] sm:$0xff] }
 0x284   : > { %v3272_v25 = vpop.f32.mrf.mxu1  ;;  %v12750_v39 = vpop.f32.mrf.mxu0 }
 0x285   : > { %16070 = vst [vmem:[#allocation120_spill] sm:$0xff] %v12745_v46  ;;  %v3273_v17 = vadd.f32 %v3272_v25, %v12464_v63  ;;  %v12753_v20 = vpack.c.bf16 %v4487_v62, %v4482_v52  ;;  %v4491_v34 = vmax.f32 %v3271_v45, 0.0  ;;  %v16074_v63 = vld [vmem:[#allocation91_spill] sm:$0xff] }
 0x286   : > { %v3274_v53 = vpop.f32.mrf.mxu1  ;;  %v12755_v35 = vpop.f32.mrf.mxu0 }
 0x287   : > { %16072 = vst [vmem:[#allocation121_spill] sm:$0xff] %v12753_v20  ;;  %v3275_v56 = vadd.f32 %v3274_v53, %v12473_v21  ;;  %v4492_v52 = vmax.f32 %v3273_v17, 0.0  ;;  %v16076_v53 = vld [vmem:[#allocation71_spill] sm:$0xff] }
 0x288   : > { %v3276_v33 = vpop.f32.mrf.mxu1  ;;  %v12758_v54 = vpop.f32.mrf.mxu0 }
 0x289   : > { %v4496_v59 = vmax.f32 %v3275_v56, 0.0  ;;  %v3277_v31 = vadd.f32 %v3276_v33, %v12478_v12 }
 0x28a   : > { %v3280_v9 = vpop.f32.mrf.mxu1  ;;  %v12761_v46 = vpop.f32.mrf.mxu0  ;;  %3745 = vmatmul.mubr.bf16.gmra.mxu1 %v16073_v16  ;;  %3938 = vmatmul.mubr.bf16.gmra.mxu0 %v16074_v63 }
 0x28b   : > { %v12765_v62 = vpack.c.bf16 %v4496_v59, %v4491_v34  ;;  %v4497_v25 = vmax.f32 %v3277_v31, 0.0  ;;  %v3281_v21 = vadd.f32 %v3280_v9, %v12483_v58  ;;  %3754 = vmatprep.mubr.bf16.mxu1 %v16076_v53  ;;  %3947 = vmatprep.mubr.bf16.mxu0 %v16003_v3  ;;  %v16078_v53 = vld [vmem:[#allocation69_spill] sm:$0xff] }
 0x28c   : > { %v3282_v45 = vpop.f32.mrf.mxu1  ;;  %v12770_v56 = vpop.f32.mrf.mxu0 }
 0x28d   : > { %16075 = vst [vmem:[#allocation122_spill] sm:$0xff] %v12765_v62  ;;  %v3283_v12 = vadd.f32 %v3282_v45, %v12486_v19  ;;  %v12773_v33 = vpack.c.bf16 %v4497_v25, %v4492_v52  ;;  %v4501_v58 = vmax.f32 %v3281_v21, 0.0  ;;  %v16079_v19 = vld [vmem:[#allocation92_spill] sm:$0xff] }
 0x28e   : > { %v3284_v20 = vpop.f32.mrf.mxu1  ;;  %v12775_v16 = vpop.f32.mrf.mxu0 }
 0x28f   : > { %16077 = vst [vmem:[#allocation123_spill] sm:$0xff] %v12773_v33  ;;  %v3285_v17 = vadd.f32 %v3284_v20, %v12495_v26  ;;  %v4502_v52 = vmax.f32 %v3283_v12, 0.0  ;;  %v16081_v20 = vld [vmem:[#allocation76_spill] sm:$0xff] }
 0x290   : > { %v3286_v34 = vpop.f32.mrf.mxu1  ;;  %v12778_v59 = vpop.f32.mrf.mxu0 }
 0x291   : > { %v4506_v9 = vmax.f32 %v3285_v17, 0.0  ;;  %v3287_v31 = vadd.f32 %v3286_v34, %v12500_v6 }
 0x292   : > { %v3290_v63 = vpop.f32.mrf.mxu1  ;;  %v12781_v62 = vpop.f32.mrf.mxu0  ;;  %3755 = vmatmul.mubr.bf16.gmra.mxu1 %v16078_v53  ;;  %3948 = vmatmul.mubr.bf16.gmra.mxu0 %v16079_v19 }
 0x293   : > { %v12785_v25 = vpack.c.bf16 %v4506_v9, %v4501_v58  ;;  %v4507_v45 = vmax.f32 %v3287_v31, 0.0  ;;  %v3291_v26 = vadd.f32 %v3290_v63, %v12505_v57  ;;  %3764 = vmatprep.mubr.bf16.mxu1 %v16081_v20  ;;  %3957 = vmatprep.mubr.bf16.mxu0 %v16003_v3  ;;  %v16085_v31 = vld [vmem:[#allocation94_spill] sm:$0xff] }
 0x294   : > { %v3292_v21 = vpop.f32.mrf.mxu1  ;;  %v12790_v17 = vpop.f32.mrf.mxu0  ;;  %v16087_v20 = vld [vmem:[#allocation74_spill] sm:$0xff] }
 0x295   : > { %16080 = vst [vmem:[#allocation124_spill] sm:$0xff] %v12785_v25  ;;  %v3293_v6 = vadd.f32 %v3292_v21, %v12508_v41  ;;  %v12793_v34 = vpack.c.bf16 %v4507_v45, %v4502_v52  ;;  %v4511_v57 = vmax.f32 %v3291_v26, 0.0  ;;  %v16088_v41 = vld [vmem:[#allocation93_spill] sm:$0xff] }
 0x296   : > { %v3294_v33 = vpop.f32.mrf.mxu1  ;;  %v12795_v53 = vpop.f32.mrf.mxu0 }
 0x297   : > { %16082 = vst [vmem:[#allocation125_spill] sm:$0xff] %v12793_v34  ;;  %16083 = vst [vmem:[#allocation126_spill] sm:$0xff] %v12795_v53  ;;  %v3295_v12 = vadd.f32 %v3294_v33, %v12513_v43  ;;  %v4512_v52 = vmax.f32 %v3293_v6, 0.0  ;;  %v16090_v33 = vld [vmem:[#allocation14_spill] sm:$0xff]  ;;  %v16091_v34 = vld [vmem:[#allocation15_spill] sm:$0xff] }
 0x298   : > { %v3296_v58 = vpop.f32.mrf.mxu1  ;;  %v12798_v9 = vpop.f32.mrf.mxu0  ;;  %v16095_v6 = vld [vmem:[#allocation96_spill] sm:$0xff] }
 0x299   : > { %16084 = vst [vmem:[#allocation127_spill] sm:$0xff] %v12798_v9  ;;  %v4516_v63 = vmax.f32 %v3295_v12, 0.0  ;;  %v3297_v19 = vadd.f32 %v3296_v58, %v16085_v31  ;;  %v16093_v58 = vld [vmem:[#allocation95_spill] sm:$0xff] }
 0x29a   : > { %v3300_v3 = vpop.f32.mrf.mxu1  ;;  %v12801_v25 = vpop.f32.mrf.mxu0  ;;  %3765 = vmatmul.mubr.bf16.gmra.mxu1 %v16087_v20  ;;  %3958 = vmatmul.mubr.bf16.gmra.mxu0 %v16088_v41  ;;  %v16097_v41 = vld [vmem:[#allocation97_spill] sm:$0xff] }
 0x29b   : > { %16086 = vst [vmem:[#allocation94_spill] sm:$0xff] %v12801_v25  ;;  %v12805_v45 = vpack.c.bf16 %v4516_v63, %v4511_v57  ;;  %v4517_v21 = vmax.f32 %v3297_v19, 0.0  ;;  %v3301_v43 = vadd.f32 %v3300_v3, %v12523_v32  ;;  %4000 = vmatprep.mubr.bf16.mxu1 %v16090_v33  ;;  %4161 = vmatprep.mubr.bf16.mxu0 %v16091_v34  ;;  %v10996_v3 = vld [vmem:[#allocation2 + $0x600] ss:$20 sps:$4 sm:$0xff]  }
 0x29c   : > { %v3302_v26 = vpop.f32.mrf.mxu1  ;;  %v12810_v12 = vpop.f32.mrf.mxu0 }
 0x29d   : > { %16089 = vst [vmem:[#allocation128_spill] sm:$0xff] %v12805_v45  ;;  %16092 = vst [vmem:[#allocation14_spill] sm:$0xff] %v12810_v12  ;;  %v3303_v31 = vadd.f32 %v3302_v26, %v16093_v58  ;;  %v12813_v25 = vpack.c.bf16 %v4517_v21, %v4512_v52  ;;  %v4521_v32 = vmax.f32 %v3301_v43, 0.0  ;;  %v11000_v45 = vld [vmem:[#allocation4 + $0x118] ss:$20 sps:$4 sm:$0xff]   ;;  %v16099_v52 = vld [vmem:[#allocation13_spill] sm:$0xff] }
 0x29e   : > { %v3304_v20 = vpop.f32.mrf.mxu1  ;;  %v12815_v9 = vpop.f32.mrf.mxu0  ;;  %v16098_v26 = vld [vmem:[#allocation16_spill] sm:$0xff]  ;;  %v11005_v21 = vld [vmem:[#allocation4 + $0xf4] ss:$20 sps:$4 sm:$0xff]  }
 0x29f   : > { %16094 = vst [vmem:[#allocation15_spill] sm:$0xff] %v12813_v25  ;;  %v3305_v57 = vadd.f32 %v3304_v20, %v16095_v6  ;;  %v4522_v58 = vmax.f32 %v3303_v31, 0.0  ;;  %v16101_v6 = vld [vmem:[#allocation98_spill] sm:$0xff]  ;;  %v11003_v31 = vld [vmem:[#allocation4 + $0xf0] ss:$20 sps:$4 sm:$0xff]  }
 0x2a0   : > { %v3306_v63 = vpop.f32.mrf.mxu1  ;;  %v12818_v19 = vpop.f32.mrf.mxu0  ;;  %v16102_v43 = vld [vmem:[#allocation18_spill] sm:$0xff] }
 0x2a1   : > { %16096 = vst [vmem:[#allocation95_spill] sm:$0xff] %v12818_v19  ;;  %v4526_v33 = vmax.f32 %v3305_v57, 0.0  ;;  %v3307_v34 = vadd.f32 %v3306_v63, %v16097_v41  ;;  %v16103_v41 = vld [vmem:[#allocation19_spill] sm:$0xff] }
 0x2a2   : > { %v3310_v53 = vpop.f32.mrf.mxu1  ;;  %v12821_v12 = vpop.f32.mrf.mxu0  ;;  %4001 = vmatmul.mubr.bf16.vlgmr.msra.gmra.mxu1 %v16098_v26  ;;  %4162 = vmatmul.mubr.bf16.vlgmr.msra.gmra.mxu0 %v16099_v52  ;;  %v10997_v26 = vld [vmem:[#allocation2 + $0x5d8] ss:$20 sps:$4 sm:$0xff]  }
 0x2a3   : > { %v12825_v25 = vpack.c.bf16 %v4526_v33, %v4521_v32  ;;  %v4527_v20 = vmax.f32 %v3307_v34, 0.0  ;;  %v3311_v19 = vadd.f32 %v3310_v53, %v16101_v6  ;;  %10412 = vmatpush3.bf16.msra.mxu1 %v12590_v60  ;;  %4008 = vmatprep.mubr.bf16.mxu1 %v16102_v43  ;;  %v11008_v43 = vld [vmem:[#allocation4 + $0xcc] ss:$20 sps:$4 sm:$0xff]  }
 0x2a4   : > { %4169 = vmatprep.mubr.bf16.mxu0 %v16103_v41  ;;  %v3312_v57 = vpop.f32.mrf.mxu1  ;;  %v12831_v63 = vpop.f32.mrf.mxu0  ;;  %10413 = vmatprep.subr.bf16.mxu1 %v10996_v3 }
 0x2a5   : > { %16100 = vst [vmem:[#allocation96_spill] sm:$0xff] %v12825_v25  ;;  %v3313_v52 = vadd.f32 %v3312_v57, %v12542_v24  ;;  %5999 = vmatpush1.bf16.msra.mxu0 %v11000_v45  ;;  %v12834_v32 = vpack.c.bf16 %v4527_v20, %v4522_v58  ;;  %v4531_v41 = vmax.f32 %v3311_v19, 0.0  ;;  %v10998_v45 = vld [vmem:[#allocation2 + $0x5b0] ss:$20 sps:$4 sm:$0xff]   ;;  %v11006_v58 = vld [vmem:[#allocation4 + $0xc8] ss:$20 sps:$4 sm:$0xff]  }
 0x2a6   : > { %v3314_v33 = vpop.f32.mrf.mxu1  ;;  %v12836_v34 = vpop.f32.mrf.mxu0  ;;  %6000 = vmatprep.subr.bf16.mxu0 %v11005_v21  ;;  %v16108_v21 = vld [vmem:[#allocation17_spill] sm:$0xff] }
 0x2a7   : > { %16104 = vst [vmem:[#allocation97_spill] sm:$0xff] %v12834_v32  ;;  %16105 = vst [vmem:[#allocation16_spill] sm:$0xff] %v12836_v34  ;;  %v3315_v60 = vadd.f32 %v3314_v33, %v12545_v11  ;;  %10414 = vmatpush3.bf16.msra.mxu1 %v10996_v3  ;;  %v16107_v32 = vld [vmem:[#allocation20_spill] sm:$0xff]  ;;  %v4532_v3 = vmax.f32 %v3313_v52, 0.0  ;;  %v16110_v34 = vld [vmem:[#allocation99_spill] sm:$0xff] }
 0x2a8   : > { %v3316_v53 = vpop.f32.mrf.mxu1  ;;  %v12839_v6 = vpop.f32.mrf.mxu0  ;;  %10415 = vmatprep.subr.bf16.mxu1 %v10997_v26  ;;  %v11011_v11 = vld [vmem:[#allocation4 + $0xa4] ss:$20 sps:$4 sm:$0xff]   ;;  %v11009_v52 = vld [vmem:[#allocation4 + $0xa0] ss:$20 sps:$4 sm:$0xff]  }
 0x2a9   : > { %16106 = vst [vmem:[#allocation13_spill] sm:$0xff] %v12839_v6  ;;  %v4536_v25 = vmax.f32 %v3315_v60, 0.0  ;;  %v3317_v24 = vadd.f32 %v3316_v53, %v12550_v7  ;;  %6001 = vmatpush1.bf16.msra.mxu0 %v11003_v31  ;;  %v16111_v60 = vld [vmem:[#allocation22_spill] sm:$0xff]  ;;  %v16112_v7 = vld [vmem:[#allocation23_spill] sm:$0xff] }
 0x2aa   : > { %v3320_v20 = vpop.f32.mrf.mxu1  ;;  %v12842_v57 = vpop.f32.mrf.mxu0  ;;  %4009 = vmatmul.mubr.bf16.gmra.mxu1 %v16107_v32  ;;  %4170 = vmatmul.mubr.bf16.gmra.mxu0 %v16108_v21  ;;  %v10999_v21 = vld [vmem:[#allocation2 + $0x588] ss:$20 sps:$4 sm:$0xff]  }
 0x2ab   : > { %v12846_v33 = vpack.c.bf16 %v4536_v25, %v4531_v41  ;;  %v4537_v6 = vmax.f32 %v3317_v24, 0.0  ;;  %v3321_v19 = vadd.f32 %v3320_v20, %v16110_v34  ;;  %4016 = vmatprep.mubr.bf16.mxu1 %v16111_v60  ;;  %4177 = vmatprep.mubr.bf16.mxu0 %v16112_v7  ;;  %v16116_v34 = vld [vmem:[#allocation100_spill] sm:$0xff] }
 0x2ac   : > { %v3322_v31 = vpop.f32.mrf.mxu1  ;;  %v12851_v53 = vpop.f32.mrf.mxu0  ;;  %10416 = vmatpush3.bf16.msra.mxu1 %v10997_v26  ;;  %6002 = vmatprep.subr.bf16.mxu0 %v11008_v43  ;;  %v11015_v26 = vld [vmem:[#allocation4 + $0x7c] ss:$20 sps:$4 sm:$0xff]  }
 0x2ad   : > { %16109 = vst [vmem:[#allocation98_spill] sm:$0xff] %v12846_v33  ;;  %16113 = vst [vmem:[#allocation18_spill] sm:$0xff] %v12851_v53  ;;  %v3323_v32 = vadd.f32 %v3322_v31, %v12558_v22  ;;  %10417 = vmatprep.subr.bf16.mxu1 %v10998_v45  ;;  %6003 = vmatpush1.bf16.msra.mxu0 %v11006_v58  ;;  %v12854_v25 = vpack.c.bf16 %v4537_v6, %v4532_v3  ;;  %v4541_v43 = vmax.f32 %v3321_v19, 0.0  ;;  %v16118_v22 = vld [vmem:[#allocation101_spill] sm:$0xff]  ;;  %v11013_v6 = vld [vmem:[#allocation4 + $0x78] ss:$20 sps:$4 sm:$0xff]  }
 0x2ae   : > { %v3324_v41 = vpop.f32.mrf.mxu1  ;;  %v12856_v24 = vpop.f32.mrf.mxu0  ;;  %6004 = vmatprep.subr.bf16.mxu0 %v11011_v11  ;;  %v11012_v58 = vld [vmem:[#allocation2 + $0x560] ss:$20 sps:$4 sm:$0xff]   ;;  %v16122_v19 = vld [vmem:[#allocation102_spill] sm:$0xff] }
 0x2af   : > { %16114 = vst [vmem:[#allocation19_spill] sm:$0xff] %v12854_v25  ;;  %16115 = vst [vmem:[#allocation20_spill] sm:$0xff] %v12856_v24  ;;  %v3325_v20 = vadd.f32 %v3324_v41, %v16116_v34  ;;  %v16119_v24 = vld [vmem:[#allocation24_spill] sm:$0xff]  ;;  %v16120_v11 = vld [vmem:[#allocation21_spill] sm:$0xff]  ;;  %v4542_v34 = vmax.f32 %v3323_v32, 0.0 }
 0x2b0   : > { %v3326_v60 = vpop.f32.mrf.mxu1  ;;  %v12859_v7 = vpop.f32.mrf.mxu0  ;;  %10418 = vmatpush3.bf16.msra.mxu1 %v10998_v45  ;;  %v11018_v41 = vld [vmem:[#allocation4 + $0x54] ss:$20 sps:$4 sm:$0xff]   ;;  %v11025_v32 = vld [vmem:[#allocation2 + $0x538] ss:$20 sps:$4 sm:$0xff]  }
 0x2b1   : > { %16117 = vst [vmem:[#allocation17_spill] sm:$0xff] %v12859_v7  ;;  %v4546_v33 = vmax.f32 %v3325_v20, 0.0  ;;  %v3327_v31 = vadd.f32 %v3326_v60, %v16118_v22  ;;  %10419 = vmatprep.subr.bf16.mxu1 %v10999_v21  ;;  %6005 = vmatpush1.bf16.msra.mxu0 %v11009_v52  ;;  %v16123_v53 = vld [vmem:[#allocation26_spill] sm:$0xff]  ;;  %v16124_v60 = vld [vmem:[#allocation27_spill] sm:$0xff] }
 0x2b2   : > { %v3330_v3 = vpop.f32.mrf.mxu1  ;;  %v12862_v25 = vpop.f32.mrf.mxu0  ;;  %4017 = vmatmul.mubr.bf16.gmra.mxu1 %v16119_v24  ;;  %4178 = vmatmul.mubr.bf16.gmra.mxu0 %v16120_v11  ;;  %v11016_v11 = vld [vmem:[#allocation4 + $0x50] ss:$20 sps:$4 sm:$0xff]  }
 0x2b3   : > { %v12866_v7 = vpack.c.bf16 %v4546_v33, %v4541_v43  ;;  %v4547_v45 = vmax.f32 %v3327_v31, 0.0  ;;  %v3331_v20 = vadd.f32 %v3330_v3, %v16122_v19  ;;  %4024 = vmatprep.mubr.bf16.mxu1 %v16123_v53  ;;  %4185 = vmatprep.mubr.bf16.mxu0 %v16124_v60 }
 0x2b4   : > { %v3332_v52 = vpop.f32.mrf.mxu1  ;;  %v12871_v22 = vpop.f32.mrf.mxu0  ;;  %10420 = vmatpush3.bf16.msra.mxu1 %v10999_v21  ;;  %6006 = vmatprep.subr.bf16.mxu0 %v11015_v26  ;;  %v11021_v21 = vld [vmem:[#allocation4 + $0x2c] ss:$20 sps:$4 sm:$0xff]  }
 0x2b5   : > { %16121 = vst [vmem:[#allocation99_spill] sm:$0xff] %v12866_v7  ;;  %v3333_v24 = vadd.f32 %v3332_v52, %v12574_v40  ;;  %10421 = vmatprep.subr.bf16.mxu1 %v11012_v58  ;;  %6007 = vmatpush1.bf16.msra.mxu0 %v11013_v6  ;;  %v12874_v33 = vpack.c.bf16 %v4547_v45, %v4542_v34  ;;  %v4551_v26 = vmax.f32 %v3331_v20, 0.0  ;;  %v16127_v40 = vld [vmem:[#allocation103_spill] sm:$0xff]  ;;  %v11019_v6 = vld [vmem:[#allocation4 + $0x28] ss:$20 sps:$4 sm:$0xff]  }
 0x2b6   : > { %v3334_v43 = vpop.f32.mrf.mxu1  ;;  %v12876_v31 = vpop.f32.mrf.mxu0  ;;  %6008 = vmatprep.subr.bf16.mxu0 %v11018_v41  ;;  %v11038_v34 = vld [vmem:[#allocation2 + $0x510] ss:$20 sps:$4 sm:$0xff]  }
 0x2b7   : > { %16125 = vst [vmem:[#allocation22_spill] sm:$0xff] %v12874_v33  ;;  %v3335_v53 = vadd.f32 %v3334_v43, %v12577_v27  ;;  %v16128_v33 = vld [vmem:[#allocation28_spill] sm:$0xff]  ;;  %v16129_v41 = vld [vmem:[#allocation25_spill] sm:$0xff]  ;;  %v4552_v43 = vmax.f32 %v3333_v24, 0.0 }
 0x2b8   : > { %v3336_v3 = vpop.f32.mrf.mxu1  ;;  %v12879_v19 = vpop.f32.mrf.mxu0  ;;  %10422 = vmatpush3.bf16.msra.mxu1 %v11012_v58  ;;  %v11024_v27 = vld [vmem:[#allocation4 + $0x4] ss:$20 sps:$4 sm:$0xff]   ;;  %v11053_v24 = vld [vmem:[#allocation4 + $0x39c] ss:$20 sps:$4 sm:$0xff]  }
 0x2b9   : > { %16126 = vst [vmem:[#allocation23_spill] sm:$0xff] %v12879_v19  ;;  %v4556_v60 = vmax.f32 %v3335_v53, 0.0  ;;  %v3337_v52 = vadd.f32 %v3336_v3, %v16127_v40  ;;  %6009 = vmatpush1.bf16.msra.mxu0 %v11016_v11  ;;  %10423 = vmatprep.subr.bf16.mxu1 %v11025_v32  ;;  %v16131_v53 = vld [vmem:[#allocation30_spill] sm:$0xff]  ;;  %v16132_v11 = vld [vmem:[#allocation31_spill] sm:$0xff] }
 0x2ba   : > { %v3340_v45 = vpop.f32.mrf.mxu1  ;;  %v12882_v7 = vpop.f32.mrf.mxu0  ;;  %4025 = vmatmul.mubr.bf16.gmra.mxu1 %v16128_v33  ;;  %4186 = vmatmul.mubr.bf16.gmra.mxu0 %v16129_v41  ;;  %v11022_v41 = vld [vmem:[#allocation4] ss:$20 sps:$4 sm:$0xff]  }
 0x2bb   : > { %v12886_v19 = vpack.c.bf16 %v4556_v60, %v4551_v26  ;;  %v4557_v58 = vmax.f32 %v3337_v52, 0.0  ;;  %v3341_v20 = vadd.f32 %v3340_v45, %v12587_v44  ;;  %4032 = vmatprep.mubr.bf16.mxu1 %v16131_v53  ;;  %4193 = vmatprep.mubr.bf16.mxu0 %v16132_v11  ;;  %v16135_v44 = vld [vmem:[#allocation104_spill] sm:$0xff] }
 0x2bc   : > { %v3342_v3 = vpop.f32.mrf.mxu1  ;;  %v12891_v40 = vpop.f32.mrf.mxu0  ;;  %6010 = vmatprep.subr.bf16.mxu0 %v11021_v21  ;;  %10424 = vmatpush3.bf16.msra.mxu1 %v11025_v32 }
 0x2bd   : > { %16130 = vst [vmem:[#allocation100_spill] sm:$0xff] %v12886_v19  ;;  %v3343_v33 = vadd.f32 %v3342_v3, %v12592_v13  ;;  %6011 = vmatpush1.bf16.msra.mxu0 %v11019_v6  ;;  %10425 = vmatprep.subr.bf16.mxu1 %v11038_v34  ;;  %v12894_v26 = vpack.c.bf16 %v4557_v58, %v4552_v43  ;;  %v11028_v19 = vld [vmem:[#allocation4 + $0x25c] ss:$20 sps:$4 sm:$0xff]   ;;  %v4561_v32 = vmax.f32 %v3341_v20, 0.0  ;;  %v16137_v13 = vld [vmem:[#allocation105_spill] sm:$0xff]  ;;  %v16141_v20 = vld [vmem:[#allocation34_spill] sm:$0xff] }
 0x2be   : > { %v3344_v60 = vpop.f32.mrf.mxu1  ;;  %v12896_v52 = vpop.f32.mrf.mxu0  ;;  %6012 = vmatprep.subr.bf16.mxu0 %v11024_v27  ;;  %v11026_v3 = vld [vmem:[#allocation4 + $0x258] ss:$20 sps:$4 sm:$0xff]   ;;  %v16139_v27 = vld [vmem:[#allocation29_spill] sm:$0xff] }
 0x2bf   : > { %16133 = vst [vmem:[#allocation101_spill] sm:$0xff] %v12894_v26  ;;  %16134 = vst [vmem:[#allocation24_spill] sm:$0xff] %v12896_v52  ;;  %v3345_v45 = vadd.f32 %v3344_v60, %v16135_v44  ;;  %v16138_v26 = vld [vmem:[#allocation32_spill] sm:$0xff]  ;;  %v11031_v60 = vld [vmem:[#allocation4 + $0x234] ss:$20 sps:$4 sm:$0xff]   ;;  %v4562_v44 = vmax.f32 %v3343_v33, 0.0 }
 0x2c0   : > { %v3346_v53 = vpop.f32.mrf.mxu1  ;;  %v12899_v11 = vpop.f32.mrf.mxu0  ;;  %10426 = vmatpush3.bf16.msra.mxu1 %v11038_v34 }
 0x2c1   : > { %16136 = vst [vmem:[#allocation21_spill] sm:$0xff] %v12899_v11  ;;  %v4566_v21 = vmax.f32 %v3345_v45, 0.0  ;;  %v3347_v6 = vadd.f32 %v3346_v53, %v16137_v13  ;;  %6013 = vmatpush1.bf16.msra.mxu0 %v11022_v41  ;;  %6191 = vmatprep.subr.bf16.mxu1 %v11053_v24  ;;  %v16142_v45 = vld [vmem:[#allocation35_spill] sm:$0xff]  ;;  %v16144_v53 = vld [vmem:[#allocation106_spill] sm:$0xff] }
 0x2c2   : > { %v3350_v43 = vpop.f32.mrf.mxu1  ;;  %v12902_v58 = vpop.f32.mrf.mxu0  ;;  %4033 = vmatmul.mubr.bf16.gmra.mxu1 %v16138_v26  ;;  %4194 = vmatmul.mubr.bf16.gmra.mxu0 %v16139_v27  ;;  %v11029_v26 = vld [vmem:[#allocation4 + $0x230] ss:$20 sps:$4 sm:$0xff]  }
 0x2c3   : > { %v12906_v52 = vpack.c.bf16 %v4566_v21, %v4561_v32  ;;  %v4567_v11 = vmax.f32 %v3347_v6, 0.0  ;;  %v3351_v34 = vadd.f32 %v3350_v43, %v12606_v0  ;;  %4040 = vmatprep.mubr.bf16.mxu1 %v16141_v20  ;;  %4201 = vmatprep.mubr.bf16.mxu0 %v16142_v45  ;;  %v16146_v21 = vld [vmem:[#allocation107_spill] sm:$0xff]  ;;  %v11034_v20 = vld [vmem:[#allocation4 + $0x20c] ss:$20 sps:$4 sm:$0xff]  }
 0x2c4   : > { %v3352_v41 = vpop.f32.mrf.mxu1  ;;  %v12911_v24 = vpop.f32.mrf.mxu0  ;;  %6014 = vmatprep.subr.bf16.mxu0 %v11028_v19 }
 0x2c5   : > { %16140 = vst [vmem:[#allocation102_spill] sm:$0xff] %v12906_v52  ;;  %16143 = vst [vmem:[#allocation26_spill] sm:$0xff] %v12911_v24  ;;  %v3353_v13 = vadd.f32 %v3352_v41, %v16144_v53  ;;  %6015 = vmatpush2.bf16.msra.mxu0 %v11026_v3  ;;  %v12914_v27 = vpack.c.bf16 %v4567_v11, %v4562_v44  ;;  %v4571_v45 = vmax.f32 %v3351_v34, 0.0  ;;  %v16148_v24 = vld [vmem:[#allocation108_spill] sm:$0xff]  ;;  %v16151_v44 = vld [vmem:[#allocation33_spill] sm:$0xff] }
 0x2c6   : > { %v3354_v33 = vpop.f32.mrf.mxu1  ;;  %v12916_v32 = vpop.f32.mrf.mxu0  ;;  %6016 = vmatprep.subr.bf16.mxu0 %v11031_v60  ;;  %v11032_v41 = vld [vmem:[#allocation4 + $0x208] ss:$20 sps:$4 sm:$0xff]   ;;  %v11037_v60 = vld [vmem:[#allocation4 + $0x1e4] ss:$20 sps:$4 sm:$0xff]  }
 0x2c7   : > { %16145 = vst [vmem:[#allocation27_spill] sm:$0xff] %v12914_v27  ;;  %v3355_v0 = vadd.f32 %v3354_v33, %v16146_v21  ;;  %v16150_v11 = vld [vmem:[#allocation36_spill] sm:$0xff]  ;;  %v4572_v27 = vmax.f32 %v3353_v13, 0.0  ;;  %v16153_v34 = vld [vmem:[#allocation38_spill] sm:$0xff] }
 0x2c8   : > { %v3356_v6 = vpop.f32.mrf.mxu1  ;;  %v12919_v43 = vpop.f32.mrf.mxu0 }
 0x2c9   : > { %16147 = vst [vmem:[#allocation103_spill] sm:$0xff] %v12919_v43  ;;  %v4576_v52 = vmax.f32 %v3355_v0, 0.0  ;;  %v3357_v19 = vadd.f32 %v3356_v6, %v16148_v24  ;;  %6017 = vmatpush2.bf16.msra.mxu0 %v11029_v26  ;;  %v16154_v0 = vld [vmem:[#allocation39_spill] sm:$0xff]  ;;  %v16156_v6 = vld [vmem:[#allocation109_spill] sm:$0xff] }
 0x2ca   : > { %v3360_v3 = vpop.f32.mrf.mxu1  ;;  %v12922_v53 = vpop.f32.mrf.mxu0  ;;  %4041 = vmatmul.mubr.bf16.gmra.mxu1 %v16150_v11  ;;  %4202 = vmatmul.mubr.bf16.gmra.mxu0 %v16151_v44  ;;  %v11035_v11 = vld [vmem:[#allocation4 + $0x1e0] ss:$20 sps:$4 sm:$0xff]  }
 0x2cb   : > { %16149 = vst [vmem:[#allocation28_spill] sm:$0xff] %v12922_v53  ;;  %v12926_v33 = vpack.c.bf16 %v4576_v52, %v4571_v45  ;;  %v4577_v21 = vmax.f32 %v3357_v19, 0.0  ;;  %v3361_v43 = vadd.f32 %v3360_v3, %v12622_v28  ;;  %4048 = vmatprep.mubr.bf16.mxu1 %v16153_v34  ;;  %4209 = vmatprep.mubr.bf16.mxu0 %v16154_v0  ;;  %v16158_v45 = vld [vmem:[#allocation110_spill] sm:$0xff]  ;;  %v11041_v34 = vld [vmem:[#allocation4 + $0x1bc] ss:$20 sps:$4 sm:$0xff]  }
 0x2cc   : > { %v3362_v24 = vpop.f32.mrf.mxu1  ;;  %v12931_v26 = vpop.f32.mrf.mxu0  ;;  %6018 = vmatprep.subr.bf16.mxu0 %v11034_v20 }
 0x2cd   : > { %16152 = vst [vmem:[#allocation25_spill] sm:$0xff] %v12926_v33  ;;  %16155 = vst [vmem:[#allocation30_spill] sm:$0xff] %v12931_v26  ;;  %v3363_v53 = vadd.f32 %v3362_v24, %v16156_v6  ;;  %6019 = vmatpush2.bf16.msra.mxu0 %v11032_v41  ;;  %v12934_v44 = vpack.c.bf16 %v4577_v21, %v4572_v27  ;;  %v4581_v0 = vmax.f32 %v3361_v43, 0.0  ;;  %v16160_v26 = vld [vmem:[#allocation111_spill] sm:$0xff]  ;;  %v11039_v24 = vld [vmem:[#allocation4 + $0x1b8] ss:$20 sps:$4 sm:$0xff]  }
 0x2ce   : > { %v3364_v13 = vpop.f32.mrf.mxu1  ;;  %v12936_v52 = vpop.f32.mrf.mxu0  ;;  %6020 = vmatprep.subr.bf16.mxu0 %v11037_v60  ;;  %v16162_v27 = vld [vmem:[#allocation40_spill] sm:$0xff]  ;;  %v16163_v21 = vld [vmem:[#allocation37_spill] sm:$0xff]  ;;  %v11044_v60 = vld [vmem:[#allocation4 + $0x194] ss:$20 sps:$4 sm:$0xff]  }
 0x2cf   : > { %16157 = vst [vmem:[#allocation31_spill] sm:$0xff] %v12934_v44  ;;  %v3365_v28 = vadd.f32 %v3364_v13, %v16158_v45  ;;  %v4582_v44 = vmax.f32 %v3363_v53, 0.0  ;;  %v16165_v43 = vld [vmem:[#allocation42_spill] sm:$0xff] }
 0x2d0   : > { %v3366_v19 = vpop.f32.mrf.mxu1  ;;  %v12939_v3 = vpop.f32.mrf.mxu0 }
 0x2d1   : > { %16159 = vst [vmem:[#allocation104_spill] sm:$0xff] %v12939_v3  ;;  %v4586_v33 = vmax.f32 %v3365_v28, 0.0  ;;  %v3367_v20 = vadd.f32 %v3366_v19, %v16160_v26  ;;  %6021 = vmatpush2.bf16.msra.mxu0 %v11035_v11  ;;  %v16166_v28 = vld [vmem:[#allocation43_spill] sm:$0xff]  ;;  %v16168_v19 = vld [vmem:[#allocation112_spill] sm:$0xff] }
 0x2d2   : > { %v3370_v41 = vpop.f32.mrf.mxu1  ;;  %v12942_v6 = vpop.f32.mrf.mxu0  ;;  %4049 = vmatmul.mubr.bf16.gmra.mxu1 %v16162_v27  ;;  %4210 = vmatmul.mubr.bf16.gmra.mxu0 %v16163_v21  ;;  %v11042_v27 = vld [vmem:[#allocation4 + $0x190] ss:$20 sps:$4 sm:$0xff]  }
 0x2d3   : > { %16161 = vst [vmem:[#allocation105_spill] sm:$0xff] %v12942_v6  ;;  %v12946_v13 = vpack.c.bf16 %v4586_v33, %v4581_v0  ;;  %v4587_v45 = vmax.f32 %v3367_v20, 0.0  ;;  %v3371_v3 = vadd.f32 %v3370_v41, %v12638_v42  ;;  %4056 = vmatprep.mubr.bf16.mxu1 %v16165_v43  ;;  %4217 = vmatprep.mubr.bf16.mxu0 %v16166_v28  ;;  %v16170_v0 = vld [vmem:[#allocation113_spill] sm:$0xff] }
 0x2d4   : > { %v3372_v26 = vpop.f32.mrf.mxu1  ;;  %v12951_v11 = vpop.f32.mrf.mxu0  ;;  %6022 = vmatprep.subr.bf16.mxu0 %v11041_v34  ;;  %v11047_v43 = vld [vmem:[#allocation4 + $0x16c] ss:$20 sps:$4 sm:$0xff]  }
 0x2d5   : > { %16164 = vst [vmem:[#allocation32_spill] sm:$0xff] %v12946_v13  ;;  %16167 = vst [vmem:[#allocation29_spill] sm:$0xff] %v12951_v11  ;;  %v3373_v6 = vadd.f32 %v3372_v26, %v16168_v19  ;;  %6023 = vmatpush2.bf16.msra.mxu0 %v11039_v24  ;;  %v12954_v21 = vpack.c.bf16 %v4587_v45, %v4582_v44  ;;  %v4591_v28 = vmax.f32 %v3371_v3, 0.0  ;;  %v16172_v11 = vld [vmem:[#allocation114_spill] sm:$0xff]  ;;  %v16173_v44 = vld [vmem:[#allocation44_spill] sm:$0xff] }
 0x2d6   : > { %v3374_v53 = vpop.f32.mrf.mxu1  ;;  %v12956_v33 = vpop.f32.mrf.mxu0  ;;  %6024 = vmatprep.subr.bf16.mxu0 %v11044_v60  ;;  %v11045_v26 = vld [vmem:[#allocation4 + $0x168] ss:$20 sps:$4 sm:$0xff]   ;;  %v16174_v45 = vld [vmem:[#allocation41_spill] sm:$0xff] }
 0x2d7   : > { %16169 = vst [vmem:[#allocation34_spill] sm:$0xff] %v12954_v21  ;;  %v3375_v42 = vadd.f32 %v3374_v53, %v16170_v0  ;;  %v11050_v60 = vld [vmem:[#allocation4 + $0x144] ss:$20 sps:$4 sm:$0xff]   ;;  %v4592_v21 = vmax.f32 %v3373_v6, 0.0  ;;  %v16176_v3 = vld [vmem:[#allocation46_spill] sm:$0xff] }
 0x2d8   : > { %v3376_v20 = vpop.f32.mrf.mxu1  ;;  %v12959_v41 = vpop.f32.mrf.mxu0 }
 0x2d9   : > { %16171 = vst [vmem:[#allocation35_spill] sm:$0xff] %v12959_v41  ;;  %v4596_v13 = vmax.f32 %v3375_v42, 0.0  ;;  %v3377_v34 = vadd.f32 %v3376_v20, %v16172_v11  ;;  %6025 = vmatpush2.bf16.msra.mxu0 %v11042_v27  ;;  %v16177_v42 = vld [vmem:[#allocation47_spill] sm:$0xff]  ;;  %v11324_v20 = vld [vmem:[%s15680_s4] sm:$0x1f] }
 0x2da   : > { %v3380_v24 = vpop.f32.mrf.mxu1  ;;  %v12962_v19 = vpop.f32.mrf.mxu0  ;;  %4057 = vmatmul.mubr.bf16.gmra.mxu1 %v16173_v44  ;;  %4218 = vmatmul.mubr.bf16.gmra.mxu0 %v16174_v45  ;;  %v16178_v44 = vld [vmem:[#allocation9_spill] sm:$0xff] }
 0x2db   : > { %v12966_v53 = vpack.c.bf16 %v4596_v13, %v4591_v28  ;;  %v4597_v0 = vmax.f32 %v3377_v34, 0.0  ;;  %v3381_v41 = vadd.f32 %v3380_v24, %v12654_v30  ;;  %4064 = vmatprep.mubr.bf16.mxu1 %v16176_v3  ;;  %4225 = vmatprep.mubr.bf16.mxu0 %v16177_v42  ;;  %v12977_v45 = vrot.slane %v11324_v20, %v16178_v44  ;;  %v11048_v13 = vld [vmem:[#allocation4 + $0x140] ss:$20 sps:$4 sm:$0xff]   ;;  %v16180_v28 = vld [vmem:[#allocation10_spill] sm:$0xff] }
 0x2dc   : > { %v3382_v11 = vpop.f32.mrf.mxu1  ;;  %v12971_v27 = vpop.f32.mrf.mxu0  ;;  %6026 = vmatprep.subr.bf16.mxu0 %v11047_v43  ;;  %v12983_v34 = vrot.slane %v11324_v20, %v16180_v28  ;;  %v16183_v28 = vld [vmem:[#allocation48_spill] sm:$0xff] }
 0x2dd   : > { %16175 = vst [vmem:[#allocation106_spill] sm:$0xff] %v12966_v53  ;;  %v3383_v6 = vadd.f32 %v3382_v11, %v12657_v47  ;;  %6027 = vmatpush2.bf16.msra.mxu0 %v11045_v26  ;;  %v12980_v30 = vpack.c.bf16 %v4597_v0, %v4592_v21  ;;  %v3424_v44 = vadd.f32 %v12663_v48, %v12977_v45  ;;  %v4601_v47 = vmax.f32 %v3381_v41, 0.0  ;;  %v16186_v48 = vld [vmem:[#allocation50_spill] sm:$0xff]  ;;  %v16187_v41 = vld [vmem:[#allocation51_spill] sm:$0xff] }
 0x2de   : > { %v3384_v24 = vpop.f32.mrf.mxu1  ;;  %v12985_v3 = vpop.f32.mrf.mxu0  ;;  %6028 = vmatprep.subr.bf16.mxu0 %v11050_v60  ;;  %v3426_v0 = vadd.f32 %v12672_v5, %v12983_v34  ;;  %v16184_v60 = vld [vmem:[#allocation45_spill] sm:$0xff]  ;;  %v3428_v5 = vadd.f32 %v12675_v1, %v12977_v45  ;;  %v3436_v1 = vadd.f32 %v12690_v10, %v12983_v34 }
 0x2df   : > { %16179 = vst [vmem:[#allocation107_spill] sm:$0xff] %v12980_v30  ;;  %16181 = vst [vmem:[#allocation108_spill] sm:$0xff] %v12985_v3  ;;  %v3385_v43 = vadd.f32 %v3384_v24, %v12660_v23  ;;  %v4602_v23 = vmax.f32 %v3383_v6, 0.0  ;;  %v3430_v6 = vadd.f32 %v12678_v61, %v12983_v34 }
 0x2e0   : > { %v3386_v42 = vpop.f32.mrf.mxu1  ;;  %v12988_v53 = vpop.f32.mrf.mxu0 }
 0x2e1   : > { %16182 = vst [vmem:[#allocation36_spill] sm:$0xff] %v12988_v53  ;;  %v4606_v26 = vmax.f32 %v3385_v43, 0.0  ;;  %v3387_v21 = vadd.f32 %v3386_v42, %v12667_v36  ;;  %6029 = vmatpush2.bf16.msra.mxu0 %v11048_v13 }
 0x2e2   : > { %v3616_v11 = vpop.f32.mrf.mxu1  ;;  %v3809_v20 = vpop.f32.mrf.mxu0  ;;  %4065 = vmatmul.mubr.bf16.gmra.mxu1 %v16183_v28  ;;  %4226 = vmatmul.mubr.bf16.gmra.mxu0 %v16184_v60 }
 0x2e3   : > { %v12997_v24 = vpack.c.bf16 %v4606_v26, %v4601_v47  ;;  %v4607_v30 = vmax.f32 %v3387_v21, 0.0  ;;  %v3617_v53 = vadd.f32 %v3616_v11, %v3424_v44  ;;  %4072 = vmatprep.mubr.bf16.mxu1 %v16186_v48  ;;  %4233 = vmatprep.mubr.bf16.mxu0 %v16187_v41  ;;  %v16189_v11 = vld [vmem:[#allocation115_spill] sm:$0xff] }
 0x2e4   : > { %v3618_v36 = vpop.f32.mrf.mxu1  ;;  %v3811_v13 = vpop.f32.mrf.mxu0  ;;  %v3434_v48 = vadd.f32 %v16189_v11, %v12977_v45 }
 0x2e5   : > { %16185 = vst [vmem:[#allocation33_spill] sm:$0xff] %v12997_v24  ;;  %v3810_v43 = vadd.f32 %v3809_v20, %v3617_v53  ;;  %v3619_v42 = vadd.f32 %v3618_v36, %v3426_v0  ;;  %v13003_v3 = vpack.c.bf16 %v4607_v30, %v4602_v23  ;;  %v16190_v0 = vld [vmem:[#allocation52_spill] sm:$0xff]  ;;  %v16191_v20 = vld [vmem:[#allocation49_spill] sm:$0xff] }
 0x2e6   : > { %v3620_v28 = vpop.f32.mrf.mxu1  ;;  %v3813_v60 = vpop.f32.mrf.mxu0 }
 0x2e7   : > { %16188 = vst [vmem:[#allocation38_spill] sm:$0xff] %v13003_v3  ;;  %v3812_v47 = vadd.f32 %v3811_v13, %v3619_v42  ;;  %v3621_v44 = vadd.f32 %v3620_v28, %v3428_v5  ;;  %v4453_v23 = vmax.f32 %v3810_v43, 0.0  ;;  %v16192_v5 = vld [vmem:[#allocation54_spill] sm:$0xff]  ;;  %v16193_v42 = vld [vmem:[#allocation55_spill] sm:$0xff]  ;;  %v3438_v28 = vadd.f32 %v12695_v37, %v12977_v45 }
 0x2e8   : > { %v3622_v26 = vpop.f32.mrf.mxu1  ;;  %v3815_v21 = vpop.f32.mrf.mxu0 }
 0x2e9   : > { %v3814_v41 = vadd.f32 %v3813_v60, %v3621_v44  ;;  %v3623_v24 = vadd.f32 %v3622_v26, %v3430_v6  ;;  %v4454_v60 = vmax.f32 %v3812_v47, 0.0  ;;  %v3444_v47 = vadd.f32 %v12701_v49, %v12977_v45 }
 0x2ea   : > { %v3626_v53 = vpop.f32.mrf.mxu1  ;;  %v3819_v30 = vpop.f32.mrf.mxu0  ;;  %4073 = vmatmul.mubr.bf16.gmra.mxu1 %v16190_v0  ;;  %4234 = vmatmul.mubr.bf16.gmra.mxu0 %v16191_v20  ;;  %v3448_v49 = vadd.f32 %v12715_v2, %v12977_v45  ;;  %v3454_v2 = vadd.f32 %v12721_v50, %v12977_v45  ;;  %v3458_v50 = vadd.f32 %v12735_v4, %v12977_v45 }
 0x2eb   : > { %v4458_v61 = vmax.f32 %v3814_v41, 0.0  ;;  %v3816_v36 = vadd.f32 %v3815_v21, %v3623_v24  ;;  %v3627_v13 = vadd.f32 %v3626_v53, %v3434_v48  ;;  %4080 = vmatprep.mubr.bf16.mxu1 %v16192_v5  ;;  %4241 = vmatprep.mubr.bf16.mxu0 %v16193_v42  ;;  %v3440_v24 = vadd.f32 %v12698_v14, %v12983_v34  ;;  %v11101_v53 = vld [vmem:[#allocation4 + $0x61c] ss:$20 sps:$4 sm:$0xff]  }
 0x2ec   : > { %v3628_v6 = vpop.f32.mrf.mxu1  ;;  %v3821_v10 = vpop.f32.mrf.mxu0  ;;  %6384 = vmatprep.subr.bf16.mxu0 %v11101_v53  ;;  %v3450_v53 = vadd.f32 %v12718_v8, %v12983_v34  ;;  %v3464_v4 = vadd.f32 %v12741_v18, %v12977_v45  ;;  %v3468_v18 = vadd.f32 %v12755_v35, %v12977_v45  ;;  %v3474_v35 = vadd.f32 %v12761_v46, %v12977_v45 }
 0x2ed   : > { %v13017_v44 = vpack.c.bf16 %v4458_v61, %v4453_v23  ;;  %v4459_v26 = vmax.f32 %v3816_v36, 0.0  ;;  %v3820_v11 = vadd.f32 %v3819_v30, %v3627_v13  ;;  %v3629_v0 = vadd.f32 %v3628_v6, %v3436_v1  ;;  %v16196_v13 = vld [vmem:[#allocation56_spill] sm:$0xff]  ;;  %v16197_v6 = vld [vmem:[#allocation58_spill] sm:$0xff] }
 0x2ee   : > { %v3630_v20 = vpop.f32.mrf.mxu1  ;;  %v3823_v43 = vpop.f32.mrf.mxu0  ;;  %v3446_v1 = vadd.f32 %v12710_v51, %v12983_v34  ;;  %v3478_v46 = vadd.f32 %v12775_v16, %v12977_v45  ;;  %v3484_v16 = vadd.f32 %v12781_v62, %v12977_v45  ;;  %v16222_v62 = vld [vmem:[#allocation126_spill] sm:$0xff] }
 0x2ef   : > { %16194 = vst [vmem:[#allocation39_spill] sm:$0xff] %v13017_v44  ;;  %v3822_v21 = vadd.f32 %v3821_v10, %v3629_v0  ;;  %v3631_v48 = vadd.f32 %v3630_v20, %v3438_v28  ;;  %v13021_v41 = vpack.c.bf16 %v4459_v26, %v4454_v60  ;;  %v4463_v14 = vmax.f32 %v3820_v11, 0.0  ;;  %v16198_v10 = vld [vmem:[#allocation59_spill] sm:$0xff] }
 0x2f0   : > { %v3632_v5 = vpop.f32.mrf.mxu1  ;;  %v3825_v37 = vpop.f32.mrf.mxu0 }
 0x2f1   : > { %16195 = vst [vmem:[#allocation109_spill] sm:$0xff] %v13021_v41  ;;  %v3824_v23 = vadd.f32 %v3823_v43, %v3631_v48  ;;  %v3633_v61 = vadd.f32 %v3632_v5, %v3440_v24  ;;  %v4464_v26 = vmax.f32 %v3822_v21, 0.0 }
 0x2f2   : > { %v3636_v30 = vpop.f32.mrf.mxu1  ;;  %v3829_v36 = vpop.f32.mrf.mxu0  ;;  %4081 = vmatmul.mubr.bf16.gmra.mxu1 %v16196_v13  ;;  %4242 = vmatmul.mubr.bf16.gmra.mxu0 %v16060_v38 }
 0x2f3   : > { %v4468_v42 = vmax.f32 %v3824_v23, 0.0  ;;  %v3826_v28 = vadd.f32 %v3825_v37, %v3633_v61  ;;  %v3637_v60 = vadd.f32 %v3636_v30, %v3444_v47  ;;  %4088 = vmatprep.mubr.bf16.mxu1 %v16197_v6  ;;  %4249 = vmatprep.mubr.bf16.mxu0 %v16198_v10  ;;  %v16202_v6 = vld [vmem:[#allocation62_spill] sm:$0xff]  ;;  %v16203_v10 = vld [vmem:[#allocation63_spill] sm:$0xff] }
 0x2f4   : > { %v3638_v0 = vpop.f32.mrf.mxu1  ;;  %v3831_v51 = vpop.f32.mrf.mxu0 }
 0x2f5   : > { %v13033_v20 = vpack.c.bf16 %v4468_v42, %v4463_v14  ;;  %v4469_v43 = vmax.f32 %v3826_v28, 0.0  ;;  %v3830_v24 = vadd.f32 %v3829_v36, %v3637_v60  ;;  %v3639_v48 = vadd.f32 %v3638_v0, %v3446_v1  ;;  %v16201_v14 = vld [vmem:[#allocation60_spill] sm:$0xff] }
 0x2f6   : > { %v3640_v38 = vpop.f32.mrf.mxu1  ;;  %v3833_v11 = vpop.f32.mrf.mxu0  ;;  %v3456_v36 = vadd.f32 %v12730_v15, %v12983_v34 }
 0x2f7   : > { %16199 = vst [vmem:[#allocation110_spill] sm:$0xff] %v13033_v20  ;;  %v3832_v5 = vadd.f32 %v3831_v51, %v3639_v48  ;;  %v3641_v37 = vadd.f32 %v3640_v38, %v3448_v49  ;;  %v13037_v47 = vpack.c.bf16 %v4469_v43, %v4464_v26  ;;  %v4473_v8 = vmax.f32 %v3830_v24, 0.0 }
 0x2f8   : > { %v3642_v23 = vpop.f32.mrf.mxu1  ;;  %v3835_v61 = vpop.f32.mrf.mxu0  ;;  %v3460_v38 = vadd.f32 %v12738_v55, %v12983_v34 }
 0x2f9   : > { %16200 = vst [vmem:[#allocation111_spill] sm:$0xff] %v13037_v47  ;;  %v3834_v21 = vadd.f32 %v3833_v11, %v3641_v37  ;;  %v3643_v30 = vadd.f32 %v3642_v23, %v3450_v53  ;;  %v4474_v49 = vmax.f32 %v3832_v5, 0.0 }
 0x2fa   : > { %v3646_v1 = vpop.f32.mrf.mxu1  ;;  %v3839_v13 = vpop.f32.mrf.mxu0  ;;  %4089 = vmatmul.mubr.bf16.gmra.mxu1 %v16201_v14  ;;  %4250 = vmatmul.mubr.bf16.gmra.mxu0 %v16064_v29 }
 0x2fb   : > { %v4478_v42 = vmax.f32 %v3834_v21, 0.0  ;;  %v3836_v28 = vadd.f32 %v3835_v61, %v3643_v30  ;;  %v3647_v60 = vadd.f32 %v3646_v1, %v3454_v2  ;;  %4096 = vmatprep.mubr.bf16.mxu1 %v16202_v6  ;;  %4257 = vmatprep.mubr.bf16.mxu0 %v16203_v10  ;;  %v3466_v21 = vadd.f32 %v12750_v39, %v12983_v34  ;;  %v16206_v1 = vld [vmem:[#allocation64_spill] sm:$0xff] }
 0x2fc   : > { %v3648_v26 = vpop.f32.mrf.mxu1  ;;  %v3841_v15 = vpop.f32.mrf.mxu0 }
 0x2fd   : > { %v13049_v0 = vpack.c.bf16 %v4478_v42, %v4473_v8  ;;  %v4479_v51 = vmax.f32 %v3836_v28, 0.0  ;;  %v3840_v43 = vadd.f32 %v3839_v13, %v3647_v60  ;;  %v3649_v48 = vadd.f32 %v3648_v26, %v3456_v36  ;;  %v16207_v13 = vld [vmem:[#allocation61_spill] sm:$0xff]  ;;  %v16208_v28 = vld [vmem:[#allocation66_spill] sm:$0xff]  ;;  %v16209_v60 = vld [vmem:[#allocation67_spill] sm:$0xff] }
 0x2fe   : > { %v3650_v29 = vpop.f32.mrf.mxu1  ;;  %v3843_v24 = vpop.f32.mrf.mxu0 }
 0x2ff   : > { %16204 = vst [vmem:[#allocation40_spill] sm:$0xff] %v13049_v0  ;;  %v3842_v11 = vadd.f32 %v3841_v15, %v3649_v48  ;;  %v3651_v53 = vadd.f32 %v3650_v29, %v3458_v50  ;;  %v13053_v37 = vpack.c.bf16 %v4479_v51, %v4474_v49  ;;  %v4483_v55 = vmax.f32 %v3840_v43, 0.0 }
 0x300   : > { %v3652_v23 = vpop.f32.mrf.mxu1  ;;  %v3845_v61 = vpop.f32.mrf.mxu0  ;;  %v3470_v48 = vadd.f32 %v12758_v54, %v12983_v34 }
 0x301   : > { %16205 = vst [vmem:[#allocation37_spill] sm:$0xff] %v13053_v37  ;;  %v3844_v5 = vadd.f32 %v3843_v24, %v3651_v53  ;;  %v3653_v2 = vadd.f32 %v3652_v23, %v3460_v38  ;;  %v4484_v6 = vmax.f32 %v3842_v11, 0.0 }
 0x302   : > { %v3656_v30 = vpop.f32.mrf.mxu1  ;;  %v3849_v36 = vpop.f32.mrf.mxu0  ;;  %4097 = vmatmul.mubr.bf16.gmra.mxu1 %v16206_v1  ;;  %4258 = vmatmul.mubr.bf16.gmra.mxu0 %v16207_v13 }
 0x303   : > { %v4488_v14 = vmax.f32 %v3844_v5, 0.0  ;;  %v3846_v8 = vadd.f32 %v3845_v61, %v3653_v2  ;;  %v3657_v42 = vadd.f32 %v3656_v30, %v3464_v4  ;;  %4104 = vmatprep.mubr.bf16.mxu1 %v16208_v28  ;;  %4265 = vmatprep.mubr.bf16.mxu0 %v16209_v60  ;;  %v3476_v4 = vadd.f32 %v12770_v56, %v12983_v34  ;;  %v16213_v30 = vld [vmem:[#allocation65_spill] sm:$0xff] }
 0x304   : > { %v3658_v10 = vpop.f32.mrf.mxu1  ;;  %v3851_v39 = vpop.f32.mrf.mxu0 }
 0x305   : > { %v13065_v50 = vpack.c.bf16 %v4488_v14, %v4483_v55  ;;  %v4489_v49 = vmax.f32 %v3846_v8, 0.0  ;;  %v3850_v26 = vadd.f32 %v3849_v36, %v3657_v42  ;;  %v3659_v15 = vadd.f32 %v3658_v10, %v3466_v21  ;;  %v16212_v21 = vld [vmem:[#allocation68_spill] sm:$0xff]  ;;  %v16214_v55 = vld [vmem:[#allocation70_spill] sm:$0xff]  ;;  %v16215_v14 = vld [vmem:[#allocation71_spill] sm:$0xff] }
 0x306   : > { %v3660_v51 = vpop.f32.mrf.mxu1  ;;  %v3853_v43 = vpop.f32.mrf.mxu0 }
 0x307   : > { %16210 = vst [vmem:[#allocation42_spill] sm:$0xff] %v13065_v50  ;;  %v3852_v29 = vadd.f32 %v3851_v39, %v3659_v15  ;;  %v3661_v24 = vadd.f32 %v3660_v51, %v3468_v18  ;;  %v13069_v38 = vpack.c.bf16 %v4489_v49, %v4484_v6  ;;  %v4493_v54 = vmax.f32 %v3850_v26, 0.0 }
 0x308   : > { %v3662_v53 = vpop.f32.mrf.mxu1  ;;  %v3855_v23 = vpop.f32.mrf.mxu0  ;;  %v3480_v49 = vadd.f32 %v12778_v59, %v12983_v34 }
 0x309   : > { %16211 = vst [vmem:[#allocation43_spill] sm:$0xff] %v13069_v38  ;;  %v3854_v11 = vadd.f32 %v3853_v43, %v3661_v24  ;;  %v3663_v61 = vadd.f32 %v3662_v53, %v3470_v48  ;;  %v4494_v8 = vmax.f32 %v3852_v29, 0.0  ;;  %v3486_v53 = vadd.f32 %v12790_v17, %v12983_v34 }
 0x30a   : > { %v3666_v5 = vpop.f32.mrf.mxu1  ;;  %v3859_v2 = vpop.f32.mrf.mxu0  ;;  %4105 = vmatmul.mubr.bf16.gmra.mxu1 %v16212_v21  ;;  %4266 = vmatmul.mubr.bf16.gmra.mxu0 %v16213_v30  ;;  %v16220_v21 = vld [vmem:[#allocation75_spill] sm:$0xff]  ;;  %v16221_v30 = vld [vmem:[#allocation76_spill] sm:$0xff] }
 0x30b   : > { %v4498_v36 = vmax.f32 %v3854_v11, 0.0  ;;  %v3856_v1 = vadd.f32 %v3855_v23, %v3663_v61  ;;  %v3667_v13 = vadd.f32 %v3666_v5, %v3474_v35  ;;  %4112 = vmatprep.mubr.bf16.mxu1 %v16214_v55  ;;  %4273 = vmatprep.mubr.bf16.mxu0 %v16215_v14  ;;  %v16218_v11 = vld [vmem:[#allocation72_spill] sm:$0xff]  ;;  %v16219_v61 = vld [vmem:[#allocation69_spill] sm:$0xff] }
 0x30c   : > { %v3668_v42 = vpop.f32.mrf.mxu1  ;;  %v3861_v56 = vpop.f32.mrf.mxu0 }
 0x30d   : > { %v13081_v28 = vpack.c.bf16 %v4498_v36, %v4493_v54  ;;  %v4499_v60 = vmax.f32 %v3856_v1, 0.0  ;;  %v3860_v18 = vadd.f32 %v3859_v2, %v3667_v13  ;;  %v3669_v6 = vadd.f32 %v3668_v42, %v3476_v4 }
 0x30e   : > { %v3670_v10 = vpop.f32.mrf.mxu1  ;;  %v3863_v39 = vpop.f32.mrf.mxu0  ;;  %v3488_v54 = vadd.f32 %v16222_v62, %v12977_v45 }
 0x30f   : > { %16216 = vst [vmem:[#allocation112_spill] sm:$0xff] %v13081_v28  ;;  %v3862_v26 = vadd.f32 %v3861_v56, %v3669_v6  ;;  %v3671_v15 = vadd.f32 %v3670_v10, %v3478_v46  ;;  %v13085_v51 = vpack.c.bf16 %v4499_v60, %v4494_v8  ;;  %v4503_v59 = vmax.f32 %v3860_v18, 0.0  ;;  %v16224_v56 = vld [vmem:[#allocation127_spill] sm:$0xff] }
 0x310   : > { %v3672_v43 = vpop.f32.mrf.mxu1  ;;  %v3865_v48 = vpop.f32.mrf.mxu0  ;;  %v3490_v60 = vadd.f32 %v16224_v56, %v12983_v34 }
 0x311   : > { %16217 = vst [vmem:[#allocation113_spill] sm:$0xff] %v13085_v51  ;;  %v3864_v29 = vadd.f32 %v3863_v39, %v3671_v15  ;;  %v3673_v24 = vadd.f32 %v3672_v43, %v3480_v49  ;;  %v4504_v36 = vmax.f32 %v3862_v26, 0.0  ;;  %v16226_v26 = vld [vmem:[#allocation94_spill] sm:$0xff] }
 0x312   : > { %v3676_v23 = vpop.f32.mrf.mxu1  ;;  %v3869_v35 = vpop.f32.mrf.mxu0  ;;  %4113 = vmatmul.mubr.bf16.gmra.mxu1 %v16218_v11  ;;  %4274 = vmatmul.mubr.bf16.gmra.mxu0 %v16219_v61  ;;  %v3494_v15 = vadd.f32 %v16226_v26, %v12977_v45  ;;  %v3504_v26 = vadd.f32 %v12821_v12, %v12977_v45  ;;  %v16238_v12 = vld [vmem:[#allocation118_spill] sm:$0xff] }
 0x313   : > { %v4508_v4 = vmax.f32 %v3864_v29, 0.0  ;;  %v3866_v5 = vadd.f32 %v3865_v48, %v3673_v24  ;;  %v3677_v2 = vadd.f32 %v3676_v23, %v3484_v16  ;;  %4120 = vmatprep.mubr.bf16.mxu1 %v16220_v21  ;;  %4281 = vmatprep.mubr.bf16.mxu0 %v16221_v30  ;;  %v16227_v16 = vld [vmem:[#allocation14_spill] sm:$0xff]  ;;  %v16228_v23 = vld [vmem:[#allocation77_spill] sm:$0xff]  ;;  %v3498_v21 = vadd.f32 %v12815_v9, %v12977_v45 }
 0x314   : > { %v3678_v1 = vpop.f32.mrf.mxu1  ;;  %v3871_v17 = vpop.f32.mrf.mxu0  ;;  %v3496_v29 = vadd.f32 %v16227_v16, %v12983_v34  ;;  %v11051_v9 = vld [vmem:[#allocation4 + $0x398] ss:$20 sps:$4 sm:$0xff]   ;;  %v11104_v16 = vld [vmem:[#allocation4 + $0x5f4] ss:$20 sps:$4 sm:$0xff]  }
 0x315   : > { %v13097_v13 = vpack.c.bf16 %v4508_v4, %v4503_v59  ;;  %v4509_v55 = vmax.f32 %v3866_v5, 0.0  ;;  %v3870_v14 = vadd.f32 %v3869_v35, %v3677_v2  ;;  %v3679_v46 = vadd.f32 %v3678_v1, %v3486_v53  ;;  %v16229_v35 = vld [vmem:[#allocation74_spill] sm:$0xff]  ;;  %v16231_v2 = vld [vmem:[#allocation117_spill] sm:$0xff] }
 0x316   : > { %v3680_v8 = vpop.f32.mrf.mxu1  ;;  %v3873_v42 = vpop.f32.mrf.mxu0  ;;  %v16230_v5 = vld [vmem:[#allocation78_spill] sm:$0xff] }
 0x317   : > { %16223 = vst [vmem:[#allocation114_spill] sm:$0xff] %v13097_v13  ;;  %v3872_v18 = vadd.f32 %v3871_v17, %v3679_v46  ;;  %v3681_v6 = vadd.f32 %v3680_v8, %v3488_v54  ;;  %v13101_v10 = vpack.c.bf16 %v4509_v55, %v4504_v36  ;;  %v4513_v11 = vmax.f32 %v3870_v14, 0.0  ;;  %v16233_v8 = vld [vmem:[#allocation95_spill] sm:$0xff] }
 0x318   : > { %v3682_v39 = vpop.f32.mrf.mxu1  ;;  %v3875_v49 = vpop.f32.mrf.mxu0 }
 0x319   : > { %16225 = vst [vmem:[#allocation44_spill] sm:$0xff] %v13101_v10  ;;  %v3874_v43 = vadd.f32 %v3873_v42, %v3681_v6  ;;  %v3683_v48 = vadd.f32 %v3682_v39, %v3490_v60  ;;  %v4514_v30 = vmax.f32 %v3872_v18, 0.0  ;;  %v3500_v42 = vadd.f32 %v16233_v8, %v12983_v34  ;;  %v11099_v18 = vld [vmem:[#allocation4 + $0x618] ss:$20 sps:$4 sm:$0xff]  }
 0x31a   : > { %v3686_v24 = vpop.f32.mrf.mxu1  ;;  %v3879_v53 = vpop.f32.mrf.mxu0  ;;  %4121 = vmatmul.mubr.bf16.gmra.mxu1 %v16228_v23  ;;  %4282 = vmatmul.mubr.bf16.gmra.mxu0 %v16229_v35  ;;  %v16235_v23 = vld [vmem:[#allocation79_spill] sm:$0xff]  ;;  %v16236_v35 = vld [vmem:[#allocation116_spill] sm:$0xff] }
 0x31b   : > { %v4518_v61 = vmax.f32 %v3874_v43, 0.0  ;;  %v3876_v59 = vadd.f32 %v3875_v49, %v3683_v48  ;;  %v3687_v4 = vadd.f32 %v3686_v24, %v3494_v15  ;;  %10427 = vmatprep.mubr.bf16.mxu1 %v16230_v5  ;;  %6030 = vmatprep.mubr.bf16.mxu0 %v16231_v2  ;;  %v11056_v48 = vld [vmem:[#allocation4 + $0x374] ss:$20 sps:$4 sm:$0xff]   ;;  %v16237_v5 = vld [vmem:[#allocation80_spill] sm:$0xff] }
 0x31c   : > { %v3688_v62 = vpop.f32.mrf.mxu1  ;;  %v3881_v54 = vpop.f32.mrf.mxu0 }
 0x31d   : > { %v13113_v36 = vpack.c.bf16 %v4518_v61, %v4513_v11  ;;  %v4519_v1 = vmax.f32 %v3876_v59, 0.0  ;;  %v3880_v17 = vadd.f32 %v3879_v53, %v3687_v4  ;;  %v3689_v55 = vadd.f32 %v3688_v62, %v3496_v29 }
 0x31e   : > { %v3690_v46 = vpop.f32.mrf.mxu1  ;;  %v3883_v14 = vpop.f32.mrf.mxu0  ;;  %v3506_v29 = vadd.f32 %v12831_v63, %v12983_v34 }
 0x31f   : > { %16232 = vst [vmem:[#allocation41_spill] sm:$0xff] %v13113_v36  ;;  %v3882_v56 = vadd.f32 %v3881_v54, %v3689_v55  ;;  %v3691_v60 = vadd.f32 %v3690_v46, %v3498_v21  ;;  %v13117_v6 = vpack.c.bf16 %v4519_v1, %v4514_v30  ;;  %v4523_v11 = vmax.f32 %v3880_v17, 0.0  ;;  %v16239_v21 = vld [vmem:[#allocation16_spill] sm:$0xff]  ;;  %v11054_v1 = vld [vmem:[#allocation4 + $0x370] ss:$20 sps:$4 sm:$0xff]  }
 0x320   : > { %v3692_v39 = vpop.f32.mrf.mxu1  ;;  %v3885_v49 = vpop.f32.mrf.mxu0  ;;  %v3508_v30 = vadd.f32 %v16239_v21, %v12977_v45  ;;  %v11102_v55 = vld [vmem:[#allocation4 + $0x5f0] ss:$20 sps:$4 sm:$0xff]  }
 0x321   : > { %16234 = vst [vmem:[#allocation46_spill] sm:$0xff] %v13117_v6  ;;  %v3884_v15 = vadd.f32 %v3883_v14, %v3691_v60  ;;  %v3693_v43 = vadd.f32 %v3692_v39, %v3500_v42  ;;  %v4524_v62 = vmax.f32 %v3882_v56, 0.0  ;;  %v11059_v42 = vld [vmem:[#allocation4 + $0x34c] ss:$20 sps:$4 sm:$0xff]  }
 0x322   : > { %v3696_v24 = vpop.f32.mrf.mxu1  ;;  %v3889_v53 = vpop.f32.mrf.mxu0  ;;  %10428 = vmatmul.mubr.bf16.vlgmr.msra.gmra.mxu1 %v16235_v23  ;;  %6031 = vmatmul.mubr.bf16.vlgmr.msra.gmra.mxu0 %v16236_v35  ;;  %v11107_v60 = vld [vmem:[#allocation4 + $0x5cc] ss:$20 sps:$4 sm:$0xff]   ;;  %v11057_v23 = vld [vmem:[#allocation4 + $0x348] ss:$20 sps:$4 sm:$0xff]  }
 0x323   : > { %v4528_v61 = vmax.f32 %v3884_v15, 0.0  ;;  %v3886_v59 = vadd.f32 %v3885_v49, %v3693_v43  ;;  %v3697_v4 = vadd.f32 %v3696_v24, %v3504_v26  ;;  %10431 = vmatprep.mubr.bf16.mxu1 %v16237_v5  ;;  %6040 = vmatprep.mubr.bf16.mxu0 %v16238_v12  ;;  %v16241_v26 = vld [vmem:[#allocation13_spill] sm:$0xff] }
 0x324   : > { %6192 = vmatpush1.bf16.msra.mxu1 %v11051_v9  ;;  %v3698_v63 = vpop.f32.mrf.mxu1  ;;  %v3891_v54 = vpop.f32.mrf.mxu0  ;;  %6385 = vmatpush1.bf16.msra.mxu0 %v11099_v18  ;;  %v3510_v56 = vadd.f32 %v16241_v26, %v12983_v34  ;;  %v11060_v26 = vld [vmem:[#allocation4 + $0x320] ss:$20 sps:$4 sm:$0xff]  }
 0x325   : > { %v13129_v46 = vpack.c.bf16 %v4528_v61, %v4523_v11  ;;  %v4529_v17 = vmax.f32 %v3886_v59, 0.0  ;;  %v3890_v14 = vadd.f32 %v3889_v53, %v3697_v4  ;;  %v3699_v8 = vadd.f32 %v3698_v63, %v3506_v29  ;;  %6193 = vmatprep.subr.bf16.mxu1 %v11056_v48  ;;  %6386 = vmatprep.subr.bf16.mxu0 %v11104_v16  ;;  %v11105_v53 = vld [vmem:[#allocation4 + $0x5c8] ss:$20 sps:$4 sm:$0xff]   ;;  %v11062_v11 = vld [vmem:[#allocation4 + $0x324] ss:$20 sps:$4 sm:$0xff]  }
 0x326   : > { %v3700_v39 = vpop.f32.mrf.mxu1  ;;  %v3893_v49 = vpop.f32.mrf.mxu0  ;;  %v3514_v48 = vadd.f32 %v12842_v57, %v12977_v45  ;;  %v11110_v61 = vld [vmem:[#allocation4 + $0x5a4] ss:$20 sps:$4 sm:$0xff]   ;;  %v16243_v59 = vld [vmem:[#allocation18_spill] sm:$0xff] }
 0x327   : > { %16240 = vst [vmem:[#allocation47_spill] sm:$0xff] %v13129_v46  ;;  %v3892_v9 = vadd.f32 %v3891_v54, %v3699_v8  ;;  %v3701_v15 = vadd.f32 %v3700_v39, %v3508_v30  ;;  %v13133_v43 = vpack.c.bf16 %v4529_v17, %v4524_v62  ;;  %v3516_v4 = vadd.f32 %v16243_v59, %v12983_v34  ;;  %v16244_v30 = vld [vmem:[#allocation81_spill] sm:$0xff]  ;;  %v16246_v57 = vld [vmem:[#allocation82_spill] sm:$0xff]  ;;  %v16247_v17 = vld [vmem:[#allocation119_spill] sm:$0xff] }
 0x328   : > { %6194 = vmatpush1.bf16.msra.mxu1 %v11054_v1  ;;  %v3702_v18 = vpop.f32.mrf.mxu1  ;;  %v3895_v24 = vpop.f32.mrf.mxu0  ;;  %6387 = vmatpush1.bf16.msra.mxu0 %v11102_v55  ;;  %v16245_v62 = vld [vmem:[#allocation53_spill] sm:$0xff]  ;;  %v4533_v63 = vmax.f32 %v3890_v14, 0.0  ;;  %v16248_v8 = vld [vmem:[#allocation20_spill] sm:$0xff] }
 0x329   : > { %16242 = vst [vmem:[#allocation48_spill] sm:$0xff] %v13133_v43  ;;  %v3894_v16 = vadd.f32 %v3893_v49, %v3701_v15  ;;  %v3703_v29 = vadd.f32 %v3702_v18, %v3510_v56  ;;  %6195 = vmatprep.subr.bf16.mxu1 %v11059_v42  ;;  %6388 = vmatprep.subr.bf16.mxu0 %v11107_v60  ;;  %v4534_v60 = vmax.f32 %v3892_v9, 0.0  ;;  %v11108_v56 = vld [vmem:[#allocation4 + $0x5a0] ss:$20 sps:$4 sm:$0xff]  }
 0x32a   : > { %v3706_v5 = vpop.f32.mrf.mxu1  ;;  %v3899_v21 = vpop.f32.mrf.mxu0  ;;  %10432 = vmatmul.mubr.bf16.gmra.mxu1 %v16244_v30  ;;  %6041 = vmatmul.mubr.bf16.gmra.mxu0 %v16245_v62  ;;  %v3518_v42 = vadd.f32 %v16248_v8, %v12977_v45  ;;  %v16250_v59 = vld [vmem:[#allocation17_spill] sm:$0xff] }
 0x32b   : > { %v4538_v54 = vmax.f32 %v3894_v16, 0.0  ;;  %v3896_v1 = vadd.f32 %v3895_v24, %v3703_v29  ;;  %v3707_v55 = vadd.f32 %v3706_v5, %v3514_v48  ;;  %10435 = vmatprep.mubr.bf16.mxu1 %v16246_v57  ;;  %6050 = vmatprep.mubr.bf16.mxu0 %v16247_v17  ;;  %v11065_v48 = vld [vmem:[#allocation4 + $0x2fc] ss:$20 sps:$4 sm:$0xff]   ;;  %v3520_v5 = vadd.f32 %v16250_v59, %v12983_v34 }
 0x32c   : > { %6196 = vmatpush1.bf16.msra.mxu1 %v11057_v23  ;;  %v3708_v39 = vpop.f32.mrf.mxu1  ;;  %v3901_v49 = vpop.f32.mrf.mxu0  ;;  %6389 = vmatpush1.bf16.msra.mxu0 %v11105_v53  ;;  %v11122_v57 = vld [vmem:[#allocation4 + $0x57c] ss:$20 sps:$4 sm:$0xff]  }
 0x32d   : > { %v13145_v15 = vpack.c.bf16 %v4538_v54, %v4533_v63  ;;  %v4539_v14 = vmax.f32 %v3896_v1, 0.0  ;;  %v3900_v18 = vadd.f32 %v3899_v21, %v3707_v55  ;;  %v3709_v24 = vadd.f32 %v3708_v39, %v3516_v4  ;;  %6197 = vmatprep.subr.bf16.mxu1 %v11062_v11  ;;  %6390 = vmatprep.subr.bf16.mxu0 %v11110_v61  ;;  %v11063_v54 = vld [vmem:[#allocation4 + $0x2f8] ss:$20 sps:$4 sm:$0xff]   ;;  %v11068_v1 = vld [vmem:[#allocation4 + $0x2d4] ss:$20 sps:$4 sm:$0xff]   ;;  %v16253_v39 = vld [vmem:[#allocation57_spill] sm:$0xff] }
 0x32e   : > { %v3710_v16 = vpop.f32.mrf.mxu1  ;;  %v3903_v29 = vpop.f32.mrf.mxu0  ;;  %v11120_v21 = vld [vmem:[#allocation4 + $0x578] ss:$20 sps:$4 sm:$0xff]   ;;  %v3524_v11 = vadd.f32 %v12862_v25, %v12977_v45  ;;  %v3526_v55 = vadd.f32 %v12871_v22, %v12983_v34  ;;  %v16255_v25 = vld [vmem:[#allocation121_spill] sm:$0xff] }
 0x32f   : > { %16249 = vst [vmem:[#allocation45_spill] sm:$0xff] %v13145_v15  ;;  %v3902_v9 = vadd.f32 %v3901_v49, %v3709_v24  ;;  %v3711_v23 = vadd.f32 %v3710_v16, %v3518_v42  ;;  %v13149_v30 = vpack.c.bf16 %v4539_v14, %v4534_v60  ;;  %v16252_v60 = vld [vmem:[#allocation83_spill] sm:$0xff]  ;;  %v4543_v49 = vmax.f32 %v3900_v18, 0.0  ;;  %v16254_v24 = vld [vmem:[#allocation84_spill] sm:$0xff] }
 0x330   : > { %6198 = vmatpush1.bf16.msra.mxu1 %v11060_v26  ;;  %v3712_v53 = vpop.f32.mrf.mxu1  ;;  %v3905_v63 = vpop.f32.mrf.mxu0  ;;  %6391 = vmatpush1.bf16.msra.mxu0 %v11108_v56  ;;  %v11066_v59 = vld [vmem:[#allocation4 + $0x2d0] ss:$20 sps:$4 sm:$0xff]  }
 0x331   : > { %16251 = vst [vmem:[#allocation50_spill] sm:$0xff] %v13149_v30  ;;  %v3904_v61 = vadd.f32 %v3903_v29, %v3711_v23  ;;  %v3713_v4 = vadd.f32 %v3712_v53, %v3520_v5  ;;  %6199 = vmatprep.subr.bf16.mxu1 %v11065_v48  ;;  %6392 = vmatprep.subr.bf16.mxu0 %v11122_v57  ;;  %v4544_v16 = vmax.f32 %v3902_v9, 0.0  ;;  %v11071_v53 = vld [vmem:[#allocation4 + $0x2ac] ss:$20 sps:$4 sm:$0xff]  }
 0x332   : > { %v3716_v8 = vpop.f32.mrf.mxu1  ;;  %v3909_v42 = vpop.f32.mrf.mxu0  ;;  %10436 = vmatmul.mubr.bf16.gmra.mxu1 %v16252_v60  ;;  %6051 = vmatmul.mubr.bf16.gmra.mxu0 %v16253_v39  ;;  %v3528_v48 = vadd.f32 %v12876_v31, %v12977_v45  ;;  %v16288_v39 = vld [vmem:[#allocation92_spill] sm:$0xff] }
 0x333   : > { %v4548_v26 = vmax.f32 %v3904_v61, 0.0  ;;  %v3906_v56 = vadd.f32 %v3905_v63, %v3713_v4  ;;  %v3717_v14 = vadd.f32 %v3716_v8, %v3524_v11  ;;  %10439 = vmatprep.mubr.bf16.mxu1 %v16254_v24  ;;  %6060 = vmatprep.mubr.bf16.mxu0 %v16255_v25  ;;  %v16257_v61 = vld [vmem:[#allocation23_spill] sm:$0xff]  ;;  %v16259_v24 = vld [vmem:[#allocation85_spill] sm:$0xff] }
 0x334   : > { %6200 = vmatpush1.bf16.msra.mxu1 %v11063_v54  ;;  %v3718_v22 = vpop.f32.mrf.mxu1  ;;  %v3911_v29 = vpop.f32.mrf.mxu0  ;;  %6393 = vmatpush1.bf16.msra.mxu0 %v11120_v21  ;;  %v3530_v4 = vadd.f32 %v16257_v61, %v12983_v34  ;;  %v11069_v21 = vld [vmem:[#allocation4 + $0x2a8] ss:$20 sps:$4 sm:$0xff]   ;;  %v11072_v61 = vld [vmem:[#allocation4 + $0x280] ss:$20 sps:$4 sm:$0xff]  }
 0x335   : > { %v13161_v5 = vpack.c.bf16 %v4548_v26, %v4543_v49  ;;  %v4549_v23 = vmax.f32 %v3906_v56, 0.0  ;;  %v3910_v18 = vadd.f32 %v3909_v42, %v3717_v14  ;;  %v3719_v57 = vadd.f32 %v3718_v22, %v3526_v55  ;;  %6201 = vmatprep.subr.bf16.mxu1 %v11068_v1  ;;  %v11074_v1 = vld [vmem:[#allocation4 + $0x284] ss:$20 sps:$4 sm:$0xff]  }
 0x336   : > { %v3720_v63 = vpop.f32.mrf.mxu1  ;;  %v3913_v11 = vpop.f32.mrf.mxu0  ;;  %v3534_v49 = vadd.f32 %v12882_v7, %v12977_v45  ;;  %v3536_v26 = vadd.f32 %v12891_v40, %v12983_v34  ;;  %v16262_v7 = vld [vmem:[#allocation123_spill] sm:$0xff] }
 0x337   : > { %16256 = vst [vmem:[#allocation51_spill] sm:$0xff] %v13161_v5  ;;  %v3912_v8 = vadd.f32 %v3911_v29, %v3719_v57  ;;  %v3721_v31 = vadd.f32 %v3720_v63, %v3528_v48  ;;  %v13165_v9 = vpack.c.bf16 %v4549_v23, %v4544_v16  ;;  %v16260_v48 = vld [vmem:[#allocation120_spill] sm:$0xff]  ;;  %v4553_v16 = vmax.f32 %v3910_v18, 0.0  ;;  %v16261_v23 = vld [vmem:[#allocation86_spill] sm:$0xff] }
 0x338   : > { %6202 = vmatpush1.bf16.msra.mxu1 %v11066_v59  ;;  %v3722_v54 = vpop.f32.mrf.mxu1  ;;  %v3915_v60 = vpop.f32.mrf.mxu0  ;;  %v16263_v57 = vld [vmem:[#allocation24_spill] sm:$0xff] }
 0x339   : > { %16258 = vst [vmem:[#allocation115_spill] sm:$0xff] %v13165_v9  ;;  %v3914_v42 = vadd.f32 %v3913_v11, %v3721_v31  ;;  %v3723_v55 = vadd.f32 %v3722_v54, %v3530_v4  ;;  %6203 = vmatprep.subr.bf16.mxu1 %v11071_v53  ;;  %v3538_v53 = vadd.f32 %v16263_v57, %v12977_v45  ;;  %v4554_v63 = vmax.f32 %v3912_v8, 0.0  ;;  %v11137_v8 = vld [vmem:[#allocation4 + $0x554] ss:$20 sps:$4 sm:$0xff]  }
 0x33a   : > { %v3726_v56 = vpop.f32.mrf.mxu1  ;;  %v3919_v14 = vpop.f32.mrf.mxu0  ;;  %10440 = vmatmul.mubr.bf16.gmra.mxu1 %v16259_v24  ;;  %6061 = vmatmul.mubr.bf16.gmra.mxu0 %v16260_v48  ;;  %v16270_v48 = vld [vmem:[#allocation88_spill] sm:$0xff] }
 0x33b   : > { %v4558_v22 = vmax.f32 %v3914_v42, 0.0  ;;  %v3916_v29 = vadd.f32 %v3915_v60, %v3723_v55  ;;  %v3727_v59 = vadd.f32 %v3726_v56, %v3534_v49  ;;  %10443 = vmatprep.mubr.bf16.mxu1 %v16261_v23  ;;  %6070 = vmatprep.mubr.bf16.mxu0 %v16262_v7  ;;  %v11077_v60 = vld [vmem:[#allocation4 + $0x4dc] ss:$20 sps:$4 sm:$0xff]   ;;  %v16265_v55 = vld [vmem:[#allocation21_spill] sm:$0xff] }
 0x33c   : > { %6204 = vmatpush1.bf16.msra.mxu1 %v11069_v21  ;;  %v3728_v40 = vpop.f32.mrf.mxu1  ;;  %v3921_v11 = vpop.f32.mrf.mxu0  ;;  %v3540_v56 = vadd.f32 %v16265_v55, %v12983_v34  ;;  %6394 = vmatprep.subr.bf16.mxu0 %v11137_v8  ;;  %v11078_v8 = vld [vmem:[#allocation4 + $0x4b0] ss:$20 sps:$4 sm:$0xff]  }
 0x33d   : > { %v13177_v4 = vpack.c.bf16 %v4558_v22, %v4553_v16  ;;  %v4559_v31 = vmax.f32 %v3916_v29, 0.0  ;;  %v3920_v54 = vadd.f32 %v3919_v14, %v3727_v59  ;;  %v3729_v18 = vadd.f32 %v3728_v40, %v3536_v26  ;;  %6205 = vmatprep.subr.bf16.mxu1 %v11074_v1  ;;  %v11075_v16 = vld [vmem:[#allocation4 + $0x4d8] ss:$20 sps:$4 sm:$0xff]   ;;  %v11135_v22 = vld [vmem:[#allocation4 + $0x550] ss:$20 sps:$4 sm:$0xff]  }
 0x33e   : > { %v3730_v49 = vpop.f32.mrf.mxu1  ;;  %v3923_v42 = vpop.f32.mrf.mxu0  ;;  %v3544_v26 = vadd.f32 %v12902_v58, %v12977_v45  ;;  %v11080_v29 = vld [vmem:[#allocation4 + $0x4b4] ss:$20 sps:$4 sm:$0xff]   ;;  %v16271_v58 = vld [vmem:[#allocation125_spill] sm:$0xff]  ;;  %6395 = vmatpush1.bf16.msra.mxu0 %v11135_v22 }
 0x33f   : > { %16264 = vst [vmem:[#allocation52_spill] sm:$0xff] %v13177_v4  ;;  %v3922_v24 = vadd.f32 %v3921_v11, %v3729_v18  ;;  %v3731_v23 = vadd.f32 %v3730_v49, %v3538_v53  ;;  %v13181_v57 = vpack.c.bf16 %v4559_v31, %v4554_v63  ;;  %v16267_v59 = vld [vmem:[#allocation26_spill] sm:$0xff]  ;;  %v16268_v11 = vld [vmem:[#allocation87_spill] sm:$0xff]  ;;  %v4563_v31 = vmax.f32 %v3920_v54, 0.0 }
 0x340   : > { %6206 = vmatpush1.bf16.msra.mxu1 %v11072_v61  ;;  %v3732_v21 = vpop.f32.mrf.mxu1  ;;  %v3925_v7 = vpop.f32.mrf.mxu0  ;;  %v3546_v40 = vadd.f32 %v16267_v59, %v12983_v34  ;;  %v16269_v61 = vld [vmem:[#allocation122_spill] sm:$0xff] }
 0x341   : > { %16266 = vst [vmem:[#allocation49_spill] sm:$0xff] %v13181_v57  ;;  %v3924_v1 = vadd.f32 %v3923_v42, %v3731_v23  ;;  %v3733_v14 = vadd.f32 %v3732_v21, %v3540_v56  ;;  %6207 = vmatprep.subr.bf16.mxu1 %v11077_v60  ;;  %v3548_v60 = vadd.f32 %v12916_v32, %v12977_v45  ;;  %v4564_v42 = vmax.f32 %v3922_v24, 0.0  ;;  %v11081_v22 = vld [vmem:[#allocation4 + $0x488] ss:$20 sps:$4 sm:$0xff]  }
 0x342   : > { %v3736_v53 = vpop.f32.mrf.mxu1  ;;  %v3929_v63 = vpop.f32.mrf.mxu0  ;;  %10444 = vmatmul.mubr.bf16.gmra.mxu1 %v16268_v11  ;;  %6071 = vmatmul.mubr.bf16.gmra.mxu0 %v16269_v61 }
 0x343   : > { %v4568_v18 = vmax.f32 %v3924_v1, 0.0  ;;  %v3926_v49 = vadd.f32 %v3925_v7, %v3733_v14  ;;  %v3737_v55 = vadd.f32 %v3736_v53, %v3544_v26  ;;  %10447 = vmatprep.mubr.bf16.mxu1 %v16270_v48  ;;  %6080 = vmatprep.mubr.bf16.mxu0 %v16271_v58  ;;  %v11083_v7 = vld [vmem:[#allocation4 + $0x48c] ss:$20 sps:$4 sm:$0xff]   ;;  %v16273_v14 = vld [vmem:[#allocation103_spill] sm:$0xff] }
 0x344   : > { %6208 = vmatpush2.bf16.msra.mxu1 %v11075_v16  ;;  %v3738_v56 = vpop.f32.mrf.mxu1  ;;  %v3931_v23 = vpop.f32.mrf.mxu0  ;;  %v3550_v53 = vadd.f32 %v16273_v14, %v12983_v34 }
 0x345   : > { %v13193_v21 = vpack.c.bf16 %v4568_v18, %v4563_v31  ;;  %v4569_v59 = vmax.f32 %v3926_v49, 0.0  ;;  %v3930_v54 = vadd.f32 %v3929_v63, %v3737_v55  ;;  %v3739_v1 = vadd.f32 %v3738_v56, %v3546_v40  ;;  %6209 = vmatprep.subr.bf16.mxu1 %v11080_v29  ;;  %v16275_v31 = vld [vmem:[#allocation28_spill] sm:$0xff]  ;;  %v16276_v49 = vld [vmem:[#allocation30_spill] sm:$0xff] }
 0x346   : > { %v3740_v26 = vpop.f32.mrf.mxu1  ;;  %v3933_v48 = vpop.f32.mrf.mxu0  ;;  %v3554_v18 = vadd.f32 %v16275_v31, %v12977_v45  ;;  %v11086_v29 = vld [vmem:[#allocation4 + $0x464] ss:$20 sps:$4 sm:$0xff]   ;;  %v3556_v55 = vadd.f32 %v16276_v49, %v12983_v34  ;;  %v16280_v31 = vld [vmem:[#allocation15_spill] sm:$0xff] }
 0x347   : > { %16272 = vst [vmem:[#allocation54_spill] sm:$0xff] %v13193_v21  ;;  %v3932_v11 = vadd.f32 %v3931_v23, %v3739_v1  ;;  %v3741_v32 = vadd.f32 %v3740_v26, %v3548_v60  ;;  %v13197_v24 = vpack.c.bf16 %v4569_v59, %v4564_v42  ;;  %v16277_v23 = vld [vmem:[#allocation89_spill] sm:$0xff]  ;;  %v16278_v60 = vld [vmem:[#allocation124_spill] sm:$0xff]  ;;  %v4573_v42 = vmax.f32 %v3930_v54, 0.0  ;;  %v16279_v26 = vld [vmem:[#allocation90_spill] sm:$0xff] }
 0x348   : > { %6210 = vmatpush2.bf16.msra.mxu1 %v11078_v8  ;;  %v3742_v16 = vpop.f32.mrf.mxu1  ;;  %v3935_v58 = vpop.f32.mrf.mxu0 }
 0x349   : > { %16274 = vst [vmem:[#allocation55_spill] sm:$0xff] %v13197_v24  ;;  %v3934_v63 = vadd.f32 %v3933_v48, %v3741_v32  ;;  %v3743_v40 = vadd.f32 %v3742_v16, %v3550_v53  ;;  %6211 = vmatprep.subr.bf16.mxu1 %v11083_v7  ;;  %v3558_v7 = vadd.f32 %v12936_v52, %v12977_v45  ;;  %v4574_v48 = vmax.f32 %v3932_v11, 0.0  ;;  %v11084_v16 = vld [vmem:[#allocation4 + $0x460] ss:$20 sps:$4 sm:$0xff]  }
 0x34a   : > { %v3746_v56 = vpop.f32.mrf.mxu1  ;;  %v3939_v14 = vpop.f32.mrf.mxu0  ;;  %10448 = vmatmul.mubr.bf16.gmra.mxu1 %v16277_v23  ;;  %6081 = vmatmul.mubr.bf16.gmra.mxu0 %v16278_v60  ;;  %v11152_v11 = vld [vmem:[#allocation4 + $0x52c] ss:$20 sps:$4 sm:$0xff]  }
 0x34b   : > { %v4578_v8 = vmax.f32 %v3934_v63, 0.0  ;;  %v3936_v59 = vadd.f32 %v3935_v58, %v3743_v40  ;;  %v3747_v1 = vadd.f32 %v3746_v56, %v3554_v18  ;;  %10451 = vmatprep.mubr.bf16.mxu1 %v16279_v26  ;;  %6090 = vmatprep.mubr.bf16.mxu0 %v16280_v31  ;;  %v11089_v58 = vld [vmem:[#allocation4 + $0x43c] ss:$20 sps:$4 sm:$0xff]  }
 0x34c   : > { %6212 = vmatpush2.bf16.msra.mxu1 %v11081_v22  ;;  %v3748_v53 = vpop.f32.mrf.mxu1  ;;  %v3941_v32 = vpop.f32.mrf.mxu0  ;;  %v16282_v40 = vld [vmem:[#allocation104_spill] sm:$0xff]  ;;  %6396 = vmatprep.subr.bf16.mxu0 %v11152_v11 }
 0x34d   : > { %v13209_v49 = vpack.c.bf16 %v4578_v8, %v4573_v42  ;;  %v4579_v23 = vmax.f32 %v3936_v59, 0.0  ;;  %v3940_v60 = vadd.f32 %v3939_v14, %v3747_v1  ;;  %v3749_v54 = vadd.f32 %v3748_v53, %v3556_v55  ;;  %6213 = vmatprep.subr.bf16.mxu1 %v11086_v29  ;;  %v11087_v42 = vld [vmem:[#allocation4 + $0x438] ss:$20 sps:$4 sm:$0xff]   ;;  %v11150_v8 = vld [vmem:[#allocation4 + $0x528] ss:$20 sps:$4 sm:$0xff]   ;;  %v16284_v14 = vld [vmem:[#allocation105_spill] sm:$0xff] }
 0x34e   : > { %v3750_v18 = vpop.f32.mrf.mxu1  ;;  %v3943_v63 = vpop.f32.mrf.mxu0  ;;  %v3560_v56 = vadd.f32 %v16282_v40, %v12983_v34  ;;  %v3564_v55 = vadd.f32 %v16284_v14, %v12977_v45  ;;  %v11092_v1 = vld [vmem:[#allocation4 + $0x414] ss:$20 sps:$4 sm:$0xff]   ;;  %v16285_v53 = vld [vmem:[#allocation29_spill] sm:$0xff]  ;;  %6397 = vmatpush1.bf16.msra.mxu0 %v11150_v8 }
 0x34f   : > { %16281 = vst [vmem:[#allocation56_spill] sm:$0xff] %v13209_v49  ;;  %v3942_v26 = vadd.f32 %v3941_v32, %v3749_v54  ;;  %v3751_v31 = vadd.f32 %v3750_v18, %v3558_v7  ;;  %v13213_v52 = vpack.c.bf16 %v4579_v23, %v4574_v48  ;;  %v3566_v32 = vadd.f32 %v16285_v53, %v12983_v34  ;;  %v16286_v23 = vld [vmem:[#allocation91_spill] sm:$0xff]  ;;  %v11093_v8 = vld [vmem:[#allocation4 + $0x3e8] ss:$20 sps:$4 sm:$0xff]  }
 0x350   : > { %6214 = vmatpush2.bf16.msra.mxu1 %v11084_v16  ;;  %v3752_v22 = vpop.f32.mrf.mxu1  ;;  %v3945_v61 = vpop.f32.mrf.mxu0  ;;  %v16287_v16 = vld [vmem:[#allocation128_spill] sm:$0xff]  ;;  %v4583_v54 = vmax.f32 %v3940_v60, 0.0 }
 0x351   : > { %16283 = vst [vmem:[#allocation58_spill] sm:$0xff] %v13213_v52  ;;  %v3944_v29 = vadd.f32 %v3943_v63, %v3751_v31  ;;  %v3753_v59 = vadd.f32 %v3752_v22, %v3560_v56  ;;  %6215 = vmatprep.subr.bf16.mxu1 %v11089_v58  ;;  %v16289_v31 = vld [vmem:[#allocation97_spill] sm:$0xff]  ;;  %v3568_v58 = vadd.f32 %v12956_v33, %v12977_v45  ;;  %v4584_v63 = vmax.f32 %v3942_v26, 0.0 }
 0x352   : > { %v3756_v7 = vpop.f32.mrf.mxu1  ;;  %v3949_v48 = vpop.f32.mrf.mxu0  ;;  %10452 = vmatmul.mubr.bf16.gmra.mxu1 %v16286_v23  ;;  %6091 = vmatmul.mubr.bf16.gmra.mxu0 %v16287_v16  ;;  %v11090_v22 = vld [vmem:[#allocation4 + $0x410] ss:$20 sps:$4 sm:$0xff]  }
 0x353   : > { %v4588_v18 = vmax.f32 %v3944_v29, 0.0  ;;  %v3946_v40 = vadd.f32 %v3945_v61, %v3753_v59  ;;  %v3757_v25 = vadd.f32 %v3756_v7, %v3564_v55  ;;  %10455 = vmatprep.mubr.bf16.mxu1 %v16288_v39  ;;  %6100 = vmatprep.mubr.bf16.mxu0 %v16289_v31  ;;  %v11095_v61 = vld [vmem:[#allocation4 + $0x3ec] ss:$20 sps:$4 sm:$0xff]   ;;  %v16291_v59 = vld [vmem:[#allocation35_spill] sm:$0xff] }
 0x354   : > { %6216 = vmatpush2.bf16.msra.mxu1 %v11087_v42  ;;  %v3758_v56 = vpop.f32.mrf.mxu1  ;;  %v3951_v11 = vpop.f32.mrf.mxu0  ;;  %v3570_v7 = vadd.f32 %v16291_v59, %v12983_v34  ;;  %v11096_v59 = vld [vmem:[#allocation4 + $0x3c0] ss:$20 sps:$4 sm:$0xff]  }
 0x355   : > { %v13225_v14 = vpack.c.bf16 %v4588_v18, %v4583_v54  ;;  %v4589_v53 = vmax.f32 %v3946_v40, 0.0  ;;  %v3950_v60 = vadd.f32 %v3949_v48, %v3757_v25  ;;  %v3759_v29 = vadd.f32 %v3758_v56, %v3566_v32  ;;  %6217 = vmatprep.subr.bf16.mxu1 %v11092_v1  ;;  %v11098_v1 = vld [vmem:[#allocation4 + $0x3c4] ss:$20 sps:$4 sm:$0xff]  }
 0x356   : > { %v3760_v55 = vpop.f32.mrf.mxu1  ;;  %v3953_v39 = vpop.f32.mrf.mxu0  ;;  %v3574_v54 = vadd.f32 %v12962_v19, %v12977_v45  ;;  %v3576_v48 = vadd.f32 %v12971_v27, %v12983_v34  ;;  %v16293_v56 = vld [vmem:[#allocation93_spill] sm:$0xff]  ;;  %v16296_v19 = vld [vmem:[#allocation108_spill] sm:$0xff] }
 0x357   : > { %16290 = vst [vmem:[#allocation59_spill] sm:$0xff] %v13225_v14  ;;  %v3952_v23 = vadd.f32 %v3951_v11, %v3759_v29  ;;  %v3761_v33 = vadd.f32 %v3760_v55, %v3568_v58  ;;  %v13229_v26 = vpack.c.bf16 %v4589_v53, %v4584_v63  ;;  %v16294_v58 = vld [vmem:[#allocation96_spill] sm:$0xff]  ;;  %v4593_v63 = vmax.f32 %v3950_v60, 0.0  ;;  %v16295_v29 = vld [vmem:[#allocation19_spill] sm:$0xff] }
 0x358   : > { %6218 = vmatpush2.bf16.msra.mxu1 %v11090_v22  ;;  %v3762_v42 = vpop.f32.mrf.mxu1  ;;  %v3955_v31 = vpop.f32.mrf.mxu0 }
 0x359   : > { %16292 = vst [vmem:[#allocation60_spill] sm:$0xff] %v13229_v26  ;;  %v3954_v25 = vadd.f32 %v3953_v39, %v3761_v33  ;;  %v3763_v32 = vadd.f32 %v3762_v42, %v3570_v7  ;;  %6219 = vmatprep.subr.bf16.mxu1 %v11095_v61  ;;  %v3578_v61 = vadd.f32 %v16296_v19, %v12977_v45  ;;  %v4594_v55 = vmax.f32 %v3952_v23, 0.0  ;;  %v11167_v23 = vld [vmem:[#allocation4 + $0x504] ss:$20 sps:$4 sm:$0xff]  }
 0x35a   : > { %v3766_v18 = vpop.f32.mrf.mxu1  ;;  %v3959_v40 = vpop.f32.mrf.mxu0  ;;  %10456 = vmatmul.mubr.bf16.gmra.mxu1 %v16293_v56  ;;  %6101 = vmatmul.mubr.bf16.gmra.mxu0 %v16294_v58 }
 0x35b   : > { %v4598_v11 = vmax.f32 %v3954_v25, 0.0  ;;  %v3956_v22 = vadd.f32 %v3955_v31, %v3763_v32  ;;  %v3767_v53 = vadd.f32 %v3766_v18, %v3574_v54  ;;  %6110 = vmatprep.mubr.bf16.mxu0 %v16295_v29  ;;  %6223 = vmatprep.mubr.bf16.mxu1 %v13021_v41  ;;  %v11113_v31 = vld [vmem:[#allocation4 + $0x124] ss:$20 sps:$4 sm:$0xff]  }
 0x35c   : > { %6220 = vmatpush2.bf16.msra.mxu1 %v11093_v8  ;;  %v3768_v27 = vpop.f32.mrf.mxu1  ;;  %v3961_v39 = vpop.f32.mrf.mxu0  ;;  %v16298_v32 = vld [vmem:[#allocation36_spill] sm:$0xff]  ;;  %6398 = vmatprep.subr.bf16.mxu0 %v11167_v23 }
 0x35d   : > { %v13241_v7 = vpack.c.bf16 %v4598_v11, %v4593_v63  ;;  %v4599_v33 = vmax.f32 %v3956_v22, 0.0  ;;  %v3960_v42 = vadd.f32 %v3959_v40, %v3767_v53  ;;  %v3769_v60 = vadd.f32 %v3768_v27, %v3576_v48  ;;  %6221 = vmatprep.subr.bf16.mxu1 %v11098_v1  ;;  %v11111_v63 = vld [vmem:[#allocation4 + $0x120] ss:$20 sps:$4 sm:$0xff]   ;;  %v11116_v48 = vld [vmem:[#allocation4 + $0xfc] ss:$20 sps:$4 sm:$0xff]   ;;  %v16300_v27 = vld [vmem:[#allocation98_spill] sm:$0xff] }
 0x35e   : > { %v3770_v54 = vpop.f32.mrf.mxu1  ;;  %v3963_v25 = vpop.f32.mrf.mxu0  ;;  %v3580_v18 = vadd.f32 %v16298_v32, %v12983_v34  ;;  %v11165_v1 = vld [vmem:[#allocation4 + $0x500] ss:$20 sps:$4 sm:$0xff]  }
 0x35f   : > { %16297 = vst [vmem:[#allocation62_spill] sm:$0xff] %v13241_v7  ;;  %v3962_v56 = vadd.f32 %v3961_v39, %v3769_v60  ;;  %v3771_v41 = vadd.f32 %v3770_v54, %v3578_v61  ;;  %v13245_v45 = vpack.c.bf16 %v4599_v33, %v4594_v55  ;;  %v4603_v34 = vmax.f32 %v3960_v42, 0.0  ;;  %v16301_v55 = vld [vmem:[#allocation22_spill] sm:$0xff]  ;;  %6399 = vmatpush1.bf16.msra.mxu0 %v11165_v1 }
 0x360   : > { %6222 = vmatpush2.bf16.msra.mxu1 %v11096_v59  ;;  %v3772_v8 = vpop.f32.mrf.mxu1  ;;  %v3965_v19 = vpop.f32.mrf.mxu0  ;;  %v16302_v59 = vld [vmem:[#allocation73_spill] sm:$0xff]  ;;  %v11114_v42 = vld [vmem:[#allocation4 + $0xf8] ss:$20 sps:$4 sm:$0xff]  }
 0x361   : > { %16299 = vst [vmem:[#allocation63_spill] sm:$0xff] %v13245_v45  ;;  %v3964_v11 = vadd.f32 %v3963_v25, %v3771_v41  ;;  %v3773_v22 = vadd.f32 %v3772_v8, %v3580_v18  ;;  %6577 = vmatprep.subr.bf16.mxu1 %v11113_v31  ;;  %v11325_v41 = vld [vmem:[%s15680_s4] sm:$0x1f]  ;;  %v4604_v60 = vmax.f32 %v3962_v56, 0.0  ;;  %v11119_v8 = vld [vmem:[#allocation4 + $0xd4] ss:$20 sps:$4 sm:$0xff]  }
 0x362   : > { %v9635_v40 = vpop.f32.mrf.mxu1  ;;  %v9747_v53 = vpop.f32.mrf.mxu0  ;;  %6111 = vmatmul.mubr.bf16.gmra.mxu0 %v16300_v27  ;;  %v13254_v33 = vrot.slane %v11325_v41, %v16302_v59 }
 0x363   : > { %v4608_v39 = vmax.f32 %v3964_v11, 0.0  ;;  %v3966_v61 = vadd.f32 %v3965_v19, %v3773_v22  ;;  %6224 = vmatmul.mubr.bf16.vlgmr.msra.gmra.mxu1 %v13017_v44  ;;  %6120 = vmatprep.mubr.bf16.mxu0 %v16301_v55 }
 0x364   : > { %6233 = vmatprep.mubr.bf16.mxu1 %v13037_v47  ;;  %v9636_v31 = vpop.f32.mrf.mxu1  ;;  %v9748_v54 = vpop.f32.mrf.mxu0  ;;  %6578 = vmatpush1.bf16.msra.mxu1 %v11111_v63  ;;  %v11117_v47 = vld [vmem:[#allocation4 + $0xd0] ss:$20 sps:$4 sm:$0xff]  }
 0x365   : > { %v13257_v25 = vpack.c.bf16 %v4608_v39, %v4603_v34  ;;  %v4609_v32 = vmax.f32 %v3966_v61, 0.0  ;;  %v9637_v18 = vadd.f32 %v9636_v31, %v9635_v40  ;;  %v9749_v23 = vadd.f32 %v9748_v54, %v9747_v53  ;;  %6579 = vmatprep.subr.bf16.mxu1 %v11116_v48  ;;  %v11125_v34 = vld [vmem:[#allocation4 + $0xac] ss:$20 sps:$4 sm:$0xff]   ;;  %v16305_v53 = vld [vmem:[#allocation99_spill] sm:$0xff] }
 0x366   : > { %v9638_v19 = vpop.f32.mrf.mxu1  ;;  %v9750_v11 = vpop.f32.mrf.mxu0  ;;  %v16306_v61 = vld [vmem:[#allocation101_spill] sm:$0xff] }
 0x367   : > { %16303 = vst [vmem:[#allocation64_spill] sm:$0xff] %v13257_v25  ;;  %v4003_v22 = vadd.f32 %v9637_v18, %v13254_v33  ;;  %v13260_v41 = vpack.c.bf16 %v4609_v32, %v4604_v60  ;;  %v11128_v32 = vld [vmem:[#allocation4 + $0x84] ss:$20 sps:$4 sm:$0xff]  }
 0x368   : > { %v9639_v56 = vpop.f32.mrf.mxu1  ;;  %v9751_v59 = vpop.f32.mrf.mxu0  ;;  %6580 = vmatpush1.bf16.msra.mxu1 %v11114_v42 }
 0x369   : > { %16304 = vst [vmem:[#allocation61_spill] sm:$0xff] %v13260_v41  ;;  %v9640_v63 = vadd.f32 %v9639_v56, %v9638_v19  ;;  %v9752_v44 = vadd.f32 %v9751_v59, %v9750_v11  ;;  %6581 = vmatprep.subr.bf16.mxu1 %v11119_v8  ;;  %v13262_v39 = vadd.f32 %v9749_v23, %v4003_v22  ;;  %v11123_v59 = vld [vmem:[#allocation4 + $0xa8] ss:$20 sps:$4 sm:$0xff]   ;;  %v11126_v56 = vld [vmem:[#allocation4 + $0x80] ss:$20 sps:$4 sm:$0xff]  }
 0x36a   : > { %v9641_v40 = vpop.f32.mrf.mxu1  ;;  %v9753_v48 = vpop.f32.mrf.mxu0  ;;  %6121 = vmatmul.mubr.bf16.gmra.mxu0 %v16305_v53 }
 0x36b   : > { %v4006_v1 = vadd.f32 %v9640_v63, %v13254_v33  ;;  %6234 = vmatmul.mubr.bf16.gmra.mxu1 %v13033_v20  ;;  %6130 = vmatprep.mubr.bf16.mxu0 %v16306_v61  ;;  %v11131_v20 = vld [vmem:[#allocation4 + $0x5c] ss:$20 sps:$4 sm:$0xff]  }
 0x36c   : > { %6243 = vmatprep.mubr.bf16.mxu1 %v13053_v37  ;;  %v9642_v60 = vpop.f32.mrf.mxu1  ;;  %v9754_v31 = vpop.f32.mrf.mxu0  ;;  %6582 = vmatpush1.bf16.msra.mxu1 %v11117_v47 }
 0x36d   : > { %v9643_v54 = vadd.f32 %v9642_v60, %v9641_v40  ;;  %v9755_v42 = vadd.f32 %v9754_v31, %v9753_v48  ;;  %6583 = vmatprep.subr.bf16.mxu1 %v11125_v34  ;;  %v13269_v18 = vadd.f32 %v9752_v44, %v4006_v1  ;;  %v16307_v34 = vld [vmem:[#allocation100_spill] sm:$0xff]  ;;  %v16308_v1 = vld [vmem:[#allocation27_spill] sm:$0xff] }
 0x36e   : > { %v9644_v23 = vpop.f32.mrf.mxu1  ;;  %v9756_v8 = vpop.f32.mrf.mxu0  ;;  %v11173_v60 = vld [vmem:[#allocation4 + $0x3a4] ss:$20 sps:$4 sm:$0xff]  }
 0x36f   : > { %v4011_v19 = vadd.f32 %v9643_v54, %v13254_v33  ;;  %v11129_v54 = vld [vmem:[#allocation4 + $0x58] ss:$20 sps:$4 sm:$0xff]   ;;  %6770 = vmatprep.subr.bf16.mxu0 %v11173_v60 }
 0x370   : > { %v9645_v11 = vpop.f32.mrf.mxu1  ;;  %v9757_v22 = vpop.f32.mrf.mxu0  ;;  %6584 = vmatpush1.bf16.msra.mxu1 %v11123_v59 }
 0x371   : > { %v9646_v63 = vadd.f32 %v9645_v11, %v9644_v23  ;;  %v9758_v37 = vadd.f32 %v9757_v22, %v9756_v8  ;;  %6585 = vmatprep.subr.bf16.mxu1 %v11128_v32  ;;  %v13272_v47 = vadd.f32 %v9755_v42, %v4011_v19  ;;  %v11134_v23 = vld [vmem:[#allocation4 + $0x34] ss:$20 sps:$4 sm:$0xff]  }
 0x372   : > { %v9647_v40 = vpop.f32.mrf.mxu1  ;;  %v9759_v48 = vpop.f32.mrf.mxu0  ;;  %6131 = vmatmul.mubr.bf16.gmra.mxu0 %v16307_v34 }
 0x373   : > { %v4014_v44 = vadd.f32 %v9646_v63, %v13254_v33  ;;  %6244 = vmatmul.mubr.bf16.gmra.mxu1 %v13049_v0  ;;  %6140 = vmatprep.mubr.bf16.mxu0 %v16308_v1  ;;  %v11132_v1 = vld [vmem:[#allocation4 + $0x30] ss:$20 sps:$4 sm:$0xff]  }
 0x374   : > { %6253 = vmatprep.mubr.bf16.mxu1 %v13069_v38  ;;  %v9648_v31 = vpop.f32.mrf.mxu1  ;;  %v9760_v59 = vpop.f32.mrf.mxu0  ;;  %6586 = vmatpush1.bf16.msra.mxu1 %v11126_v56  ;;  %v11140_v56 = vld [vmem:[#allocation4 + $0xc] ss:$20 sps:$4 sm:$0xff]  }
 0x375   : > { %v9649_v32 = vadd.f32 %v9648_v31, %v9647_v40  ;;  %v9761_v42 = vadd.f32 %v9760_v59, %v9759_v48  ;;  %6587 = vmatprep.subr.bf16.mxu1 %v11131_v20  ;;  %v13279_v8 = vadd.f32 %v9758_v37, %v4014_v44  ;;  %v16309_v48 = vld [vmem:[#allocation102_spill] sm:$0xff]  ;;  %v16310_v44 = vld [vmem:[#allocation31_spill] sm:$0xff] }
 0x376   : > { %v9650_v19 = vpop.f32.mrf.mxu1  ;;  %v9762_v11 = vpop.f32.mrf.mxu0 }
 0x377   : > { %v4019_v22 = vadd.f32 %v9649_v32, %v13254_v33  ;;  %v11143_v32 = vld [vmem:[#allocation4 + $0x264] ss:$20 sps:$4 sm:$0xff]  }
 0x378   : > { %v9651_v63 = vpop.f32.mrf.mxu1  ;;  %v9763_v0 = vpop.f32.mrf.mxu0  ;;  %6588 = vmatpush1.bf16.msra.mxu1 %v11129_v54 }
 0x379   : > { %v9652_v38 = vadd.f32 %v9651_v63, %v9650_v19  ;;  %v9764_v34 = vadd.f32 %v9763_v0, %v9762_v11  ;;  %6589 = vmatprep.subr.bf16.mxu1 %v11134_v23  ;;  %v13282_v61 = vadd.f32 %v9761_v42, %v4019_v22  ;;  %v11138_v0 = vld [vmem:[#allocation4 + $0x8] ss:$20 sps:$4 sm:$0xff]   ;;  %v11141_v63 = vld [vmem:[#allocation4 + $0x260] ss:$20 sps:$4 sm:$0xff]  }
 0x37a   : > { %v9653_v40 = vpop.f32.mrf.mxu1  ;;  %v9765_v20 = vpop.f32.mrf.mxu0  ;;  %6141 = vmatmul.mubr.bf16.gmra.mxu0 %v16309_v48 }
 0x37b   : > { %v4022_v37 = vadd.f32 %v9652_v38, %v13254_v33  ;;  %6254 = vmatmul.mubr.bf16.gmra.mxu1 %v13065_v50  ;;  %6150 = vmatprep.mubr.bf16.mxu0 %v16310_v44  ;;  %v11146_v44 = vld [vmem:[#allocation4 + $0x23c] ss:$20 sps:$4 sm:$0xff]  }
 0x37c   : > { %6263 = vmatprep.mubr.bf16.mxu1 %v13085_v51  ;;  %v9654_v60 = vpop.f32.mrf.mxu1  ;;  %v9766_v31 = vpop.f32.mrf.mxu0  ;;  %6590 = vmatpush1.bf16.msra.mxu1 %v11132_v1 }
 0x37d   : > { %v9655_v59 = vadd.f32 %v9654_v60, %v9653_v40  ;;  %v9767_v54 = vadd.f32 %v9766_v31, %v9765_v20  ;;  %6591 = vmatprep.subr.bf16.mxu1 %v11140_v56  ;;  %v13289_v42 = vadd.f32 %v9764_v34, %v4022_v37  ;;  %v16311_v56 = vld [vmem:[#allocation25_spill] sm:$0xff]  ;;  %v16312_v37 = vld [vmem:[#allocation34_spill] sm:$0xff] }
 0x37e   : > { %v9656_v23 = vpop.f32.mrf.mxu1  ;;  %v9768_v19 = vpop.f32.mrf.mxu0 }
 0x37f   : > { %v4027_v38 = vadd.f32 %v9655_v59, %v13254_v33 }
 0x380   : > { %v9657_v11 = vpop.f32.mrf.mxu1  ;;  %v9769_v22 = vpop.f32.mrf.mxu0  ;;  %6592 = vmatpush1.bf16.msra.mxu1 %v11138_v0  ;;  %v11144_v0 = vld [vmem:[#allocation4 + $0x238] ss:$20 sps:$4 sm:$0xff]  }
 0x381   : > { %v9658_v50 = vadd.f32 %v9657_v11, %v9656_v23  ;;  %v9770_v51 = vadd.f32 %v9769_v22, %v9768_v19  ;;  %6593 = vmatprep.subr.bf16.mxu1 %v11143_v32  ;;  %v13292_v1 = vadd.f32 %v9767_v54, %v4027_v38  ;;  %v11149_v54 = vld [vmem:[#allocation4 + $0x214] ss:$20 sps:$4 sm:$0xff]   ;;  %v11147_v11 = vld [vmem:[#allocation4 + $0x210] ss:$20 sps:$4 sm:$0xff]  }
 0x382   : > { %v9659_v40 = vpop.f32.mrf.mxu1  ;;  %v13294_v20 = vpop.f32.mrf.mxu0  ;;  %6151 = vmatmul.mubr.bf16.gmra.mxu0 %v16311_v56 }
 0x383   : > { %v4030_v34 = vadd.f32 %v9658_v50, %v13254_v33  ;;  %6264 = vmatmul.mubr.bf16.gmra.mxu1 %v13081_v28  ;;  %6160 = vmatprep.mubr.bf16.mxu0 %v16312_v37 }
 0x384   : > { %6273 = vmatprep.mubr.bf16.mxu1 %v13101_v10  ;;  %v9660_v60 = vpop.f32.mrf.mxu1  ;;  %v13301_v31 = vpop.f32.mrf.mxu0  ;;  %6594 = vmatpush2.bf16.msra.mxu1 %v11141_v63  ;;  %v11155_v10 = vld [vmem:[#allocation4 + $0x1ec] ss:$20 sps:$4 sm:$0xff]  }
 0x385   : > { %v13303_v59 = vadd.f32 %v9660_v60, %v9659_v40  ;;  %6595 = vmatprep.subr.bf16.mxu1 %v11146_v44  ;;  %v13305_v32 = vadd.f32 %v9770_v51, %v4030_v34  ;;  %v16313_v40 = vld [vmem:[#allocation32_spill] sm:$0xff]  ;;  %v16314_v51 = vld [vmem:[#allocation107_spill] sm:$0xff] }
 0x386   : > { %v9662_v23 = vpop.f32.mrf.mxu1  ;;  %v13307_v19 = vpop.f32.mrf.mxu0  ;;  %v11153_v60 = vld [vmem:[#allocation4 + $0x1e8] ss:$20 sps:$4 sm:$0xff]  }
 0x388   : > { %v9663_v50 = vpop.f32.mrf.mxu1  ;;  %v13309_v38 = vpop.f32.mrf.mxu0  ;;  %6596 = vmatpush2.bf16.msra.mxu1 %v11144_v0 }
 0x389   : > { %v13311_v22 = vadd.f32 %v9663_v50, %v9662_v23  ;;  %6597 = vmatprep.subr.bf16.mxu1 %v11149_v54  ;;  %v11158_v54 = vld [vmem:[#allocation4 + $0x1c4] ss:$20 sps:$4 sm:$0xff]  }
 0x38a   : > { %v9665_v63 = vpop.f32.mrf.mxu1  ;;  %v13313_v28 = vpop.f32.mrf.mxu0  ;;  %6161 = vmatmul.mubr.bf16.gmra.mxu0 %v16313_v40 }
 0x38b   : > { %6274 = vmatmul.mubr.bf16.gmra.mxu1 %v13097_v13  ;;  %6170 = vmatprep.mubr.bf16.mxu0 %v16314_v51  ;;  %v11156_v13 = vld [vmem:[#allocation4 + $0x1c0] ss:$20 sps:$4 sm:$0xff]  }
 0x38c   : > { %6283 = vmatprep.mubr.bf16.mxu1 %v13117_v6  ;;  %v9666_v44 = vpop.f32.mrf.mxu1  ;;  %v13319_v34 = vpop.f32.mrf.mxu0  ;;  %6598 = vmatpush2.bf16.msra.mxu1 %v11147_v11  ;;  %v11161_v6 = vld [vmem:[#allocation4 + $0x19c] ss:$20 sps:$4 sm:$0xff]   ;;  %v16315_v11 = vld [vmem:[#allocation106_spill] sm:$0xff] }
 0x38d   : > { %v13321_v0 = vadd.f32 %v9666_v44, %v9665_v63  ;;  %6599 = vmatprep.subr.bf16.mxu1 %v11155_v10  ;;  %v11159_v44 = vld [vmem:[#allocation4 + $0x198] ss:$20 sps:$4 sm:$0xff]  }
 0x38e   : > { %v9668_v23 = vpop.f32.mrf.mxu1  ;;  %v13323_v50 = vpop.f32.mrf.mxu0 }
 0x390   : > { %v9669_v37 = vpop.f32.mrf.mxu1  ;;  %v13325_v40 = vpop.f32.mrf.mxu0  ;;  %6600 = vmatpush2.bf16.msra.mxu1 %v11153_v60  ;;  %v11164_v60 = vld [vmem:[#allocation4 + $0x174] ss:$20 sps:$4 sm:$0xff]  }
 0x391   : > { %v13327_v51 = vadd.f32 %v9669_v37, %v9668_v23  ;;  %6601 = vmatprep.subr.bf16.mxu1 %v11158_v54 }
 0x392   : > { %v9671_v56 = vpop.f32.mrf.mxu1  ;;  %v13329_v48 = vpop.f32.mrf.mxu0  ;;  %6171 = vmatmul.mubr.bf16.gmra.mxu0 %v16315_v11 }
 0x393   : > { %6284 = vmatmul.mubr.bf16.gmra.mxu1 %v13113_v36  ;;  %6180 = vmatprep.mubr.bf16.mxu0 %v13003_v3  ;;  %v11162_v36 = vld [vmem:[#allocation4 + $0x170] ss:$20 sps:$4 sm:$0xff]  }
 0x394   : > { %6293 = vmatprep.mubr.bf16.mxu1 %v13133_v43  ;;  %v9672_v10 = vpop.f32.mrf.mxu1  ;;  %v13335_v63 = vpop.f32.mrf.mxu0  ;;  %6602 = vmatpush2.bf16.msra.mxu1 %v11156_v13  ;;  %v11170_v43 = vld [vmem:[#allocation4 + $0x14c] ss:$20 sps:$4 sm:$0xff]  }
 0x395   : > { %v13337_v37 = vadd.f32 %v9672_v10, %v9671_v56  ;;  %6603 = vmatprep.subr.bf16.mxu1 %v11161_v6  ;;  %v16318_v13 = vld [vmem:[#allocation33_spill] sm:$0xff]  ;;  %v16319_v6 = vmov 0  }
 0x396   : > { %v9674_v54 = vpop.f32.mrf.mxu1  ;;  %v13339_v23 = vpop.f32.mrf.mxu0 }
 0x397   : > { %16316 = vst [vmem:[#allocation66_spill] sm:$0xff] %v13339_v23 }
 0x398   : > { %v9675_v53 = vpop.f32.mrf.mxu1  ;;  %v13341_v11 = vpop.f32.mrf.mxu0  ;;  %6604 = vmatpush2.bf16.msra.mxu1 %v11159_v44  ;;  %v11168_v44 = vld [vmem:[#allocation4 + $0x148] ss:$20 sps:$4 sm:$0xff]  }
 0x399   : > { %16317 = vst [vmem:[#allocation67_spill] sm:$0xff] %v13341_v11  ;;  %v13343_v3 = vadd.f32 %v9675_v53, %v9674_v54  ;;  %6605 = vmatprep.subr.bf16.mxu1 %v11164_v60 }
 0x39a   : > { %v9677_v55 = vpop.f32.mrf.mxu1  ;;  %v13345_v27 = vpop.f32.mrf.mxu0  ;;  %6181 = vmatmul.mubr.bf16.gmra.mxu0 %v16318_v13 }
 0x39b   : > { %6294 = vmatmul.mubr.bf16.gmra.mxu1 %v13129_v46  ;;  %6416 = vmatprep.mubr.bf16.mxu0 %v16319_v6 }
 0x39c   : > { %6303 = vmatprep.mubr.bf16.mxu1 %v13149_v30  ;;  %v9678_v56 = vpop.f32.mrf.mxu1  ;;  %v13351_v10 = vpop.f32.mrf.mxu0  ;;  %6606 = vmatpush2.bf16.msra.mxu1 %v11162_v36 }
 0x39d   : > { %v13353_v53 = vadd.f32 %v9678_v56, %v9677_v55  ;;  %6607 = vmatprep.subr.bf16.mxu1 %v11170_v43 }
 0x39e   : > { %v9680_v60 = vpop.f32.mrf.mxu1  ;;  %v13355_v54 = vpop.f32.mrf.mxu0 }
 0x3a0   : > { %v9681_v29 = vpop.f32.mrf.mxu1  ;;  %v13357_v58 = vpop.f32.mrf.mxu0  ;;  %6608 = vmatpush2.bf16.msra.mxu1 %v11168_v44 }
 0x3a1   : > { %v13359_v46 = vadd.f32 %v9681_v29, %v9680_v60 }
 0x3a2   : > { %v9683_v13 = vpop.f32.mrf.mxu1  ;;  %v13361_v16 = vpop.f32.mrf.mxu0 }
 0x3a3   : > { %16320 = vst [vmem:[#allocation68_spill] sm:$0xff] %v13361_v16  ;;  %6304 = vmatmul.mubr.bf16.gmra.mxu1 %v13145_v15 }
 0x3a4   : > { %6313 = vmatprep.mubr.bf16.mxu1 %v13165_v9  ;;  %v9684_v36 = vpop.f32.mrf.mxu1  ;;  %v13365_v55 = vpop.f32.mrf.mxu0 }
 0x3a5   : > { %16321 = vst [vmem:[#allocation65_spill] sm:$0xff] %v13365_v55  ;;  %v13367_v43 = vadd.f32 %v9684_v36, %v9683_v13  ;;  %v11197_v13 = vld [vmem:[#allocation4 + $0x624] ss:$20 sps:$4 sm:$0xff]  }
 0x3a6   : > { %v9686_v56 = vpop.f32.mrf.mxu1  ;;  %v13369_v30 = vpop.f32.mrf.mxu0  ;;  %6963 = vmatprep.subr.bf16.mxu1 %v11197_v13 }
 0x3a7   : > { %16322 = vst [vmem:[#allocation70_spill] sm:$0xff] %v13369_v30 }
 0x3a8   : > { %v9687_v11 = vpop.f32.mrf.mxu1  ;;  %v13371_v23 = vpop.f32.mrf.mxu0 }
 0x3a9   : > { %16323 = vst [vmem:[#allocation71_spill] sm:$0xff] %v13371_v23  ;;  %v13373_v29 = vadd.f32 %v9687_v11, %v9686_v56 }
 0x3aa   : > { %v9689_v44 = vpop.f32.mrf.mxu1  ;;  %v13375_v60 = vpop.f32.mrf.mxu0 }
 0x3ab   : > { %16324 = vst [vmem:[#allocation72_spill] sm:$0xff] %v13373_v29  ;;  %6314 = vmatmul.mubr.bf16.gmra.mxu1 %v13161_v5 }
 0x3ac   : > { %6323 = vmatprep.mubr.bf16.mxu1 %v13181_v57  ;;  %v9690_v9 = vpop.f32.mrf.mxu1  ;;  %v13379_v15 = vpop.f32.mrf.mxu0 }
 0x3ad   : > { %16325 = vst [vmem:[#allocation69_spill] sm:$0xff] %v13379_v15  ;;  %v13381_v36 = vadd.f32 %v9690_v9, %v9689_v44 }
 0x3ae   : > { %v9692_v55 = vpop.f32.mrf.mxu1  ;;  %v13383_v30 = vpop.f32.mrf.mxu0 }
 0x3af   : > { %16326 = vst [vmem:[#allocation75_spill] sm:$0xff] %v13383_v30 }
 0x3b0   : > { %v9693_v23 = vpop.f32.mrf.mxu1  ;;  %v13385_v11 = vpop.f32.mrf.mxu0 }
 0x3b1   : > { %16327 = vst [vmem:[#allocation76_spill] sm:$0xff] %v13385_v11  ;;  %v13387_v56 = vadd.f32 %v9693_v23, %v9692_v55 }
 0x3b2   : > { %v9695_v29 = vpop.f32.mrf.mxu1  ;;  %v13389_v16 = vpop.f32.mrf.mxu0 }
 0x3b3   : > { %16328 = vst [vmem:[#allocation126_spill] sm:$0xff] %v13389_v16  ;;  %6324 = vmatmul.mubr.bf16.gmra.mxu1 %v13177_v4 }
 0x3b4   : > { %6333 = vmatprep.mubr.bf16.mxu1 %v13197_v24  ;;  %v9696_v57 = vpop.f32.mrf.mxu1  ;;  %v13393_v5 = vpop.f32.mrf.mxu0 }
 0x3b5   : > { %16329 = vst [vmem:[#allocation127_spill] sm:$0xff] %v13393_v5  ;;  %v13395_v9 = vadd.f32 %v9696_v57, %v9695_v29 }
 0x3b6   : > { %v9698_v44 = vpop.f32.mrf.mxu1  ;;  %v13397_v30 = vpop.f32.mrf.mxu0 }
 0x3b7   : > { %16330 = vst [vmem:[#allocation94_spill] sm:$0xff] %v13397_v30 }
 0x3b8   : > { %v9699_v13 = vpop.f32.mrf.mxu1  ;;  %v13399_v15 = vpop.f32.mrf.mxu0 }
 0x3b9   : > { %16331 = vst [vmem:[#allocation14_spill] sm:$0xff] %v13399_v15  ;;  %v13401_v23 = vadd.f32 %v9699_v13, %v9698_v44 }
 0x3ba   : > { %v9701_v55 = vpop.f32.mrf.mxu1  ;;  %v13403_v11 = vpop.f32.mrf.mxu0 }
 0x3bb   : > { %16332 = vst [vmem:[#allocation77_spill] sm:$0xff] %v13401_v23  ;;  %6334 = vmatmul.mubr.bf16.gmra.mxu1 %v13193_v21 }
 0x3bc   : > { %6343 = vmatprep.mubr.bf16.mxu1 %v13213_v52  ;;  %v9702_v24 = vpop.f32.mrf.mxu1  ;;  %v13407_v4 = vpop.f32.mrf.mxu0 }
 0x3bd   : > { %16333 = vst [vmem:[#allocation74_spill] sm:$0xff] %v13407_v4  ;;  %v13409_v57 = vadd.f32 %v9702_v24, %v9701_v55 }
 0x3be   : > { %v9704_v29 = vpop.f32.mrf.mxu1  ;;  %v13411_v5 = vpop.f32.mrf.mxu0 }
 0x3bf   : > { %16334 = vst [vmem:[#allocation78_spill] sm:$0xff] %v13411_v5 }
 0x3c0   : > { %v9705_v30 = vpop.f32.mrf.mxu1  ;;  %v13413_v16 = vpop.f32.mrf.mxu0 }
 0x3c1   : > { %16335 = vst [vmem:[#allocation95_spill] sm:$0xff] %v13413_v16  ;;  %v13415_v44 = vadd.f32 %v9705_v30, %v9704_v29 }
 0x3c2   : > { %v9707_v13 = vpop.f32.mrf.mxu1  ;;  %v13417_v15 = vpop.f32.mrf.mxu0 }
 0x3c3   : > { %16336 = vst [vmem:[#allocation79_spill] sm:$0xff] %v13417_v15  ;;  %6344 = vmatmul.mubr.bf16.gmra.mxu1 %v13209_v49 }
 0x3c4   : > { %6353 = vmatprep.mubr.bf16.mxu1 %v13229_v26  ;;  %v9708_v52 = vpop.f32.mrf.mxu1  ;;  %v13421_v21 = vpop.f32.mrf.mxu0 }
 0x3c5   : > { %16337 = vst [vmem:[#allocation80_spill] sm:$0xff] %v13421_v21  ;;  %v13423_v24 = vadd.f32 %v9708_v52, %v9707_v13 }
 0x3c6   : > { %v9710_v55 = vpop.f32.mrf.mxu1  ;;  %v13425_v23 = vpop.f32.mrf.mxu0 }
 0x3c7   : > { %16338 = vst [vmem:[#allocation16_spill] sm:$0xff] %v13425_v23 }
 0x3c8   : > { %v9711_v5 = vpop.f32.mrf.mxu1  ;;  %v13427_v4 = vpop.f32.mrf.mxu0 }
 0x3c9   : > { %16339 = vst [vmem:[#allocation13_spill] sm:$0xff] %v13427_v4  ;;  %v13429_v30 = vadd.f32 %v9711_v5, %v9710_v55 }
 0x3ca   : > { %v9713_v29 = vpop.f32.mrf.mxu1  ;;  %v13431_v16 = vpop.f32.mrf.mxu0 }
 0x3cb   : > { %16340 = vst [vmem:[#allocation18_spill] sm:$0xff] %v13429_v30  ;;  %6354 = vmatmul.mubr.bf16.gmra.mxu1 %v13225_v14 }
 0x3cc   : > { %6363 = vmatprep.mubr.bf16.mxu1 %v13245_v45  ;;  %v9714_v26 = vpop.f32.mrf.mxu1  ;;  %v13435_v49 = vpop.f32.mrf.mxu0 }
 0x3cd   : > { %16341 = vst [vmem:[#allocation81_spill] sm:$0xff] %v13435_v49  ;;  %v13437_v52 = vadd.f32 %v9714_v26, %v9713_v29 }
 0x3ce   : > { %v9716_v13 = vpop.f32.mrf.mxu1  ;;  %v13439_v21 = vpop.f32.mrf.mxu0 }
 0x3cf   : > { %16342 = vst [vmem:[#allocation82_spill] sm:$0xff] %v13439_v21 }
 0x3d0   : > { %v9717_v23 = vpop.f32.mrf.mxu1  ;;  %v13441_v15 = vpop.f32.mrf.mxu0 }
 0x3d1   : > { %16343 = vst [vmem:[#allocation20_spill] sm:$0xff] %v13441_v15  ;;  %v13443_v5 = vadd.f32 %v9717_v23, %v9716_v13 }
 0x3d2   : > { %v9719_v55 = vpop.f32.mrf.mxu1  ;;  %v13445_v4 = vpop.f32.mrf.mxu0 }
 0x3d3   : > { %16344 = vst [vmem:[#allocation17_spill] sm:$0xff] %v13445_v4  ;;  %6364 = vmatmul.mubr.bf16.gmra.mxu1 %v13241_v7 }
 0x3d4   : > { %6373 = vmatprep.mubr.bf16.mxu1 %v13260_v41  ;;  %v9720_v45 = vpop.f32.mrf.mxu1  ;;  %v13449_v14 = vpop.f32.mrf.mxu0 }
 0x3d5   : > { %16345 = vst [vmem:[#allocation83_spill] sm:$0xff] %v13449_v14  ;;  %v13451_v26 = vadd.f32 %v9720_v45, %v9719_v55 }
 0x3d6   : > { %v9722_v29 = vpop.f32.mrf.mxu1  ;;  %v13453_v30 = vpop.f32.mrf.mxu0 }
 0x3d7   : > { %16346 = vst [vmem:[#allocation84_spill] sm:$0xff] %v13451_v26  ;;  %16347 = vst [vmem:[#allocation23_spill] sm:$0xff] %v13453_v30 }
 0x3d8   : > { %v9723_v21 = vpop.f32.mrf.mxu1  ;;  %v13455_v49 = vpop.f32.mrf.mxu0 }
 0x3d9   : > { %16348 = vst [vmem:[#allocation85_spill] sm:$0xff] %v13455_v49  ;;  %v13457_v23 = vadd.f32 %v9723_v21, %v9722_v29  ;;  %v11195_v21 = vld [vmem:[#allocation4 + $0x620] ss:$20 sps:$4 sm:$0xff]   ;;  %v11206_v49 = vld [vmem:[#allocation4 + $0x5fc] ss:$20 sps:$4 sm:$0xff]  }
 0x3da   : > { %v9725_v13 = vpop.f32.mrf.mxu1  ;;  %v13459_v15 = vpop.f32.mrf.mxu0 }
 0x3db   : > { %16349 = vst [vmem:[#allocation86_spill] sm:$0xff] %v13457_v23  ;;  %16350 = vst [vmem:[#allocation24_spill] sm:$0xff] %v13459_v15  ;;  %6374 = vmatmul.mubr.bf16.gmra.mxu1 %v13257_v25 }
 0x3dc   : > { %6609 = vmatprep.mubr.bf16.mxu1 %v16231_v2  ;;  %v9726_v41 = vpop.f32.mrf.mxu1  ;;  %v13463_v7 = vpop.f32.mrf.mxu0 }
 0x3dd   : > { %16351 = vst [vmem:[#allocation21_spill] sm:$0xff] %v13463_v7  ;;  %v13465_v45 = vadd.f32 %v9726_v41, %v9725_v13  ;;  %v11204_v13 = vld [vmem:[#allocation4 + $0x5f8] ss:$20 sps:$4 sm:$0xff]  }
 0x3de   : > { %v9728_v55 = vpop.f32.mrf.mxu1  ;;  %v13467_v14 = vpop.f32.mrf.mxu0 }
 0x3df   : > { %16352 = vst [vmem:[#allocation26_spill] sm:$0xff] %v13467_v14 }
 0x3e0   : > { %v9729_v30 = vpop.f32.mrf.mxu1  ;;  %v13469_v4 = vpop.f32.mrf.mxu0 }
 0x3e1   : > { %16353 = vst [vmem:[#allocation87_spill] sm:$0xff] %v13469_v4  ;;  %v13471_v29 = vadd.f32 %v9729_v30, %v9728_v55  ;;  %v11215_v4 = vld [vmem:[#allocation4 + $0x5d4] ss:$20 sps:$4 sm:$0xff]  }
 0x3e2   : > { %v10429_v23 = vpop.f32.mrf.mxu1  ;;  %v13473_v15 = vpop.f32.mrf.mxu0 }
 0x3e3   : > { %16354 = vst [vmem:[#allocation88_spill] sm:$0xff] %v13471_v29  ;;  %16355 = vst [vmem:[#allocation103_spill] sm:$0xff] %v13473_v15  ;;  %6610 = vmatmul.mubr.bf16.vlgmr.msra.gmra.mxu1 %v16236_v35  ;;  %v4333_v25 = vadd.f32 %v10429_v23, %v13272_v47  ;;  %v11221_v47 = vld [vmem:[#allocation4 + $0x5ac] ss:$20 sps:$4 sm:$0xff]  }
 0x3e4   : > { %6619 = vmatprep.mubr.bf16.mxu1 %v16238_v12  ;;  %v4324_v2 = vpop.f32.mrf.mxu1  ;;  %v13477_v41 = vpop.f32.mrf.mxu0  ;;  %6964 = vmatpush1.bf16.msra.mxu1 %v11195_v21  ;;  %v11213_v12 = vld [vmem:[#allocation4 + $0x5d0] ss:$20 sps:$4 sm:$0xff]  }
 0x3e5   : > { %16356 = vst [vmem:[#allocation28_spill] sm:$0xff] %v13477_v41  ;;  %6965 = vmatprep.subr.bf16.mxu1 %v11206_v49  ;;  %v4325_v55 = vadd.f32 %v4324_v2, %v13262_v39  ;;  %v4465_v7 = vmax.f32 %v4333_v25, 0.0  ;;  %v11171_v25 = vld [vmem:[#allocation4 + $0x3a0] ss:$20 sps:$4 sm:$0xff]  }
 0x3e6   : > { %v10430_v14 = vpop.f32.mrf.mxu1  ;;  %v13480_v30 = vpop.f32.mrf.mxu0 }
 0x3e7   : > { %16357 = vst [vmem:[#allocation30_spill] sm:$0xff] %v13480_v30  ;;  %v4336_v15 = vadd.f32 %v10430_v14, %v13279_v8  ;;  %v4455_v26 = vmax.f32 %v4325_v55, 0.0  ;;  %v11219_v8 = vld [vmem:[#allocation4 + $0x5a8] ss:$20 sps:$4 sm:$0xff]  }
 0x3e8   : > { %v4327_v29 = vpop.f32.mrf.mxu1  ;;  %v13484_v35 = vpop.f32.mrf.mxu0  ;;  %6966 = vmatpush1.bf16.msra.mxu1 %v11204_v13  ;;  %v4043_v13 = vadd.f32 %v13321_v0, %v13254_v33 }
 0x3e9   : > { %v4470_v41 = vmax.f32 %v4336_v15, 0.0  ;;  %v4328_v21 = vadd.f32 %v4327_v29, %v13269_v18  ;;  %6967 = vmatprep.subr.bf16.mxu1 %v11215_v4  ;;  %v11176_v18 = vld [vmem:[#allocation4 + $0x37c] ss:$20 sps:$4 sm:$0xff]  }
 0x3ea   : > { %v10433_v49 = vpop.f32.mrf.mxu1  ;;  %v13487_v23 = vpop.f32.mrf.mxu0 }
 0x3eb   : > { %v13489_v30 = vpack.c.bf16 %v4470_v41, %v4465_v7  ;;  %v4460_v2 = vmax.f32 %v4328_v21, 0.0  ;;  %6620 = vmatmul.mubr.bf16.gmra.mxu1 %v16245_v62  ;;  %v4349_v4 = vadd.f32 %v10433_v49, %v13292_v1  ;;  %v11224_v41 = vld [vmem:[#allocation4 + $0x584] ss:$20 sps:$4 sm:$0xff]   ;;  %v9779_v1 = vadd.f32 %v13319_v34, %v13313_v28 }
 0x3ec   : > { %6629 = vmatprep.mubr.bf16.mxu1 %v16247_v17  ;;  %v4340_v14 = vpop.f32.mrf.mxu1  ;;  %v13493_v39 = vpop.f32.mrf.mxu0  ;;  %6968 = vmatpush1.bf16.msra.mxu1 %v11213_v12  ;;  %v4035_v12 = vadd.f32 %v13303_v59, %v13254_v33  ;;  %v11174_v49 = vld [vmem:[#allocation4 + $0x378] ss:$20 sps:$4 sm:$0xff]   ;;  %v11222_v59 = vld [vmem:[#allocation4 + $0x580] ss:$20 sps:$4 sm:$0xff]   ;;  %v9773_v28 = vadd.f32 %v13301_v31, %v13294_v20  ;;  %v4038_v34 = vadd.f32 %v13311_v22, %v13254_v33 }
 0x3ed   : > { %16358 = vst [vmem:[#allocation89_spill] sm:$0xff] %v13489_v30  ;;  %v13495_v15 = vpack.c.bf16 %v4460_v2, %v4455_v26  ;;  %6969 = vmatprep.subr.bf16.mxu1 %v11221_v47  ;;  %v4341_v55 = vadd.f32 %v4340_v14, %v13282_v61  ;;  %v4046_v61 = vadd.f32 %v13327_v51, %v13254_v33  ;;  %v4485_v0 = vmax.f32 %v4349_v4, 0.0  ;;  %v11179_v14 = vld [vmem:[#allocation4 + $0x354] ss:$20 sps:$4 sm:$0xff]   ;;  %v11230_v51 = vld [vmem:[#allocation4 + $0x55c] ss:$20 sps:$4 sm:$0xff]  }
 0x3ee   : > { %v10434_v29 = vpop.f32.mrf.mxu1  ;;  %v13498_v7 = vpop.f32.mrf.mxu0  ;;  %v9776_v20 = vadd.f32 %v13309_v38, %v13307_v19  ;;  %v16362_v31 = vld [vmem:[#allocation121_spill] sm:$0xff]  ;;  %v4196_v22 = vadd.f32 %v9773_v28, %v4035_v12  ;;  %v11233_v19 = vld [vmem:[#allocation4 + $0x534] ss:$20 sps:$4 sm:$0xff]   ;;  %v4059_v38 = vadd.f32 %v13353_v53, %v13254_v33  ;;  %v4062_v53 = vadd.f32 %v13359_v46, %v13254_v33 }
 0x3ef   : > { %16359 = vst [vmem:[#allocation90_spill] sm:$0xff] %v13495_v15  ;;  %v4352_v21 = vadd.f32 %v10434_v29, %v13305_v32  ;;  %6417 = vmatmul.mubr.bf16.vlgmr.msra.gmra.mxu0 %v13495_v15  ;;  %v4475_v4 = vmax.f32 %v4341_v55, 0.0  ;;  %v11239_v46 = vld [vmem:[#allocation4 + $0x50c] ss:$20 sps:$4 sm:$0xff]  }
 0x3f0   : > { %6771 = vmatpush1.bf16.msra.mxu0 %v11171_v25  ;;  %v4343_v26 = vpop.f32.mrf.mxu1  ;;  %v13509_v47 = vpop.f32.mrf.mxu0  ;;  %6426 = vmatprep.mubr.bf16.mxu0 %v16319_v6  ;;  %v9782_v25 = vadd.f32 %v13325_v40, %v13323_v50  ;;  %v11177_v50 = vld [vmem:[#allocation4 + $0x350] ss:$20 sps:$4 sm:$0xff]  }
 0x3f1   : > { %v4490_v32 = vmax.f32 %v4352_v21, 0.0  ;;  %v4344_v2 = vadd.f32 %v4343_v26, %v13289_v42  ;;  %6772 = vmatprep.subr.bf16.mxu0 %v11176_v18  ;;  %6970 = vmatpush1.bf16.msra.mxu1 %v11219_v8  ;;  %v4204_v8 = vadd.f32 %v9779_v1, %v4043_v13  ;;  %v16361_v21 = vld [vmem:[#allocation57_spill] sm:$0xff]  ;;  %v11228_v13 = vld [vmem:[#allocation4 + $0x558] ss:$20 sps:$4 sm:$0xff]  }
 0x3f2   : > { %v10437_v29 = vpop.f32.mrf.mxu1  ;;  %v13521_v17 = vpop.f32.mrf.mxu0  ;;  %6971 = vmatprep.subr.bf16.mxu1 %v11224_v41 }
 0x3f3   : > { %v13523_v42 = vpack.c.bf16 %v4490_v32, %v4485_v0  ;;  %v4480_v18 = vmax.f32 %v4344_v2, 0.0  ;;  %6630 = vmatmul.mubr.bf16.gmra.mxu1 %v16361_v21  ;;  %v4365_v55 = vadd.f32 %v10437_v29, %v4204_v8  ;;  %v4207_v0 = vadd.f32 %v9782_v25, %v4046_v61  ;;  %v11182_v32 = vld [vmem:[#allocation4 + $0x32c] ss:$20 sps:$4 sm:$0xff]   ;;  %v11180_v29 = vld [vmem:[#allocation4 + $0x328] ss:$20 sps:$4 sm:$0xff]  }
 0x3f4   : > { %6639 = vmatprep.mubr.bf16.mxu1 %v16362_v31  ;;  %v4356_v26 = vpop.f32.mrf.mxu1  ;;  %v13529_v40 = vpop.f32.mrf.mxu0  ;;  %6773 = vmatpush1.bf16.msra.mxu0 %v11174_v49  ;;  %v4199_v49 = vadd.f32 %v9776_v20, %v4038_v34  ;;  %v4051_v61 = vadd.f32 %v13337_v37, %v13254_v33  ;;  %v11185_v34 = vld [vmem:[#allocation4 + $0x304] ss:$20 sps:$4 sm:$0xff]   ;;  %v9794_v8 = vadd.f32 %v13357_v58, %v13355_v54  ;;  %v11183_v54 = vld [vmem:[#allocation4 + $0x300] ss:$20 sps:$4 sm:$0xff]  }
 0x3f5   : > { %16360 = vst [vmem:[#allocation104_spill] sm:$0xff] %v13523_v42  ;;  %v13531_v41 = vpack.c.bf16 %v4480_v18, %v4475_v4  ;;  %6774 = vmatprep.subr.bf16.mxu0 %v11179_v14  ;;  %6972 = vmatpush1.bf16.msra.mxu1 %v11222_v59  ;;  %v4357_v12 = vadd.f32 %v4356_v26, %v4196_v22  ;;  %v11231_v37 = vld [vmem:[#allocation4 + $0x530] ss:$20 sps:$4 sm:$0xff]  }
 0x3f6   : > { %v10438_v1 = vpop.f32.mrf.mxu1  ;;  %v13533_v2 = vpop.f32.mrf.mxu0  ;;  %6973 = vmatprep.subr.bf16.mxu1 %v11230_v51  ;;  %v9791_v14 = vadd.f32 %v13351_v10, %v13345_v27  ;;  %v4505_v51 = vmax.f32 %v4365_v55, 0.0  ;;  %v9785_v27 = vadd.f32 %v13335_v63, %v13329_v48  ;;  %v4054_v10 = vadd.f32 %v13343_v3, %v13254_v33  ;;  %v16368_v48 = vld [vmem:[#allocation67_spill] sm:$0xff] }
 0x3f7   : > { %16363 = vst [vmem:[#allocation105_spill] sm:$0xff] %v13531_v41  ;;  %v4368_v28 = vadd.f32 %v10438_v1, %v4207_v0  ;;  %6427 = vmatmul.mubr.bf16.gmra.mxu0 %v13489_v30  ;;  %v4495_v26 = vmax.f32 %v4357_v12, 0.0  ;;  %v16369_v1 = vld [vmem:[#allocation123_spill] sm:$0xff] }
 0x3f8   : > { %v4359_v59 = vpop.f32.mrf.mxu1  ;;  %v13542_v25 = vpop.f32.mrf.mxu0  ;;  %6436 = vmatprep.mubr.bf16.mxu0 %v16319_v6  ;;  %6775 = vmatpush1.bf16.msra.mxu0 %v11177_v50  ;;  %v4220_v0 = vadd.f32 %v9791_v14, %v4059_v38  ;;  %v4212_v3 = vadd.f32 %v9785_v27, %v4051_v61  ;;  %v11237_v38 = vld [vmem:[#allocation4 + $0x508] ss:$20 sps:$4 sm:$0xff]   ;;  %v4075_v61 = vadd.f32 %v13381_v36, %v13254_v33 }
 0x3f9   : > { %16364 = vst [vmem:[#allocation29_spill] sm:$0xff] %v13542_v25  ;;  %v4510_v4 = vmax.f32 %v4368_v28, 0.0  ;;  %v4360_v18 = vadd.f32 %v4359_v59, %v4199_v49  ;;  %6776 = vmatprep.subr.bf16.mxu0 %v11182_v32  ;;  %6974 = vmatpush1.bf16.msra.mxu1 %v11228_v13  ;;  %v16366_v32 = vld [vmem:[#allocation120_spill] sm:$0xff]  ;;  %v16367_v13 = vld [vmem:[#allocation66_spill] sm:$0xff]  ;;  %v4223_v49 = vadd.f32 %v9794_v8, %v4062_v53  ;;  %v16371_v53 = vld [vmem:[#allocation69_spill] sm:$0xff] }
 0x3fa   : > { %v10441_v20 = vpop.f32.mrf.mxu1  ;;  %v13553_v22 = vpop.f32.mrf.mxu0  ;;  %6975 = vmatprep.subr.bf16.mxu1 %v11233_v19  ;;  %v9788_v63 = vadd.f32 %v16368_v48, %v16367_v13  ;;  %v11188_v59 = vld [vmem:[#allocation4 + $0x2dc] ss:$20 sps:$4 sm:$0xff]   ;;  %v4067_v27 = vadd.f32 %v13367_v43, %v13254_v33  ;;  %v4078_v36 = vadd.f32 %v13387_v56, %v13254_v33 }
 0x3fb   : > { %v13555_v50 = vpack.c.bf16 %v4510_v4, %v4505_v51  ;;  %v4500_v55 = vmax.f32 %v4360_v18, 0.0  ;;  %6640 = vmatmul.mubr.bf16.gmra.mxu1 %v16366_v32  ;;  %v4381_v12 = vadd.f32 %v10441_v20, %v4220_v0  ;;  %v11186_v20 = vld [vmem:[#allocation4 + $0x2d8] ss:$20 sps:$4 sm:$0xff]   ;;  %v16374_v0 = vld [vmem:[#allocation65_spill] sm:$0xff] }
 0x3fc   : > { %6649 = vmatprep.mubr.bf16.mxu1 %v16369_v1  ;;  %v4372_v28 = vpop.f32.mrf.mxu1  ;;  %v13561_v58 = vpop.f32.mrf.mxu0  ;;  %6777 = vmatpush1.bf16.msra.mxu0 %v11180_v29  ;;  %v4215_v29 = vadd.f32 %v9788_v63, %v4054_v10  ;;  %v11191_v10 = vld [vmem:[#allocation4 + $0x2b4] ss:$20 sps:$4 sm:$0xff]   ;;  %v16373_v43 = vld [vmem:[#allocation68_spill] sm:$0xff] }
 0x3fd   : > { %16365 = vst [vmem:[#allocation91_spill] sm:$0xff] %v13555_v50  ;;  %v13563_v19 = vpack.c.bf16 %v4500_v55, %v4495_v26  ;;  %6778 = vmatprep.subr.bf16.mxu0 %v11185_v34  ;;  %6976 = vmatpush1.bf16.msra.mxu1 %v11231_v37  ;;  %v4373_v4 = vadd.f32 %v4372_v28, %v4212_v3  ;;  %v16376_v63 = vld [vmem:[#allocation75_spill] sm:$0xff]  ;;  %v16377_v3 = vld [vmem:[#allocation76_spill] sm:$0xff] }
 0x3fe   : > { %v10442_v14 = vpop.f32.mrf.mxu1  ;;  %v13565_v51 = vpop.f32.mrf.mxu0  ;;  %6977 = vmatprep.subr.bf16.mxu1 %v11239_v46  ;;  %v9803_v34 = vadd.f32 %v16371_v53, %v13375_v60  ;;  %v4525_v46 = vmax.f32 %v4381_v12, 0.0  ;;  %v9797_v13 = vadd.f32 %v16374_v0, %v16373_v43  ;;  %v16375_v60 = vld [vmem:[#allocation72_spill] sm:$0xff]  ;;  %v9806_v28 = vadd.f32 %v16377_v3, %v16376_v63 }
 0x3ff   : > { %16370 = vst [vmem:[#allocation92_spill] sm:$0xff] %v13563_v19  ;;  %v4384_v18 = vadd.f32 %v10442_v14, %v4223_v49  ;;  %6437 = vmatmul.mubr.bf16.gmra.mxu0 %v13531_v41  ;;  %v4070_v48 = vadd.f32 %v16375_v60, %v13254_v33  ;;  %v4515_v14 = vmax.f32 %v4373_v4, 0.0  ;;  %v11189_v60 = vld [vmem:[#allocation4 + $0x2b0] ss:$20 sps:$4 sm:$0xff]  }
 0x400   : > { %v4375_v37 = vpop.f32.mrf.mxu1  ;;  %v13574_v8 = vpop.f32.mrf.mxu0  ;;  %6446 = vmatprep.mubr.bf16.mxu0 %v16319_v6  ;;  %6779 = vmatpush1.bf16.msra.mxu0 %v11183_v54  ;;  %v4228_v4 = vadd.f32 %v9797_v13, %v4067_v27  ;;  %v11192_v13 = vld [vmem:[#allocation4 + $0x288] ss:$20 sps:$4 sm:$0xff]  }
 0x401   : > { %16372 = vst [vmem:[#allocation35_spill] sm:$0xff] %v13574_v8  ;;  %v4530_v26 = vmax.f32 %v4384_v18, 0.0  ;;  %v4376_v55 = vadd.f32 %v4375_v37, %v4215_v29  ;;  %6780 = vmatprep.subr.bf16.mxu0 %v11188_v59  ;;  %6978 = vmatpush1.bf16.msra.mxu1 %v11237_v38  ;;  %v4236_v18 = vadd.f32 %v9803_v34, %v4075_v61  ;;  %v16379_v59 = vld [vmem:[#allocation122_spill] sm:$0xff]  ;;  %v16381_v29 = vld [vmem:[#allocation71_spill] sm:$0xff]  ;;  %v16382_v37 = vld [vmem:[#allocation125_spill] sm:$0xff] }
 0x402   : > { %v10445_v54 = vpop.f32.mrf.mxu1  ;;  %v13585_v49 = vpop.f32.mrf.mxu0  ;;  %v16380_v38 = vld [vmem:[#allocation70_spill] sm:$0xff] }
 0x403   : > { %v13587_v56 = vpack.c.bf16 %v4530_v26, %v4525_v46  ;;  %v4520_v12 = vmax.f32 %v4376_v55, 0.0  ;;  %6650 = vmatmul.mubr.bf16.gmra.mxu1 %v16379_v59  ;;  %v9800_v53 = vadd.f32 %v16381_v29, %v16380_v38  ;;  %v4397_v3 = vadd.f32 %v10445_v54, %v4236_v18  ;;  %v11194_v26 = vld [vmem:[#allocation4 + $0x28c] ss:$20 sps:$4 sm:$0xff]  }
 0x404   : > { %6659 = vmatprep.mubr.bf16.mxu1 %v16382_v37  ;;  %v4388_v43 = vpop.f32.mrf.mxu1  ;;  %v13593_v0 = vpop.f32.mrf.mxu0  ;;  %6781 = vmatpush1.bf16.msra.mxu0 %v11186_v20  ;;  %v4239_v46 = vadd.f32 %v9806_v28, %v4078_v36  ;;  %v4091_v55 = vadd.f32 %v13409_v57, %v13254_v33  ;;  %v4083_v20 = vadd.f32 %v13395_v9, %v13254_v33  ;;  %v16384_v54 = vld [vmem:[#allocation74_spill] sm:$0xff]  ;;  %v16387_v9 = vld [vmem:[#allocation127_spill] sm:$0xff] }
 0x405   : > { %16378 = vst [vmem:[#allocation93_spill] sm:$0xff] %v13587_v56  ;;  %v13595_v63 = vpack.c.bf16 %v4520_v12, %v4515_v14  ;;  %6782 = vmatprep.subr.bf16.mxu0 %v11191_v10  ;;  %v4389_v38 = vadd.f32 %v4388_v43, %v4228_v4  ;;  %v4231_v37 = vadd.f32 %v9800_v53, %v4070_v48  ;;  %v4545_v28 = vmax.f32 %v4397_v3, 0.0  ;;  %v11200_v48 = vld [vmem:[#allocation4 + $0x4e4] ss:$20 sps:$4 sm:$0xff]   ;;  %v16386_v18 = vld [vmem:[#allocation126_spill] sm:$0xff] }
 0x406   : > { %v10446_v61 = vpop.f32.mrf.mxu1  ;;  %v13597_v34 = vpop.f32.mrf.mxu0  ;;  %v9815_v27 = vadd.f32 %v16384_v54, %v13403_v11  ;;  %v4094_v57 = vadd.f32 %v13415_v44, %v13254_v33  ;;  %v9809_v53 = vadd.f32 %v16387_v9, %v16386_v18  ;;  %v16388_v11 = vld [vmem:[#allocation77_spill] sm:$0xff]  ;;  %v16389_v4 = vld [vmem:[#allocation78_spill] sm:$0xff]  ;;  %v16395_v18 = vld [vmem:[#allocation15_spill] sm:$0xff] }
 0x407   : > { %16383 = vst [vmem:[#allocation108_spill] sm:$0xff] %v13595_v63  ;;  %v4400_v29 = vadd.f32 %v10446_v61, %v4239_v46  ;;  %6447 = vmatmul.mubr.bf16.gmra.mxu0 %v13523_v42  ;;  %v4086_v43 = vadd.f32 %v16388_v11, %v13254_v33  ;;  %v16390_v46 = vld [vmem:[#allocation95_spill] sm:$0xff]  ;;  %v4535_v59 = vmax.f32 %v4389_v38, 0.0 }
 0x408   : > { %v4391_v36 = vpop.f32.mrf.mxu1  ;;  %v13606_v10 = vpop.f32.mrf.mxu0  ;;  %6456 = vmatprep.mubr.bf16.mxu0 %v16319_v6  ;;  %6783 = vmatpush1.bf16.msra.mxu0 %v11189_v60  ;;  %v9818_v61 = vadd.f32 %v16390_v46, %v16389_v4  ;;  %v4252_v3 = vadd.f32 %v9815_v27, %v4091_v55  ;;  %v11198_v4 = vld [vmem:[#allocation4 + $0x4e0] ss:$20 sps:$4 sm:$0xff]   ;;  %v4244_v38 = vadd.f32 %v9809_v53, %v4083_v20  ;;  %v11201_v53 = vld [vmem:[#allocation4 + $0x4b8] ss:$20 sps:$4 sm:$0xff]  }
 0x409   : > { %16385 = vst [vmem:[#allocation36_spill] sm:$0xff] %v13606_v10  ;;  %v4550_v14 = vmax.f32 %v4400_v29, 0.0  ;;  %v4392_v12 = vadd.f32 %v4391_v36, %v4231_v37  ;;  %6784 = vmatprep.subr.bf16.mxu0 %v11194_v26  ;;  %v16392_v37 = vld [vmem:[#allocation124_spill] sm:$0xff]  ;;  %v16393_v26 = vld [vmem:[#allocation94_spill] sm:$0xff] }
 0x40a   : > { %v10449_v54 = vpop.f32.mrf.mxu1  ;;  %v13617_v60 = vpop.f32.mrf.mxu0  ;;  %v16394_v29 = vld [vmem:[#allocation14_spill] sm:$0xff] }
 0x40b   : > { %v13619_v1 = vpack.c.bf16 %v4550_v14, %v4545_v28  ;;  %v4540_v44 = vmax.f32 %v4392_v12, 0.0  ;;  %6660 = vmatmul.mubr.bf16.gmra.mxu1 %v16392_v37  ;;  %v9812_v36 = vadd.f32 %v16394_v29, %v16393_v26  ;;  %v4413_v32 = vadd.f32 %v10449_v54, %v4252_v3  ;;  %v11203_v14 = vld [vmem:[#allocation4 + $0x4bc] ss:$20 sps:$4 sm:$0xff]  }
 0x40c   : > { %6669 = vmatprep.mubr.bf16.mxu1 %v16395_v18  ;;  %v4404_v9 = vpop.f32.mrf.mxu1  ;;  %v13625_v11 = vpop.f32.mrf.mxu0  ;;  %6785 = vmatpush1.bf16.msra.mxu0 %v11192_v13  ;;  %v4255_v28 = vadd.f32 %v9818_v61, %v4094_v57  ;;  %v4107_v12 = vadd.f32 %v13437_v52, %v13254_v33  ;;  %v16397_v13 = vld [vmem:[#allocation81_spill] sm:$0xff]  ;;  %v4110_v52 = vadd.f32 %v13443_v5, %v13254_v33  ;;  %v16399_v3 = vld [vmem:[#allocation79_spill] sm:$0xff] }
 0x40d   : > { %16391 = vst [vmem:[#allocation66_spill] sm:$0xff] %v13619_v1  ;;  %v13627_v46 = vpack.c.bf16 %v4540_v44, %v4535_v59  ;;  %6786 = vmatprep.subr.bf16.mxu0 %v11200_v48  ;;  %v4405_v26 = vadd.f32 %v4404_v9, %v4244_v38  ;;  %v4247_v18 = vadd.f32 %v9812_v36, %v4086_v43  ;;  %v4565_v61 = vmax.f32 %v4413_v32, 0.0  ;;  %v11209_v43 = vld [vmem:[#allocation4 + $0x494] ss:$20 sps:$4 sm:$0xff]  }
 0x40e   : > { %v10450_v55 = vpop.f32.mrf.mxu1  ;;  %v13629_v27 = vpop.f32.mrf.mxu0  ;;  %v4099_v59 = vadd.f32 %v13423_v24, %v13254_v33  ;;  %v9827_v20 = vadd.f32 %v16397_v13, %v13431_v16  ;;  %v16400_v24 = vld [vmem:[#allocation80_spill] sm:$0xff]  ;;  %v16401_v16 = vld [vmem:[#allocation18_spill] sm:$0xff] }
 0x40f   : > { %16396 = vst [vmem:[#allocation67_spill] sm:$0xff] %v13627_v46  ;;  %v4416_v29 = vadd.f32 %v10450_v55, %v4255_v28  ;;  %6457 = vmatmul.mubr.bf16.gmra.mxu0 %v13563_v19  ;;  %v9821_v36 = vadd.f32 %v16400_v24, %v16399_v3  ;;  %v4102_v9 = vadd.f32 %v16401_v16, %v13254_v33  ;;  %v16402_v38 = vld [vmem:[#allocation82_spill] sm:$0xff]  ;;  %v16403_v28 = vld [vmem:[#allocation20_spill] sm:$0xff]  ;;  %v4555_v37 = vmax.f32 %v4405_v26, 0.0  ;;  %v16408_v3 = vld [vmem:[#allocation97_spill] sm:$0xff] }
 0x410   : > { %v4407_v57 = vpop.f32.mrf.mxu1  ;;  %v13638_v48 = vpop.f32.mrf.mxu0  ;;  %6466 = vmatprep.mubr.bf16.mxu0 %v16319_v6  ;;  %6787 = vmatpush2.bf16.msra.mxu0 %v11198_v4  ;;  %v9830_v55 = vadd.f32 %v16403_v28, %v16402_v38  ;;  %v4268_v32 = vadd.f32 %v9827_v20, %v4107_v12  ;;  %v11207_v38 = vld [vmem:[#allocation4 + $0x490] ss:$20 sps:$4 sm:$0xff]  }
 0x411   : > { %16398 = vst [vmem:[#allocation69_spill] sm:$0xff] %v13638_v48  ;;  %v4570_v54 = vmax.f32 %v4416_v29, 0.0  ;;  %v4408_v44 = vadd.f32 %v4407_v57, %v4247_v18  ;;  %6788 = vmatprep.subr.bf16.mxu0 %v11203_v14  ;;  %v16405_v18 = vld [vmem:[#allocation128_spill] sm:$0xff]  ;;  %v16407_v29 = vld [vmem:[#allocation13_spill] sm:$0xff]  ;;  %v4260_v26 = vadd.f32 %v9821_v36, %v4099_v59 }
 0x412   : > { %v10453_v13 = vpop.f32.mrf.mxu1  ;;  %v13649_v4 = vpop.f32.mrf.mxu0  ;;  %v16406_v14 = vld [vmem:[#allocation16_spill] sm:$0xff]  ;;  %v11216_v48 = vld [vmem:[#allocation4 + $0x440] ss:$20 sps:$4 sm:$0xff]  }
 0x413   : > { %v13651_v31 = vpack.c.bf16 %v4570_v54, %v4565_v61  ;;  %v4560_v5 = vmax.f32 %v4408_v44, 0.0  ;;  %6670 = vmatmul.mubr.bf16.gmra.mxu1 %v16405_v18  ;;  %v9824_v57 = vadd.f32 %v16407_v29, %v16406_v14  ;;  %v4429_v21 = vadd.f32 %v10453_v13, %v4268_v32  ;;  %v11212_v54 = vld [vmem:[#allocation4 + $0x46c] ss:$20 sps:$4 sm:$0xff]   ;;  %v11210_v36 = vld [vmem:[#allocation4 + $0x468] ss:$20 sps:$4 sm:$0xff]   ;;  %v16419_v18 = vld [vmem:[#allocation87_spill] sm:$0xff] }
 0x414   : > { %6679 = vmatprep.mubr.bf16.mxu1 %v16408_v3  ;;  %v4420_v24 = vpop.f32.mrf.mxu1  ;;  %v13657_v16 = vpop.f32.mrf.mxu0  ;;  %6789 = vmatpush2.bf16.msra.mxu0 %v11201_v53  ;;  %v4271_v61 = vadd.f32 %v9830_v55, %v4110_v52  ;;  %v4123_v44 = vadd.f32 %v13465_v45, %v13254_v33  ;;  %v16410_v53 = vld [vmem:[#allocation84_spill] sm:$0xff]  ;;  %v16412_v13 = vld [vmem:[#allocation21_spill] sm:$0xff] }
 0x415   : > { %16404 = vst [vmem:[#allocation68_spill] sm:$0xff] %v13651_v31  ;;  %v13659_v28 = vpack.c.bf16 %v4560_v5, %v4555_v37  ;;  %6790 = vmatprep.subr.bf16.mxu0 %v11209_v43  ;;  %v4421_v14 = vadd.f32 %v4420_v24, %v4260_v26  ;;  %v4263_v3 = vadd.f32 %v9824_v57, %v4102_v9  ;;  %v16411_v5 = vld [vmem:[#allocation24_spill] sm:$0xff]  ;;  %v4585_v32 = vmax.f32 %v4429_v21, 0.0  ;;  %v16415_v57 = vld [vmem:[#allocation17_spill] sm:$0xff] }
 0x416   : > { %v10454_v12 = vpop.f32.mrf.mxu1  ;;  %v13661_v20 = vpop.f32.mrf.mxu0  ;;  %v4115_v37 = vadd.f32 %v16410_v53, %v13254_v33  ;;  %v9839_v59 = vadd.f32 %v16412_v13, %v16411_v5  ;;  %v16414_v45 = vld [vmem:[#allocation88_spill] sm:$0xff]  ;;  %v16417_v53 = vld [vmem:[#allocation86_spill] sm:$0xff]  ;;  %v4931_v21 = vld [vmem:[%s15682_s6] sm:$0x1f] }
 0x417   : > { %16409 = vst [vmem:[#allocation65_spill] sm:$0xff] %v13659_v28  ;;  %v4432_v29 = vadd.f32 %v10454_v12, %v4271_v61  ;;  %6467 = vmatmul.mubr.bf16.gmra.mxu0 %v13555_v50  ;;  %v4126_v55 = vadd.f32 %v16414_v45, %v13254_v33  ;;  %v11218_v9 = vld [vmem:[#allocation4 + $0x444] ss:$20 sps:$4 sm:$0xff]   ;;  %v16416_v61 = vld [vmem:[#allocation83_spill] sm:$0xff]  ;;  %v4118_v5 = vadd.f32 %v16417_v53, %v13254_v33  ;;  %v16418_v13 = vld [vmem:[#allocation26_spill] sm:$0xff] }
 0x418   : > { %v4423_v52 = vpop.f32.mrf.mxu1  ;;  %v13670_v43 = vpop.f32.mrf.mxu0  ;;  %6476 = vmatprep.mubr.bf16.mxu0 %v16319_v6  ;;  %6791 = vmatpush2.bf16.msra.mxu0 %v11207_v38  ;;  %v9833_v12 = vadd.f32 %v16416_v61, %v16415_v57  ;;  %v9842_v62 = vadd.f32 %v16419_v18, %v16418_v13  ;;  %v16421_v45 = vld [vmem:[#allocation96_spill] sm:$0xff]  ;;  %v16422_v57 = vld [vmem:[#allocation23_spill] sm:$0xff]  ;;  %v16423_v61 = vld [vmem:[#allocation85_spill] sm:$0xff] }
 0x419   : > { %16413 = vst [vmem:[#allocation72_spill] sm:$0xff] %v13670_v43  ;;  %v4590_v24 = vmax.f32 %v4432_v29, 0.0  ;;  %v4424_v26 = vadd.f32 %v4423_v52, %v4263_v3  ;;  %6792 = vmatprep.subr.bf16.mxu0 %v11212_v54  ;;  %v4575_v29 = vmax.f32 %v4421_v14, 0.0  ;;  %v4284_v52 = vadd.f32 %v9839_v59, %v4123_v44  ;;  %v16424_v53 = vld [vmem:[#allocation19_spill] sm:$0xff]  ;;  %v16426_v44 = vld [vmem:[#allocation12_spill] sm:$0xff] }
 0x41a   : > { %v10457_v43 = vpop.f32.mrf.mxu1  ;;  %v13681_v38 = vpop.f32.mrf.mxu0  ;;  %v9836_v33 = vadd.f32 %v16423_v61, %v16422_v57  ;;  %v4276_v14 = vadd.f32 %v9833_v12, %v4115_v37  ;;  %v13697_v59 = vrot.slane %v4931_v21, %v16426_v44  ;;  %v11236_v12 = vld [vmem:[#allocation4 + $0x3f4] ss:$20 sps:$4 sm:$0xff]  }
 0x41b   : > { %v13686_v3 = vpack.c.bf16 %v4590_v24, %v4585_v32  ;;  %v4580_v54 = vmax.f32 %v4424_v26, 0.0  ;;  %6680 = vmatmul.mubr.bf16.gmra.mxu1 %v16421_v45  ;;  %v4445_v8 = vadd.f32 %v10457_v43, %v4284_v52  ;;  %v4287_v32 = vadd.f32 %v9842_v62, %v4126_v55  ;;  %v11227_v24 = vld [vmem:[#allocation4 + $0x41c] ss:$20 sps:$4 sm:$0xff]   ;;  %v11225_v62 = vld [vmem:[#allocation4 + $0x418] ss:$20 sps:$4 sm:$0xff]  }
 0x41c   : > { %6689 = vmatprep.mubr.bf16.mxu1 %v16424_v53  ;;  %v4436_v18 = vpop.f32.mrf.mxu1  ;;  %v13692_v13 = vpop.f32.mrf.mxu0  ;;  %6793 = vmatpush2.bf16.msra.mxu0 %v11210_v36  ;;  %v4279_v53 = vadd.f32 %v9836_v33, %v4118_v5  ;;  %v16427_v36 = vld [vmem:[#allocation11_spill] sm:$0xff] }
 0x41d   : > { %16420 = vst [vmem:[#allocation75_spill] sm:$0xff] %v13686_v3  ;;  %v13694_v10 = vpack.c.bf16 %v4580_v54, %v4575_v29  ;;  %6794 = vmatprep.subr.bf16.mxu0 %v11218_v9  ;;  %v4437_v57 = vadd.f32 %v4436_v18, %v4276_v14  ;;  %v13703_v25 = vrot.slane %v4931_v21, %v16427_v36  ;;  %v4605_v37 = vmax.f32 %v4445_v8, 0.0  ;;  %v16429_v54 = vld [vmem:[#allocation103_spill] sm:$0xff]  ;;  %v16435_v36 = vld [vmem:[#allocation30_spill] sm:$0xff] }
 0x41e   : > { %v10458_v26 = vpop.f32.mrf.mxu1  ;;  %v13699_v45 = vpop.f32.mrf.mxu0  ;;  %v6033_v52 = vadd.f32 %v16429_v54, %v13697_v59 }
 0x41f   : > { %16425 = vst [vmem:[#allocation76_spill] sm:$0xff] %v13694_v10  ;;  %v4448_v61 = vadd.f32 %v10458_v26, %v4287_v32  ;;  %6477 = vmatmul.mubr.bf16.gmra.mxu0 %v13595_v63  ;;  %v4595_v18 = vmax.f32 %v4437_v57, 0.0  ;;  %v16431_v32 = vld [vmem:[#allocation98_spill] sm:$0xff] }
 0x420   : > { %v4439_v29 = vpop.f32.mrf.mxu1  ;;  %v13705_v43 = vpop.f32.mrf.mxu0  ;;  %6486 = vmatprep.mubr.bf16.mxu0 %v16319_v6  ;;  %6795 = vmatpush2.bf16.msra.mxu0 %v11216_v48  ;;  %v16432_v48 = vld [vmem:[#allocation28_spill] sm:$0xff] }
 0x421   : > { %16428 = vst [vmem:[#allocation70_spill] sm:$0xff] %v13705_v43  ;;  %v4610_v55 = vmax.f32 %v4448_v61, 0.0  ;;  %v4440_v9 = vadd.f32 %v4439_v29, %v4279_v53  ;;  %6796 = vmatprep.subr.bf16.mxu0 %v11227_v24  ;;  %v6035_v44 = vadd.f32 %v16432_v48, %v13703_v25  ;;  %v16433_v53 = vld [vmem:[#allocation22_spill] sm:$0xff]  ;;  %v11234_v24 = vld [vmem:[#allocation4 + $0x3f0] ss:$20 sps:$4 sm:$0xff]   ;;  %v6037_v29 = vadd.f32 %v16435_v36, %v13697_v59 }
 0x422   : > { %v13712_v33 = vpop.f32.mrf.mxu0  ;;  %v11242_v61 = vld [vmem:[#allocation4 + $0x3cc] ss:$20 sps:$4 sm:$0xff]   ;;  %v16436_v48 = vld [vmem:[#allocation99_spill] sm:$0xff] }
 0x423   : > { %v13710_v5 = vpack.c.bf16 %v4610_v55, %v4605_v37  ;;  %v4600_v21 = vmax.f32 %v4440_v9, 0.0  ;;  %v6225_v14 = vpop.f32.mrf.mxu1  ;;  %6690 = vmatmul.mubr.bf16.gmra.mxu1 %v16431_v32  ;;  %v16437_v36 = vld [vmem:[#allocation101_spill] sm:$0xff] }
 0x424   : > { %v13717_v8 = vadd.f32 %v6225_v14, %v6033_v52  ;;  %6699 = vmatprep.mubr.bf16.mxu1 %v16433_v53  ;;  %6797 = vmatpush2.bf16.msra.mxu0 %v11225_v62  ;;  %v13726_v55 = vpop.f32.mrf.mxu0  ;;  %v11240_v62 = vld [vmem:[#allocation4 + $0x3c8] ss:$20 sps:$4 sm:$0xff]  }
 0x425   : > { %16430 = vst [vmem:[#allocation71_spill] sm:$0xff] %v13710_v5  ;;  %v13720_v26 = vpack.c.bf16 %v4600_v21, %v4595_v18  ;;  %v6227_v57 = vpop.f32.mrf.mxu1  ;;  %6798 = vmatprep.subr.bf16.mxu0 %v11236_v12  ;;  %v11243_v12 = vld [vmem:[#allocation4 + $0x268] ss:$20 sps:$4 sm:$0xff]   ;;  %v6043_v18 = vadd.f32 %v13487_v23, %v13697_v59 }
 0x426   : > { %v13724_v37 = vadd.f32 %v6227_v57, %v6035_v44  ;;  %v13736_v21 = vpop.f32.mrf.mxu0  ;;  %v6045_v44 = vadd.f32 %v13493_v39, %v13703_v25 }
 0x427   : > { %16434 = vst [vmem:[#allocation74_spill] sm:$0xff] %v13720_v26  ;;  %v6229_v9 = vpop.f32.mrf.mxu1  ;;  %6487 = vmatmul.mubr.bf16.gmra.mxu0 %v13587_v56 }
 0x428   : > { %v13729_v54 = vadd.f32 %v6229_v9, %v6037_v29  ;;  %6496 = vmatprep.mubr.bf16.mxu0 %v16319_v6  ;;  %6799 = vmatpush2.bf16.msra.mxu0 %v11234_v24  ;;  %v11251_v24 = vld [vmem:[#allocation4 + $0x4e8] ss:$20 sps:$4 sm:$0xff]   ;;  %v13748_v9 = vpop.f32.mrf.mxu0 }
 0x429   : > { %v13732_v52 = vpop.f32.mrf.mxu1  ;;  %6800 = vmatprep.subr.bf16.mxu0 %v11242_v61  ;;  %v6047_v61 = vadd.f32 %v13498_v7, %v13697_v59  ;;  %9979 = vmatprep.subr.bf16.mxu1 %v11251_v24  ;;  %16438 = vst [vmem:[#allocation126_spill] sm:$0xff] %v13748_v9 }
 0x42b   : > { %v6235_v14 = vpop.f32.mrf.mxu1  ;;  %6700 = vmatmul.mubr.bf16.gmra.mxu1 %v16436_v48 }
 0x42c   : > { %v13741_v57 = vadd.f32 %v6235_v14, %v6043_v18  ;;  %6709 = vmatprep.mubr.bf16.mxu1 %v16437_v36  ;;  %6801 = vmatpush2.bf16.msra.mxu0 %v11240_v62  ;;  %v6053_v62 = vadd.f32 %v13521_v17, %v13697_v59  ;;  %v16439_v14 = vld [vmem:[#allocation100_spill] sm:$0xff] }
 0x42d   : > { %v6237_v29 = vpop.f32.mrf.mxu1  ;;  %9867 = vmatprep.subr.bf16.mxu0 %v11243_v12  ;;  %v13758_v12 = vpop.f32.mrf.mxu0 }
 0x42e   : > { %v13746_v23 = vadd.f32 %v6237_v29, %v6045_v44  ;;  %v6055_v44 = vadd.f32 %v13529_v40, %v13703_v25  ;;  %v16440_v29 = vld [vmem:[#allocation27_spill] sm:$0xff] }
 0x42f   : > { %v6239_v48 = vpop.f32.mrf.mxu1  ;;  %6497 = vmatmul.mubr.bf16.gmra.mxu0 %v13627_v46  ;;  %v13770_v53 = vpop.f32.mrf.mxu0 }
 0x430   : > { %v13751_v39 = vadd.f32 %v6239_v48, %v6047_v61  ;;  %6506 = vmatprep.mubr.bf16.mxu0 %v16319_v6  ;;  %v6057_v61 = vadd.f32 %v13533_v2, %v13697_v59  ;;  %v16442_v2 = vld [vmem:[#allocation102_spill] sm:$0xff] }
 0x431   : > { %v13754_v18 = vpop.f32.mrf.mxu1 }
 0x433   : > { %v6245_v7 = vpop.f32.mrf.mxu1  ;;  %6710 = vmatmul.mubr.bf16.gmra.mxu1 %v16439_v14  ;;  %v16443_v14 = vld [vmem:[#allocation31_spill] sm:$0xff] }
 0x434   : > { %v13763_v24 = vadd.f32 %v6245_v7, %v6053_v62  ;;  %6719 = vmatprep.mubr.bf16.mxu1 %v16440_v29  ;;  %v6063_v62 = vadd.f32 %v13553_v22, %v13697_v59  ;;  %v13780_v7 = vpop.f32.mrf.mxu0 }
 0x435   : > { %v6247_v48 = vpop.f32.mrf.mxu1 }
 0x436   : > { %v13768_v36 = vadd.f32 %v6247_v48, %v6055_v44  ;;  %v6065_v44 = vadd.f32 %v13561_v58, %v13703_v25  ;;  %v13792_v43 = vpop.f32.mrf.mxu0 }
 0x437   : > { %v6249_v17 = vpop.f32.mrf.mxu1  ;;  %6507 = vmatmul.mubr.bf16.gmra.mxu0 %v13619_v1  ;;  %16444 = vst [vmem:[#allocation77_spill] sm:$0xff] %v13792_v43 }
 0x438   : > { %v13773_v32 = vadd.f32 %v6249_v17, %v6057_v61  ;;  %6516 = vmatprep.mubr.bf16.mxu0 %v16319_v6  ;;  %v6067_v17 = vadd.f32 %v13565_v51, %v13697_v59  ;;  %v16447_v51 = vld [vmem:[#allocation25_spill] sm:$0xff] }
 0x439   : > { %v13776_v40 = vpop.f32.mrf.mxu1 }
 0x43a   : > { %16441 = vst [vmem:[#allocation127_spill] sm:$0xff] %v13773_v32 }
 0x43b   : > { %v6255_v29 = vpop.f32.mrf.mxu1  ;;  %6720 = vmatmul.mubr.bf16.gmra.mxu1 %v16442_v2  ;;  %v16448_v2 = vld [vmem:[#allocation34_spill] sm:$0xff] }
 0x43c   : > { %v13785_v48 = vadd.f32 %v6255_v29, %v6063_v62  ;;  %6729 = vmatprep.mubr.bf16.mxu1 %v16443_v14  ;;  %v6073_v29 = vadd.f32 %v13585_v49, %v13697_v59  ;;  %v13802_v62 = vpop.f32.mrf.mxu0 }
 0x43d   : > { %v6257_v61 = vpop.f32.mrf.mxu1 }
 0x43e   : > { %v13790_v9 = vadd.f32 %v6257_v61, %v6065_v44  ;;  %v6075_v44 = vadd.f32 %v13593_v0, %v13703_v25 }
 0x43f   : > { %v6259_v22 = vpop.f32.mrf.mxu1  ;;  %6517 = vmatmul.mubr.bf16.gmra.mxu0 %v13659_v28 }
 0x440   : > { %v13795_v32 = vadd.f32 %v6259_v22, %v6067_v17  ;;  %6526 = vmatprep.mubr.bf16.mxu0 %v16319_v6  ;;  %v6077_v22 = vadd.f32 %v13597_v34, %v13697_v59  ;;  %v16452_v34 = vld [vmem:[#allocation32_spill] sm:$0xff] }
 0x441   : > { %v13798_v58 = vpop.f32.mrf.mxu1 }
 0x442   : > { %16445 = vst [vmem:[#allocation78_spill] sm:$0xff] %v13795_v32  ;;  %16446 = vst [vmem:[#allocation95_spill] sm:$0xff] %v13798_v58  ;;  %v13814_v32 = vpop.f32.mrf.mxu0 }
 0x443   : > { %v6265_v14 = vpop.f32.mrf.mxu1  ;;  %6730 = vmatmul.mubr.bf16.gmra.mxu1 %v16447_v51  ;;  %v16453_v51 = vld [vmem:[#allocation107_spill] sm:$0xff] }
 0x444   : > { %v13807_v61 = vadd.f32 %v6265_v14, %v6073_v29  ;;  %6739 = vmatprep.mubr.bf16.mxu1 %v16448_v2  ;;  %v6083_v14 = vadd.f32 %v13617_v60, %v13697_v59  ;;  %v13824_v29 = vpop.f32.mrf.mxu0 }
 0x445   : > { %v6267_v17 = vpop.f32.mrf.mxu1 }
 0x446   : > { %v13812_v43 = vadd.f32 %v6267_v17, %v6075_v44  ;;  %v6085_v44 = vadd.f32 %v13625_v11, %v13703_v25 }
 0x447   : > { %v6269_v49 = vpop.f32.mrf.mxu1  ;;  %6527 = vmatmul.mubr.bf16.gmra.mxu0 %v13651_v31 }
 0x448   : > { %16449 = vst [vmem:[#allocation94_spill] sm:$0xff] %v13812_v43  ;;  %v13817_v58 = vadd.f32 %v6269_v49, %v6077_v22  ;;  %6536 = vmatprep.mubr.bf16.mxu0 %v16319_v6  ;;  %v6087_v49 = vadd.f32 %v13629_v27, %v13697_v59  ;;  %v16457_v27 = vld [vmem:[#allocation106_spill] sm:$0xff] }
 0x449   : > { %v13820_v0 = vpop.f32.mrf.mxu1 }
 0x44a   : > { %16450 = vst [vmem:[#allocation14_spill] sm:$0xff] %v13817_v58  ;;  %16451 = vst [vmem:[#allocation81_spill] sm:$0xff] %v13820_v0  ;;  %v13836_v0 = vpop.f32.mrf.mxu0 }
 0x44b   : > { %v6275_v2 = vpop.f32.mrf.mxu1  ;;  %6740 = vmatmul.mubr.bf16.gmra.mxu1 %v16452_v34  ;;  %16454 = vst [vmem:[#allocation79_spill] sm:$0xff] %v13836_v0  ;;  %v16458_v34 = vld [vmem:[#allocation38_spill] sm:$0xff] }
 0x44c   : > { %v13829_v17 = vadd.f32 %v6275_v2, %v6083_v14  ;;  %6749 = vmatprep.mubr.bf16.mxu1 %v16453_v51  ;;  %v6093_v2 = vadd.f32 %v13649_v4, %v13697_v59  ;;  %v13846_v14 = vpop.f32.mrf.mxu0 }
 0x44d   : > { %v6277_v22 = vpop.f32.mrf.mxu1 }
 0x44e   : > { %v13834_v58 = vadd.f32 %v6277_v22, %v6085_v44  ;;  %v6095_v44 = vadd.f32 %v13657_v16, %v13703_v25 }
 0x44f   : > { %v6279_v60 = vpop.f32.mrf.mxu1  ;;  %6537 = vmatmul.mubr.bf16.gmra.mxu0 %v13694_v10 }
 0x450   : > { %v13839_v43 = vadd.f32 %v6279_v60, %v6087_v49  ;;  %6546 = vmatprep.mubr.bf16.mxu0 %v16319_v6  ;;  %v6097_v60 = vadd.f32 %v13661_v20, %v13697_v59  ;;  %v16461_v20 = vld [vmem:[#allocation33_spill] sm:$0xff] }
 0x451   : > { %v13842_v11 = vpop.f32.mrf.mxu1 }
 0x452   : > { %16455 = vst [vmem:[#allocation80_spill] sm:$0xff] %v13839_v43  ;;  %16456 = vst [vmem:[#allocation18_spill] sm:$0xff] %v13842_v11  ;;  %v13858_v43 = vpop.f32.mrf.mxu0 }
 0x453   : > { %v6285_v51 = vpop.f32.mrf.mxu1  ;;  %6750 = vmatmul.mubr.bf16.gmra.mxu1 %v16457_v27 }
 0x454   : > { %v13851_v22 = vadd.f32 %v6285_v51, %v6093_v2  ;;  %6759 = vmatprep.mubr.bf16.mxu1 %v16458_v34  ;;  %v6103_v51 = vadd.f32 %v13681_v38, %v13697_v59  ;;  %v13868_v2 = vpop.f32.mrf.mxu0 }
 0x455   : > { %v6287_v49 = vpop.f32.mrf.mxu1 }
 0x456   : > { %v13856_v0 = vadd.f32 %v6287_v49, %v6095_v44  ;;  %v6105_v44 = vadd.f32 %v13692_v13, %v13703_v25  ;;  %v11252_v13 = vld [vmem:[#allocation4 + $0x3a8] ss:$20 sps:$4 sm:$0xff]  }
 0x457   : > { %v6289_v4 = vpop.f32.mrf.mxu1  ;;  %6547 = vmatmul.mubr.bf16.gmra.mxu0 %v13686_v3 }
 0x458   : > { %v13861_v11 = vadd.f32 %v6289_v4, %v6097_v60  ;;  %6556 = vmatprep.mubr.bf16.mxu0 %v16319_v6  ;;  %v6107_v4 = vadd.f32 %v13699_v45, %v13697_v59 }
 0x459   : > { %v13864_v16 = vpop.f32.mrf.mxu1 }
 0x45a   : > { %16459 = vst [vmem:[#allocation82_spill] sm:$0xff] %v13861_v11  ;;  %16460 = vst [vmem:[#allocation20_spill] sm:$0xff] %v13864_v16  ;;  %v13880_v11 = vpop.f32.mrf.mxu0 }
 0x45b   : > { %v6295_v34 = vpop.f32.mrf.mxu1  ;;  %6760 = vmatmul.mubr.bf16.gmra.mxu1 %v16461_v20  ;;  %16464 = vst [vmem:[#allocation84_spill] sm:$0xff] %v13880_v11  ;;  %v6113_v20 = vadd.f32 %v13712_v33, %v13697_v59  ;;  %v11259_v11 = vld [vmem:[#allocation4 + $0x498] ss:$20 sps:$4 sm:$0xff]   ;;  %v6117_v33 = vadd.f32 %v13736_v21, %v13697_v59  ;;  %v6123_v21 = vadd.f32 %v13758_v12, %v13697_v59 }
 0x45c   : > { %v13873_v49 = vadd.f32 %v6295_v34, %v6103_v51  ;;  %6995 = vmatprep.mubr.bf16.mxu1 %v16319_v6  ;;  %v11255_v51 = vld [vmem:[#allocation4 + $0x4c0] ss:$20 sps:$4 sm:$0xff]   ;;  %v6127_v12 = vadd.f32 %v13780_v7, %v13697_v59  ;;  %v11266_v7 = vld [vmem:[#allocation4 + $0x308] ss:$20 sps:$4 sm:$0xff]  }
 0x45d   : > { %v6297_v60 = vpop.f32.mrf.mxu1 }
 0x45e   : > { %16462 = vst [vmem:[#allocation16_spill] sm:$0xff] %v13873_v49  ;;  %v13878_v27 = vadd.f32 %v6297_v60, %v6105_v44  ;;  %v13890_v49 = vpop.f32.mrf.mxu0  ;;  %v6115_v44 = vadd.f32 %v13726_v55, %v13703_v25 }
 0x45f   : > { %v6299_v38 = vpop.f32.mrf.mxu1  ;;  %6557 = vmatmul.mubr.bf16.gmra.mxu0 %v13720_v26 }
 0x460   : > { %16463 = vst [vmem:[#allocation13_spill] sm:$0xff] %v13878_v27  ;;  %v13883_v16 = vadd.f32 %v6299_v38, %v6107_v4  ;;  %6566 = vmatprep.mubr.bf16.mxu0 %v16319_v6  ;;  %v11256_v4 = vld [vmem:[#allocation4 + $0x380] ss:$20 sps:$4 sm:$0xff]  }
 0x461   : > { %v13886_v34 = vpop.f32.mrf.mxu1 }
 0x462   : > { %16465 = vst [vmem:[#allocation24_spill] sm:$0xff] %v13883_v16  ;;  %16466 = vst [vmem:[#allocation21_spill] sm:$0xff] %v13886_v34  ;;  %v13902_v34 = vpop.f32.mrf.mxu0 }
 0x463   : > { %v6305_v45 = vpop.f32.mrf.mxu1  ;;  %6996 = vmatmul.mubr.bf16.vlgmr.msra.gmra.mxu1 %v13495_v15 }
 0x464   : > { %v13895_v60 = vadd.f32 %v6305_v45, %v6113_v20  ;;  %7005 = vmatprep.mubr.bf16.mxu1 %v16319_v6  ;;  %9980 = vmatpush3.bf16.msra.mxu1 %v11252_v13  ;;  %v16470_v20 = vld [vmem:[#allocation109_spill] sm:$0xff]  ;;  %v11260_v13 = vld [vmem:[#allocation4 + $0x358] ss:$20 sps:$4 sm:$0xff]  }
 0x465   : > { %v6307_v38 = vpop.f32.mrf.mxu1  ;;  %9981 = vmatprep.subr.bf16.mxu1 %v11255_v51  ;;  %v11262_v51 = vld [vmem:[#allocation4 + $0x470] ss:$20 sps:$4 sm:$0xff]  }
 0x466   : > { %16467 = vst [vmem:[#allocation88_spill] sm:$0xff] %v13895_v60  ;;  %v13900_v16 = vadd.f32 %v6307_v38, %v6115_v44  ;;  %v13912_v44 = vpop.f32.mrf.mxu0  ;;  %v11265_v60 = vld [vmem:[#allocation4 + $0x448] ss:$20 sps:$4 sm:$0xff]  }
 0x467   : > { %v6309_v15 = vpop.f32.mrf.mxu1  ;;  %6567 = vmatmul.mubr.bf16.gmra.mxu0 %v13710_v5 }
 0x468   : > { %16468 = vst [vmem:[#allocation17_spill] sm:$0xff] %v13900_v16  ;;  %v13905_v55 = vadd.f32 %v6309_v15, %v6117_v33  ;;  %6802 = vmatprep.mubr.bf16.mxu0 %v16470_v20  ;;  %9982 = vmatpush3.bf16.msra.mxu1 %v11256_v4  ;;  %v6125_v15 = vadd.f32 %v13770_v53, %v13703_v25  ;;  %v16475_v53 = vld [vmem:[#allocation39_spill] sm:$0xff] }
 0x469   : > { %v13908_v45 = vpop.f32.mrf.mxu1  ;;  %9983 = vmatprep.subr.bf16.mxu1 %v11259_v11  ;;  %v11245_v11 = vld [vmem:[#allocation4 + $0x240] ss:$20 sps:$4 sm:$0xff]  }
 0x46a   : > { %16469 = vst [vmem:[#allocation83_spill] sm:$0xff] %v13905_v55  ;;  %16471 = vst [vmem:[#allocation86_spill] sm:$0xff] %v13908_v45  ;;  %v11244_v55 = vld [vmem:[#allocation4 + $0x128] ss:$20 sps:$4 sm:$0xff]   ;;  %v11264_v45 = vld [vmem:[#allocation4 + $0x330] ss:$20 sps:$4 sm:$0xff]  }
 0x46b   : > { %v6315_v38 = vpop.f32.mrf.mxu1  ;;  %7006 = vmatmul.mubr.bf16.gmra.mxu1 %v13489_v30  ;;  %v13924_v30 = vpop.f32.mrf.mxu0 }
 0x46c   : > { %v13917_v33 = vadd.f32 %v6315_v38, %v6123_v21  ;;  %7015 = vmatprep.mubr.bf16.mxu1 %v16319_v6  ;;  %9984 = vmatpush3.bf16.msra.mxu1 %v11260_v13  ;;  %16474 = vst [vmem:[#allocation23_spill] sm:$0xff] %v13924_v30  ;;  %v16477_v38 = vld [vmem:[#allocation111_spill] sm:$0xff] }
 0x46d   : > { %v6317_v4 = vpop.f32.mrf.mxu1  ;;  %9985 = vmatprep.subr.bf16.mxu1 %v11262_v51  ;;  %v11246_v13 = vld [vmem:[#allocation4 + $0x100] ss:$20 sps:$4 sm:$0xff]   ;;  %v11247_v51 = vld [vmem:[#allocation4 + $0x218] ss:$20 sps:$4 sm:$0xff]   ;;  %v13934_v30 = vpop.f32.mrf.mxu0 }
 0x46e   : > { %16472 = vst [vmem:[#allocation26_spill] sm:$0xff] %v13917_v33  ;;  %v13922_v16 = vadd.f32 %v6317_v4, %v6125_v15  ;;  %v6133_v15 = vadd.f32 %v13802_v62, %v13697_v59  ;;  %v11267_v4 = vld [vmem:[#allocation4 + $0x420] ss:$20 sps:$4 sm:$0xff]  }
 0x46f   : > { %v6319_v27 = vpop.f32.mrf.mxu1  ;;  %6803 = vmatmul.mubr.bf16.vlgmr.msra.gmra.mxu0 %v16475_v53  ;;  %v11268_v62 = vld [vmem:[#allocation4 + $0x2e0] ss:$20 sps:$4 sm:$0xff]  }
 0x470   : > { %16473 = vst [vmem:[#allocation87_spill] sm:$0xff] %v13922_v16  ;;  %v13927_v21 = vadd.f32 %v6319_v27, %v6127_v12  ;;  %9868 = vmatpush3.bf16.msra.mxu0 %v11244_v55  ;;  %6812 = vmatprep.mubr.bf16.mxu0 %v16477_v38  ;;  %v6135_v27 = vadd.f32 %v13814_v32, %v13703_v25  ;;  %v11249_v12 = vld [vmem:[#allocation4 + $0x1f0] ss:$20 sps:$4 sm:$0xff]  }
 0x471   : > { %v13930_v33 = vpop.f32.mrf.mxu1  ;;  %9869 = vmatprep.subr.bf16.mxu0 %v11245_v11  ;;  %9986 = vmatpush3.bf16.msra.mxu1 %v11264_v45  ;;  %v11248_v45 = vld [vmem:[#allocation4 + $0xd8] ss:$20 sps:$4 sm:$0xff]  }
 0x472   : > { %16476 = vst [vmem:[#allocation85_spill] sm:$0xff] %v13927_v21  ;;  %16478 = vst [vmem:[#allocation12_spill] sm:$0xff] %v13930_v33  ;;  %9987 = vmatprep.subr.bf16.mxu1 %v11265_v60  ;;  %v6137_v60 = vadd.f32 %v13824_v29, %v13697_v59  ;;  %v13946_v33 = vpop.f32.mrf.mxu0  ;;  %v11270_v29 = vld [vmem:[#allocation4 + $0x2b8] ss:$20 sps:$4 sm:$0xff]  }
 0x473   : > { %v6325_v16 = vpop.f32.mrf.mxu1  ;;  %7016 = vmatmul.mubr.bf16.gmra.mxu1 %v13531_v41  ;;  %v11269_v41 = vld [vmem:[#allocation4 + $0x3f8] ss:$20 sps:$4 sm:$0xff]  }
 0x474   : > { %v13939_v55 = vadd.f32 %v6325_v16, %v6133_v15  ;;  %7025 = vmatprep.mubr.bf16.mxu1 %v16319_v6  ;;  %9870 = vmatpush3.bf16.msra.mxu0 %v11246_v13  ;;  %v16481_v16 = vld [vmem:[#allocation110_spill] sm:$0xff]  ;;  %v16483_v13 = vld [vmem:[#allocation37_spill] sm:$0xff] }
 0x475   : > { %v6327_v11 = vpop.f32.mrf.mxu1  ;;  %9871 = vmatprep.subr.bf16.mxu0 %v11247_v51  ;;  %9988 = vmatpush3.bf16.msra.mxu1 %v11266_v7  ;;  %v11250_v51 = vld [vmem:[#allocation4 + $0xb0] ss:$20 sps:$4 sm:$0xff]  }
 0x476   : > { %16479 = vst [vmem:[#allocation11_spill] sm:$0xff] %v13939_v55  ;;  %v13944_v21 = vadd.f32 %v6327_v11, %v6135_v27  ;;  %9989 = vmatprep.subr.bf16.mxu1 %v11267_v4  ;;  %v11253_v55 = vld [vmem:[#allocation4 + $0x1c8] ss:$20 sps:$4 sm:$0xff]   ;;  %v6143_v4 = vadd.f32 %v13846_v14, %v13697_v59  ;;  %v11272_v27 = vld [vmem:[#allocation4 + $0x3d0] ss:$20 sps:$4 sm:$0xff]   ;;  %v6166_v11 = vpop.f32.mrf.mxu0 }
 0x477   : > { %v6329_v32 = vpop.f32.mrf.mxu1  ;;  %6813 = vmatmul.mubr.bf16.gmra.mxu0 %v16481_v16  ;;  %v11274_v14 = vld [vmem:[#allocation4 + $0x290] ss:$20 sps:$4 sm:$0xff]  }
 0x478   : > { %16480 = vst [vmem:[#allocation103_spill] sm:$0xff] %v13944_v21  ;;  %v13949_v15 = vadd.f32 %v6329_v32, %v6137_v60  ;;  %6822 = vmatprep.mubr.bf16.mxu0 %v16483_v13  ;;  %9872 = vmatpush3.bf16.msra.mxu0 %v11248_v45  ;;  %v6145_v60 = vadd.f32 %v13858_v43, %v13703_v25  ;;  %v11257_v32 = vld [vmem:[#allocation4 + $0x1a0] ss:$20 sps:$4 sm:$0xff]  }
 0x479   : > { %v13952_v7 = vpop.f32.mrf.mxu1  ;;  %9873 = vmatprep.subr.bf16.mxu0 %v11249_v12  ;;  %9990 = vmatpush3.bf16.msra.mxu1 %v11268_v62  ;;  %v11254_v12 = vld [vmem:[#allocation4 + $0x88] ss:$20 sps:$4 sm:$0xff]  }
 0x47a   : > { %16482 = vst [vmem:[#allocation28_spill] sm:$0xff] %v13949_v15  ;;  %9991 = vmatprep.subr.bf16.mxu1 %v11269_v41  ;;  %v6147_v41 = vadd.f32 %v13868_v2, %v13697_v59  ;;  %v6153_v2 = vadd.f32 %v13890_v49, %v13697_v59 }
 0x47b   : > { %v6335_v21 = vpop.f32.mrf.mxu1  ;;  %7026 = vmatmul.mubr.bf16.gmra.mxu1 %v13523_v42  ;;  %v13966_v42 = vpop.f32.mrf.mxu0 }
 0x47c   : > { %v13959_v45 = vadd.f32 %v6335_v21, %v6143_v4  ;;  %7035 = vmatprep.mubr.bf16.mxu1 %v16319_v6  ;;  %9874 = vmatpush3.bf16.msra.mxu0 %v11250_v51  ;;  %16485 = vst [vmem:[#allocation109_spill] sm:$0xff] %v13966_v42  ;;  %v16486_v21 = vld [vmem:[#allocation40_spill] sm:$0xff]  ;;  %v16488_v51 = vld [vmem:[#allocation43_spill] sm:$0xff] }
 0x47d   : > { %v6337_v62 = vpop.f32.mrf.mxu1  ;;  %9875 = vmatprep.subr.bf16.mxu0 %v11253_v55  ;;  %9992 = vmatpush3.bf16.msra.mxu1 %v11270_v29  ;;  %v11258_v55 = vld [vmem:[#allocation4 + $0x60] ss:$20 sps:$4 sm:$0xff]   ;;  %v11261_v29 = vld [vmem:[#allocation4 + $0x178] ss:$20 sps:$4 sm:$0xff]  }
 0x47e   : > { %16484 = vst [vmem:[#allocation30_spill] sm:$0xff] %v13959_v45  ;;  %v13964_v15 = vadd.f32 %v6337_v62, %v6145_v60  ;;  %9993 = vmatprep.subr.bf16.mxu1 %v11272_v27  ;;  %v6172_v27 = vpop.f32.mrf.mxu0  ;;  %v6155_v62 = vadd.f32 %v13902_v34, %v13703_v25  ;;  %v16492_v34 = vld [vmem:[#allocation113_spill] sm:$0xff] }
 0x47f   : > { %v6339_v43 = vpop.f32.mrf.mxu1  ;;  %6823 = vmatmul.mubr.bf16.gmra.mxu0 %v16486_v21 }
 0x480   : > { %v13969_v4 = vadd.f32 %v6339_v43, %v6147_v41  ;;  %6832 = vmatprep.mubr.bf16.mxu0 %v16488_v51  ;;  %9876 = vmatpush3.bf16.msra.mxu0 %v11254_v12  ;;  %v11263_v12 = vld [vmem:[#allocation4 + $0x38] ss:$20 sps:$4 sm:$0xff]   ;;  %v6174_v42 = vpop.f32.mrf.mxu0 }
 0x481   : > { %v13972_v45 = vpop.f32.mrf.mxu1  ;;  %9877 = vmatprep.subr.bf16.mxu0 %v11257_v32  ;;  %9994 = vmatpush3.bf16.msra.mxu1 %v11274_v14  ;;  %v11271_v32 = vld [vmem:[#allocation4 + $0x150] ss:$20 sps:$4 sm:$0xff]   ;;  %v6157_v14 = vadd.f32 %v13912_v44, %v13697_v59  ;;  %v6163_v44 = vadd.f32 %v13934_v30, %v13697_v59 }
 0x482   : > { %16487 = vst [vmem:[#allocation39_spill] sm:$0xff] %v13969_v4  ;;  %16489 = vst [vmem:[#allocation111_spill] sm:$0xff] %v13972_v45 }
 0x483   : > { %v6345_v60 = vpop.f32.mrf.mxu1  ;;  %7036 = vmatmul.mubr.bf16.gmra.mxu1 %v13563_v19  ;;  %v16490_v19 = vld [vmem:[#allocation42_spill] sm:$0xff] }
 0x484   : > { %v13979_v41 = vadd.f32 %v6345_v60, %v6153_v2  ;;  %7045 = vmatprep.mubr.bf16.mxu1 %v16319_v6  ;;  %9878 = vmatpush3.bf16.msra.mxu0 %v11258_v55  ;;  %v11273_v2 = vld [vmem:[#allocation4 + $0x10] ss:$20 sps:$4 sm:$0xff]   ;;  %v6176_v60 = vpop.f32.mrf.mxu0 }
 0x485   : > { %v6347_v43 = vpop.f32.mrf.mxu1  ;;  %9879 = vmatprep.subr.bf16.mxu0 %v11261_v29  ;;  %v13992_v29 = vld [vmem:[#allocation4 + $0x628] ss:$20 sps:$4 sm:$0xff]  }
 0x486   : > { %v13984_v49 = vadd.f32 %v6347_v43, %v6155_v62  ;;  %v14006_v30 = vpop.f32.mrf.mxu0 }
 0x487   : > { %v6349_v4 = vpop.f32.mrf.mxu1  ;;  %6833 = vmatmul.mubr.bf16.gmra.mxu0 %v16490_v19  ;;  %16496 = vst [vmem:[#allocation42_spill] sm:$0xff] %v14006_v30 }
 0x488   : > { %v13987_v45 = vadd.f32 %v6349_v4, %v6157_v14  ;;  %6842 = vmatprep.mubr.bf16.mxu0 %v16492_v34  ;;  %9880 = vmatpush3.bf16.msra.mxu0 %v11263_v12  ;;  %v6165_v4 = vadd.f32 %v13946_v33, %v13703_v25  ;;  %v16499_v33 = vld [vmem:[#allocation44_spill] sm:$0xff] }
 0x489   : > { %v13990_v55 = vpop.f32.mrf.mxu1  ;;  %9881 = vmatprep.subr.bf16.mxu0 %v11271_v32  ;;  %v6167_v32 = vadd.f32 %v6166_v11, %v13697_v59  ;;  %v6175_v11 = vadd.f32 %v6174_v42, %v13703_v25 }
 0x48a   : > { %16491 = vst [vmem:[#allocation110_spill] sm:$0xff] %v13987_v45  ;;  %16493 = vst [vmem:[#allocation37_spill] sm:$0xff] %v13990_v55  ;;  %v16497_v55 = vld [vmem:[#allocation112_spill] sm:$0xff] }
 0x48b   : > { %v6355_v62 = vpop.f32.mrf.mxu1  ;;  %7046 = vmatmul.mubr.bf16.gmra.mxu1 %v13555_v50 }
 0x48c   : > { %v13999_v43 = vadd.f32 %v6355_v62, %v6163_v44  ;;  %7055 = vmatprep.mubr.bf16.mxu1 %v16319_v6  ;;  %9882 = vmatpush3.bf16.msra.mxu0 %v11273_v2  ;;  %v6173_v2 = vadd.f32 %v6172_v27, %v13697_v59  ;;  %v6182_v62 = vpop.f32.mrf.mxu0 }
 0x48d   : > { %v6357_v12 = vpop.f32.mrf.mxu1  ;;  %10459 = vmatprep.subr.bf16.mxu0 %v13992_v29  ;;  %v6183_v42 = vadd.f32 %v6182_v62, %v13697_v59  ;;  %v16511_v62 = vld [vmem:[#allocation48_spill] sm:$0xff] }
 0x48e   : > { %16494 = vst [vmem:[#allocation40_spill] sm:$0xff] %v13999_v43  ;;  %v14004_v14 = vadd.f32 %v6357_v12, %v6165_v4  ;;  %v6184_v30 = vpop.f32.mrf.mxu0 }
 0x48f   : > { %v6359_v45 = vpop.f32.mrf.mxu1  ;;  %6843 = vmatmul.mubr.bf16.gmra.mxu0 %v16497_v55 }
 0x490   : > { %16495 = vst [vmem:[#allocation43_spill] sm:$0xff] %v14004_v14  ;;  %v14009_v50 = vadd.f32 %v6359_v45, %v6167_v32  ;;  %6852 = vmatprep.mubr.bf16.mxu0 %v16499_v33  ;;  %v6177_v45 = vadd.f32 %v6176_v60, %v13697_v59  ;;  %v16505_v14 = vld [vmem:[#allocation46_spill] sm:$0xff]  ;;  %v6185_v60 = vadd.f32 %v6184_v30, %v13703_v25 }
 0x491   : > { %v14012_v44 = vpop.f32.mrf.mxu1 }
 0x492   : > { %16498 = vst [vmem:[#allocation113_spill] sm:$0xff] %v14009_v50  ;;  %16500 = vst [vmem:[#allocation112_spill] sm:$0xff] %v14012_v44  ;;  %v16503_v44 = vld [vmem:[#allocation114_spill] sm:$0xff] }
 0x493   : > { %v6365_v43 = vpop.f32.mrf.mxu1  ;;  %7056 = vmatmul.mubr.bf16.gmra.mxu1 %v13595_v63 }
 0x494   : > { %v14017_v4 = vadd.f32 %v6365_v43, %v6173_v2  ;;  %7065 = vmatprep.mubr.bf16.mxu1 %v16319_v6  ;;  %v6186_v43 = vpop.f32.mrf.mxu0 }
 0x495   : > { %v6367_v12 = vpop.f32.mrf.mxu1 }
 0x496   : > { %16501 = vst [vmem:[#allocation44_spill] sm:$0xff] %v14017_v4  ;;  %v14021_v32 = vadd.f32 %v6367_v12, %v6175_v11 }
 0x497   : > { %v6369_v50 = vpop.f32.mrf.mxu1  ;;  %6853 = vmatmul.mubr.bf16.gmra.mxu0 %v16503_v44 }
 0x498   : > { %16502 = vst [vmem:[#allocation129_spill] sm:$0xff] %v14021_v32  ;;  %v14024_v27 = vadd.f32 %v6369_v50, %v6177_v45  ;;  %6862 = vmatprep.mubr.bf16.mxu0 %v16505_v14  ;;  %v6187_v50 = vadd.f32 %v6186_v43, %v13697_v59  ;;  %v16509_v32 = vld [vmem:[#allocation41_spill] sm:$0xff]  ;;  %v16517_v43 = vld [vmem:[#allocation50_spill] sm:$0xff] }
 0x499   : > { %v14027_v63 = vpop.f32.mrf.mxu1 }
 0x49a   : > { %16504 = vst [vmem:[#allocation114_spill] sm:$0xff] %v14024_v27  ;;  %16506 = vst [vmem:[#allocation46_spill] sm:$0xff] %v14027_v63 }
 0x49b   : > { %v6375_v2 = vpop.f32.mrf.mxu1  ;;  %7066 = vmatmul.mubr.bf16.gmra.mxu1 %v13587_v56 }
 0x49c   : > { %v14032_v11 = vadd.f32 %v6375_v2, %v6183_v42  ;;  %7075 = vmatprep.mubr.bf16.mxu1 %v16319_v6  ;;  %v16516_v42 = vld [vmem:[#allocation47_spill] sm:$0xff] }
 0x49d   : > { %v6377_v12 = vpop.f32.mrf.mxu1 }
 0x49e   : > { %16507 = vst [vmem:[#allocation130_spill] sm:$0xff] %v14032_v11  ;;  %v14036_v45 = vadd.f32 %v6377_v12, %v6185_v60  ;;  %v14060_v60 = vpop.f32.mrf.mxu0 }
 0x49f   : > { %v6379_v27 = vpop.f32.mrf.mxu1  ;;  %6863 = vmatmul.mubr.bf16.gmra.mxu0 %v16509_v32  ;;  %16520 = vst [vmem:[#allocation135_spill] sm:$0xff] %v14060_v60 }
 0x4a0   : > { %16508 = vst [vmem:[#allocation131_spill] sm:$0xff] %v14036_v45  ;;  %v14039_v63 = vadd.f32 %v6379_v27, %v6187_v50  ;;  %6872 = vmatprep.mubr.bf16.mxu0 %v16511_v62 }
 0x4a1   : > { %v14042_v4 = vpop.f32.mrf.mxu1 }
 0x4a2   : > { %16510 = vst [vmem:[#allocation41_spill] sm:$0xff] %v14039_v63  ;;  %16512 = vst [vmem:[#allocation48_spill] sm:$0xff] %v14042_v4 }
 0x4a3   : > { %v14044_v56 = vpop.f32.mrf.mxu1  ;;  %7076 = vmatmul.mubr.bf16.gmra.mxu1 %v13627_v46 }
 0x4a4   : > { %16513 = vst [vmem:[#allocation132_spill] sm:$0xff] %v14044_v56  ;;  %7085 = vmatprep.mubr.bf16.mxu1 %v16319_v6  ;;  %v16524_v56 = vld [vmem:[#allocation115_spill] sm:$0xff] }
 0x4a5   : > { %v14048_v30 = vpop.f32.mrf.mxu1 }
 0x4a6   : > { %16514 = vst [vmem:[#allocation133_spill] sm:$0xff] %v14048_v30 }
 0x4a7   : > { %v14050_v59 = vpop.f32.mrf.mxu1  ;;  %6873 = vmatmul.mubr.bf16.gmra.mxu0 %v16516_v42 }
 0x4a8   : > { %16515 = vst [vmem:[#allocation134_spill] sm:$0xff] %v14050_v59  ;;  %6882 = vmatprep.mubr.bf16.mxu0 %v16517_v43  ;;  %v16523_v59 = vld [vmem:[#allocation45_spill] sm:$0xff] }
 0x4a9   : > { %v14054_v27 = vpop.f32.mrf.mxu1 }
 0x4aa   : > { %16518 = vst [vmem:[#allocation47_spill] sm:$0xff] %v14054_v27 }
 0x4ab   : > { %v14056_v2 = vpop.f32.mrf.mxu1  ;;  %7086 = vmatmul.mubr.bf16.gmra.mxu1 %v13619_v1  ;;  %v6039_v1 = vadd.f32 %v13484_v35, %v13703_v25 }
 0x4ac   : > { %16519 = vst [vmem:[#allocation50_spill] sm:$0xff] %v14056_v2  ;;  %7095 = vmatprep.mubr.bf16.mxu1 %v16319_v6 }
 0x4ad   : > { %v14062_v12 = vpop.f32.mrf.mxu1 }
 0x4ae   : > { %16521 = vst [vmem:[#allocation136_spill] sm:$0xff] %v14062_v12  ;;  %v6232_v12 = vadd.f32 %v13732_v52, %v6039_v1 }
 0x4af   : > { %v14064_v50 = vpop.f32.mrf.mxu1  ;;  %v6418_v46 = vpop.f32.mrf.mxu0  ;;  %6883 = vmatmul.mubr.bf16.gmra.mxu0 %v16523_v59 }
 0x4b0   : > { %16522 = vst [vmem:[#allocation137_spill] sm:$0xff] %v14064_v50  ;;  %v6419_v30 = vadd.f32 %v6418_v46, %v13717_v8  ;;  %6892 = vmatprep.mubr.bf16.mxu0 %v16524_v56 }
 0x4b1   : > { %v14069_v27 = vpop.f32.mrf.mxu1  ;;  %v6420_v2 = vpop.f32.mrf.mxu0 }
 0x4b2   : > { %16525 = vst [vmem:[#allocation45_spill] sm:$0xff] %v14069_v27  ;;  %v6421_v63 = vadd.f32 %v6420_v2, %v13724_v37  ;;  %v7639_v27 = vmax.f32 %v6419_v30, 0.0  ;;  %v16527_v2 = vld [vmem:[#allocation51_spill] sm:$0xff] }
 0x4b3   : > { %v14074_v4 = vpop.f32.mrf.mxu1  ;;  %7096 = vmatmul.mubr.bf16.gmra.mxu1 %v13659_v28  ;;  %v6422_v50 = vpop.f32.mrf.mxu0 }
 0x4b4   : > { %16526 = vst [vmem:[#allocation138_spill] sm:$0xff] %v14074_v4  ;;  %v6423_v45 = vadd.f32 %v6422_v50, %v13729_v54  ;;  %7105 = vmatprep.mubr.bf16.mxu1 %v16319_v6  ;;  %v7640_v4 = vmax.f32 %v6421_v63, 0.0  ;;  %v16529_v54 = vld [vmem:[#allocation49_spill] sm:$0xff] }
 0x4b5   : > { %v14080_v46 = vpop.f32.mrf.mxu1  ;;  %v6424_v8 = vpop.f32.mrf.mxu0 }
 0x4b6   : > { %v7644_v60 = vmax.f32 %v6423_v45, 0.0  ;;  %v6425_v11 = vadd.f32 %v6424_v8, %v6232_v12  ;;  %v6049_v45 = vadd.f32 %v13509_v47, %v13703_v25 }
 0x4b7   : > { %v14082_v35 = vpop.f32.mrf.mxu1  ;;  %v6428_v37 = vpop.f32.mrf.mxu0  ;;  %6893 = vmatmul.mubr.bf16.gmra.mxu0 %v16527_v2 }
 0x4b8   : > { %v14085_v28 = vpack.c.bf16 %v7644_v60, %v7639_v27  ;;  %v7645_v56 = vmax.f32 %v6425_v11, 0.0  ;;  %v6429_v1 = vadd.f32 %v6428_v37, %v13741_v57  ;;  %6902 = vmatprep.mubr.bf16.mxu0 %v16529_v54  ;;  %v6242_v11 = vadd.f32 %v13754_v18, %v6049_v45 }
 0x4b9   : > { %v14089_v52 = vpop.f32.mrf.mxu1  ;;  %v6430_v50 = vpop.f32.mrf.mxu0 }
 0x4ba   : > { %16528 = vst [vmem:[#allocation51_spill] sm:$0xff] %v14085_v28  ;;  %v6431_v30 = vadd.f32 %v6430_v50, %v13746_v23  ;;  %v14094_v12 = vpack.c.bf16 %v7645_v56, %v7640_v4  ;;  %v7649_v37 = vmax.f32 %v6429_v1, 0.0  ;;  %v16532_v4 = vld [vmem:[#allocation52_spill] sm:$0xff] }
 0x4bb   : > { %v14096_v8 = vpop.f32.mrf.mxu1  ;;  %7106 = vmatmul.mubr.bf16.gmra.mxu1 %v13651_v31  ;;  %v6432_v63 = vpop.f32.mrf.mxu0  ;;  %v11280_v1 = vld [vmem:[%s15683_s7 + $0x78] sm:$0xff]  }
 0x4bc   : > { %16530 = vst [vmem:[#allocation49_spill] sm:$0xff] %v14094_v12  ;;  %v6433_v57 = vadd.f32 %v6432_v63, %v13751_v39  ;;  %7115 = vmatprep.mubr.bf16.mxu1 %v16319_v6  ;;  %v7650_v50 = vmax.f32 %v6431_v30, 0.0  ;;  %v16534_v39 = vld [vmem:[#allocation55_spill] sm:$0xff]  ;;  %10115 = vmatprep.subr.bf16.mxu1 %v11280_v1 }
 0x4bd   : > { %v14102_v27 = vpop.f32.mrf.mxu1  ;;  %v6434_v60 = vpop.f32.mrf.mxu0 }
 0x4be   : > { %v7654_v47 = vmax.f32 %v6433_v57, 0.0  ;;  %v6435_v28 = vadd.f32 %v6434_v60, %v6242_v11  ;;  %v16536_v11 = vld [vmem:[#allocation29_spill] sm:$0xff] }
 0x4bf   : > { %v14104_v23 = vpop.f32.mrf.mxu1  ;;  %v6438_v56 = vpop.f32.mrf.mxu0  ;;  %6903 = vmatmul.mubr.bf16.gmra.mxu0 %v16532_v4  ;;  %v6059_v57 = vadd.f32 %v16536_v11, %v13703_v25 }
 0x4c0   : > { %16531 = vst [vmem:[#allocation139_spill] sm:$0xff] %v14104_v23  ;;  %v14107_v31 = vpack.c.bf16 %v7654_v47, %v7649_v37  ;;  %v7655_v12 = vmax.f32 %v6435_v28, 0.0  ;;  %v6439_v18 = vadd.f32 %v6438_v56, %v13763_v24  ;;  %6912 = vmatprep.mubr.bf16.mxu0 %v16534_v39  ;;  %v16538_v47 = vld [vmem:[#allocation127_spill] sm:$0xff] }
 0x4c1   : > { %v14111_v45 = vpop.f32.mrf.mxu1  ;;  %v6440_v63 = vpop.f32.mrf.mxu0  ;;  %v6252_v24 = vadd.f32 %v13776_v40, %v6059_v57  ;;  %v16543_v57 = vld [vmem:[#allocation58_spill] sm:$0xff] }
 0x4c2   : > { %16533 = vst [vmem:[#allocation52_spill] sm:$0xff] %v14107_v31  ;;  %16535 = vst [vmem:[#allocation55_spill] sm:$0xff] %v14111_v45  ;;  %v6441_v60 = vadd.f32 %v6440_v63, %v13768_v36  ;;  %v14119_v30 = vpack.c.bf16 %v7655_v12, %v7650_v50  ;;  %v7659_v11 = vmax.f32 %v6439_v18, 0.0  ;;  %v16541_v63 = vld [vmem:[#allocation54_spill] sm:$0xff]  ;;  %v16545_v18 = vld [vmem:[#allocation35_spill] sm:$0xff] }
 0x4c3   : > { %v14121_v37 = vpop.f32.mrf.mxu1  ;;  %7116 = vmatmul.mubr.bf16.gmra.mxu1 %v13694_v10  ;;  %v6442_v28 = vpop.f32.mrf.mxu0 }
 0x4c4   : > { %16537 = vst [vmem:[#allocation29_spill] sm:$0xff] %v14119_v30  ;;  %v6443_v56 = vadd.f32 %v6442_v28, %v16538_v47  ;;  %7125 = vmatprep.mubr.bf16.mxu1 %v16319_v6  ;;  %v7660_v10 = vmax.f32 %v6441_v60, 0.0  ;;  %v16548_v60 = vld [vmem:[#allocation95_spill] sm:$0xff] }
 0x4c5   : > { %v14127_v31 = vpop.f32.mrf.mxu1  ;;  %v6444_v45 = vpop.f32.mrf.mxu0 }
 0x4c6   : > { %16539 = vst [vmem:[#allocation127_spill] sm:$0xff] %v14127_v31  ;;  %v7664_v23 = vmax.f32 %v6443_v56, 0.0  ;;  %v6445_v36 = vadd.f32 %v6444_v45, %v6252_v24  ;;  %v6069_v56 = vadd.f32 %v16545_v18, %v13703_v25 }
 0x4c7   : > { %v14129_v12 = vpop.f32.mrf.mxu1  ;;  %v6448_v50 = vpop.f32.mrf.mxu0  ;;  %6913 = vmatmul.mubr.bf16.gmra.mxu0 %v16541_v63 }
 0x4c8   : > { %16540 = vst [vmem:[#allocation140_spill] sm:$0xff] %v14129_v12  ;;  %v14132_v30 = vpack.c.bf16 %v7664_v23, %v7659_v11  ;;  %v7665_v1 = vmax.f32 %v6445_v36, 0.0  ;;  %v6449_v40 = vadd.f32 %v6448_v50, %v13785_v48  ;;  %6922 = vmatprep.mubr.bf16.mxu0 %v16543_v57  ;;  %v6262_v11 = vadd.f32 %v16548_v60, %v6069_v56  ;;  %v16549_v48 = vld [vmem:[#allocation78_spill] sm:$0xff] }
 0x4c9   : > { %v14136_v28 = vpop.f32.mrf.mxu1  ;;  %v6450_v47 = vpop.f32.mrf.mxu0 }
 0x4ca   : > { %16542 = vst [vmem:[#allocation54_spill] sm:$0xff] %v14132_v30  ;;  %16544 = vst [vmem:[#allocation58_spill] sm:$0xff] %v14136_v28  ;;  %v6451_v45 = vadd.f32 %v6450_v47, %v13790_v9  ;;  %v14141_v24 = vpack.c.bf16 %v7665_v1, %v7660_v10  ;;  %v7669_v28 = vmax.f32 %v6449_v40, 0.0  ;;  %v16552_v1 = vld [vmem:[#allocation56_spill] sm:$0xff] }
 0x4cb   : > { %v14143_v12 = vpop.f32.mrf.mxu1  ;;  %7126 = vmatmul.mubr.bf16.gmra.mxu1 %v13686_v3  ;;  %v6452_v23 = vpop.f32.mrf.mxu0  ;;  %v16556_v40 = vld [vmem:[#allocation36_spill] sm:$0xff] }
 0x4cc   : > { %16546 = vst [vmem:[#allocation35_spill] sm:$0xff] %v14141_v24  ;;  %16547 = vst [vmem:[#allocation141_spill] sm:$0xff] %v14143_v12  ;;  %v6453_v36 = vadd.f32 %v6452_v23, %v16549_v48  ;;  %7135 = vmatprep.mubr.bf16.mxu1 %v16319_v6  ;;  %v7670_v47 = vmax.f32 %v6451_v45, 0.0  ;;  %v16554_v23 = vld [vmem:[#allocation60_spill] sm:$0xff] }
 0x4cd   : > { %v14149_v50 = vpop.f32.mrf.mxu1  ;;  %v6454_v30 = vpop.f32.mrf.mxu0 }
 0x4ce   : > { %16550 = vst [vmem:[#allocation95_spill] sm:$0xff] %v14149_v50  ;;  %v7674_v18 = vmax.f32 %v6453_v36, 0.0  ;;  %v6455_v31 = vadd.f32 %v6454_v30, %v6262_v11  ;;  %v6079_v36 = vadd.f32 %v16556_v40, %v13703_v25  ;;  %v16557_v30 = vld [vmem:[#allocation94_spill] sm:$0xff] }
 0x4cf   : > { %v14151_v9 = vpop.f32.mrf.mxu1  ;;  %v6458_v10 = vpop.f32.mrf.mxu0  ;;  %6923 = vmatmul.mubr.bf16.gmra.mxu0 %v16552_v1 }
 0x4d0   : > { %16551 = vst [vmem:[#allocation78_spill] sm:$0xff] %v14151_v9  ;;  %v14154_v3 = vpack.c.bf16 %v7674_v18, %v7669_v28  ;;  %v7675_v24 = vmax.f32 %v6455_v31, 0.0  ;;  %v6459_v56 = vadd.f32 %v6458_v10, %v13807_v61  ;;  %6932 = vmatprep.mubr.bf16.mxu0 %v16554_v23  ;;  %v16559_v31 = vld [vmem:[#allocation81_spill] sm:$0xff]  ;;  %v16560_v61 = vld [vmem:[#allocation14_spill] sm:$0xff] }
 0x4d1   : > { %v14158_v60 = vpop.f32.mrf.mxu1  ;;  %v6460_v48 = vpop.f32.mrf.mxu0  ;;  %v6272_v45 = vadd.f32 %v16559_v31, %v6079_v36 }
 0x4d2   : > { %16553 = vst [vmem:[#allocation56_spill] sm:$0xff] %v14154_v3  ;;  %16555 = vst [vmem:[#allocation60_spill] sm:$0xff] %v14158_v60  ;;  %v6461_v11 = vadd.f32 %v6460_v48, %v16557_v30  ;;  %v14163_v9 = vpack.c.bf16 %v7675_v24, %v7670_v47  ;;  %v7679_v60 = vmax.f32 %v6459_v56, 0.0  ;;  %v16562_v47 = vld [vmem:[#allocation59_spill] sm:$0xff]  ;;  %v16566_v56 = vld [vmem:[#allocation69_spill] sm:$0xff] }
 0x4d3   : > { %v14165_v50 = vpop.f32.mrf.mxu1  ;;  %7136 = vmatmul.mubr.bf16.gmra.mxu1 %v13720_v26  ;;  %v6462_v28 = vpop.f32.mrf.mxu0 }
 0x4d4   : > { %16558 = vst [vmem:[#allocation36_spill] sm:$0xff] %v14163_v9  ;;  %v6463_v18 = vadd.f32 %v6462_v28, %v16560_v61  ;;  %7145 = vmatprep.mubr.bf16.mxu1 %v16319_v6  ;;  %v7680_v30 = vmax.f32 %v6461_v11, 0.0  ;;  %v16564_v28 = vld [vmem:[#allocation63_spill] sm:$0xff]  ;;  %v6089_v61 = vadd.f32 %v16566_v56, %v13703_v25 }
 0x4d5   : > { %v14171_v10 = vpop.f32.mrf.mxu1  ;;  %v6464_v3 = vpop.f32.mrf.mxu0 }
 0x4d6   : > { %v7684_v40 = vmax.f32 %v6463_v18, 0.0  ;;  %v6465_v12 = vadd.f32 %v6464_v3, %v6272_v45 }
 0x4d7   : > { %v14173_v48 = vpop.f32.mrf.mxu1  ;;  %v6468_v24 = vpop.f32.mrf.mxu0  ;;  %6933 = vmatmul.mubr.bf16.gmra.mxu0 %v16562_v47 }
 0x4d8   : > { %16561 = vst [vmem:[#allocation94_spill] sm:$0xff] %v14173_v48  ;;  %v14176_v26 = vpack.c.bf16 %v7684_v40, %v7679_v60  ;;  %v7685_v9 = vmax.f32 %v6465_v12, 0.0  ;;  %v6469_v36 = vadd.f32 %v6468_v24, %v13829_v17  ;;  %6942 = vmatprep.mubr.bf16.mxu0 %v16564_v28  ;;  %v16568_v12 = vld [vmem:[#allocation18_spill] sm:$0xff]  ;;  %v16569_v17 = vld [vmem:[#allocation80_spill] sm:$0xff] }
 0x4d9   : > { %v14180_v6 = vpop.f32.mrf.mxu1  ;;  %v6470_v31 = vpop.f32.mrf.mxu0  ;;  %v6282_v11 = vadd.f32 %v16568_v12, %v6089_v61  ;;  %v11283_v12 = vld [vmem:[%s15683_s7 + $0x70] sm:$0xff]  }
 0x4da   : > { %16563 = vst [vmem:[#allocation81_spill] sm:$0xff] %v14176_v26  ;;  %16565 = vst [vmem:[#allocation14_spill] sm:$0xff] %v14180_v6  ;;  %v6471_v3 = vadd.f32 %v6470_v31, %v13834_v58  ;;  %v14185_v45 = vpack.c.bf16 %v7685_v9, %v7680_v30  ;;  %v7689_v6 = vmax.f32 %v6469_v36, 0.0  ;;  %v16570_v30 = vld [vmem:[#allocation62_spill] sm:$0xff] }
 0x4db   : > { %v14187_v18 = vpop.f32.mrf.mxu1  ;;  %7146 = vmatmul.mubr.bf16.gmra.mxu1 %v13710_v5  ;;  %v6472_v60 = vpop.f32.mrf.mxu0 }
 0x4dc   : > { %16567 = vst [vmem:[#allocation59_spill] sm:$0xff] %v14185_v45  ;;  %v6473_v40 = vadd.f32 %v6472_v60, %v16569_v17  ;;  %7349 = vmatprep.mubr.bf16.mxu1 %v16470_v20  ;;  %v7690_v31 = vmax.f32 %v6471_v3, 0.0  ;;  %v16572_v60 = vld [vmem:[#allocation61_spill] sm:$0xff]  ;;  %v11281_v20 = vld [vmem:[%s15683_s7 + $0x38] sm:$0xff]  }
 0x4dd   : > { %v14193_v24 = vpop.f32.mrf.mxu1  ;;  %v6474_v26 = vpop.f32.mrf.mxu0  ;;  %v16574_v3 = vld [vmem:[#allocation72_spill] sm:$0xff] }
 0x4de   : > { %v7694_v56 = vmax.f32 %v6473_v40, 0.0  ;;  %v6475_v48 = vadd.f32 %v6474_v26, %v6282_v11  ;;  %v16577_v40 = vld [vmem:[#allocation20_spill] sm:$0xff] }
 0x4df   : > { %v14195_v58 = vpop.f32.mrf.mxu1  ;;  %v6478_v9 = vpop.f32.mrf.mxu0  ;;  %6943 = vmatmul.mubr.bf16.gmra.mxu0 %v16570_v30 }
 0x4e0   : > { %v14198_v5 = vpack.c.bf16 %v7694_v56, %v7689_v6  ;;  %v7695_v45 = vmax.f32 %v6475_v48, 0.0  ;;  %v6479_v61 = vadd.f32 %v6478_v9, %v13851_v22  ;;  %6952 = vmatprep.mubr.bf16.mxu0 %v16572_v60  ;;  %v6099_v6 = vadd.f32 %v16574_v3, %v13703_v25  ;;  %v16578_v9 = vld [vmem:[#allocation82_spill] sm:$0xff]  ;;  %v11284_v3 = vld [vmem:[%s15683_s7 + $0x30] sm:$0xff]  }
 0x4e1   : > { %v14205_v36 = vpop.f32.mrf.mxu1  ;;  %v6480_v26 = vpop.f32.mrf.mxu0 }
 0x4e2   : > { %16571 = vst [vmem:[#allocation63_spill] sm:$0xff] %v14198_v5  ;;  %16573 = vst [vmem:[#allocation69_spill] sm:$0xff] %v14205_v36  ;;  %v6481_v48 = vadd.f32 %v6480_v26, %v13856_v0  ;;  %v14213_v11 = vpack.c.bf16 %v7695_v45, %v7690_v31  ;;  %v6292_v56 = vadd.f32 %v16577_v40, %v6099_v6  ;;  %v7699_v45 = vmax.f32 %v6479_v61, 0.0  ;;  %v11286_v61 = vld [vmem:[%s15683_s7 + $0x28] sm:$0xff]  }
 0x4e3   : > { %v14215_v22 = vpop.f32.mrf.mxu1  ;;  %7350 = vmatmul.mubr.bf16.vlgmr.msra.gmra.mxu1 %v16475_v53  ;;  %v6482_v17 = vpop.f32.mrf.mxu0  ;;  %v11285_v53 = vld [vmem:[%s15683_s7 + $0x68] sm:$0xff]  }
 0x4e4   : > { %16575 = vst [vmem:[#allocation18_spill] sm:$0xff] %v14213_v11  ;;  %16576 = vst [vmem:[#allocation80_spill] sm:$0xff] %v14215_v22  ;;  %v6483_v5 = vadd.f32 %v6482_v17, %v16578_v9  ;;  %7357 = vmatprep.mubr.bf16.mxu1 %v16477_v38  ;;  %10116 = vmatpush3.bf16.msra.mxu1 %v11281_v20  ;;  %v16581_v38 = vld [vmem:[#allocation64_spill] sm:$0xff]  ;;  %v7700_v20 = vmax.f32 %v6481_v48, 0.0  ;;  %v16584_v22 = vld [vmem:[#allocation117_spill] sm:$0xff] }
 0x4e5   : > { %v14224_v36 = vpop.f32.mrf.mxu1  ;;  %v6484_v0 = vpop.f32.mrf.mxu0  ;;  %10117 = vmatprep.subr.bf16.mxu1 %v11283_v12  ;;  %v16583_v11 = vld [vmem:[#allocation16_spill] sm:$0xff]  ;;  %v11288_v48 = vld [vmem:[%s15683_s7 + $0x60] sm:$0xff]  }
 0x4e6   : > { %16579 = vst [vmem:[#allocation62_spill] sm:$0xff] %v14224_v36  ;;  %v7704_v31 = vmax.f32 %v6483_v5, 0.0  ;;  %v6485_v26 = vadd.f32 %v6484_v0, %v6292_v56  ;;  %v16586_v56 = vld [vmem:[#allocation70_spill] sm:$0xff] }
 0x4e7   : > { %v14229_v6 = vpop.f32.mrf.mxu1  ;;  %v6488_v17 = vpop.f32.mrf.mxu0  ;;  %6953 = vmatmul.mubr.bf16.gmra.mxu0 %v16581_v38  ;;  %v6109_v0 = vadd.f32 %v16586_v56, %v13703_v25  ;;  %v11276_v56 = vld [vmem:[#allocation4 + $0x600] ss:$20 sps:$4 sm:$0xff]  }
 0x4e8   : > { %16580 = vst [vmem:[#allocation61_spill] sm:$0xff] %v14229_v6  ;;  %v14232_v40 = vpack.c.bf16 %v7704_v31, %v7699_v45  ;;  %v7705_v9 = vmax.f32 %v6485_v26, 0.0  ;;  %v6489_v36 = vadd.f32 %v6488_v17, %v16583_v11  ;;  %7188 = vmatprep.mubr.bf16.mxu0 %v16584_v22  ;;  %10118 = vmatpush3.bf16.msra.mxu1 %v11284_v3  ;;  %v16587_v45 = vld [vmem:[#allocation13_spill] sm:$0xff] }
 0x4e9   : > { %v14239_v5 = vpop.f32.mrf.mxu1  ;;  %v6490_v12 = vpop.f32.mrf.mxu0  ;;  %10119 = vmatprep.subr.bf16.mxu1 %v11285_v53  ;;  %v16589_v26 = vld [vmem:[#allocation21_spill] sm:$0xff] }
 0x4ea   : > { %16582 = vst [vmem:[#allocation72_spill] sm:$0xff] %v14232_v40  ;;  %16585 = vst [vmem:[#allocation20_spill] sm:$0xff] %v14239_v5  ;;  %v6491_v11 = vadd.f32 %v6490_v12, %v16587_v45  ;;  %v14247_v31 = vpack.c.bf16 %v7705_v9, %v7700_v20  ;;  %v6302_v17 = vadd.f32 %v16589_v26, %v6109_v0  ;;  %v16590_v40 = vld [vmem:[#allocation24_spill] sm:$0xff]  ;;  %v11289_v20 = vld [vmem:[%s15683_s7 + $0x20] sm:$0xff]   ;;  %v7709_v9 = vmax.f32 %v6489_v36, 0.0 }
 0x4eb   : > { %v14249_v22 = vpop.f32.mrf.mxu1  ;;  %7358 = vmatmul.mubr.bf16.gmra.mxu1 %v16481_v16  ;;  %v6492_v3 = vpop.f32.mrf.mxu0  ;;  %v11290_v0 = vld [vmem:[%s15683_s7 + $0x58] sm:$0xff]   ;;  %v16595_v36 = vld [vmem:[#allocation118_spill] sm:$0xff] }
 0x4ec   : > { %16588 = vst [vmem:[#allocation82_spill] sm:$0xff] %v14247_v31  ;;  %v6493_v53 = vadd.f32 %v6492_v3, %v16590_v40  ;;  %7365 = vmatprep.mubr.bf16.mxu1 %v16483_v13  ;;  %10120 = vmatpush3.bf16.msra.mxu1 %v11286_v61  ;;  %v16592_v61 = vld [vmem:[#allocation116_spill] sm:$0xff]  ;;  %v7710_v45 = vmax.f32 %v6491_v11, 0.0  ;;  %v16597_v11 = vld [vmem:[#allocation126_spill] sm:$0xff] }
 0x4ed   : > { %v14255_v5 = vpop.f32.mrf.mxu1  ;;  %v6494_v6 = vpop.f32.mrf.mxu0  ;;  %10121 = vmatprep.subr.bf16.mxu1 %v11288_v48  ;;  %v16594_v26 = vld [vmem:[#allocation88_spill] sm:$0xff] }
 0x4ee   : > { %v7714_v12 = vmax.f32 %v6493_v53, 0.0  ;;  %v6495_v16 = vadd.f32 %v6494_v6, %v6302_v17  ;;  %v11277_v53 = vld [vmem:[#allocation4 + $0x5d8] ss:$20 sps:$4 sm:$0xff]  }
 0x4ef   : > { %v14263_v40 = vpop.f32.mrf.mxu1  ;;  %v6498_v13 = vpop.f32.mrf.mxu0  ;;  %7189 = vmatmul.mubr.bf16.vlgmr.msra.gmra.mxu0 %v16592_v61  ;;  %v11291_v61 = vld [vmem:[%s15683_s7 + $0x18] sm:$0xff]  }
 0x4f0   : > { %16591 = vst [vmem:[#allocation64_spill] sm:$0xff] %v14263_v40  ;;  %v14266_v3 = vpack.c.bf16 %v7714_v12, %v7709_v9  ;;  %v7715_v48 = vmax.f32 %v6495_v16, 0.0  ;;  %v6499_v31 = vadd.f32 %v6498_v13, %v16594_v26  ;;  %10460 = vmatpush3.bf16.msra.mxu0 %v13992_v29  ;;  %7196 = vmatprep.mubr.bf16.mxu0 %v16595_v36  ;;  %v16598_v12 = vld [vmem:[#allocation17_spill] sm:$0xff]  ;;  %v11292_v29 = vld [vmem:[%s15683_s7 + $0x50] sm:$0xff]   ;;  %v16601_v36 = vld [vmem:[#allocation86_spill] sm:$0xff] }
 0x4f1   : > { %v14271_v6 = vpop.f32.mrf.mxu1  ;;  %v6500_v17 = vpop.f32.mrf.mxu0  ;;  %10461 = vmatprep.subr.bf16.mxu0 %v11276_v56  ;;  %10122 = vmatpush3.bf16.msra.mxu1 %v11289_v20  ;;  %v6119_v9 = vadd.f32 %v16597_v11, %v13703_v25  ;;  %v11278_v11 = vld [vmem:[#allocation4 + $0x5b0] ss:$20 sps:$4 sm:$0xff]  }
 0x4f2   : > { %16593 = vst [vmem:[#allocation16_spill] sm:$0xff] %v14266_v3  ;;  %16596 = vst [vmem:[#allocation117_spill] sm:$0xff] %v14271_v6  ;;  %v6501_v16 = vadd.f32 %v6500_v17, %v16598_v12  ;;  %10123 = vmatprep.subr.bf16.mxu1 %v11290_v0  ;;  %v14282_v13 = vpack.c.bf16 %v7715_v48, %v7710_v45  ;;  %v16602_v6 = vld [vmem:[#allocation83_spill] sm:$0xff]  ;;  %v7719_v48 = vmax.f32 %v6499_v31, 0.0 }
 0x4f3   : > { %v14284_v26 = vpop.f32.mrf.mxu1  ;;  %7366 = vmatmul.mubr.bf16.gmra.mxu1 %v16486_v21  ;;  %v6502_v20 = vpop.f32.mrf.mxu0  ;;  %v6312_v3 = vadd.f32 %v16601_v36, %v6119_v9  ;;  %v11293_v45 = vld [vmem:[%s15683_s7 + $0x10] sm:$0xff]   ;;  %v16604_v9 = vld [vmem:[#allocation53_spill] sm:$0xff] }
 0x4f4   : > { %16599 = vst [vmem:[#allocation70_spill] sm:$0xff] %v14282_v13  ;;  %16600 = vst [vmem:[#allocation13_spill] sm:$0xff] %v14284_v26  ;;  %v6503_v40 = vadd.f32 %v6502_v20, %v16602_v6  ;;  %7373 = vmatprep.mubr.bf16.mxu1 %v16488_v51  ;;  %10462 = vmatpush3.bf16.msra.mxu0 %v11276_v56  ;;  %v11294_v6 = vld [vmem:[%s15683_s7 + $0x48] sm:$0xff]   ;;  %v7720_v20 = vmax.f32 %v6501_v16, 0.0  ;;  %v16607_v26 = vld [vmem:[#allocation119_spill] sm:$0xff] }
 0x4f5   : > { %v14290_v17 = vpop.f32.mrf.mxu1  ;;  %v6504_v0 = vpop.f32.mrf.mxu0  ;;  %10463 = vmatprep.subr.bf16.mxu0 %v11277_v53  ;;  %10124 = vmatpush3.bf16.msra.mxu1 %v11291_v61  ;;  %v16606_v13 = vld [vmem:[#allocation26_spill] sm:$0xff]  ;;  %v16608_v16 = vld [vmem:[#allocation77_spill] sm:$0xff] }
 0x4f6   : > { %16603 = vst [vmem:[#allocation21_spill] sm:$0xff] %v14290_v17  ;;  %v7724_v21 = vmax.f32 %v6503_v40, 0.0  ;;  %v6505_v12 = vadd.f32 %v6504_v0, %v6312_v3  ;;  %10125 = vmatprep.subr.bf16.mxu1 %v11292_v29  ;;  %v11279_v3 = vld [vmem:[#allocation4 + $0x588] ss:$20 sps:$4 sm:$0xff]   ;;  %v6129_v0 = vadd.f32 %v16608_v16, %v13703_v25  ;;  %v11282_v16 = vld [vmem:[#allocation4 + $0x560] ss:$20 sps:$4 sm:$0xff]  }
 0x4f7   : > { %v14298_v51 = vpop.f32.mrf.mxu1  ;;  %v6508_v56 = vpop.f32.mrf.mxu0  ;;  %7197 = vmatmul.mubr.bf16.gmra.mxu0 %v16604_v9  ;;  %v11295_v29 = vld [vmem:[%s15683_s7 + $0x8] sm:$0xff]   ;;  %v16613_v9 = vld [vmem:[#allocation85_spill] sm:$0xff] }
 0x4f8   : > { %v14301_v36 = vpack.c.bf16 %v7724_v21, %v7719_v48  ;;  %v7725_v61 = vmax.f32 %v6505_v12, 0.0  ;;  %v6509_v17 = vadd.f32 %v6508_v56, %v16606_v13  ;;  %7204 = vmatprep.mubr.bf16.mxu0 %v16607_v26  ;;  %10464 = vmatpush3.bf16.msra.mxu0 %v11277_v53  ;;  %v16609_v48 = vld [vmem:[#allocation87_spill] sm:$0xff]  ;;  %v11297_v53 = vld [vmem:[%s15683_s7 + $0x40] sm:$0xff]   ;;  %v16612_v12 = vld [vmem:[#allocation12_spill] sm:$0xff] }
 0x4f9   : > { %v14305_v31 = vpop.f32.mrf.mxu1  ;;  %v6510_v40 = vpop.f32.mrf.mxu0  ;;  %10465 = vmatprep.subr.bf16.mxu0 %v11278_v11  ;;  %10126 = vmatpush3.bf16.msra.mxu1 %v11293_v45  ;;  %v6322_v56 = vadd.f32 %v16612_v12, %v6129_v0  ;;  %v16615_v12 = vld [vmem:[#allocation57_spill] sm:$0xff] }
 0x4fa   : > { %16605 = vst [vmem:[#allocation24_spill] sm:$0xff] %v14301_v36  ;;  %v6511_v21 = vadd.f32 %v6510_v40, %v16609_v48  ;;  %10127 = vmatprep.subr.bf16.mxu1 %v11294_v6  ;;  %v14316_v13 = vpack.c.bf16 %v7725_v61, %v7720_v20  ;;  %v11298_v20 = vld [vmem:[%s15683_s7] sm:$0xff]   ;;  %v7729_v61 = vmax.f32 %v6509_v17, 0.0 }
 0x4fb   : > { %v14318_v26 = vpop.f32.mrf.mxu1  ;;  %7374 = vmatmul.mubr.bf16.gmra.mxu1 %v16490_v19  ;;  %v6512_v45 = vpop.f32.mrf.mxu0 }
 0x4fc   : > { %16610 = vst [vmem:[#allocation116_spill] sm:$0xff] %v14316_v13  ;;  %16611 = vst [vmem:[#allocation88_spill] sm:$0xff] %v14318_v26  ;;  %v6513_v36 = vadd.f32 %v6512_v45, %v16613_v9  ;;  %7381 = vmatprep.mubr.bf16.mxu1 %v16492_v34  ;;  %10466 = vmatpush3.bf16.msra.mxu0 %v11278_v11  ;;  %v7730_v34 = vmax.f32 %v6511_v21, 0.0  ;;  %v16617_v13 = vld [vmem:[#allocation11_spill] sm:$0xff] }
 0x4fd   : > { %v14324_v40 = vpop.f32.mrf.mxu1  ;;  %v6514_v6 = vpop.f32.mrf.mxu0  ;;  %10467 = vmatprep.subr.bf16.mxu0 %v11279_v3  ;;  %10128 = vmatpush3.bf16.msra.mxu1 %v11295_v29  ;;  %v16618_v29 = vld [vmem:[#allocation121_spill] sm:$0xff] }
 0x4fe   : > { %16614 = vst [vmem:[#allocation118_spill] sm:$0xff] %v14324_v40  ;;  %v7734_v19 = vmax.f32 %v6513_v36, 0.0  ;;  %v6515_v48 = vadd.f32 %v6514_v6, %v6322_v56  ;;  %10129 = vmatprep.subr.bf16.mxu1 %v11297_v53  ;;  %v11287_v36 = vld [vmem:[#allocation4 + $0x538] ss:$20 sps:$4 sm:$0xff]   ;;  %v16619_v53 = vld [vmem:[#allocation79_spill] sm:$0xff] }
 0x4ff   : > { %v14329_v0 = vpop.f32.mrf.mxu1  ;;  %v6518_v45 = vpop.f32.mrf.mxu0  ;;  %7205 = vmatmul.mubr.bf16.gmra.mxu0 %v16615_v12  ;;  %v6139_v56 = vadd.f32 %v16619_v53, %v13703_v25  ;;  %v16620_v6 = vld [vmem:[#allocation103_spill] sm:$0xff] }
 0x500   : > { %v14332_v11 = vpack.c.bf16 %v7734_v19, %v7729_v61  ;;  %v7735_v9 = vmax.f32 %v6515_v48, 0.0  ;;  %v6519_v40 = vadd.f32 %v6518_v45, %v16617_v13  ;;  %7212 = vmatprep.mubr.bf16.mxu0 %v16618_v29  ;;  %10468 = vmatpush3.bf16.msra.mxu0 %v11279_v3  ;;  %v16622_v19 = vld [vmem:[#allocation28_spill] sm:$0xff]  ;;  %v11296_v29 = vld [vmem:[#allocation4 + $0x510] ss:$20 sps:$4 sm:$0xff]  }
 0x501   : > { %v14336_v26 = vpop.f32.mrf.mxu1  ;;  %v6520_v17 = vpop.f32.mrf.mxu0  ;;  %10469 = vmatprep.subr.bf16.mxu0 %v11282_v16  ;;  %10130 = vmatpush3.bf16.msra.mxu1 %v11298_v20  ;;  %v6332_v3 = vadd.f32 %v13952_v7, %v6139_v56 }
 0x502   : > { %16616 = vst [vmem:[#allocation126_spill] sm:$0xff] %v14332_v11  ;;  %v6521_v12 = vadd.f32 %v6520_v17, %v16620_v6  ;;  %v14341_v21 = vpack.c.bf16 %v7735_v9, %v7730_v34  ;;  %v7739_v17 = vmax.f32 %v6519_v40, 0.0  ;;  %v16627_v40 = vld [vmem:[#allocation84_spill] sm:$0xff] }
 0x503   : > { %v14343_v61 = vpop.f32.mrf.mxu1  ;;  %7382 = vmatmul.mubr.bf16.gmra.mxu1 %v16497_v55  ;;  %v6522_v13 = vpop.f32.mrf.mxu0  ;;  %v16623_v55 = vld [vmem:[#allocation120_spill] sm:$0xff] }
 0x504   : > { %16621 = vst [vmem:[#allocation17_spill] sm:$0xff] %v14341_v21  ;;  %v6523_v48 = vadd.f32 %v6522_v13, %v16622_v19  ;;  %7389 = vmatprep.mubr.bf16.mxu1 %v16499_v33  ;;  %10470 = vmatpush3.bf16.msra.mxu0 %v11282_v16  ;;  %v7740_v11 = vmax.f32 %v6521_v12, 0.0  ;;  %v16625_v13 = vld [vmem:[#allocation30_spill] sm:$0xff]  ;;  %v16626_v16 = vld [vmem:[#allocation123_spill] sm:$0xff] }
 0x505   : > { %v14349_v20 = vpop.f32.mrf.mxu1  ;;  %v6524_v45 = vpop.f32.mrf.mxu0  ;;  %10471 = vmatprep.subr.bf16.mxu0 %v11287_v36 }
 0x506   : > { %v7744_v34 = vmax.f32 %v6523_v48, 0.0  ;;  %v6525_v9 = vadd.f32 %v6524_v45, %v6332_v3  ;;  %v6149_v3 = vadd.f32 %v16627_v40, %v13703_v25 }
 0x507   : > { %v14351_v53 = vpop.f32.mrf.mxu1  ;;  %v6528_v6 = vpop.f32.mrf.mxu0  ;;  %7213 = vmatmul.mubr.bf16.gmra.mxu0 %v16623_v55 }
 0x508   : > { %v14354_v7 = vpack.c.bf16 %v7744_v34, %v7739_v17  ;;  %v7745_v56 = vmax.f32 %v6525_v9, 0.0  ;;  %v6529_v33 = vadd.f32 %v6528_v6, %v16625_v13  ;;  %7220 = vmatprep.mubr.bf16.mxu0 %v16626_v16  ;;  %10472 = vmatpush3.bf16.msra.mxu0 %v11287_v36  ;;  %v16629_v34 = vld [vmem:[#allocation111_spill] sm:$0xff] }
 0x509   : > { %v14358_v19 = vpop.f32.mrf.mxu1  ;;  %v6530_v21 = vpop.f32.mrf.mxu0  ;;  %10473 = vmatprep.subr.bf16.mxu0 %v11296_v29  ;;  %v6342_v9 = vadd.f32 %v16629_v34, %v6149_v3  ;;  %v16630_v6 = vld [vmem:[#allocation39_spill] sm:$0xff]  ;;  %v16635_v34 = vld [vmem:[#allocation125_spill] sm:$0xff] }
 0x50a   : > { %16624 = vst [vmem:[#allocation86_spill] sm:$0xff] %v14354_v7  ;;  %v6531_v48 = vadd.f32 %v6530_v21, %v13964_v15  ;;  %v14363_v45 = vpack.c.bf16 %v7745_v56, %v7740_v11  ;;  %v7749_v16 = vmax.f32 %v6529_v33, 0.0  ;;  %v11299_v11 = vld [vmem:[%s15683_s7 + $0xf8] sm:$0xff]   ;;  %v16633_v56 = vld [vmem:[#allocation122_spill] sm:$0xff] }
 0x50b   : > { %v14365_v12 = vpop.f32.mrf.mxu1  ;;  %7390 = vmatmul.mubr.bf16.gmra.mxu1 %v16503_v44  ;;  %v6532_v17 = vpop.f32.mrf.mxu0 }
 0x50c   : > { %16628 = vst [vmem:[#allocation83_spill] sm:$0xff] %v14363_v45  ;;  %v6533_v36 = vadd.f32 %v6532_v17, %v16630_v6  ;;  %7397 = vmatprep.mubr.bf16.mxu1 %v16505_v14  ;;  %10474 = vmatpush3.bf16.msra.mxu0 %v11296_v29  ;;  %v7750_v3 = vmax.f32 %v6531_v48, 0.0  ;;  %v16637_v6 = vld [vmem:[#allocation23_spill] sm:$0xff] }
 0x50d   : > { %v14371_v55 = vpop.f32.mrf.mxu1  ;;  %v6534_v13 = vpop.f32.mrf.mxu0  ;;  %10227 = vmatprep.subr.bf16.mxu0 %v11299_v11 }
 0x50e   : > { %16631 = vst [vmem:[#allocation53_spill] sm:$0xff] %v14371_v55  ;;  %v7754_v40 = vmax.f32 %v6533_v36, 0.0  ;;  %v6535_v15 = vadd.f32 %v6534_v13, %v6342_v9  ;;  %v6159_v36 = vadd.f32 %v16637_v6, %v13703_v25 }
 0x50f   : > { %v14376_v21 = vpop.f32.mrf.mxu1  ;;  %v6538_v44 = vpop.f32.mrf.mxu0  ;;  %7221 = vmatmul.mubr.bf16.gmra.mxu0 %v16633_v56 }
 0x510   : > { %16632 = vst [vmem:[#allocation26_spill] sm:$0xff] %v14376_v21  ;;  %v14379_v17 = vpack.c.bf16 %v7754_v40, %v7749_v16  ;;  %v7755_v14 = vmax.f32 %v6535_v15, 0.0  ;;  %v6539_v29 = vadd.f32 %v6538_v44, %v13979_v41  ;;  %7228 = vmatprep.mubr.bf16.mxu0 %v16635_v34  ;;  %v16640_v16 = vld [vmem:[#allocation37_spill] sm:$0xff]  ;;  %v16641_v40 = vld [vmem:[#allocation110_spill] sm:$0xff] }
 0x511   : > { %v14383_v33 = vpop.f32.mrf.mxu1  ;;  %v6540_v9 = vpop.f32.mrf.mxu0  ;;  %v6352_v41 = vadd.f32 %v16640_v16, %v6159_v36  ;;  %v16646_v36 = vld [vmem:[#allocation40_spill] sm:$0xff] }
 0x512   : > { %16634 = vst [vmem:[#allocation119_spill] sm:$0xff] %v14379_v17  ;;  %16636 = vst [vmem:[#allocation77_spill] sm:$0xff] %v14383_v33  ;;  %v6541_v13 = vadd.f32 %v6540_v9, %v13984_v49  ;;  %v14388_v7 = vpack.c.bf16 %v7755_v14, %v7750_v3  ;;  %v7759_v34 = vmax.f32 %v6539_v29, 0.0  ;;  %v16644_v14 = vld [vmem:[#allocation124_spill] sm:$0xff]  ;;  %v16649_v29 = vld [vmem:[#allocation109_spill] sm:$0xff] }
 0x513   : > { %v14390_v56 = vpop.f32.mrf.mxu1  ;;  %7398 = vmatmul.mubr.bf16.gmra.mxu1 %v16509_v32  ;;  %v6542_v48 = vpop.f32.mrf.mxu0 }
 0x514   : > { %16638 = vst [vmem:[#allocation87_spill] sm:$0xff] %v14388_v7  ;;  %16639 = vst [vmem:[#allocation12_spill] sm:$0xff] %v14390_v56  ;;  %v6543_v15 = vadd.f32 %v6542_v48, %v16641_v40  ;;  %7405 = vmatprep.mubr.bf16.mxu1 %v16511_v62  ;;  %v7760_v9 = vmax.f32 %v6541_v13, 0.0  ;;  %v16647_v48 = vld [vmem:[#allocation15_spill] sm:$0xff]  ;;  %v16681_v56 = vld [vmem:[#allocation98_spill] sm:$0xff] }
 0x515   : > { %v14396_v11 = vpop.f32.mrf.mxu1  ;;  %v6544_v44 = vpop.f32.mrf.mxu0 }
 0x516   : > { %16642 = vst [vmem:[#allocation85_spill] sm:$0xff] %v14396_v11  ;;  %v7764_v6 = vmax.f32 %v6543_v15, 0.0  ;;  %v6545_v17 = vadd.f32 %v6544_v44, %v6352_v41  ;;  %v6169_v15 = vadd.f32 %v16649_v29, %v13703_v25  ;;  %v16650_v41 = vld [vmem:[#allocation43_spill] sm:$0xff]  ;;  %v16679_v11 = vld [vmem:[#allocation132_spill] sm:$0xff] }
 0x517   : > { %v14398_v49 = vpop.f32.mrf.mxu1  ;;  %v6548_v3 = vpop.f32.mrf.mxu0  ;;  %7229 = vmatmul.mubr.bf16.gmra.mxu0 %v16644_v14 }
 0x518   : > { %16643 = vst [vmem:[#allocation57_spill] sm:$0xff] %v14398_v49  ;;  %v14401_v32 = vpack.c.bf16 %v7764_v6, %v7759_v34  ;;  %v7765_v7 = vmax.f32 %v6545_v17, 0.0  ;;  %v6549_v16 = vadd.f32 %v6548_v3, %v16646_v36  ;;  %7236 = vmatprep.mubr.bf16.mxu0 %v16647_v48  ;;  %v16653_v17 = vld [vmem:[#allocation112_spill] sm:$0xff]  ;;  %v16654_v6 = vld [vmem:[#allocation113_spill] sm:$0xff] }
 0x519   : > { %v14405_v62 = vpop.f32.mrf.mxu1  ;;  %v6550_v40 = vpop.f32.mrf.mxu0  ;;  %v6362_v34 = vadd.f32 %v16653_v17, %v6169_v15  ;;  %v16659_v15 = vld [vmem:[#allocation44_spill] sm:$0xff] }
 0x51a   : > { %16645 = vst [vmem:[#allocation11_spill] sm:$0xff] %v14401_v32  ;;  %16648 = vst [vmem:[#allocation121_spill] sm:$0xff] %v14405_v62  ;;  %v6551_v44 = vadd.f32 %v6550_v40, %v16650_v41  ;;  %v14410_v45 = vpack.c.bf16 %v7765_v7, %v7760_v9  ;;  %v7769_v48 = vmax.f32 %v6549_v16, 0.0  ;;  %v16657_v9 = vld [vmem:[#allocation128_spill] sm:$0xff]  ;;  %v16662_v16 = vld [vmem:[#allocation42_spill] sm:$0xff] }
 0x51b   : > { %v14412_v49 = vpop.f32.mrf.mxu1  ;;  %7406 = vmatmul.mubr.bf16.gmra.mxu1 %v16516_v42  ;;  %v6552_v13 = vpop.f32.mrf.mxu0 }
 0x51c   : > { %16651 = vst [vmem:[#allocation79_spill] sm:$0xff] %v14410_v45  ;;  %16652 = vst [vmem:[#allocation103_spill] sm:$0xff] %v14412_v49  ;;  %v6553_v3 = vadd.f32 %v6552_v13, %v16654_v6  ;;  %7413 = vmatprep.mubr.bf16.mxu1 %v16517_v43  ;;  %v7770_v41 = vmax.f32 %v6551_v44, 0.0  ;;  %v16660_v13 = vld [vmem:[#allocation97_spill] sm:$0xff] }
 0x51d   : > { %v14418_v14 = vpop.f32.mrf.mxu1  ;;  %v6554_v36 = vpop.f32.mrf.mxu0 }
 0x51e   : > { %16655 = vst [vmem:[#allocation28_spill] sm:$0xff] %v14418_v14  ;;  %v7774_v29 = vmax.f32 %v6553_v3, 0.0  ;;  %v6555_v32 = vadd.f32 %v6554_v36, %v6362_v34  ;;  %v6179_v3 = vadd.f32 %v16662_v16, %v13703_v25  ;;  %v16663_v34 = vld [vmem:[#allocation129_spill] sm:$0xff] }
 0x51f   : > { %v14420_v40 = vpop.f32.mrf.mxu1  ;;  %v6558_v7 = vpop.f32.mrf.mxu0  ;;  %7237 = vmatmul.mubr.bf16.gmra.mxu0 %v16657_v9  ;;  %v16667_v9 = vld [vmem:[#allocation115_spill] sm:$0xff] }
 0x520   : > { %16656 = vst [vmem:[#allocation120_spill] sm:$0xff] %v14420_v40  ;;  %v14423_v42 = vpack.c.bf16 %v7774_v29, %v7769_v48  ;;  %v7775_v45 = vmax.f32 %v6555_v32, 0.0  ;;  %v6559_v17 = vadd.f32 %v6558_v7, %v16659_v15  ;;  %7244 = vmatprep.mubr.bf16.mxu0 %v16660_v13  ;;  %v16665_v48 = vld [vmem:[#allocation46_spill] sm:$0xff] }
 0x521   : > { %v14427_v43 = vpop.f32.mrf.mxu1  ;;  %v6560_v6 = vpop.f32.mrf.mxu0  ;;  %v6372_v32 = vadd.f32 %v16665_v48, %v6179_v3  ;;  %v16666_v29 = vld [vmem:[#allocation114_spill] sm:$0xff]  ;;  %v16671_v3 = vld [vmem:[#allocation19_spill] sm:$0xff] }
 0x522   : > { %16658 = vst [vmem:[#allocation30_spill] sm:$0xff] %v14423_v42  ;;  %16661 = vst [vmem:[#allocation123_spill] sm:$0xff] %v14427_v43  ;;  %v6561_v36 = vadd.f32 %v6560_v6, %v16663_v34  ;;  %v14432_v40 = vpack.c.bf16 %v7775_v45, %v7770_v41  ;;  %v7779_v42 = vmax.f32 %v6559_v17, 0.0  ;;  %v16668_v6 = vld [vmem:[#allocation96_spill] sm:$0xff]  ;;  %v16670_v34 = vld [vmem:[#allocation130_spill] sm:$0xff] }
 0x523   : > { %v6997_v14 = vpop.f32.mrf.mxu1  ;;  %7414 = vmatmul.mubr.bf16.gmra.mxu1 %v16523_v59  ;;  %v6562_v44 = vpop.f32.mrf.mxu0  ;;  %v11326_v17 = vld [vmem:[%s15682_s6] sm:$0x1f] }
 0x524   : > { %16664 = vst [vmem:[#allocation84_spill] sm:$0xff] %v14432_v40  ;;  %v6563_v7 = vadd.f32 %v6562_v44, %v16666_v29  ;;  %7421 = vmatprep.mubr.bf16.mxu1 %v16667_v9  ;;  %v7780_v45 = vmax.f32 %v6561_v36, 0.0  ;;  %v16672_v29 = vld [vmem:[#allocation135_spill] sm:$0xff] }
 0x525   : > { %v6999_v15 = vpop.f32.mrf.mxu1  ;;  %v6564_v13 = vpop.f32.mrf.mxu0  ;;  %v6189_v9 = vadd.f32 %v16672_v29, %v13703_v25  ;;  %v16674_v36 = vld [vmem:[#allocation131_spill] sm:$0xff] }
 0x526   : > { %v7784_v43 = vmax.f32 %v6563_v7, 0.0  ;;  %v6565_v49 = vadd.f32 %v6564_v13, %v6372_v32  ;;  %v16673_v32 = vld [vmem:[#allocation9_spill] sm:$0xff] }
 0x527   : > { %v7001_v16 = vpop.f32.mrf.mxu1  ;;  %v6568_v62 = vpop.f32.mrf.mxu0  ;;  %7245 = vmatmul.mubr.bf16.gmra.mxu0 %v16668_v6  ;;  %v14449_v7 = vrot.slane %v11326_v17, %v16673_v32 }
 0x528   : > { %v14439_v41 = vpack.c.bf16 %v7784_v43, %v7779_v42  ;;  %v7785_v59 = vmax.f32 %v6565_v49, 0.0  ;;  %v6569_v40 = vadd.f32 %v6568_v62, %v16670_v34  ;;  %7252 = vmatprep.mubr.bf16.mxu0 %v16671_v3  ;;  %v16676_v49 = vld [vmem:[#allocation10_spill] sm:$0xff]  ;;  %v16677_v34 = vld [vmem:[#allocation48_spill] sm:$0xff]  ;;  %v16678_v3 = vld [vmem:[#allocation41_spill] sm:$0xff] }
 0x529   : > { %v7003_v44 = vpop.f32.mrf.mxu1  ;;  %v6570_v48 = vpop.f32.mrf.mxu0  ;;  %v14455_v62 = vrot.slane %v11326_v17, %v16676_v49  ;;  %v6382_v25 = vadd.f32 %v16677_v34, %v6189_v9  ;;  %v16680_v17 = vld [vmem:[#allocation133_spill] sm:$0xff] }
 0x52a   : > { %16669 = vst [vmem:[#allocation111_spill] sm:$0xff] %v14439_v41  ;;  %v6571_v42 = vadd.f32 %v6570_v48, %v16674_v36  ;;  %v14452_v43 = vpack.c.bf16 %v7785_v59, %v7780_v45  ;;  %v6612_v48 = vadd.f32 %v16679_v11, %v14449_v7  ;;  %v7789_v45 = vmax.f32 %v6569_v40, 0.0  ;;  %v16684_v11 = vld [vmem:[#allocation134_spill] sm:$0xff] }
 0x52b   : > { %v7007_v13 = vpop.f32.mrf.mxu1  ;;  %7422 = vmatmul.mubr.bf16.gmra.mxu1 %v16527_v2  ;;  %v6572_v6 = vpop.f32.mrf.mxu0  ;;  %v6614_v49 = vadd.f32 %v16680_v17, %v14455_v62  ;;  %v6616_v40 = vadd.f32 %v16684_v11, %v14449_v7 }
 0x52c   : > { %16675 = vst [vmem:[#allocation39_spill] sm:$0xff] %v14452_v43  ;;  %v6573_v29 = vadd.f32 %v6572_v6, %v16678_v3  ;;  %7429 = vmatprep.mubr.bf16.mxu1 %v16529_v54  ;;  %v7790_v9 = vmax.f32 %v6571_v42, 0.0  ;;  %v16683_v3 = vld [vmem:[#allocation22_spill] sm:$0xff]  ;;  %v16686_v42 = vld [vmem:[#allocation47_spill] sm:$0xff] }
 0x52d   : > { %v7009_v41 = vpop.f32.mrf.mxu1  ;;  %v6574_v32 = vpop.f32.mrf.mxu0 }
 0x52e   : > { %v7794_v59 = vmax.f32 %v6573_v29, 0.0  ;;  %v6575_v36 = vadd.f32 %v6574_v32, %v6382_v25 }
 0x52f   : > { %v7011_v43 = vpop.f32.mrf.mxu1  ;;  %v6804_v2 = vpop.f32.mrf.mxu0  ;;  %7253 = vmatmul.mubr.bf16.gmra.mxu0 %v16681_v56 }
 0x530   : > { %v14466_v34 = vpack.c.bf16 %v7794_v59, %v7789_v45  ;;  %v7795_v6 = vmax.f32 %v6575_v36, 0.0  ;;  %v6805_v54 = vadd.f32 %v6804_v2, %v6612_v48  ;;  %7260 = vmatprep.mubr.bf16.mxu0 %v16683_v3  ;;  %v6618_v45 = vadd.f32 %v16686_v42, %v14455_v62  ;;  %v16687_v3 = vld [vmem:[#allocation50_spill] sm:$0xff] }
 0x531   : > { %v7013_v33 = vpop.f32.mrf.mxu1  ;;  %v6806_v21 = vpop.f32.mrf.mxu0  ;;  %v6622_v11 = vadd.f32 %v16687_v3, %v14449_v7 }
 0x532   : > { %16682 = vst [vmem:[#allocation122_spill] sm:$0xff] %v14466_v34  ;;  %v6998_v25 = vadd.f32 %v6997_v14, %v6805_v54  ;;  %v6807_v29 = vadd.f32 %v6806_v21, %v6614_v49  ;;  %v14471_v32 = vpack.c.bf16 %v7795_v6, %v7790_v9  ;;  %v16688_v49 = vld [vmem:[#allocation136_spill] sm:$0xff]  ;;  %v16689_v54 = vld [vmem:[#allocation99_spill] sm:$0xff] }
 0x533   : > { %v7017_v17 = vpop.f32.mrf.mxu1  ;;  %7430 = vmatmul.mubr.bf16.gmra.mxu1 %v16532_v4  ;;  %v6808_v56 = vpop.f32.mrf.mxu0  ;;  %v6624_v9 = vadd.f32 %v16688_v49, %v14455_v62 }
 0x534   : > { %16685 = vst [vmem:[#allocation125_spill] sm:$0xff] %v14471_v32  ;;  %v7000_v59 = vadd.f32 %v6999_v15, %v6807_v29  ;;  %v6809_v48 = vadd.f32 %v6808_v56, %v6616_v40  ;;  %7437 = vmatprep.mubr.bf16.mxu1 %v16534_v39  ;;  %v7641_v34 = vmax.f32 %v6998_v25, 0.0  ;;  %v16690_v29 = vld [vmem:[#allocation101_spill] sm:$0xff] }
 0x535   : > { %v7019_v36 = vpop.f32.mrf.mxu1  ;;  %v6810_v2 = vpop.f32.mrf.mxu0  ;;  %v16691_v39 = vld [vmem:[#allocation137_spill] sm:$0xff] }
 0x536   : > { %v7002_v14 = vadd.f32 %v7001_v16, %v6809_v48  ;;  %v6811_v21 = vadd.f32 %v6810_v2, %v6618_v45  ;;  %v6626_v56 = vadd.f32 %v16691_v39, %v14449_v7  ;;  %v7642_v32 = vmax.f32 %v7000_v59, 0.0 }
 0x537   : > { %v7021_v6 = vpop.f32.mrf.mxu1  ;;  %v6814_v4 = vpop.f32.mrf.mxu0  ;;  %7261 = vmatmul.mubr.bf16.gmra.mxu0 %v16689_v54 }
 0x538   : > { %v7646_v42 = vmax.f32 %v7002_v14, 0.0  ;;  %v7004_v15 = vadd.f32 %v7003_v44, %v6811_v21  ;;  %v6815_v40 = vadd.f32 %v6814_v4, %v6622_v11  ;;  %7268 = vmatprep.mubr.bf16.mxu0 %v16690_v29  ;;  %v16692_v44 = vld [vmem:[#allocation45_spill] sm:$0xff] }
 0x539   : > { %v7023_v3 = vpop.f32.mrf.mxu1  ;;  %v6816_v16 = vpop.f32.mrf.mxu0  ;;  %v6628_v11 = vadd.f32 %v16692_v44, %v14455_v62 }
 0x53a   : > { %v14485_v45 = vpack.c.bf16 %v7646_v42, %v7641_v34  ;;  %v7647_v48 = vmax.f32 %v7004_v15, 0.0  ;;  %v7008_v2 = vadd.f32 %v7007_v13, %v6815_v40  ;;  %v6817_v49 = vadd.f32 %v6816_v16, %v6624_v9  ;;  %v16693_v34 = vld [vmem:[#allocation138_spill] sm:$0xff]  ;;  %v16695_v16 = vld [vmem:[#allocation27_spill] sm:$0xff] }
 0x53b   : > { %v7027_v55 = vpop.f32.mrf.mxu1  ;;  %7438 = vmatmul.mubr.bf16.gmra.mxu1 %v16541_v63  ;;  %v6818_v25 = vpop.f32.mrf.mxu0  ;;  %v6632_v42 = vadd.f32 %v16693_v34, %v14449_v7  ;;  %v14498_v63 = vld [vmem:[%s15683_s7 + $0x138] sm:$0xff]  }
 0x53c   : > { %v7010_v14 = vadd.f32 %v7009_v41, %v6817_v49  ;;  %v6819_v21 = vadd.f32 %v6818_v25, %v6626_v56  ;;  %7445 = vmatprep.mubr.bf16.mxu1 %v16543_v57  ;;  %v14491_v4 = vpack.c.bf16 %v7647_v48, %v7642_v32  ;;  %v6634_v41 = vadd.f32 %v14080_v46, %v14455_v62  ;;  %v16694_v57 = vld [vmem:[#allocation100_spill] sm:$0xff] }
 0x53d   : > { %v7029_v59 = vpop.f32.mrf.mxu1  ;;  %v6820_v54 = vpop.f32.mrf.mxu0  ;;  %v7651_v32 = vmax.f32 %v7008_v2, 0.0  ;;  %10507 = vmatprep.subr.bf16.mxu1 %v14498_v63  ;;  %v6638_v2 = vadd.f32 %v14089_v52, %v14455_v62 }
 0x53e   : > { %v7012_v13 = vadd.f32 %v7011_v43, %v6819_v21  ;;  %v6821_v9 = vadd.f32 %v6820_v54, %v6628_v11  ;;  %v6636_v43 = vadd.f32 %v14082_v35, %v14449_v7  ;;  %v7652_v48 = vmax.f32 %v7010_v14, 0.0 }
 0x53f   : > { %v7031_v15 = vpop.f32.mrf.mxu1  ;;  %v6824_v40 = vpop.f32.mrf.mxu0  ;;  %7269 = vmatmul.mubr.bf16.gmra.mxu0 %v16694_v57 }
 0x540   : > { %v7656_v29 = vmax.f32 %v7012_v13, 0.0  ;;  %v7014_v39 = vadd.f32 %v7013_v33, %v6821_v9  ;;  %v6825_v56 = vadd.f32 %v6824_v40, %v6632_v42  ;;  %7276 = vmatprep.mubr.bf16.mxu0 %v16695_v16  ;;  %v6642_v9 = vadd.f32 %v14096_v8, %v14449_v7 }
 0x541   : > { %v7033_v49 = vpop.f32.mrf.mxu1  ;;  %v6826_v25 = vpop.f32.mrf.mxu0 }
 0x542   : > { %v14507_v44 = vpack.c.bf16 %v7656_v29, %v7651_v32  ;;  %v7657_v46 = vmax.f32 %v7014_v39, 0.0  ;;  %v7018_v11 = vadd.f32 %v7017_v17, %v6825_v56  ;;  %v6827_v21 = vadd.f32 %v6826_v25, %v6634_v41  ;;  %v16696_v32 = vld [vmem:[#allocation102_spill] sm:$0xff]  ;;  %v16697_v39 = vld [vmem:[#allocation31_spill] sm:$0xff] }
 0x543   : > { %v7037_v54 = vpop.f32.mrf.mxu1  ;;  %7446 = vmatmul.mubr.bf16.gmra.mxu1 %v16552_v1  ;;  %v6828_v33 = vpop.f32.mrf.mxu0  ;;  %v6644_v1 = vadd.f32 %v14102_v27, %v14455_v62  ;;  %v16698_v56 = vld [vmem:[#allocation139_spill] sm:$0xff] }
 0x544   : > { %v7020_v34 = vadd.f32 %v7019_v36, %v6827_v21  ;;  %v6829_v42 = vadd.f32 %v6828_v33, %v6636_v43  ;;  %7453 = vmatprep.mubr.bf16.mxu1 %v16554_v23  ;;  %v14513_v35 = vpack.c.bf16 %v7657_v46, %v7652_v48  ;;  %v7661_v52 = vmax.f32 %v7018_v11, 0.0 }
 0x545   : > { %v7039_v14 = vpop.f32.mrf.mxu1  ;;  %v6830_v13 = vpop.f32.mrf.mxu0  ;;  %v6646_v16 = vadd.f32 %v16698_v56, %v14449_v7 }
 0x546   : > { %v7022_v17 = vadd.f32 %v7021_v6, %v6829_v42  ;;  %v6831_v41 = vadd.f32 %v6830_v13, %v6638_v2  ;;  %v7662_v43 = vmax.f32 %v7020_v34, 0.0 }
 0x547   : > { %v7041_v40 = vpop.f32.mrf.mxu1  ;;  %v6834_v57 = vpop.f32.mrf.mxu0  ;;  %7277 = vmatmul.mubr.bf16.gmra.mxu0 %v16696_v32 }
 0x548   : > { %v7666_v36 = vmax.f32 %v7022_v17, 0.0  ;;  %v7024_v29 = vadd.f32 %v7023_v3, %v6831_v41  ;;  %v6835_v23 = vadd.f32 %v6834_v57, %v6642_v9  ;;  %7284 = vmatprep.mubr.bf16.mxu0 %v16697_v39  ;;  %v16699_v3 = vld [vmem:[#allocation55_spill] sm:$0xff]  ;;  %v6652_v17 = vadd.f32 %v14121_v37, %v14449_v7  ;;  %v16703_v39 = vld [vmem:[#allocation140_spill] sm:$0xff] }
 0x549   : > { %v7043_v8 = vpop.f32.mrf.mxu1  ;;  %v6836_v6 = vpop.f32.mrf.mxu0  ;;  %v6648_v33 = vadd.f32 %v16699_v3, %v14455_v62  ;;  %v6656_v56 = vadd.f32 %v16703_v39, %v14449_v7 }
 0x54a   : > { %v14523_v48 = vpack.c.bf16 %v7666_v36, %v7661_v52  ;;  %v7667_v25 = vmax.f32 %v7024_v29, 0.0  ;;  %v7028_v27 = vadd.f32 %v7027_v55, %v6835_v23  ;;  %v6837_v46 = vadd.f32 %v6836_v6, %v6644_v1  ;;  %v16700_v1 = vld [vmem:[#allocation127_spill] sm:$0xff]  ;;  %v16701_v52 = vld [vmem:[#allocation25_spill] sm:$0xff]  ;;  %v16702_v23 = vld [vmem:[#allocation34_spill] sm:$0xff] }
 0x54b   : > { %v7047_v21 = vpop.f32.mrf.mxu1  ;;  %7454 = vmatmul.mubr.bf16.gmra.mxu1 %v16562_v47  ;;  %v6838_v11 = vpop.f32.mrf.mxu0  ;;  %v6654_v47 = vadd.f32 %v16700_v1, %v14455_v62 }
 0x54c   : > { %v7030_v2 = vadd.f32 %v7029_v59, %v6837_v46  ;;  %v6839_v42 = vadd.f32 %v6838_v11, %v6646_v16  ;;  %7461 = vmatprep.mubr.bf16.mxu1 %v16564_v28  ;;  %v14529_v13 = vpack.c.bf16 %v7667_v25, %v7662_v43  ;;  %v7671_v59 = vmax.f32 %v7028_v27, 0.0 }
 0x54d   : > { %v7049_v34 = vpop.f32.mrf.mxu1  ;;  %v6840_v9 = vpop.f32.mrf.mxu0 }
 0x54e   : > { %v7032_v55 = vadd.f32 %v7031_v15, %v6839_v42  ;;  %v6841_v41 = vadd.f32 %v6840_v9, %v6648_v33  ;;  %v7672_v16 = vmax.f32 %v7030_v2, 0.0 }
 0x54f   : > { %v7051_v57 = vpop.f32.mrf.mxu1  ;;  %v6844_v32 = vpop.f32.mrf.mxu0  ;;  %7285 = vmatmul.mubr.bf16.gmra.mxu0 %v16701_v52 }
 0x550   : > { %v7676_v36 = vmax.f32 %v7032_v55, 0.0  ;;  %v7034_v29 = vadd.f32 %v7033_v49, %v6841_v41  ;;  %v6845_v28 = vadd.f32 %v6844_v32, %v6652_v17  ;;  %7292 = vmatprep.mubr.bf16.mxu0 %v16702_v23  ;;  %v16704_v49 = vld [vmem:[#allocation58_spill] sm:$0xff]  ;;  %v16705_v55 = vld [vmem:[#allocation141_spill] sm:$0xff] }
 0x551   : > { %v7053_v37 = vpop.f32.mrf.mxu1  ;;  %v6846_v15 = vpop.f32.mrf.mxu0  ;;  %v6658_v3 = vadd.f32 %v16704_v49, %v14455_v62  ;;  %v6662_v41 = vadd.f32 %v16705_v55, %v14449_v7  ;;  %v16709_v23 = vld [vmem:[#allocation78_spill] sm:$0xff]  ;;  %v16711_v55 = vld [vmem:[#allocation49_spill] sm:$0xff] }
 0x552   : > { %v14539_v43 = vpack.c.bf16 %v7676_v36, %v7671_v59  ;;  %v7677_v6 = vmax.f32 %v7034_v29, 0.0  ;;  %v7038_v25 = vadd.f32 %v7037_v54, %v6845_v28  ;;  %v6847_v46 = vadd.f32 %v6846_v15, %v6654_v47  ;;  %v16706_v47 = vld [vmem:[#allocation95_spill] sm:$0xff]  ;;  %v16707_v59 = vld [vmem:[#allocation32_spill] sm:$0xff] }
 0x553   : > { %v7057_v11 = vpop.f32.mrf.mxu1  ;;  %7462 = vmatmul.mubr.bf16.gmra.mxu1 %v16570_v30  ;;  %v6848_v27 = vpop.f32.mrf.mxu0  ;;  %v6664_v30 = vadd.f32 %v16706_v47, %v14455_v62  ;;  %v16708_v28 = vld [vmem:[#allocation107_spill] sm:$0xff]  ;;  %v6666_v39 = vadd.f32 %v16709_v23, %v14449_v7 }
 0x554   : > { %v7040_v33 = vadd.f32 %v7039_v14, %v6847_v46  ;;  %v6849_v42 = vadd.f32 %v6848_v27, %v6656_v56  ;;  %7469 = vmatprep.mubr.bf16.mxu1 %v16572_v60  ;;  %v14545_v9 = vpack.c.bf16 %v7677_v6, %v7672_v16  ;;  %v7681_v14 = vmax.f32 %v7038_v25, 0.0 }
 0x555   : > { %v7059_v2 = vpop.f32.mrf.mxu1  ;;  %v6850_v17 = vpop.f32.mrf.mxu0 }
 0x556   : > { %v7042_v54 = vadd.f32 %v7041_v40, %v6849_v42  ;;  %v6851_v1 = vadd.f32 %v6850_v17, %v6658_v3  ;;  %v7682_v56 = vmax.f32 %v7040_v33, 0.0 }
 0x557   : > { %v7061_v32 = vpop.f32.mrf.mxu1  ;;  %v6854_v52 = vpop.f32.mrf.mxu0  ;;  %7293 = vmatmul.mubr.bf16.gmra.mxu0 %v16707_v59  ;;  %v16712_v59 = vld [vmem:[#allocation106_spill] sm:$0xff] }
 0x558   : > { %v7686_v36 = vmax.f32 %v7042_v54, 0.0  ;;  %v7044_v29 = vadd.f32 %v7043_v8, %v6851_v1  ;;  %v6855_v60 = vadd.f32 %v6854_v52, %v6662_v41  ;;  %7300 = vmatprep.mubr.bf16.mxu0 %v16708_v28  ;;  %v16710_v8 = vld [vmem:[#allocation60_spill] sm:$0xff]  ;;  %v16714_v28 = vld [vmem:[#allocation94_spill] sm:$0xff] }
 0x559   : > { %v7063_v16 = vpop.f32.mrf.mxu1  ;;  %v6856_v40 = vpop.f32.mrf.mxu0  ;;  %v6668_v3 = vadd.f32 %v16710_v8, %v14455_v62  ;;  %v6676_v23 = vadd.f32 %v16714_v28, %v14449_v7  ;;  %v16716_v8 = vld [vmem:[#allocation51_spill] sm:$0xff]  ;;  %v16719_v28 = vld [vmem:[#allocation90_spill] sm:$0xff] }
 0x55a   : > { %v14555_v15 = vpack.c.bf16 %v7686_v36, %v7681_v14  ;;  %v7687_v6 = vmax.f32 %v7044_v29, 0.0  ;;  %v7048_v46 = vadd.f32 %v7047_v21, %v6855_v60  ;;  %v6857_v27 = vadd.f32 %v6856_v40, %v6664_v30  ;;  %v16713_v60 = vld [vmem:[#allocation38_spill] sm:$0xff] }
 0x55b   : > { %v14557_v49 = vpop.f32.mrf.mxu1  ;;  %7470 = vmatmul.mubr.bf16.gmra.mxu1 %v16581_v38  ;;  %v6858_v25 = vpop.f32.mrf.mxu0  ;;  %v6672_v21 = vadd.f32 %v14165_v50, %v14449_v7  ;;  %v6674_v38 = vadd.f32 %v14171_v10, %v14455_v62  ;;  %v11316_v10 = vld [vmem:[%s15683_s7 + $0x130] sm:$0xff]  }
 0x55c   : > { %v7050_v42 = vadd.f32 %v7049_v34, %v6857_v27  ;;  %v6859_v17 = vadd.f32 %v6858_v25, %v6666_v39  ;;  %8238 = vmatprep.mubr.bf16.mxu1 %v16711_v55  ;;  %v14563_v33 = vpack.c.bf16 %v7687_v6, %v7682_v56  ;;  %v7691_v34 = vmax.f32 %v7048_v46, 0.0  ;;  %v16717_v55 = vld [vmem:[#allocation29_spill] sm:$0xff] }
 0x55d   : > { %v7069_v41 = vpop.f32.mrf.mxu1  ;;  %v6860_v54 = vpop.f32.mrf.mxu0 }
 0x55e   : > { %v7052_v1 = vadd.f32 %v7051_v57, %v6859_v17  ;;  %v6861_v47 = vadd.f32 %v6860_v54, %v6668_v3  ;;  %v7692_v50 = vmax.f32 %v7050_v42, 0.0 }
 0x55f   : > { %v14569_v30 = vpop.f32.mrf.mxu1  ;;  %v6864_v52 = vpop.f32.mrf.mxu0  ;;  %7301 = vmatmul.mubr.bf16.gmra.mxu0 %v16712_v59 }
 0x560   : > { %v7696_v14 = vmax.f32 %v7052_v1, 0.0  ;;  %v7054_v36 = vadd.f32 %v7053_v37, %v6861_v47  ;;  %v6865_v29 = vadd.f32 %v6864_v52, %v6672_v21  ;;  %7308 = vmatprep.mubr.bf16.mxu0 %v16713_v60  ;;  %v16715_v37 = vld [vmem:[#allocation14_spill] sm:$0xff]  ;;  %v6682_v47 = vadd.f32 %v14187_v18, %v14449_v7 }
 0x561   : > { %v14575_v57 = vpop.f32.mrf.mxu1  ;;  %v6866_v39 = vpop.f32.mrf.mxu0  ;;  %v6678_v27 = vadd.f32 %v16715_v37, %v14455_v62  ;;  %v11317_v1 = vld [vmem:[%s15683_s7 + $0x128] sm:$0xff]   ;;  %v6684_v52 = vadd.f32 %v14193_v24, %v14455_v62  ;;  %v6686_v18 = vadd.f32 %v14195_v58, %v14449_v7 }
 0x562   : > { %v14580_v56 = vpack.c.bf16 %v7696_v14, %v7691_v34  ;;  %v7697_v40 = vmax.f32 %v7054_v36, 0.0  ;;  %v7058_v6 = vadd.f32 %v7057_v11, %v6865_v29  ;;  %v6867_v46 = vadd.f32 %v6866_v39, %v6674_v38  ;;  %v16718_v34 = vld [vmem:[#allocation33_spill] sm:$0xff] }
 0x563   : > { %v14584_v25 = vpop.f32.mrf.mxu1  ;;  %8239 = vmatmul.mubr.bf16.vlgmr.msra.gmra.mxu1 %v16716_v8  ;;  %v6868_v3 = vpop.f32.mrf.mxu0 }
 0x564   : > { %v7060_v42 = vadd.f32 %v7059_v2, %v6867_v46  ;;  %v6869_v17 = vadd.f32 %v6868_v3, %v6676_v23  ;;  %8246 = vmatprep.mubr.bf16.mxu1 %v16717_v55  ;;  %10508 = vmatpush3.bf16.msra.mxu1 %v14498_v63  ;;  %v14589_v54 = vpack.c.bf16 %v7697_v40, %v7692_v50  ;;  %v7701_v14 = vmax.f32 %v7058_v6, 0.0  ;;  %v16722_v3 = vld [vmem:[#allocation35_spill] sm:$0xff] }
 0x565   : > { %v14591_v21 = vpop.f32.mrf.mxu1  ;;  %v6870_v11 = vpop.f32.mrf.mxu0  ;;  %10509 = vmatprep.subr.bf16.mxu1 %v11316_v10 }
 0x566   : > { %v7062_v38 = vadd.f32 %v7061_v32, %v6869_v17  ;;  %v6871_v2 = vadd.f32 %v6870_v11, %v6678_v27  ;;  %v7702_v32 = vmax.f32 %v7060_v42, 0.0  ;;  %v11300_v42 = vld [vmem:[%s15683_s7 + $0xb8] sm:$0xff]   ;;  %v11301_v11 = vld [vmem:[%s15683_s7 + $0xf0] sm:$0xff]  }
 0x567   : > { %v14600_v59 = vpop.f32.mrf.mxu1  ;;  %v6874_v63 = vpop.f32.mrf.mxu0  ;;  %7309 = vmatmul.mubr.bf16.gmra.mxu0 %v16718_v34 }
 0x568   : > { %v7706_v36 = vmax.f32 %v7062_v38, 0.0  ;;  %v7064_v29 = vadd.f32 %v7063_v16, %v6871_v2  ;;  %v6875_v60 = vadd.f32 %v6874_v63, %v6682_v47  ;;  %10475 = vmatprep.mubr.bf16.mxu0 %v16719_v28  ;;  %10510 = vmatpush3.bf16.msra.mxu1 %v11316_v10  ;;  %v16720_v16 = vld [vmem:[#allocation69_spill] sm:$0xff]  ;;  %v16721_v10 = vld [vmem:[#allocation52_spill] sm:$0xff]  ;;  %v16724_v63 = vld [vmem:[#allocation62_spill] sm:$0xff] }
 0x569   : > { %v14606_v23 = vpop.f32.mrf.mxu1  ;;  %v6876_v50 = vpop.f32.mrf.mxu0  ;;  %10511 = vmatprep.subr.bf16.mxu1 %v11317_v1  ;;  %v6688_v46 = vadd.f32 %v16720_v16, %v14455_v62  ;;  %v16723_v47 = vld [vmem:[#allocation80_spill] sm:$0xff] }
 0x56a   : > { %v14608_v24 = vpack.c.bf16 %v7706_v36, %v7701_v14  ;;  %v7707_v39 = vmax.f32 %v7064_v29, 0.0  ;;  %v7068_v40 = vadd.f32 %v14557_v49, %v6875_v60  ;;  %v6877_v6 = vadd.f32 %v6876_v50, %v6684_v52  ;;  %v11318_v52 = vld [vmem:[%s15683_s7 + $0x120] sm:$0xff]  }
 0x56b   : > { %v14613_v37 = vpop.f32.mrf.mxu1  ;;  %8247 = vmatmul.mubr.bf16.gmra.mxu1 %v16721_v10  ;;  %v6878_v27 = vpop.f32.mrf.mxu0  ;;  %v16725_v36 = vld [vmem:[#allocation89_spill] sm:$0xff] }
 0x56c   : > { %v7070_v58 = vadd.f32 %v7069_v41, %v6877_v6  ;;  %v6879_v8 = vadd.f32 %v6878_v27, %v6686_v18  ;;  %8254 = vmatprep.mubr.bf16.mxu1 %v16722_v3  ;;  %v14620_v17 = vpack.c.bf16 %v7707_v39, %v7702_v32  ;;  %10512 = vmatpush3.bf16.msra.mxu1 %v11317_v1  ;;  %v7711_v29 = vmax.f32 %v7068_v40, 0.0  ;;  %v16726_v32 = vld [vmem:[#allocation105_spill] sm:$0xff]  ;;  %v16728_v3 = vld [vmem:[#allocation20_spill] sm:$0xff] }
 0x56d   : > { %v14622_v49 = vpop.f32.mrf.mxu1  ;;  %v6880_v55 = vpop.f32.mrf.mxu0  ;;  %v6692_v41 = vadd.f32 %v16723_v47, %v14449_v7  ;;  %v6694_v1 = vadd.f32 %v16724_v63, %v14455_v62  ;;  %v16727_v50 = vld [vmem:[#allocation61_spill] sm:$0xff]  ;;  %10513 = vmatprep.subr.bf16.mxu1 %v11318_v52 }
 0x56e   : > { %v7072_v38 = vadd.f32 %v14569_v30, %v6879_v8  ;;  %v6881_v2 = vadd.f32 %v6880_v55, %v6688_v46  ;;  %v11302_v30 = vld [vmem:[%s15683_s7 + $0xb0] sm:$0xff]   ;;  %v6696_v39 = vadd.f32 %v16727_v50, %v14449_v7  ;;  %v7712_v6 = vmax.f32 %v7070_v58, 0.0  ;;  %v16729_v55 = vld [vmem:[#allocation54_spill] sm:$0xff] }
 0x56f   : > { %v14635_v34 = vpop.f32.mrf.mxu1  ;;  %v6884_v14 = vpop.f32.mrf.mxu0  ;;  %10476 = vmatmul.mubr.bf16.vlgmr.msra.gmra.mxu0 %v16725_v36 }
 0x570   : > { %v7716_v60 = vmax.f32 %v7072_v38, 0.0  ;;  %v7074_v28 = vadd.f32 %v14575_v57, %v6881_v2  ;;  %v6885_v18 = vadd.f32 %v6884_v14, %v6692_v41  ;;  %10479 = vmatprep.mubr.bf16.mxu0 %v16726_v32  ;;  %10228 = vmatpush3.bf16.msra.mxu0 %v11300_v42  ;;  %v11303_v57 = vld [vmem:[%s15683_s7 + $0xe8] sm:$0xff]   ;;  %v6698_v42 = vadd.f32 %v16728_v3, %v14455_v62  ;;  %v16730_v38 = vld [vmem:[#allocation36_spill] sm:$0xff] }
 0x571   : > { %v14645_v16 = vpop.f32.mrf.mxu1  ;;  %v6886_v46 = vpop.f32.mrf.mxu0  ;;  %10229 = vmatprep.subr.bf16.mxu0 %v11301_v11  ;;  %10514 = vmatpush3.bf16.msra.mxu1 %v11318_v52 }
 0x572   : > { %v14650_v40 = vpack.c.bf16 %v7716_v60, %v7711_v29  ;;  %v7717_v10 = vmax.f32 %v7074_v28, 0.0  ;;  %v7078_v27 = vadd.f32 %v14584_v25, %v6885_v18  ;;  %v6887_v8 = vadd.f32 %v6886_v46, %v6694_v1  ;;  %v11304_v25 = vld [vmem:[%s15683_s7 + $0xa8] sm:$0xff]   ;;  %v11305_v1 = vld [vmem:[%s15683_s7 + $0xe0] sm:$0xff]   ;;  %v16731_v18 = vld [vmem:[#allocation104_spill] sm:$0xff] }
 0x573   : > { %v14655_v58 = vpop.f32.mrf.mxu1  ;;  %8255 = vmatmul.mubr.bf16.gmra.mxu1 %v16729_v55  ;;  %v6888_v11 = vpop.f32.mrf.mxu0  ;;  %v6704_v29 = vadd.f32 %v14255_v5, %v14455_v62  ;;  %v16734_v55 = vld [vmem:[#allocation117_spill] sm:$0xff] }
 0x574   : > { %v7080_v47 = vadd.f32 %v14591_v21, %v6887_v8  ;;  %v6889_v41 = vadd.f32 %v6888_v11, %v6696_v39  ;;  %8262 = vmatprep.mubr.bf16.mxu1 %v16730_v38  ;;  %10230 = vmatpush3.bf16.msra.mxu0 %v11302_v30  ;;  %v14663_v2 = vpack.c.bf16 %v7717_v10, %v7712_v6  ;;  %v7721_v32 = vmax.f32 %v7078_v27, 0.0  ;;  %v16732_v6 = vld [vmem:[#allocation92_spill] sm:$0xff] }
 0x575   : > { %v14665_v52 = vpop.f32.mrf.mxu1  ;;  %v6890_v63 = vpop.f32.mrf.mxu0  ;;  %10231 = vmatprep.subr.bf16.mxu0 %v11303_v57  ;;  %v6702_v21 = vadd.f32 %v14249_v22, %v14449_v7  ;;  %v11306_v22 = vld [vmem:[%s15683_s7 + $0xa0] sm:$0xff]   ;;  %v6708_v11 = vadd.f32 %v16734_v55, %v14455_v62 }
 0x576   : > { %v7082_v14 = vadd.f32 %v14600_v59, %v6889_v41  ;;  %v6891_v36 = vadd.f32 %v6890_v63, %v6698_v42  ;;  %v16733_v59 = vld [vmem:[#allocation64_spill] sm:$0xff]  ;;  %v7722_v46 = vmax.f32 %v7080_v47, 0.0 }
 0x577   : > { %v14675_v60 = vpop.f32.mrf.mxu1  ;;  %v6894_v28 = vpop.f32.mrf.mxu0  ;;  %10480 = vmatmul.mubr.bf16.gmra.mxu0 %v16731_v18  ;;  %v6706_v5 = vadd.f32 %v16733_v59, %v14449_v7  ;;  %v16735_v47 = vld [vmem:[#allocation56_spill] sm:$0xff]  ;;  %v16739_v59 = vld [vmem:[#allocation91_spill] sm:$0xff] }
 0x578   : > { %v7726_v30 = vmax.f32 %v7082_v14, 0.0  ;;  %v7084_v50 = vadd.f32 %v14606_v23, %v6891_v36  ;;  %v6895_v39 = vadd.f32 %v6894_v28, %v6702_v21  ;;  %10483 = vmatprep.mubr.bf16.mxu0 %v16732_v6  ;;  %10232 = vmatpush3.bf16.msra.mxu0 %v11304_v25  ;;  %v11307_v23 = vld [vmem:[%s15683_s7 + $0xd8] sm:$0xff]  }
 0x579   : > { %v14685_v57 = vpop.f32.mrf.mxu1  ;;  %v6896_v10 = vpop.f32.mrf.mxu0  ;;  %10233 = vmatprep.subr.bf16.mxu0 %v11305_v1  ;;  %v16736_v1 = vld [vmem:[#allocation59_spill] sm:$0xff]  ;;  %v11308_v21 = vld [vmem:[%s15683_s7 + $0x98] sm:$0xff]  }
 0x57a   : > { %v14690_v27 = vpack.c.bf16 %v7726_v30, %v7721_v32  ;;  %v7727_v8 = vmax.f32 %v7084_v50, 0.0  ;;  %v7088_v3 = vadd.f32 %v14613_v37, %v6895_v39  ;;  %v6897_v42 = vadd.f32 %v6896_v10, %v6704_v29  ;;  %v11309_v29 = vld [vmem:[%s15683_s7 + $0xd0] sm:$0xff]   ;;  %v11319_v30 = vld [vmem:[%s15683_s7 + $0x118] sm:$0xff]   ;;  %v16738_v50 = vld [vmem:[#allocation21_spill] sm:$0xff] }
 0x57b   : > { %v14695_v41 = vpop.f32.mrf.mxu1  ;;  %8263 = vmatmul.mubr.bf16.gmra.mxu1 %v16735_v47  ;;  %v6898_v38 = vpop.f32.mrf.mxu0  ;;  %v6714_v39 = vadd.f32 %v16738_v50, %v14455_v62  ;;  %10515 = vmatprep.subr.bf16.mxu1 %v11319_v30 }
 0x57c   : > { %v7090_v25 = vadd.f32 %v14622_v49, %v6897_v42  ;;  %v6899_v63 = vadd.f32 %v6898_v38, %v6706_v5  ;;  %8270 = vmatprep.mubr.bf16.mxu1 %v16736_v1  ;;  %10234 = vmatpush3.bf16.msra.mxu0 %v11306_v22  ;;  %v14703_v37 = vpack.c.bf16 %v7727_v8, %v7722_v46  ;;  %v16737_v49 = vld [vmem:[#allocation13_spill] sm:$0xff]  ;;  %v7731_v5 = vmax.f32 %v7088_v3, 0.0  ;;  %v16740_v8 = vld [vmem:[#allocation108_spill] sm:$0xff] }
 0x57d   : > { %v14705_v14 = vpop.f32.mrf.mxu1  ;;  %v6900_v36 = vpop.f32.mrf.mxu0  ;;  %10235 = vmatprep.subr.bf16.mxu0 %v11307_v23  ;;  %v6712_v28 = vadd.f32 %v16737_v49, %v14449_v7  ;;  %v6716_v42 = vadd.f32 %v14298_v51, %v14449_v7  ;;  %10516 = vmatpush3.bf16.msra.mxu1 %v11319_v30  ;;  %v6718_v51 = vadd.f32 %v14305_v31, %v14455_v62  ;;  %v11313_v30 = vld [vmem:[%s15683_s7 + $0xc0] sm:$0xff]  }
 0x57e   : > { %v7092_v18 = vadd.f32 %v14635_v34, %v6899_v63  ;;  %v6901_v32 = vadd.f32 %v6900_v36, %v6708_v11  ;;  %v11310_v34 = vld [vmem:[%s15683_s7 + $0x90] sm:$0xff]   ;;  %v7732_v55 = vmax.f32 %v7090_v25, 0.0 }
 0x57f   : > { %v14718_v6 = vpop.f32.mrf.mxu1  ;;  %v6904_v22 = vpop.f32.mrf.mxu0  ;;  %10484 = vmatmul.mubr.bf16.gmra.mxu0 %v16739_v59  ;;  %v16744_v59 = vld [vmem:[#allocation118_spill] sm:$0xff] }
 0x580   : > { %v7736_v46 = vmax.f32 %v7092_v18, 0.0  ;;  %v7094_v10 = vadd.f32 %v14645_v16, %v6901_v32  ;;  %v6905_v23 = vadd.f32 %v6904_v22, %v6712_v28  ;;  %10487 = vmatprep.mubr.bf16.mxu0 %v16740_v8  ;;  %10236 = vmatpush3.bf16.msra.mxu0 %v11308_v21  ;;  %v11311_v16 = vld [vmem:[%s15683_s7 + $0xc8] sm:$0xff]   ;;  %v16741_v21 = vld [vmem:[#allocation81_spill] sm:$0xff] }
 0x581   : > { %v14728_v11 = vpop.f32.mrf.mxu1  ;;  %v6906_v47 = vpop.f32.mrf.mxu0  ;;  %10237 = vmatprep.subr.bf16.mxu0 %v11309_v29  ;;  %v16742_v28 = vld [vmem:[#allocation18_spill] sm:$0xff] }
 0x582   : > { %v14733_v3 = vpack.c.bf16 %v7736_v46, %v7731_v5  ;;  %v7737_v38 = vmax.f32 %v7094_v10, 0.0  ;;  %v7098_v63 = vadd.f32 %v14655_v58, %v6905_v23  ;;  %v6907_v1 = vadd.f32 %v6906_v47, %v6714_v39  ;;  %v11312_v58 = vld [vmem:[%s15683_s7 + $0x88] sm:$0xff]   ;;  %v16745_v23 = vld [vmem:[#allocation93_spill] sm:$0xff]  ;;  %v16746_v47 = vld [vmem:[#allocation67_spill] sm:$0xff] }
 0x583   : > { %v14738_v25 = vpop.f32.mrf.mxu1  ;;  %8271 = vmatmul.mubr.bf16.gmra.mxu1 %v16741_v21  ;;  %v6908_v36 = vpop.f32.mrf.mxu0  ;;  %v6724_v5 = vadd.f32 %v16744_v59, %v14455_v62  ;;  %v11320_v59 = vld [vmem:[%s15683_s7 + $0x110] sm:$0xff]  }
 0x584   : > { %v7100_v29 = vadd.f32 %v14665_v52, %v6907_v1  ;;  %v6909_v49 = vadd.f32 %v6908_v36, %v6716_v42  ;;  %8278 = vmatprep.mubr.bf16.mxu1 %v16742_v28  ;;  %10238 = vmatpush3.bf16.msra.mxu0 %v11310_v34  ;;  %v14746_v18 = vpack.c.bf16 %v7737_v38, %v7732_v55  ;;  %v16743_v52 = vld [vmem:[#allocation88_spill] sm:$0xff]  ;;  %v7741_v8 = vmax.f32 %v7098_v63, 0.0 }
 0x585   : > { %v14748_v32 = vpop.f32.mrf.mxu1  ;;  %v6910_v31 = vpop.f32.mrf.mxu0  ;;  %10239 = vmatprep.subr.bf16.mxu0 %v11311_v16  ;;  %v6722_v50 = vadd.f32 %v16743_v52, %v14449_v7  ;;  %v6726_v16 = vadd.f32 %v14329_v0, %v14449_v7  ;;  %10517 = vmatprep.subr.bf16.mxu1 %v11320_v59 }
 0x586   : > { %v7102_v39 = vadd.f32 %v14675_v60, %v6909_v49  ;;  %v6911_v22 = vadd.f32 %v6910_v31, %v6718_v51  ;;  %v11314_v60 = vld [vmem:[%s15683_s7 + $0x80] sm:$0xff]   ;;  %v7742_v38 = vmax.f32 %v7100_v29, 0.0  ;;  %v6728_v49 = vadd.f32 %v14336_v26, %v14455_v62  ;;  %v16748_v29 = vld [vmem:[#allocation82_spill] sm:$0xff]  ;;  %10518 = vmatpush3.bf16.msra.mxu1 %v11320_v59 }
 0x587   : > { %v14758_v46 = vpop.f32.mrf.mxu1  ;;  %v6914_v10 = vpop.f32.mrf.mxu0  ;;  %10488 = vmatmul.mubr.bf16.gmra.mxu0 %v16745_v23  ;;  %v16749_v23 = vld [vmem:[#allocation66_spill] sm:$0xff] }
 0x588   : > { %v7746_v34 = vmax.f32 %v7102_v39, 0.0  ;;  %v7104_v42 = vadd.f32 %v14685_v57, %v6911_v22  ;;  %v6915_v55 = vadd.f32 %v6914_v10, %v6722_v50  ;;  %10491 = vmatprep.mubr.bf16.mxu0 %v16746_v47  ;;  %10240 = vmatpush3.bf16.msra.mxu0 %v11312_v58  ;;  %v16747_v58 = vld [vmem:[#allocation63_spill] sm:$0xff] }
 0x589   : > { %v7123_v1 = vpop.f32.mrf.mxu1  ;;  %v6916_v51 = vpop.f32.mrf.mxu0  ;;  %10241 = vmatprep.subr.bf16.mxu0 %v11313_v30 }
 0x58a   : > { %v14768_v21 = vpack.c.bf16 %v7746_v34, %v7741_v8  ;;  %v7747_v63 = vmax.f32 %v7104_v42, 0.0  ;;  %v7108_v57 = vadd.f32 %v14695_v41, %v6915_v55  ;;  %v6917_v36 = vadd.f32 %v6916_v51, %v6724_v5 }
 0x58b   : > { %v7127_v28 = vpop.f32.mrf.mxu1  ;;  %8279 = vmatmul.mubr.bf16.gmra.mxu1 %v16747_v58  ;;  %v6918_v31 = vpop.f32.mrf.mxu0  ;;  %v6732_v41 = vadd.f32 %v14343_v61, %v14449_v7  ;;  %v16750_v61 = vld [vmem:[#allocation65_spill] sm:$0xff] }
 0x58c   : > { %v7110_v52 = vadd.f32 %v14705_v14, %v6917_v36  ;;  %v6919_v0 = vadd.f32 %v6918_v31, %v6726_v16  ;;  %8286 = vmatprep.mubr.bf16.mxu1 %v16748_v29  ;;  %10242 = vmatpush3.bf16.msra.mxu0 %v11314_v60  ;;  %v14776_v30 = vpack.c.bf16 %v7747_v63, %v7742_v38  ;;  %v7751_v8 = vmax.f32 %v7108_v57, 0.0  ;;  %v16751_v36 = vld [vmem:[#allocation72_spill] sm:$0xff]  ;;  %v16752_v31 = vld [vmem:[#allocation70_spill] sm:$0xff] }
 0x58d   : > { %v7129_v50 = vpop.f32.mrf.mxu1  ;;  %v6920_v39 = vpop.f32.mrf.mxu0  ;;  %v6734_v14 = vadd.f32 %v14349_v20, %v14455_v62 }
 0x58e   : > { %v7112_v22 = vadd.f32 %v14718_v6, %v6919_v0  ;;  %v6921_v26 = vadd.f32 %v6920_v39, %v6728_v49  ;;  %v6736_v6 = vadd.f32 %v14351_v53, %v14449_v7  ;;  %v7752_v47 = vmax.f32 %v7110_v52, 0.0 }
 0x58f   : > { %v7131_v5 = vpop.f32.mrf.mxu1  ;;  %v6924_v10 = vpop.f32.mrf.mxu0  ;;  %10492 = vmatmul.mubr.bf16.gmra.mxu0 %v16749_v23  ;;  %v6738_v49 = vadd.f32 %v14358_v19, %v14455_v62 }
 0x590   : > { %v7756_v34 = vmax.f32 %v7112_v22, 0.0  ;;  %v7114_v42 = vadd.f32 %v14728_v11, %v6921_v26  ;;  %v6925_v55 = vadd.f32 %v6924_v10, %v6732_v41  ;;  %10495 = vmatprep.mubr.bf16.mxu0 %v16750_v61  ;;  %v16753_v22 = vld [vmem:[#allocation53_spill] sm:$0xff] }
 0x591   : > { %v7133_v60 = vpop.f32.mrf.mxu1  ;;  %v6926_v16 = vpop.f32.mrf.mxu0  ;;  %v6744_v26 = vadd.f32 %v16753_v22, %v14455_v62 }
 0x592   : > { %v14791_v20 = vpack.c.bf16 %v7756_v34, %v7751_v8  ;;  %v7757_v38 = vmax.f32 %v7114_v42, 0.0  ;;  %v7118_v51 = vadd.f32 %v14738_v25, %v6925_v55  ;;  %v6927_v63 = vadd.f32 %v6926_v16, %v6734_v14  ;;  %v16754_v14 = vld [vmem:[#allocation68_spill] sm:$0xff]  ;;  %v16756_v42 = vld [vmem:[#allocation26_spill] sm:$0xff] }
 0x593   : > { %v7137_v57 = vpop.f32.mrf.mxu1  ;;  %8287 = vmatmul.mubr.bf16.gmra.mxu1 %v16751_v36  ;;  %v6928_v11 = vpop.f32.mrf.mxu0  ;;  %v6742_v25 = vadd.f32 %v14365_v12, %v14449_v7  ;;  %v16755_v34 = vld [vmem:[#allocation76_spill] sm:$0xff]  ;;  %v6746_v55 = vadd.f32 %v16756_v42, %v14449_v7 }
 0x594   : > { %v7120_v58 = vadd.f32 %v14748_v32, %v6927_v63  ;;  %v6929_v53 = vadd.f32 %v6928_v11, %v6736_v6  ;;  %8294 = vmatprep.mubr.bf16.mxu1 %v16752_v31  ;;  %v14799_v52 = vpack.c.bf16 %v7757_v38, %v7752_v47  ;;  %v7761_v32 = vmax.f32 %v7118_v51, 0.0  ;;  %v16757_v36 = vld [vmem:[#allocation16_spill] sm:$0xff] }
 0x595   : > { %v7139_v0 = vpop.f32.mrf.mxu1  ;;  %v6930_v29 = vpop.f32.mrf.mxu0  ;;  %v16759_v31 = vld [vmem:[#allocation116_spill] sm:$0xff] }
 0x596   : > { %v7122_v39 = vadd.f32 %v14758_v46, %v6929_v53  ;;  %v6931_v41 = vadd.f32 %v6930_v29, %v6738_v49  ;;  %v7762_v12 = vmax.f32 %v7120_v58, 0.0 }
 0x597   : > { %v7141_v59 = vpop.f32.mrf.mxu1  ;;  %v6934_v19 = vpop.f32.mrf.mxu0  ;;  %10496 = vmatmul.mubr.bf16.gmra.mxu0 %v16754_v14 }
 0x598   : > { %v7766_v10 = vmax.f32 %v7122_v39, 0.0  ;;  %v7124_v23 = vadd.f32 %v7123_v1, %v6931_v41  ;;  %v6935_v8 = vadd.f32 %v6934_v19, %v6742_v25  ;;  %10499 = vmatprep.mubr.bf16.mxu0 %v16755_v34  ;;  %v16758_v1 = vld [vmem:[#allocation77_spill] sm:$0xff]  ;;  %v16760_v39 = vld [vmem:[#allocation12_spill] sm:$0xff] }
 0x599   : > { %v7143_v61 = vpop.f32.mrf.mxu1  ;;  %v6936_v46 = vpop.f32.mrf.mxu0  ;;  %v6748_v11 = vadd.f32 %v16758_v1, %v14455_v62  ;;  %v16761_v19 = vld [vmem:[#allocation85_spill] sm:$0xff] }
 0x59a   : > { %v14810_v6 = vpack.c.bf16 %v7766_v10, %v7761_v32  ;;  %v7767_v47 = vmax.f32 %v7124_v23, 0.0  ;;  %v7128_v16 = vadd.f32 %v7127_v28, %v6935_v8  ;;  %v6937_v38 = vadd.f32 %v6936_v46, %v6744_v26  ;;  %v11321_v26 = vld [vmem:[%s15683_s7 + $0x108] sm:$0xff]   ;;  %v16762_v10 = vld [vmem:[#allocation75_spill] sm:$0xff] }
 0x59b   : > { %v7147_v63 = vpop.f32.mrf.mxu1  ;;  %8295 = vmatmul.mubr.bf16.gmra.mxu1 %v16757_v36  ;;  %v6938_v51 = vpop.f32.mrf.mxu0  ;;  %v6752_v28 = vadd.f32 %v16760_v39, %v14449_v7  ;;  %10519 = vmatprep.subr.bf16.mxu1 %v11321_v26 }
 0x59c   : > { %v7130_v49 = vadd.f32 %v7129_v50, %v6937_v38  ;;  %v6939_v53 = vadd.f32 %v6938_v51, %v6746_v55  ;;  %8302 = vmatprep.mubr.bf16.mxu1 %v16759_v31  ;;  %v14816_v29 = vpack.c.bf16 %v7767_v47, %v7762_v12  ;;  %v6754_v50 = vadd.f32 %v16761_v19, %v14455_v62  ;;  %v16763_v55 = vld [vmem:[#allocation74_spill] sm:$0xff]  ;;  %v16766_v31 = vld [vmem:[#allocation121_spill] sm:$0xff]  ;;  %v16768_v19 = vld [vmem:[#allocation103_spill] sm:$0xff] }
 0x59d   : > { %v14818_v58 = vpop.f32.mrf.mxu1  ;;  %v6940_v25 = vpop.f32.mrf.mxu0  ;;  %v7771_v23 = vmax.f32 %v7128_v16, 0.0  ;;  %10520 = vmatpush3.bf16.msra.mxu1 %v11321_v26  ;;  %v16765_v16 = vld [vmem:[#allocation24_spill] sm:$0xff] }
 0x59e   : > { %v7132_v41 = vadd.f32 %v7131_v5, %v6939_v53  ;;  %v6941_v22 = vadd.f32 %v6940_v25, %v6748_v11  ;;  %v16764_v5 = vld [vmem:[#allocation57_spill] sm:$0xff]  ;;  %v7772_v46 = vmax.f32 %v7130_v49, 0.0  ;;  %v6758_v25 = vadd.f32 %v16766_v31, %v14455_v62 }
 0x59f   : > { %v7151_v14 = vpop.f32.mrf.mxu1  ;;  %v6944_v32 = vpop.f32.mrf.mxu0  ;;  %10500 = vmatmul.mubr.bf16.gmra.mxu0 %v16762_v10  ;;  %v6756_v12 = vadd.f32 %v16764_v5, %v14449_v7 }
 0x5a0   : > { %v7776_v8 = vmax.f32 %v7132_v41, 0.0  ;;  %v7134_v34 = vadd.f32 %v7133_v60, %v6941_v22  ;;  %v6945_v42 = vadd.f32 %v6944_v32, %v6752_v28  ;;  %10503 = vmatprep.mubr.bf16.mxu0 %v16763_v55  ;;  %v16767_v41 = vld [vmem:[#allocation17_spill] sm:$0xff]  ;;  %v6762_v32 = vadd.f32 %v16768_v19, %v14449_v7  ;;  %v16774_v19 = vld [vmem:[#allocation83_spill] sm:$0xff] }
 0x5a1   : > { %v7153_v47 = vpop.f32.mrf.mxu1  ;;  %v6946_v38 = vpop.f32.mrf.mxu0 }
 0x5a2   : > { %v14831_v36 = vpack.c.bf16 %v7776_v8, %v7771_v23  ;;  %v7777_v51 = vmax.f32 %v7134_v34, 0.0  ;;  %v7138_v1 = vadd.f32 %v7137_v57, %v6945_v42  ;;  %v6947_v11 = vadd.f32 %v6946_v38, %v6754_v50  ;;  %v16769_v34 = vld [vmem:[#allocation71_spill] sm:$0xff]  ;;  %v16771_v38 = vld [vmem:[#allocation120_spill] sm:$0xff] }
 0x5a3   : > { %v9995_v53 = vpop.f32.mrf.mxu1  ;;  %8303 = vmatmul.mubr.bf16.gmra.mxu1 %v16765_v16  ;;  %v6948_v60 = vpop.f32.mrf.mxu0 }
 0x5a4   : > { %v7140_v39 = vadd.f32 %v7139_v0, %v6947_v11  ;;  %v6949_v28 = vadd.f32 %v6948_v60, %v6756_v12  ;;  %8310 = vmatprep.mubr.bf16.mxu1 %v16767_v41  ;;  %v14837_v49 = vpack.c.bf16 %v7777_v51, %v7772_v46  ;;  %v7781_v42 = vmax.f32 %v7138_v1, 0.0  ;;  %v16770_v12 = vld [vmem:[#allocation28_spill] sm:$0xff] }
 0x5a5   : > { %v9996_v22 = vpop.f32.mrf.mxu1  ;;  %v6950_v26 = vpop.f32.mrf.mxu0  ;;  %v6764_v46 = vadd.f32 %v16770_v12, %v14455_v62  ;;  %v6766_v51 = vadd.f32 %v16771_v38, %v14449_v7 }
 0x5a6   : > { %v7142_v57 = vadd.f32 %v7141_v59, %v6949_v28  ;;  %v9997_v50 = vadd.f32 %v9996_v22, %v9995_v53  ;;  %v6951_v10 = vadd.f32 %v6950_v26, %v6758_v25  ;;  %v7782_v11 = vmax.f32 %v7140_v39, 0.0 }
 0x5a7   : > { %v9998_v23 = vpop.f32.mrf.mxu1  ;;  %v6954_v8 = vpop.f32.mrf.mxu0  ;;  %10504 = vmatmul.mubr.bf16.gmra.mxu0 %v16769_v34 }
 0x5a8   : > { %v7786_v55 = vmax.f32 %v7142_v57, 0.0  ;;  %v7144_v0 = vadd.f32 %v7143_v61, %v6951_v10  ;;  %v6955_v5 = vadd.f32 %v6954_v8, %v6762_v32  ;;  %8399 = vmatprep.mubr.bf16.mxu0 %v14491_v4  ;;  %v16772_v61 = vld [vmem:[#allocation126_spill] sm:$0xff]  ;;  %v16773_v4 = vld [vmem:[#allocation123_spill] sm:$0xff] }
 0x5a9   : > { %v9999_v59 = vpop.f32.mrf.mxu1  ;;  %v6956_v53 = vpop.f32.mrf.mxu0  ;;  %v6768_v22 = vadd.f32 %v16773_v4, %v14455_v62  ;;  %v11327_v62 = vld [vmem:[%s15682_s6] sm:$0x1f] }
 0x5aa   : > { %v14847_v16 = vpack.c.bf16 %v7786_v55, %v7781_v42  ;;  %v7787_v60 = vmax.f32 %v7144_v0, 0.0  ;;  %v7148_v31 = vadd.f32 %v7147_v63, %v6955_v5  ;;  %v10000_v25 = vadd.f32 %v9999_v59, %v9998_v23  ;;  %v16775_v5 = vld [vmem:[#allocation73_spill] sm:$0xff]  ;;  %v16776_v59 = vld [vmem:[#allocation86_spill] sm:$0xff] }
 0x5ab   : > { %v6957_v1 = vadd.f32 %v6956_v53, %v6764_v46  ;;  %v10001_v28 = vpop.f32.mrf.mxu1  ;;  %8311 = vmatmul.mubr.bf16.gmra.mxu1 %v16772_v61  ;;  %v6958_v41 = vpop.f32.mrf.mxu0 }
 0x5ac   : > { %v6959_v26 = vadd.f32 %v6958_v41, %v6766_v51  ;;  %8318 = vmatprep.mubr.bf16.mxu1 %v16774_v19  ;;  %v14853_v7 = vpack.c.bf16 %v7787_v60, %v7782_v11  ;;  %v7791_v42 = vmax.f32 %v7148_v31, 0.0  ;;  %v16777_v31 = vld [vmem:[#allocation87_spill] sm:$0xff] }
 0x5ad   : > { %v7150_v39 = vadd.f32 %v14818_v58, %v6957_v1  ;;  %v10002_v32 = vpop.f32.mrf.mxu1  ;;  %v6960_v57 = vpop.f32.mrf.mxu0  ;;  %v14862_v58 = vrot.slane %v11327_v62, %v16775_v5 }
 0x5ae   : > { %v7152_v10 = vadd.f32 %v7151_v14, %v6959_v26  ;;  %v10003_v63 = vadd.f32 %v10002_v32, %v10001_v28  ;;  %v6961_v23 = vadd.f32 %v6960_v57, %v6768_v22  ;;  %v11322_v14 = vld [vmem:[%s15683_s7 + $0x100] sm:$0xff]  }
 0x5af   : > { %v10004_v8 = vpop.f32.mrf.mxu1  ;;  %v9883_v34 = vpop.f32.mrf.mxu0  ;;  %8400 = vmatmul.mubr.bf16.vlgmr.msra.gmra.mxu0 %v14485_v45  ;;  %v7792_v12 = vmax.f32 %v7150_v39, 0.0  ;;  %10521 = vmatprep.subr.bf16.mxu1 %v11322_v14 }
 0x5b0   : > { %v7796_v55 = vmax.f32 %v7152_v10, 0.0  ;;  %v7154_v0 = vadd.f32 %v7153_v47, %v6961_v23  ;;  %8407 = vmatprep.mubr.bf16.mxu0 %v14513_v35  ;;  %10522 = vmatpush3.bf16.msra.mxu1 %v11322_v14 }
 0x5b1   : > { %v10005_v46 = vpop.f32.mrf.mxu1  ;;  %v9884_v38 = vpop.f32.mrf.mxu0 }
 0x5b2   : > { %v14867_v45 = vpack.c.bf16 %v7796_v55, %v7791_v42  ;;  %v7797_v51 = vmax.f32 %v7154_v0, 0.0  ;;  %v10006_v47 = vadd.f32 %v10005_v46, %v10004_v8  ;;  %v9885_v11 = vadd.f32 %v9884_v38, %v9883_v34  ;;  %v16778_v42 = vld [vmem:[#allocation119_spill] sm:$0xff] }
 0x5b3   : > { %v10007_v35 = vpop.f32.mrf.mxu1  ;;  %8319 = vmatmul.mubr.bf16.gmra.mxu1 %v16776_v59  ;;  %v9886_v53 = vpop.f32.mrf.mxu0  ;;  %v16779_v0 = vld [vmem:[#allocation79_spill] sm:$0xff] }
 0x5b4   : > { %v7191_v60 = vadd.f32 %v9885_v11, %v14862_v58  ;;  %8326 = vmatprep.mubr.bf16.mxu1 %v16777_v31  ;;  %v14872_v1 = vpack.c.bf16 %v7797_v51, %v7792_v12 }
 0x5b5   : > { %v10008_v28 = vpop.f32.mrf.mxu1  ;;  %v9887_v61 = vpop.f32.mrf.mxu0 }
 0x5b6   : > { %v10009_v41 = vadd.f32 %v10008_v28, %v10007_v35  ;;  %v9888_v4 = vadd.f32 %v9887_v61, %v9886_v53  ;;  %v14874_v22 = vadd.f32 %v9997_v50, %v7191_v60  ;;  %v16780_v60 = vld [vmem:[#allocation11_spill] sm:$0xff]  ;;  %v16781_v28 = vld [vmem:[#allocation84_spill] sm:$0xff] }
 0x5b7   : > { %v10010_v26 = vpop.f32.mrf.mxu1  ;;  %v9889_v19 = vpop.f32.mrf.mxu0  ;;  %8408 = vmatmul.mubr.bf16.gmra.mxu0 %v14507_v44 }
 0x5b8   : > { %v7194_v39 = vadd.f32 %v9888_v4, %v14862_v58  ;;  %8415 = vmatprep.mubr.bf16.mxu0 %v14529_v13 }
 0x5b9   : > { %v10011_v32 = vpop.f32.mrf.mxu1  ;;  %v9890_v57 = vpop.f32.mrf.mxu0 }
 0x5ba   : > { %v10012_v10 = vadd.f32 %v10011_v32, %v10010_v26  ;;  %v9891_v23 = vadd.f32 %v9890_v57, %v9889_v19  ;;  %v14879_v8 = vadd.f32 %v10000_v25, %v7194_v39 }
 0x5bb   : > { %v10013_v34 = vpop.f32.mrf.mxu1  ;;  %8327 = vmatmul.mubr.bf16.gmra.mxu1 %v16778_v42  ;;  %v9892_v55 = vpop.f32.mrf.mxu0  ;;  %v16782_v42 = vld [vmem:[#allocation30_spill] sm:$0xff] }
 0x5bc   : > { %v7199_v50 = vadd.f32 %v9891_v23, %v14862_v58  ;;  %8334 = vmatprep.mubr.bf16.mxu1 %v16779_v0 }
 0x5bd   : > { %v10014_v62 = vpop.f32.mrf.mxu1  ;;  %v9893_v44 = vpop.f32.mrf.mxu0 }
 0x5be   : > { %v10015_v5 = vadd.f32 %v10014_v62, %v10013_v34  ;;  %v9894_v14 = vadd.f32 %v9893_v44, %v9892_v55  ;;  %v14884_v12 = vadd.f32 %v10003_v63, %v7199_v50  ;;  %v16783_v50 = vld [vmem:[#allocation39_spill] sm:$0xff] }
 0x5bf   : > { %v10016_v13 = vpop.f32.mrf.mxu1  ;;  %v9895_v46 = vpop.f32.mrf.mxu0  ;;  %8416 = vmatmul.mubr.bf16.gmra.mxu0 %v14523_v48 }
 0x5c0   : > { %v7202_v25 = vadd.f32 %v9894_v14, %v14862_v58  ;;  %8423 = vmatprep.mubr.bf16.mxu0 %v14545_v9 }
 0x5c1   : > { %v10017_v38 = vpop.f32.mrf.mxu1  ;;  %v9896_v51 = vpop.f32.mrf.mxu0 }
 0x5c2   : > { %v10018_v11 = vadd.f32 %v10017_v38, %v10016_v13  ;;  %v9897_v35 = vadd.f32 %v9896_v51, %v9895_v46  ;;  %v14889_v59 = vadd.f32 %v10006_v47, %v7202_v25 }
 0x5c3   : > { %v14891_v53 = vpop.f32.mrf.mxu1  ;;  %8335 = vmatmul.mubr.bf16.gmra.mxu1 %v16780_v60  ;;  %v9898_v63 = vpop.f32.mrf.mxu0  ;;  %v16785_v60 = vld [vmem:[#allocation125_spill] sm:$0xff] }
 0x5c4   : > { %v7207_v31 = vadd.f32 %v9897_v35, %v14862_v58  ;;  %8342 = vmatprep.mubr.bf16.mxu1 %v16781_v28 }
 0x5c5   : > { %v14896_v48 = vpop.f32.mrf.mxu1  ;;  %v9899_v61 = vpop.f32.mrf.mxu0 }
 0x5c6   : > { %v9900_v4 = vadd.f32 %v9899_v61, %v9898_v63  ;;  %v14898_v9 = vadd.f32 %v10009_v41, %v7207_v31 }
 0x5c7   : > { %v14900_v26 = vpop.f32.mrf.mxu1  ;;  %v9901_v19 = vpop.f32.mrf.mxu0  ;;  %8424 = vmatmul.mubr.bf16.gmra.mxu0 %v14539_v43 }
 0x5c8   : > { %v7210_v47 = vadd.f32 %v9900_v4, %v14862_v58  ;;  %8431 = vmatprep.mubr.bf16.mxu0 %v14563_v33 }
 0x5c9   : > { %v14905_v39 = vpop.f32.mrf.mxu1  ;;  %v9902_v32 = vpop.f32.mrf.mxu0 }
 0x5ca   : > { %v9903_v57 = vadd.f32 %v9902_v32, %v9901_v19  ;;  %v14907_v23 = vadd.f32 %v10012_v10, %v7210_v47  ;;  %v16786_v47 = vld [vmem:[#allocation122_spill] sm:$0xff] }
 0x5cb   : > { %v14909_v34 = vpop.f32.mrf.mxu1  ;;  %8343 = vmatmul.mubr.bf16.gmra.mxu1 %v16782_v42  ;;  %v9904_v41 = vpop.f32.mrf.mxu0 }
 0x5cc   : > { %v7215_v55 = vadd.f32 %v9903_v57, %v14862_v58  ;;  %8350 = vmatprep.mubr.bf16.mxu1 %v16783_v50 }
 0x5cd   : > { %v14914_v43 = vpop.f32.mrf.mxu1  ;;  %v9905_v0 = vpop.f32.mrf.mxu0 }
 0x5ce   : > { %v9906_v62 = vadd.f32 %v9905_v0, %v9904_v41  ;;  %v14916_v33 = vadd.f32 %v10015_v5, %v7215_v55  ;;  %v16784_v5 = vld [vmem:[#allocation111_spill] sm:$0xff] }
 0x5cf   : > { %v14918_v44 = vpop.f32.mrf.mxu1  ;;  %v9907_v14 = vpop.f32.mrf.mxu0  ;;  %8432 = vmatmul.mubr.bf16.gmra.mxu0 %v14555_v15 }
 0x5d0   : > { %v7218_v10 = vadd.f32 %v9906_v62, %v14862_v58  ;;  %8439 = vmatprep.mubr.bf16.mxu0 %v14589_v54 }
 0x5d1   : > { %v14923_v13 = vpop.f32.mrf.mxu1  ;;  %v9908_v46 = vpop.f32.mrf.mxu0 }
 0x5d2   : > { %v14925_v25 = vadd.f32 %v9908_v46, %v9907_v14  ;;  %v14927_v38 = vadd.f32 %v10018_v11, %v7218_v10 }
 0x5d3   : > { %v14929_v51 = vpop.f32.mrf.mxu1  ;;  %8351 = vmatmul.mubr.bf16.gmra.mxu1 %v16784_v5  ;;  %v9910_v35 = vpop.f32.mrf.mxu0 }
 0x5d4   : > { %8358 = vmatprep.mubr.bf16.mxu1 %v16785_v60 }
 0x5d5   : > { %v14933_v63 = vpop.f32.mrf.mxu1  ;;  %v9911_v15 = vpop.f32.mrf.mxu0 }
 0x5d6   : > { %v14935_v31 = vadd.f32 %v9911_v15, %v9910_v35 }
 0x5d7   : > { %v14937_v54 = vpop.f32.mrf.mxu1  ;;  %v9913_v28 = vpop.f32.mrf.mxu0  ;;  %8440 = vmatmul.mubr.bf16.gmra.mxu0 %v14580_v56 }
 0x5d8   : > { %8447 = vmatprep.mubr.bf16.mxu0 %v14620_v17 }
 0x5d9   : > { %v14941_v11 = vpop.f32.mrf.mxu1  ;;  %v9914_v61 = vpop.f32.mrf.mxu0 }
 0x5da   : > { %v14943_v4 = vadd.f32 %v9914_v61, %v9913_v28 }
 0x5db   : > { %v14945_v19 = vpop.f32.mrf.mxu1  ;;  %8359 = vmatmul.mubr.bf16.gmra.mxu1 %v16786_v47  ;;  %v9916_v32 = vpop.f32.mrf.mxu0 }
 0x5dd   : > { %v14948_v57 = vpop.f32.mrf.mxu1  ;;  %v9917_v42 = vpop.f32.mrf.mxu0 }
 0x5de   : > { %v14950_v41 = vadd.f32 %v9917_v42, %v9916_v32 }
 0x5df   : > { %v14952_v55 = vpop.f32.mrf.mxu1  ;;  %v9919_v56 = vpop.f32.mrf.mxu0  ;;  %8448 = vmatmul.mubr.bf16.gmra.mxu0 %v14608_v24 }
 0x5e0   : > { %8455 = vmatprep.mubr.bf16.mxu0 %v14663_v2 }
 0x5e1   : > { %v14956_v17 = vpop.f32.mrf.mxu1  ;;  %v9920_v50 = vpop.f32.mrf.mxu0 }
 0x5e2   : > { %v14958_v0 = vadd.f32 %v9920_v50, %v9919_v56 }
 0x5e3   : > { %v14960_v62 = vpop.f32.mrf.mxu1  ;;  %v9922_v14 = vpop.f32.mrf.mxu0 }
 0x5e5   : > { %v14962_v10 = vpop.f32.mrf.mxu1  ;;  %v9923_v46 = vpop.f32.mrf.mxu0 }
 0x5e6   : > { %v14964_v5 = vadd.f32 %v9923_v46, %v9922_v14 }
 0x5e7   : > { %v14966_v35 = vpop.f32.mrf.mxu1  ;;  %v9925_v60 = vpop.f32.mrf.mxu0  ;;  %8456 = vmatmul.mubr.bf16.gmra.mxu0 %v14650_v40 }
 0x5e8   : > { %16787 = vst [vmem:[#allocation23_spill] sm:$0xff] %v14966_v35  ;;  %8463 = vmatprep.mubr.bf16.mxu0 %v14703_v37 }
 0x5e9   : > { %v14970_v24 = vpop.f32.mrf.mxu1  ;;  %v9926_v2 = vpop.f32.mrf.mxu0 }
 0x5ea   : > { %16788 = vst [vmem:[#allocation37_spill] sm:$0xff] %v14970_v24  ;;  %v14972_v15 = vadd.f32 %v9926_v2, %v9925_v60 }
 0x5eb   : > { %v14974_v28 = vpop.f32.mrf.mxu1  ;;  %v9928_v61 = vpop.f32.mrf.mxu0 }
 0x5ed   : > { %v14976_v47 = vpop.f32.mrf.mxu1  ;;  %v9929_v32 = vpop.f32.mrf.mxu0 }
 0x5ee   : > { %v14978_v42 = vadd.f32 %v9929_v32, %v9928_v61 }
 0x5ef   : > { %v14980_v56 = vpop.f32.mrf.mxu1  ;;  %v9931_v50 = vpop.f32.mrf.mxu0  ;;  %8464 = vmatmul.mubr.bf16.gmra.mxu0 %v14690_v27 }
 0x5f0   : > { %8471 = vmatprep.mubr.bf16.mxu0 %v14746_v18 }
 0x5f1   : > { %v14984_v40 = vpop.f32.mrf.mxu1  ;;  %v9932_v37 = vpop.f32.mrf.mxu0 }
 0x5f2   : > { %16789 = vst [vmem:[#allocation110_spill] sm:$0xff] %v14984_v40  ;;  %v14986_v14 = vadd.f32 %v9932_v37, %v9931_v50 }
 0x5f3   : > { %v14988_v46 = vpop.f32.mrf.mxu1  ;;  %v9934_v60 = vpop.f32.mrf.mxu0 }
 0x5f4   : > { %16790 = vst [vmem:[#allocation124_spill] sm:$0xff] %v14988_v46 }
 0x5f5   : > { %v14990_v2 = vpop.f32.mrf.mxu1  ;;  %v9935_v24 = vpop.f32.mrf.mxu0 }
 0x5f6   : > { %16791 = vst [vmem:[#allocation40_spill] sm:$0xff] %v14990_v2  ;;  %v14992_v61 = vadd.f32 %v9935_v24, %v9934_v60 }
 0x5f7   : > { %v14994_v32 = vpop.f32.mrf.mxu1  ;;  %v9937_v35 = vpop.f32.mrf.mxu0  ;;  %8472 = vmatmul.mubr.bf16.gmra.mxu0 %v14733_v3 }
 0x5f8   : > { %16792 = vst [vmem:[#allocation15_spill] sm:$0xff] %v14994_v32  ;;  %8479 = vmatprep.mubr.bf16.mxu0 %v14776_v30 }
 0x5f9   : > { %v14998_v27 = vpop.f32.mrf.mxu1  ;;  %v9938_v18 = vpop.f32.mrf.mxu0 }
 0x5fa   : > { %16793 = vst [vmem:[#allocation109_spill] sm:$0xff] %v14998_v27  ;;  %v15000_v50 = vadd.f32 %v9938_v18, %v9937_v35 }
 0x5fb   : > { %v15002_v37 = vpop.f32.mrf.mxu1  ;;  %v9940_v46 = vpop.f32.mrf.mxu0 }
 0x5fc   : > { %16794 = vst [vmem:[#allocation43_spill] sm:$0xff] %v15002_v37 }
 0x5fd   : > { %v15004_v40 = vpop.f32.mrf.mxu1  ;;  %v9941_v2 = vpop.f32.mrf.mxu0 }
 0x5fe   : > { %16795 = vst [vmem:[#allocation112_spill] sm:$0xff] %v15004_v40  ;;  %v15006_v24 = vadd.f32 %v9941_v2, %v9940_v46 }
 0x5ff   : > { %v15008_v60 = vpop.f32.mrf.mxu1  ;;  %v9943_v32 = vpop.f32.mrf.mxu0  ;;  %8480 = vmatmul.mubr.bf16.gmra.mxu0 %v14768_v21 }
 0x600   : > { %16796 = vst [vmem:[#allocation113_spill] sm:$0xff] %v15008_v60  ;;  %8487 = vmatprep.mubr.bf16.mxu0 %v14799_v52 }
 0x601   : > { %v15012_v3 = vpop.f32.mrf.mxu1  ;;  %v9944_v30 = vpop.f32.mrf.mxu0 }
 0x602   : > { %16797 = vst [vmem:[#allocation128_spill] sm:$0xff] %v15012_v3  ;;  %v15014_v35 = vadd.f32 %v9944_v30, %v9943_v32 }
 0x603   : > { %v15016_v18 = vpop.f32.mrf.mxu1  ;;  %v9946_v27 = vpop.f32.mrf.mxu0 }
 0x604   : > { %16798 = vst [vmem:[#allocation44_spill] sm:$0xff] %v15016_v18 }
 0x605   : > { %v15018_v37 = vpop.f32.mrf.mxu1  ;;  %v9947_v40 = vpop.f32.mrf.mxu0 }
 0x606   : > { %16799 = vst [vmem:[#allocation97_spill] sm:$0xff] %v15018_v37  ;;  %v15020_v46 = vadd.f32 %v9947_v40, %v9946_v27 }
 0x607   : > { %v15022_v2 = vpop.f32.mrf.mxu1  ;;  %v9949_v60 = vpop.f32.mrf.mxu0  ;;  %8488 = vmatmul.mubr.bf16.gmra.mxu0 %v14791_v20 }
 0x608   : > { %16800 = vst [vmem:[#allocation42_spill] sm:$0xff] %v15020_v46  ;;  %16801 = vst [vmem:[#allocation129_spill] sm:$0xff] %v15022_v2  ;;  %8495 = vmatprep.mubr.bf16.mxu0 %v14816_v29 }
 0x609   : > { %v15026_v21 = vpop.f32.mrf.mxu1  ;;  %v9950_v52 = vpop.f32.mrf.mxu0 }
 0x60a   : > { %16802 = vst [vmem:[#allocation46_spill] sm:$0xff] %v15026_v21  ;;  %v15028_v32 = vadd.f32 %v9950_v52, %v9949_v60 }
 0x60b   : > { %v15030_v30 = vpop.f32.mrf.mxu1  ;;  %v9952_v18 = vpop.f32.mrf.mxu0 }
 0x60c   : > { %16803 = vst [vmem:[#allocation114_spill] sm:$0xff] %v15030_v30 }
 0x60d   : > { %v15032_v3 = vpop.f32.mrf.mxu1  ;;  %v9953_v37 = vpop.f32.mrf.mxu0 }
 0x60e   : > { %16804 = vst [vmem:[#allocation115_spill] sm:$0xff] %v15032_v3  ;;  %v15034_v40 = vadd.f32 %v9953_v37, %v9952_v18 }
 0x60f   : > { %v15036_v27 = vpop.f32.mrf.mxu1  ;;  %v9955_v2 = vpop.f32.mrf.mxu0  ;;  %8496 = vmatmul.mubr.bf16.gmra.mxu0 %v14810_v6 }
 0x610   : > { %16805 = vst [vmem:[#allocation96_spill] sm:$0xff] %v15036_v27  ;;  %8503 = vmatprep.mubr.bf16.mxu0 %v14837_v49 }
 0x611   : > { %v15040_v20 = vpop.f32.mrf.mxu1  ;;  %v9956_v29 = vpop.f32.mrf.mxu0 }
 0x612   : > { %16806 = vst [vmem:[#allocation130_spill] sm:$0xff] %v15040_v20  ;;  %v15042_v60 = vadd.f32 %v9956_v29, %v9955_v2 }
 0x613   : > { %v15044_v52 = vpop.f32.mrf.mxu1  ;;  %v9958_v21 = vpop.f32.mrf.mxu0 }
 0x614   : > { %16807 = vst [vmem:[#allocation19_spill] sm:$0xff] %v15042_v60  ;;  %16808 = vst [vmem:[#allocation135_spill] sm:$0xff] %v15044_v52 }
 0x615   : > { %v15046_v30 = vpop.f32.mrf.mxu1  ;;  %v9959_v3 = vpop.f32.mrf.mxu0 }
 0x616   : > { %16809 = vst [vmem:[#allocation9_spill] sm:$0xff] %v15046_v30  ;;  %v15048_v37 = vadd.f32 %v9959_v3, %v9958_v21 }
 0x617   : > { %v15050_v18 = vpop.f32.mrf.mxu1  ;;  %v9961_v27 = vpop.f32.mrf.mxu0  ;;  %8504 = vmatmul.mubr.bf16.gmra.mxu0 %v14831_v36 }
 0x618   : > { %16810 = vst [vmem:[#allocation131_spill] sm:$0xff] %v15048_v37  ;;  %16811 = vst [vmem:[#allocation10_spill] sm:$0xff] %v15050_v18  ;;  %8511 = vmatprep.mubr.bf16.mxu0 %v14853_v7 }
 0x619   : > { %v15054_v6 = vpop.f32.mrf.mxu1  ;;  %v9962_v49 = vpop.f32.mrf.mxu0 }
 0x61a   : > { %16812 = vst [vmem:[#allocation48_spill] sm:$0xff] %v15054_v6  ;;  %v15056_v2 = vadd.f32 %v9962_v49, %v9961_v27 }
 0x61b   : > { %v15058_v29 = vpop.f32.mrf.mxu1  ;;  %v9964_v52 = vpop.f32.mrf.mxu0 }
 0x61c   : > { %16813 = vst [vmem:[#allocation41_spill] sm:$0xff] %v15056_v2  ;;  %16814 = vst [vmem:[#allocation132_spill] sm:$0xff] %v15058_v29 }
 0x61d   : > { %v15060_v20 = vpop.f32.mrf.mxu1  ;;  %v9965_v30 = vpop.f32.mrf.mxu0 }
 0x61e   : > { %16815 = vst [vmem:[#allocation133_spill] sm:$0xff] %v15060_v20  ;;  %v15062_v3 = vadd.f32 %v9965_v30, %v9964_v52 }
 0x61f   : > { %v15064_v21 = vpop.f32.mrf.mxu1  ;;  %v9967_v18 = vpop.f32.mrf.mxu0  ;;  %8512 = vmatmul.mubr.bf16.gmra.mxu0 %v14847_v16 }
 0x620   : > { %16816 = vst [vmem:[#allocation98_spill] sm:$0xff] %v15062_v3  ;;  %16817 = vst [vmem:[#allocation22_spill] sm:$0xff] %v15064_v21  ;;  %8519 = vmatprep.mubr.bf16.mxu0 %v14872_v1 }
 0x621   : > { %v15068_v36 = vpop.f32.mrf.mxu1  ;;  %v9968_v7 = vpop.f32.mrf.mxu0 }
 0x622   : > { %16818 = vst [vmem:[#allocation134_spill] sm:$0xff] %v15068_v36  ;;  %v15070_v27 = vadd.f32 %v9968_v7, %v9967_v18 }
 0x623   : > { %v10131_v49 = vpop.f32.mrf.mxu1  ;;  %v9970_v29 = vpop.f32.mrf.mxu0 }
 0x624   : > { %16819 = vst [vmem:[#allocation47_spill] sm:$0xff] %v15070_v27 }
 0x625   : > { %v10132_v6 = vpop.f32.mrf.mxu1  ;;  %v9971_v37 = vpop.f32.mrf.mxu0 }
 0x626   : > { %v15072_v20 = vadd.f32 %v10132_v6, %v10131_v49  ;;  %v15074_v30 = vadd.f32 %v9971_v37, %v9970_v29 }
 0x627   : > { %v10134_v52 = vpop.f32.mrf.mxu1  ;;  %v15076_v21 = vpop.f32.mrf.mxu0  ;;  %8520 = vmatmul.mubr.bf16.gmra.mxu0 %v14867_v45 }
 0x628   : > { %16820 = vst [vmem:[#allocation50_spill] sm:$0xff] %v15072_v20  ;;  %16821 = vst [vmem:[#allocation136_spill] sm:$0xff] %v15074_v30 }
 0x629   : > { %16822 = vst [vmem:[#allocation99_spill] sm:$0xff] %v15076_v21  ;;  %v10135_v16 = vpop.f32.mrf.mxu1  ;;  %v15079_v1 = vpop.f32.mrf.mxu0 }
 0x62a   : > { %16823 = vst [vmem:[#allocation101_spill] sm:$0xff] %v15079_v1  ;;  %v15081_v36 = vadd.f32 %v10135_v16, %v10134_v52 }
 0x62b   : > { %v10137_v18 = vpop.f32.mrf.mxu1  ;;  %v15083_v7 = vpop.f32.mrf.mxu0 }
 0x62c   : > { %16824 = vst [vmem:[#allocation137_spill] sm:$0xff] %v15081_v36  ;;  %16825 = vst [vmem:[#allocation45_spill] sm:$0xff] %v15083_v7 }
 0x62d   : > { %v10138_v27 = vpop.f32.mrf.mxu1  ;;  %v15085_v3 = vpop.f32.mrf.mxu0 }
 0x62e   : > { %16826 = vst [vmem:[#allocation138_spill] sm:$0xff] %v15085_v3  ;;  %v15087_v6 = vadd.f32 %v10138_v27, %v10137_v18 }
 0x62f   : > { %v10140_v37 = vpop.f32.mrf.mxu1  ;;  %v10477_v29 = vpop.f32.mrf.mxu0 }
 0x630   : > { %16827 = vst [vmem:[#allocation100_spill] sm:$0xff] %v15087_v6  ;;  %v7521_v30 = vadd.f32 %v10477_v29, %v14884_v12 }
 0x631   : > { %v10141_v49 = vpop.f32.mrf.mxu1  ;;  %v7512_v20 = vpop.f32.mrf.mxu0 }
 0x632   : > { %v15090_v45 = vadd.f32 %v10141_v49, %v10140_v37  ;;  %v7513_v52 = vadd.f32 %v7512_v20, %v14874_v22  ;;  %v7653_v60 = vmax.f32 %v7521_v30, 0.0 }
 0x633   : > { %v10143_v21 = vpop.f32.mrf.mxu1  ;;  %v10478_v1 = vpop.f32.mrf.mxu0 }
 0x634   : > { %16828 = vst [vmem:[#allocation27_spill] sm:$0xff] %v15090_v45  ;;  %v7524_v16 = vadd.f32 %v10478_v1, %v14889_v59  ;;  %v7643_v46 = vmax.f32 %v7513_v52, 0.0 }
 0x635   : > { %v10144_v36 = vpop.f32.mrf.mxu1  ;;  %v7515_v7 = vpop.f32.mrf.mxu0 }
 0x636   : > { %v7658_v3 = vmax.f32 %v7524_v16, 0.0  ;;  %v15094_v27 = vadd.f32 %v10144_v36, %v10143_v21  ;;  %v7516_v18 = vadd.f32 %v7515_v7, %v14879_v8  ;;  %v7231_v21 = vadd.f32 %v14943_v4, %v14862_v58 }
 0x637   : > { %v10146_v6 = vpop.f32.mrf.mxu1  ;;  %v10481_v2 = vpop.f32.mrf.mxu0 }
 0x638   : > { %v7808_v12 = vpack.c.bf16 %v7658_v3, %v7653_v60  ;;  %v7648_v37 = vmax.f32 %v7516_v18, 0.0  ;;  %v7537_v22 = vadd.f32 %v10481_v2, %v14916_v33  ;;  %v10027_v60 = vadd.f32 %v14914_v43, %v14909_v34 }
 0x639   : > { %v10147_v29 = vpop.f32.mrf.mxu1  ;;  %v7528_v49 = vpop.f32.mrf.mxu0  ;;  %v7234_v33 = vadd.f32 %v14950_v41, %v14862_v58  ;;  %v10030_v34 = vadd.f32 %v14923_v13, %v14918_v44  ;;  %v7226_v43 = vadd.f32 %v14935_v31, %v14862_v58  ;;  %v10024_v18 = vadd.f32 %v14905_v39, %v14900_v26 }
 0x63a   : > { %v7803_v45 = vpack.c.bf16 %v7648_v37, %v7643_v46  ;;  %v15098_v20 = vadd.f32 %v10147_v29, %v10146_v6  ;;  %v7529_v36 = vadd.f32 %v7528_v49, %v14898_v9  ;;  %v7223_v46 = vadd.f32 %v14925_v25, %v14862_v58 }
 0x63b   : > { %v10149_v59 = vpop.f32.mrf.mxu1  ;;  %v10482_v1 = vpop.f32.mrf.mxu0  ;;  %v7673_v30 = vmax.f32 %v7537_v22, 0.0  ;;  %v7392_v16 = vadd.f32 %v10027_v60, %v7231_v21  ;;  %v7395_v44 = vadd.f32 %v10030_v34, %v7234_v33  ;;  %v7247_v31 = vadd.f32 %v14972_v15, %v14862_v58 }
 0x63c   : > { %v7540_v8 = vadd.f32 %v10482_v1, %v14927_v38  ;;  %10523 = vmatprep.mubr.bf16.mxu1 %v7803_v45  ;;  %v10021_v38 = vadd.f32 %v14896_v48, %v14891_v53  ;;  %v7663_v6 = vmax.f32 %v7529_v36, 0.0  ;;  %v7387_v1 = vadd.f32 %v10024_v18, %v7226_v43 }
 0x63d   : > { %v10150_v2 = vpop.f32.mrf.mxu1  ;;  %v7531_v3 = vpop.f32.mrf.mxu0  ;;  %10524 = vmatmul.mubr.bf16.vlgmr.msra.gmra.mxu1 %v7808_v12  ;;  %v10039_v26 = vadd.f32 %v14948_v57, %v14945_v19  ;;  %v7239_v39 = vadd.f32 %v14958_v0, %v14862_v58  ;;  %v7250_v21 = vadd.f32 %v14978_v42, %v14862_v58  ;;  %v10042_v19 = vadd.f32 %v14956_v17, %v14952_v55 }
 0x63e   : > { %v7678_v7 = vmax.f32 %v7540_v8, 0.0  ;;  %v15110_v4 = vadd.f32 %v10150_v2, %v10149_v59  ;;  %v7532_v9 = vadd.f32 %v7531_v3, %v14907_v23  ;;  %v7384_v23 = vadd.f32 %v10021_v38, %v7223_v46 }
 0x63f   : > { %v10152_v25 = vpop.f32.mrf.mxu1  ;;  %v10485_v41 = vpop.f32.mrf.mxu0  ;;  %v10033_v2 = vadd.f32 %v14933_v63, %v14929_v51  ;;  %v7242_v57 = vadd.f32 %v14964_v5, %v14862_v58  ;;  %v10036_v38 = vadd.f32 %v14941_v11, %v14937_v54  ;;  %v7411_v55 = vadd.f32 %v10042_v19, %v7250_v21 }
 0x640   : > { %v7818_v45 = vpack.c.bf16 %v7678_v7, %v7673_v30  ;;  %v7668_v52 = vmax.f32 %v7532_v9, 0.0  ;;  %v7553_v53 = vadd.f32 %v10485_v41, %v7392_v16  ;;  %v7408_v9 = vadd.f32 %v10039_v26, %v7247_v31  ;;  %v16831_v26 = vld [vmem:[#allocation37_spill] sm:$0xff] }
 0x641   : > { %v10153_v12 = vpop.f32.mrf.mxu1  ;;  %v7544_v37 = vpop.f32.mrf.mxu0  ;;  %v7400_v43 = vadd.f32 %v10033_v2, %v7239_v39  ;;  %v7263_v5 = vadd.f32 %v15000_v50, %v14862_v58  ;;  %v7403_v16 = vadd.f32 %v10036_v38, %v7242_v57  ;;  %v10051_v54 = vadd.f32 %v14976_v47, %v14974_v28 }
 0x642   : > { %v7813_v29 = vpack.c.bf16 %v7668_v52, %v7663_v6  ;;  %v15121_v48 = vadd.f32 %v10153_v12, %v10152_v25  ;;  %v7545_v22 = vadd.f32 %v7544_v37, %v7384_v23  ;;  %v7693_v60 = vmax.f32 %v7553_v53, 0.0 }
 0x643   : > { %v10155_v13 = vpop.f32.mrf.mxu1  ;;  %v10486_v49 = vpop.f32.mrf.mxu0  ;;  %v7255_v11 = vadd.f32 %v14986_v14, %v14862_v58  ;;  %v7266_v18 = vadd.f32 %v15006_v24, %v14862_v58  ;;  %v7258_v47 = vadd.f32 %v14992_v61, %v14862_v58  ;;  %v7279_v61 = vadd.f32 %v15028_v32, %v14862_v58 }
 0x644   : > { %v7556_v59 = vadd.f32 %v10486_v49, %v7395_v44  ;;  %10527 = vmatprep.mubr.bf16.mxu1 %v7813_v29  ;;  %v7683_v42 = vmax.f32 %v7545_v22, 0.0  ;;  %v10045_v44 = vadd.f32 %v14962_v10, %v14960_v62 }
 0x645   : > { %v10156_v36 = vpop.f32.mrf.mxu1  ;;  %v7547_v8 = vpop.f32.mrf.mxu0  ;;  %10528 = vmatmul.mubr.bf16.gmra.mxu1 %v7818_v45 }
 0x646   : > { %v7698_v46 = vmax.f32 %v7556_v59, 0.0  ;;  %v15131_v33 = vadd.f32 %v10156_v36, %v10155_v13  ;;  %v7548_v15 = vadd.f32 %v7547_v8, %v7387_v1  ;;  %v16829_v13 = vld [vmem:[#allocation110_spill] sm:$0xff]  ;;  %v7424_v59 = vadd.f32 %v10051_v54, %v7263_v5  ;;  %v16830_v1 = vld [vmem:[#allocation23_spill] sm:$0xff] }
 0x647   : > { %v10158_v0 = vpop.f32.mrf.mxu1  ;;  %v10489_v3 = vpop.f32.mrf.mxu0  ;;  %v10054_v28 = vadd.f32 %v16829_v13, %v14980_v56  ;;  %v10048_v39 = vadd.f32 %v16831_v26, %v16830_v1  ;;  %v7416_v36 = vadd.f32 %v10045_v44, %v7255_v11 }
 0x648   : > { %v7828_v30 = vpack.c.bf16 %v7698_v46, %v7693_v60  ;;  %v7688_v7 = vmax.f32 %v7548_v15, 0.0  ;;  %v7569_v51 = vadd.f32 %v10489_v3, %v7408_v9  ;;  %v16833_v3 = vld [vmem:[#allocation112_spill] sm:$0xff] }
 0x649   : > { %v10159_v34 = vpop.f32.mrf.mxu1  ;;  %v7560_v25 = vpop.f32.mrf.mxu0  ;;  %v7427_v56 = vadd.f32 %v10054_v28, %v7266_v18  ;;  %v7419_v57 = vadd.f32 %v10048_v39, %v7258_v47  ;;  %v16842_v39 = vld [vmem:[#allocation114_spill] sm:$0xff] }
 0x64a   : > { %v7823_v41 = vpack.c.bf16 %v7688_v7, %v7683_v42  ;;  %v15141_v63 = vadd.f32 %v10159_v34, %v10158_v0  ;;  %v7561_v45 = vadd.f32 %v7560_v25, %v7400_v43  ;;  %v7713_v37 = vmax.f32 %v7569_v51, 0.0  ;;  %v16832_v0 = vld [vmem:[#allocation43_spill] sm:$0xff]  ;;  %v16835_v51 = vld [vmem:[#allocation40_spill] sm:$0xff] }
 0x64b   : > { %v10161_v17 = vpop.f32.mrf.mxu1  ;;  %v10490_v6 = vpop.f32.mrf.mxu0  ;;  %v10063_v42 = vadd.f32 %v16833_v3, %v16832_v0  ;;  %v7282_v7 = vadd.f32 %v15034_v40, %v14862_v58  ;;  %v16846_v0 = vld [vmem:[#allocation44_spill] sm:$0xff]  ;;  %v16847_v3 = vld [vmem:[#allocation97_spill] sm:$0xff] }
 0x64c   : > { %v7572_v52 = vadd.f32 %v10490_v6, %v7411_v55  ;;  %10531 = vmatprep.mubr.bf16.mxu1 %v7823_v41  ;;  %v7703_v24 = vmax.f32 %v7561_v45, 0.0  ;;  %v16834_v41 = vld [vmem:[#allocation124_spill] sm:$0xff]  ;;  %v16838_v45 = vld [vmem:[#allocation42_spill] sm:$0xff] }
 0x64d   : > { %v10162_v12 = vpop.f32.mrf.mxu1  ;;  %v7563_v23 = vpop.f32.mrf.mxu0  ;;  %10532 = vmatmul.mubr.bf16.gmra.mxu1 %v7828_v30  ;;  %v7271_v30 = vadd.f32 %v15014_v35, %v14862_v58  ;;  %v10057_v55 = vadd.f32 %v16835_v51, %v16834_v41  ;;  %v16837_v6 = vld [vmem:[#allocation128_spill] sm:$0xff]  ;;  %v7274_v35 = vadd.f32 %v16838_v45, %v14862_v58  ;;  %v7440_v18 = vadd.f32 %v10063_v42, %v7279_v61 }
 0x64e   : > { %v7718_v29 = vmax.f32 %v7572_v52, 0.0  ;;  %v15151_v53 = vadd.f32 %v10162_v12, %v10161_v17  ;;  %v7564_v50 = vadd.f32 %v7563_v23, %v7403_v16  ;;  %v16836_v17 = vld [vmem:[#allocation113_spill] sm:$0xff]  ;;  %v16839_v12 = vld [vmem:[#allocation15_spill] sm:$0xff]  ;;  %v10069_v42 = vadd.f32 %v16847_v3, %v16846_v0  ;;  %v16862_v3 = vld [vmem:[#allocation136_spill] sm:$0xff] }
 0x64f   : > { %v10164_v14 = vpop.f32.mrf.mxu1  ;;  %v10493_v49 = vpop.f32.mrf.mxu0  ;;  %v10066_v5 = vadd.f32 %v16837_v6, %v16836_v17  ;;  %v16840_v23 = vld [vmem:[#allocation109_spill] sm:$0xff] }
 0x650   : > { %v7838_v31 = vpack.c.bf16 %v7718_v29, %v7713_v37  ;;  %v7708_v22 = vmax.f32 %v7564_v50, 0.0  ;;  %v7585_v62 = vadd.f32 %v10493_v49, %v7424_v59  ;;  %v10060_v37 = vadd.f32 %v16840_v23, %v16839_v12  ;;  %v16851_v6 = vld [vmem:[#allocation129_spill] sm:$0xff] }
 0x651   : > { %v10165_v21 = vpop.f32.mrf.mxu1  ;;  %v7576_v8 = vpop.f32.mrf.mxu0  ;;  %v7432_v50 = vadd.f32 %v10057_v55, %v7271_v30  ;;  %v16848_v30 = vld [vmem:[#allocation96_spill] sm:$0xff] }
 0x652   : > { %v7833_v60 = vpack.c.bf16 %v7708_v22, %v7703_v24  ;;  %v15161_v10 = vadd.f32 %v10165_v21, %v10164_v14  ;;  %v7577_v2 = vadd.f32 %v7576_v8, %v7416_v36  ;;  %v7733_v34 = vmax.f32 %v7585_v62, 0.0  ;;  %v16843_v21 = vld [vmem:[#allocation115_spill] sm:$0xff]  ;;  %v16845_v62 = vld [vmem:[#allocation98_spill] sm:$0xff] }
 0x653   : > { %v10167_v46 = vpop.f32.mrf.mxu1  ;;  %v10494_v15 = vpop.f32.mrf.mxu0  ;;  %v7443_v14 = vadd.f32 %v10066_v5, %v7282_v7  ;;  %v7435_v26 = vadd.f32 %v10060_v37, %v7274_v35  ;;  %v10075_v36 = vadd.f32 %v16843_v21, %v16842_v39  ;;  %v16844_v8 = vld [vmem:[#allocation19_spill] sm:$0xff]  ;;  %v16849_v7 = vld [vmem:[#allocation130_spill] sm:$0xff]  ;;  %v16853_v35 = vld [vmem:[#allocation45_spill] sm:$0xff] }
 0x654   : > { %v7588_v19 = vadd.f32 %v10494_v15, %v7427_v56  ;;  %10535 = vmatprep.mubr.bf16.mxu1 %v7833_v60  ;;  %v7723_v40 = vmax.f32 %v7577_v2, 0.0  ;;  %v7287_v60 = vadd.f32 %v16844_v8, %v14862_v58  ;;  %v7298_v56 = vadd.f32 %v16845_v62, %v14862_v58  ;;  %v16852_v5 = vld [vmem:[#allocation46_spill] sm:$0xff]  ;;  %v16859_v62 = vld [vmem:[#allocation9_spill] sm:$0xff] }
 0x655   : > { %v10168_v9 = vpop.f32.mrf.mxu1  ;;  %v7579_v38 = vpop.f32.mrf.mxu0  ;;  %10536 = vmatmul.mubr.bf16.gmra.mxu1 %v7838_v31  ;;  %v16841_v31 = vld [vmem:[#allocation41_spill] sm:$0xff]  ;;  %v10072_v45 = vadd.f32 %v16852_v5, %v16851_v6 }
 0x656   : > { %v7738_v43 = vmax.f32 %v7588_v19, 0.0  ;;  %v15171_v25 = vadd.f32 %v10168_v9, %v10167_v46  ;;  %v7580_v32 = vadd.f32 %v7579_v38, %v7419_v57  ;;  %v7295_v22 = vadd.f32 %v16841_v31, %v14862_v58  ;;  %v16850_v38 = vld [vmem:[#allocation131_spill] sm:$0xff] }
 0x657   : > { %v10170_v52 = vpop.f32.mrf.mxu1  ;;  %v10497_v16 = vpop.f32.mrf.mxu0  ;;  %v10078_v9 = vadd.f32 %v16849_v7, %v16848_v30  ;;  %v16857_v31 = vld [vmem:[#allocation47_spill] sm:$0xff] }
 0x658   : > { %v7848_v54 = vpack.c.bf16 %v7738_v43, %v7733_v34  ;;  %v7728_v11 = vmax.f32 %v7580_v32, 0.0  ;;  %v7601_v28 = vadd.f32 %v10497_v16, %v7440_v18  ;;  %v7290_v34 = vadd.f32 %v16850_v38, %v14862_v58  ;;  %v16863_v38 = vld [vmem:[#allocation10_spill] sm:$0xff] }
 0x659   : > { %v10171_v29 = vpop.f32.mrf.mxu1  ;;  %v7592_v44 = vpop.f32.mrf.mxu0  ;;  %v7456_v17 = vadd.f32 %v10075_v36, %v7295_v22  ;;  %v7459_v37 = vadd.f32 %v10078_v9, %v7298_v56  ;;  %v7303_v22 = vadd.f32 %v16857_v31, %v14862_v58 }
 0x65a   : > { %v7843_v13 = vpack.c.bf16 %v7728_v11, %v7723_v40  ;;  %v15181_v47 = vadd.f32 %v10171_v29, %v10170_v52  ;;  %v7593_v59 = vadd.f32 %v7592_v44, %v7432_v50  ;;  %v7753_v61 = vmax.f32 %v7601_v28, 0.0  ;;  %v16854_v52 = vld [vmem:[#allocation138_spill] sm:$0xff]  ;;  %v16855_v29 = vld [vmem:[#allocation99_spill] sm:$0xff]  ;;  %v16856_v50 = vld [vmem:[#allocation101_spill] sm:$0xff] }
 0x65b   : > { %v10173_v49 = vpop.f32.mrf.mxu1  ;;  %v10498_v24 = vpop.f32.mrf.mxu0  ;;  %v9978_v16 = vadd.f32 %v16854_v52, %v16853_v35  ;;  %v9975_v44 = vadd.f32 %v16856_v50, %v16855_v29 }
 0x65c   : > { %v7604_v1 = vadd.f32 %v10498_v24, %v7443_v14  ;;  %10539 = vmatprep.mubr.bf16.mxu1 %v7843_v13  ;;  %v7743_v41 = vmax.f32 %v7593_v59, 0.0  ;;  %v7451_v24 = vadd.f32 %v10072_v45, %v7290_v34  ;;  %v16864_v34 = vld [vmem:[#allocation48_spill] sm:$0xff] }
 0x65d   : > { %v10174_v46 = vpop.f32.mrf.mxu1  ;;  %v7595_v15 = vpop.f32.mrf.mxu0  ;;  %10540 = vmatmul.mubr.bf16.gmra.mxu1 %v7848_v54  ;;  %v7448_v54 = vadd.f32 %v10069_v42, %v7287_v60  ;;  %v7314_v59 = vadd.f32 %v9978_v16, %v14862_v58  ;;  %v16858_v60 = vld [vmem:[#allocation135_spill] sm:$0xff]  ;;  %v7306_v42 = vadd.f32 %v16862_v3, %v14862_v58 }
 0x65e   : > { %v7758_v2 = vmax.f32 %v7604_v1, 0.0  ;;  %v15191_v19 = vadd.f32 %v10174_v46, %v10173_v49  ;;  %v7596_v57 = vadd.f32 %v7595_v15, %v7435_v26  ;;  %v10081_v56 = vadd.f32 %v16859_v62, %v16858_v60  ;;  %v16860_v46 = vld [vmem:[#allocation22_spill] sm:$0xff] }
 0x65f   : > { %v10176_v43 = vpop.f32.mrf.mxu1  ;;  %v10501_v32 = vpop.f32.mrf.mxu0  ;;  %v16861_v15 = vld [vmem:[#allocation134_spill] sm:$0xff] }
 0x660   : > { %v7858_v51 = vpack.c.bf16 %v7758_v2, %v7753_v61  ;;  %v7748_v55 = vmax.f32 %v7596_v57, 0.0  ;;  %v7617_v12 = vadd.f32 %v10501_v32, %v7456_v17  ;;  %v10090_v61 = vadd.f32 %v16861_v15, %v16860_v46  ;;  %v16865_v32 = vld [vmem:[#allocation132_spill] sm:$0xff] }
 0x661   : > { %v10177_v40 = vpop.f32.mrf.mxu1  ;;  %v7608_v11 = vpop.f32.mrf.mxu0  ;;  %v7311_v2 = vadd.f32 %v9975_v44, %v14862_v58  ;;  %v7464_v45 = vadd.f32 %v10081_v56, %v7303_v22  ;;  %v15230_v44 = vld [vmem:[%s15684_s8] ss:$0 sm:$0xff] }
 0x662   : > { %v7853_v18 = vpack.c.bf16 %v7748_v55, %v7743_v41  ;;  %v15203_v23 = vadd.f32 %v10177_v40, %v10176_v43  ;;  %v7609_v14 = vadd.f32 %v7608_v11, %v7448_v54  ;;  %v7773_v39 = vmax.f32 %v7617_v12, 0.0  ;;  %v16866_v41 = vld [vmem:[#allocation133_spill] sm:$0xff] }
 0x663   : > { %v10179_v13 = vpop.f32.mrf.mxu1  ;;  %v10502_v28 = vpop.f32.mrf.mxu0  ;;  %v10084_v43 = vadd.f32 %v16864_v34, %v16863_v38  ;;  %v7475_v35 = vadd.f32 %v10090_v61, %v7314_v59 }
 0x664   : > { %v7620_v49 = vadd.f32 %v10502_v28, %v7459_v37  ;;  %10543 = vmatprep.mubr.bf16.mxu1 %v7853_v18  ;;  %v7763_v30 = vmax.f32 %v7609_v14, 0.0 }
 0x665   : > { %v10180_v1 = vpop.f32.mrf.mxu1  ;;  %v7611_v26 = vpop.f32.mrf.mxu0  ;;  %10544 = vmatmul.mubr.bf16.gmra.mxu1 %v7858_v51  ;;  %v10087_v51 = vadd.f32 %v16866_v41, %v16865_v32  ;;  %v7467_v11 = vadd.f32 %v10084_v43, %v7306_v42 }
 0x666   : > { %v7778_v21 = vmax.f32 %v7620_v49, 0.0  ;;  %v15210_v36 = vadd.f32 %v10180_v1, %v10179_v13  ;;  %v7612_v8 = vadd.f32 %v7611_v26, %v7451_v24  ;;  %v16868_v1 = vld [vmem:[#allocation50_spill] sm:$0xff] }
 0x667   : > { %v10182_v57 = vpop.f32.mrf.mxu1  ;;  %v10505_v0 = vpop.f32.mrf.mxu0  ;;  %v7472_v52 = vadd.f32 %v10087_v51, %v7311_v2  ;;  %v8241_v26 = vadd.f32 %v16868_v1, %v15230_v44  ;;  %v16869_v2 = vld [vmem:[#allocation137_spill] sm:$0xff] }
 0x668   : > { %v7868_v7 = vpack.c.bf16 %v7778_v21, %v7773_v39  ;;  %v7768_v9 = vmax.f32 %v7612_v8, 0.0 }
 0x669   : > { %v10183_v55 = vpop.f32.mrf.mxu1  ;;  %v7624_v17 = vpop.f32.mrf.mxu0  ;;  %v7633_v18 = vadd.f32 %v10505_v0, %v7472_v52 }
 0x66a   : > { %v7863_v6 = vpack.c.bf16 %v7768_v9, %v7763_v30  ;;  %v15223_v5 = vadd.f32 %v10183_v55, %v10182_v57  ;;  %v7625_v58 = vadd.f32 %v7624_v17, %v7464_v45  ;;  %v8244_v57 = vadd.f32 %v16869_v2, %v15230_v44 }
 0x66b   : > { %v10185_v16 = vpop.f32.mrf.mxu1  ;;  %v10506_v40 = vpop.f32.mrf.mxu0  ;;  %v7793_v31 = vmax.f32 %v7633_v18, 0.0 }
 0x66c   : > { %16867 = vst [vmem:[#allocation102_spill] sm:$0xff] %v15223_v5  ;;  %v7636_v54 = vadd.f32 %v10506_v40, %v7475_v35  ;;  %10547 = vmatprep.mubr.bf16.mxu1 %v7863_v6  ;;  %v7783_v49 = vmax.f32 %v7625_v58, 0.0 }
 0x66d   : > { %v10186_v12 = vpop.f32.mrf.mxu1  ;;  %v7627_v37 = vpop.f32.mrf.mxu0  ;;  %10548 = vmatmul.mubr.bf16.gmra.mxu1 %v7868_v7 }
 0x66e   : > { %v15225_v29 = vadd.f32 %v10186_v12, %v10185_v16  ;;  %v7628_v50 = vadd.f32 %v7627_v37, %v7467_v11  ;;  %v7798_v13 = vmax.f32 %v7636_v54, 0.0 }
 0x66f   : > { %v10188_v28 = vpop.f32.mrf.mxu1  ;;  %v10243_v14 = vpop.f32.mrf.mxu0 }
 0x670   : > { %v7788_v24 = vmax.f32 %v7628_v50, 0.0  ;;  %v7878_v60 = vpack.c.bf16 %v7798_v13, %v7793_v31 }
 0x671   : > { %v10189_v22 = vpop.f32.mrf.mxu1  ;;  %v10244_v59 = vpop.f32.mrf.mxu0 }
 0x672   : > { %v7873_v39 = vpack.c.bf16 %v7788_v24, %v7783_v49  ;;  %v15234_v21 = vadd.f32 %v10189_v22, %v10188_v28  ;;  %v10245_v8 = vadd.f32 %v10244_v59, %v10243_v14 }
 0x673   : > { %v10191_v62 = vpop.f32.mrf.mxu1  ;;  %v10246_v56 = vpop.f32.mrf.mxu0 }
 0x674   : > { %10551 = vmatprep.mubr.bf16.mxu1 %v7873_v39  ;;  %v15236_v46 = vadd.f32 %v10245_v8, %v8241_v26 }
 0x675   : > { %v10192_v15 = vpop.f32.mrf.mxu1  ;;  %v10247_v61 = vpop.f32.mrf.mxu0  ;;  %10552 = vmatmul.mubr.bf16.gmra.mxu1 %v7878_v60 }
 0x676   : > { %v15240_v0 = vadd.f32 %v10192_v15, %v10191_v62  ;;  %v10248_v3 = vadd.f32 %v10247_v61, %v10246_v56 }
 0x677   : > { %v10194_v42 = vpop.f32.mrf.mxu1  ;;  %v15242_v30 = vpop.f32.mrf.mxu0 }
 0x678   : > { %16870 = vst [vmem:[#allocation31_spill] sm:$0xff] %v15240_v0  ;;  %v15244_v7 = vadd.f32 %v10248_v3, %v8244_v57 }
 0x679   : > { %v10195_v9 = vpop.f32.mrf.mxu1  ;;  %v15246_v38 = vpop.f32.mrf.mxu0 }
 0x67a   : > { %v15248_v34 = vadd.f32 %v10195_v9, %v10194_v42 }
 0x67b   : > { %v10197_v43 = vpop.f32.mrf.mxu1  ;;  %v15250_v32 = vpop.f32.mrf.mxu0 }
 0x67c   : > { %16871 = vst [vmem:[#allocation139_spill] sm:$0xff] %v15248_v34 }
 0x67d   : > { %v10198_v41 = vpop.f32.mrf.mxu1  ;;  %v15252_v51 = vpop.f32.mrf.mxu0 }
 0x67e   : > { %v15254_v55 = vadd.f32 %v10198_v41, %v10197_v43 }
 0x67f   : > { %v10200_v17 = vpop.f32.mrf.mxu1  ;;  %v15256_v6 = vpop.f32.mrf.mxu0 }
 0x680   : > { %16872 = vst [vmem:[#allocation55_spill] sm:$0xff] %v15254_v55 }
 0x681   : > { %v10201_v45 = vpop.f32.mrf.mxu1  ;;  %v15258_v35 = vpop.f32.mrf.mxu0 }
 0x682   : > { %v15260_v52 = vadd.f32 %v10201_v45, %v10200_v17 }
 0x683   : > { %v10203_v16 = vpop.f32.mrf.mxu1  ;;  %v15262_v40 = vpop.f32.mrf.mxu0 }
 0x684   : > { %16873 = vst [vmem:[#allocation127_spill] sm:$0xff] %v15260_v52 }
 0x685   : > { %v10204_v58 = vpop.f32.mrf.mxu1  ;;  %v15264_v54 = vpop.f32.mrf.mxu0 }
 0x686   : > { %v15266_v11 = vadd.f32 %v10204_v58, %v10203_v16 }
 0x687   : > { %v10206_v18 = vpop.f32.mrf.mxu1  ;;  %v15268_v12 = vpop.f32.mrf.mxu0 }
 0x688   : > { %16874 = vst [vmem:[#allocation25_spill] sm:$0xff] %v15266_v11 }
 0x689   : > { %v10207_v37 = vpop.f32.mrf.mxu1  ;;  %v15270_v50 = vpop.f32.mrf.mxu0 }
 0x68a   : > { %v15272_v13 = vadd.f32 %v10207_v37, %v10206_v18 }
 0x68b   : > { %v10209_v28 = vpop.f32.mrf.mxu1  ;;  %v15274_v14 = vpop.f32.mrf.mxu0 }
 0x68c   : > { %16875 = vst [vmem:[#allocation34_spill] sm:$0xff] %v15272_v13 }
 0x68d   : > { %v10210_v49 = vpop.f32.mrf.mxu1  ;;  %v15276_v24 = vpop.f32.mrf.mxu0 }
 0x68e   : > { %v15278_v31 = vadd.f32 %v10210_v49, %v10209_v28 }
 0x68f   : > { %v10212_v22 = vpop.f32.mrf.mxu1  ;;  %v15280_v59 = vpop.f32.mrf.mxu0 }
 0x690   : > { %16876 = vst [vmem:[#allocation140_spill] sm:$0xff] %v15278_v31 }
 0x691   : > { %v10213_v1 = vpop.f32.mrf.mxu1  ;;  %v15282_v26 = vpop.f32.mrf.mxu0 }
 0x692   : > { %v15284_v39 = vadd.f32 %v10213_v1, %v10212_v22 }
 0x693   : > { %v10215_v8 = vpop.f32.mrf.mxu1  ;;  %v15286_v60 = vpop.f32.mrf.mxu0 }
 0x694   : > { %16877 = vst [vmem:[#allocation58_spill] sm:$0xff] %v15284_v39 }
 0x695   : > { %v10216_v62 = vpop.f32.mrf.mxu1  ;;  %v15288_v56 = vpop.f32.mrf.mxu0 }
 0x696   : > { %v15290_v15 = vadd.f32 %v10216_v62, %v10215_v8 }
 0x697   : > { %v10218_v61 = vpop.f32.mrf.mxu1  ;;  %v15292_v2 = vpop.f32.mrf.mxu0 }
 0x698   : > { %16878 = vst [vmem:[#allocation141_spill] sm:$0xff] %v15290_v15 }
 0x699   : > { %v10219_v57 = vpop.f32.mrf.mxu1  ;;  %v15294_v3 = vpop.f32.mrf.mxu0 }
 0x69a   : > { %v15296_v42 = vadd.f32 %v10219_v57, %v10218_v61 }
 0x69b   : > { %v15298_v9 = vpop.f32.mrf.mxu0  ;;  %v15348_v0 = vpop.f32.mrf.mxu1 }
 0x69c   : > { %16879 = vst [vmem:[#allocation95_spill] sm:$0xff] %v15296_v42  ;;  %16889 = vst [vmem:[#allocation51_spill] sm:$0xff] %v15348_v0  ;;  %v10254_v0 = vadd.f32 %v15252_v51, %v15250_v32 }
 0x69d   : > { %v15300_v43 = vpop.f32.mrf.mxu0  ;;  %v15352_v5 = vpop.f32.mrf.mxu1 }
 0x69e   : > { %16891 = vst [vmem:[#allocation33_spill] sm:$0xff] %v15352_v5 }
 0x69f   : > { %v15302_v41 = vpop.f32.mrf.mxu0 }
 0x6a1   : > { %v15304_v17 = vpop.f32.mrf.mxu0 }
 0x6a3   : > { %v15306_v45 = vpop.f32.mrf.mxu0 }
 0x6a5   : > { %v15308_v16 = vpop.f32.mrf.mxu0 }
 0x6a7   : > { %v15310_v58 = vpop.f32.mrf.mxu0 }
 0x6a9   : > { %v15312_v18 = vpop.f32.mrf.mxu0 }
 0x6ab   : > { %v15314_v37 = vpop.f32.mrf.mxu0 }
 0x6ad   : > { %v15316_v28 = vpop.f32.mrf.mxu0 }
 0x6af   : > { %v15318_v49 = vpop.f32.mrf.mxu0 }
 0x6b1   : > { %v15320_v22 = vpop.f32.mrf.mxu0 }
 0x6b3   : > { %v15322_v1 = vpop.f32.mrf.mxu0 }
 0x6b4   : > { %16880 = vst [vmem:[#allocation32_spill] sm:$0xff] %v15322_v1 }
 0x6b5   : > { %v15324_v8 = vpop.f32.mrf.mxu0 }
 0x6b6   : > { %16881 = vst [vmem:[#allocation107_spill] sm:$0xff] %v15324_v8 }
 0x6b7   : > { %v15326_v62 = vpop.f32.mrf.mxu0 }
 0x6b9   : > { %v15328_v61 = vpop.f32.mrf.mxu0 }
 0x6bb   : > { %v15330_v57 = vpop.f32.mrf.mxu0 }
 0x6bd   : > { %v15332_v42 = vpop.f32.mrf.mxu0 }
 0x6bf   : > { %v15334_v15 = vpop.f32.mrf.mxu0 }
 0x6c0   : > { %16882 = vst [vmem:[#allocation78_spill] sm:$0xff] %v15334_v15  ;;  %v15356_v15 = vpop.f32.mrf.mxu1 }
 0x6c1   : > { %v15336_v13 = vpop.f32.mrf.mxu0  ;;  %16893 = vst [vmem:[#allocation69_spill] sm:$0xff] %v15356_v15  ;;  %v16895_v15 = vld [vmem:[#allocation27_spill] sm:$0xff] }
 0x6c2   : > { %16883 = vst [vmem:[#allocation60_spill] sm:$0xff] %v15336_v13  ;;  %v16894_v13 = vld [vmem:[#allocation100_spill] sm:$0xff] }
 0x6c3   : > { %v15338_v39 = vpop.f32.mrf.mxu0 }
 0x6c4   : > { %16884 = vst [vmem:[#allocation49_spill] sm:$0xff] %v15338_v39 }
 0x6c5   : > { %v15340_v11 = vpop.f32.mrf.mxu0 }
 0x6c6   : > { %16885 = vst [vmem:[#allocation106_spill] sm:$0xff] %v15340_v11  ;;  %v10251_v11 = vadd.f32 %v15246_v38, %v15242_v30  ;;  %v10263_v38 = vadd.f32 %v15270_v50, %v15268_v12 }
 0x6c7   : > { %v15342_v31 = vpop.f32.mrf.mxu0 }
 0x6c8   : > { %16886 = vst [vmem:[#allocation38_spill] sm:$0xff] %v15342_v31  ;;  %v8252_v31 = vadd.f32 %v16895_v15, %v15230_v44  ;;  %v8257_v15 = vadd.f32 %v15094_v27, %v15230_v44 }
 0x6c9   : > { %v15344_v34 = vpop.f32.mrf.mxu0 }
 0x6ca   : > { %16887 = vst [vmem:[#allocation94_spill] sm:$0xff] %v15344_v34  ;;  %v8249_v34 = vadd.f32 %v16894_v13, %v15230_v44  ;;  %v10257_v13 = vadd.f32 %v15258_v35, %v15256_v6  ;;  %v8268_v6 = vadd.f32 %v15121_v48, %v15230_v44  ;;  %v10260_v35 = vadd.f32 %v15264_v54, %v15262_v40 }
 0x6cb   : > { %v15346_v52 = vpop.f32.mrf.mxu0  ;;  %v8281_v40 = vadd.f32 %v15151_v53, %v15230_v44  ;;  %v10269_v54 = vadd.f32 %v15282_v26, %v15280_v59  ;;  %v8284_v59 = vadd.f32 %v15161_v10, %v15230_v44  ;;  %v10272_v26 = vadd.f32 %v15288_v56, %v15286_v60 }
 0x6cc   : > { %16888 = vst [vmem:[#allocation14_spill] sm:$0xff] %v15346_v52  ;;  %v15365_v52 = vpop.f32.mrf.mxu1  ;;  %v8410_v5 = vadd.f32 %v10251_v11, %v8249_v34  ;;  %v8413_v34 = vadd.f32 %v10254_v0, %v8252_v31  ;;  %v8418_v27 = vadd.f32 %v10257_v13, %v8257_v15  ;;  %v8297_v60 = vadd.f32 %v15191_v19, %v15230_v44 }
 0x6cd   : > { %v15350_v55 = vpop.f32.mrf.mxu0  ;;  %v10281_v56 = vadd.f32 %v15304_v17, %v15302_v41  ;;  %v8300_v41 = vadd.f32 %v15203_v23, %v15230_v44  ;;  %v10284_v17 = vadd.f32 %v15308_v16, %v15306_v45  ;;  %v8313_v45 = vadd.f32 %v15225_v29, %v15230_v44 }
 0x6ce   : > { %16890 = vst [vmem:[#allocation29_spill] sm:$0xff] %v15350_v55  ;;  %v10293_v16 = vadd.f32 %v15320_v22, %v15318_v49  ;;  %v8316_v49 = vadd.f32 %v15234_v21, %v15230_v44  ;;  %v16896_v22 = vld [vmem:[#allocation32_spill] sm:$0xff] }
 0x6cf   : > { %v15354_v8 = vpop.f32.mrf.mxu0 }
 0x6d0   : > { %16892 = vst [vmem:[#allocation90_spill] sm:$0xff] %v15354_v8 }
 0x6d1   : > { %v15361_v39 = vpop.f32.mrf.mxu0 }
 0x6d3   : > { %v15369_v55 = vpop.f32.mrf.mxu0 }
 0x6d5   : > { %v15379_v51 = vpop.f32.mrf.mxu0 }
 0x6fd   : > { %v10525_v8 = vpop.f32.mrf.mxu1 }
 0x6fe   : > { %v8571_v1 = vadd.f32 %v10525_v8, %v8410_v5  ;;  %v8265_v5 = vadd.f32 %v15110_v4, %v15230_v44 }
 0x6ff   : > { %v8562_v30 = vpop.f32.mrf.mxu1 }
 0x700   : > { %8691 = vst [vmem:[%s15375_s30 + $0x10] sm:$0xff] %v8571_v1  ;;  %v8563_v32 = vadd.f32 %v8562_v30, %v15236_v46  ;;  %v10266_v46 = vadd.f32 %v15276_v24, %v15274_v14  ;;  %v8426_v31 = vadd.f32 %v10263_v38, %v8265_v5  ;;  %v15392_v1 = vpop.f32.mrf.mxu0  ;;  %v8260_v14 = vadd.f32 %v15098_v20, %v15230_v44 }
 0x701   : > { %v10526_v11 = vpop.f32.mrf.mxu1 }
 0x702   : > { %8689 = vst [vmem:[%s15375_s30] sm:$0xff] %v8563_v32  ;;  %v8574_v12 = vadd.f32 %v10526_v11, %v8413_v34  ;;  %v8429_v38 = vadd.f32 %v10266_v46, %v8268_v6  ;;  %v15404_v32 = vpop.f32.mrf.mxu0  ;;  %v8421_v11 = vadd.f32 %v10260_v35, %v8260_v14 }
 0x703   : > { %v8565_v50 = vpop.f32.mrf.mxu1 }
 0x704   : > { %8692 = vst [vmem:[%s15375_s30 + $0x18] sm:$0xff] %v8574_v12  ;;  %v8566_v0 = vadd.f32 %v8565_v50, %v15244_v7  ;;  %v10275_v7 = vadd.f32 %v15294_v3, %v15292_v2  ;;  %v8273_v2 = vadd.f32 %v15131_v33, %v15230_v44  ;;  %v10278_v3 = vadd.f32 %v15300_v43, %v15298_v9  ;;  %v15416_v12 = vpop.f32.mrf.mxu0 }
 0x705   : > { %v10529_v4 = vpop.f32.mrf.mxu1  ;;  %v8276_v9 = vadd.f32 %v15141_v63, %v15230_v44  ;;  %v10287_v43 = vadd.f32 %v15312_v18, %v15310_v58  ;;  %v8289_v58 = vadd.f32 %v15171_v25, %v15230_v44  ;;  %v10290_v18 = vadd.f32 %v15316_v28, %v15314_v37 }
 0x706   : > { %8690 = vst [vmem:[%s15375_s30 + $0x8] sm:$0xff] %v8566_v0  ;;  %v8587_v8 = vadd.f32 %v10529_v4, %v8426_v31  ;;  %v8442_v13 = vadd.f32 %v10275_v7, %v8281_v40  ;;  %v8434_v15 = vadd.f32 %v10269_v54, %v8273_v2  ;;  %v8445_v0 = vadd.f32 %v10278_v3, %v8284_v59  ;;  %v15428_v31 = vpop.f32.mrf.mxu0 }
 0x707   : > { %v8578_v30 = vpop.f32.mrf.mxu1  ;;  %v8437_v6 = vadd.f32 %v10272_v26, %v8276_v9  ;;  %v8450_v14 = vadd.f32 %v10281_v56, %v8289_v58  ;;  %v8292_v37 = vadd.f32 %v15181_v47, %v15230_v44  ;;  %v10299_v28 = vadd.f32 %v15328_v61, %v15326_v62  ;;  %v16906_v58 = vld [vmem:[#allocation29_spill] sm:$0xff] }
 0x708   : > { %8695 = vst [vmem:[%s15375_s30 + $0x30] sm:$0xff] %v8587_v8  ;;  %v8579_v24 = vadd.f32 %v8578_v30, %v8418_v27  ;;  %v8458_v8 = vadd.f32 %v10287_v43, %v8297_v60  ;;  %v15440_v27 = vpop.f32.mrf.mxu0  ;;  %v8305_v62 = vadd.f32 %v15210_v36, %v15230_v44  ;;  %v10302_v61 = vadd.f32 %v15332_v42, %v15330_v57  ;;  %v16899_v57 = vld [vmem:[#allocation38_spill] sm:$0xff] }
 0x709   : > { %v10530_v48 = vpop.f32.mrf.mxu1  ;;  %v8453_v40 = vadd.f32 %v10284_v17, %v8292_v37  ;;  %v16902_v43 = vld [vmem:[#allocation78_spill] sm:$0xff]  ;;  %v16907_v17 = vld [vmem:[#allocation127_spill] sm:$0xff] }
 0x70a   : > { %8693 = vst [vmem:[%s15375_s30 + $0x20] sm:$0xff] %v8579_v24  ;;  %v8590_v34 = vadd.f32 %v10530_v48, %v8429_v38  ;;  %v8461_v24 = vadd.f32 %v10290_v18, %v8300_v41  ;;  %v15452_v38 = vpop.f32.mrf.mxu0 }
 0x70b   : > { %v8581_v20 = vpop.f32.mrf.mxu1 }
 0x70c   : > { %8696 = vst [vmem:[%s15375_s30 + $0x38] sm:$0xff] %v8590_v34  ;;  %v8582_v5 = vadd.f32 %v8581_v20, %v8421_v11  ;;  %v8474_v34 = vadd.f32 %v10299_v28, %v8313_v45  ;;  %v15464_v11 = vpop.f32.mrf.mxu0  ;;  %v16897_v20 = vld [vmem:[#allocation107_spill] sm:$0xff] }
 0x70d   : > { %v10533_v53 = vpop.f32.mrf.mxu1  ;;  %v10296_v2 = vadd.f32 %v16897_v20, %v16896_v22 }
 0x70e   : > { %8694 = vst [vmem:[%s15375_s30 + $0x28] sm:$0xff] %v8582_v5  ;;  %v8603_v50 = vadd.f32 %v10533_v53, %v8442_v13  ;;  %v8466_v5 = vadd.f32 %v10293_v16, %v8305_v62  ;;  %v16898_v13 = vld [vmem:[#allocation102_spill] sm:$0xff]  ;;  %v10323_v16 = vadd.f32 %v15404_v32, %v15392_v1  ;;  %v10326_v1 = vadd.f32 %v15428_v31, %v15416_v12 }
 0x70f   : > { %v8594_v33 = vpop.f32.mrf.mxu1  ;;  %v8308_v42 = vadd.f32 %v16898_v13, %v15230_v44  ;;  %v16900_v53 = vld [vmem:[#allocation94_spill] sm:$0xff]  ;;  %v16915_v13 = vld [vmem:[#allocation33_spill] sm:$0xff] }
 0x710   : > { %8699 = vst [vmem:[%s15375_s30 + $0x50] sm:$0xff] %v8603_v50  ;;  %v8595_v46 = vadd.f32 %v8594_v33, %v8434_v15  ;;  %v10311_v59 = vadd.f32 %v16900_v53, %v16899_v57  ;;  %v8477_v50 = vadd.f32 %v10302_v61, %v8316_v49  ;;  %v15476_v15 = vpop.f32.mrf.mxu0  ;;  %v16901_v33 = vld [vmem:[#allocation55_spill] sm:$0xff]  ;;  %v16911_v61 = vld [vmem:[#allocation140_spill] sm:$0xff]  ;;  %v16917_v12 = vld [vmem:[#allocation34_spill] sm:$0xff] }
 0x711   : > { %v10534_v10 = vpop.f32.mrf.mxu1  ;;  %v8329_v9 = vadd.f32 %v16901_v33, %v15230_v44  ;;  %v8469_v60 = vadd.f32 %v10296_v2, %v8308_v42  ;;  %v16913_v2 = vld [vmem:[#allocation25_spill] sm:$0xff]  ;;  %v8340_v31 = vadd.f32 %v16917_v12, %v15230_v44 }
 0x712   : > { %8697 = vst [vmem:[%s15375_s30 + $0x40] sm:$0xff] %v8595_v46  ;;  %v8606_v4 = vadd.f32 %v10534_v10, %v8445_v0  ;;  %v16903_v46 = vld [vmem:[#allocation60_spill] sm:$0xff] }
 0x713   : > { %v8597_v63 = vpop.f32.mrf.mxu1  ;;  %v10305_v0 = vadd.f32 %v16903_v46, %v16902_v43 }
 0x714   : > { %8700 = vst [vmem:[%s15375_s30 + $0x58] sm:$0xff] %v8606_v4  ;;  %v8598_v35 = vadd.f32 %v8597_v63, %v8437_v6  ;;  %v16904_v4 = vld [vmem:[#allocation31_spill] sm:$0xff]  ;;  %v16905_v63 = vld [vmem:[#allocation14_spill] sm:$0xff] }
 0x715   : > { %v10537_v19 = vpop.f32.mrf.mxu1  ;;  %v8321_v6 = vadd.f32 %v16904_v4, %v15230_v44  ;;  %v10314_v18 = vadd.f32 %v16906_v58, %v16905_v63  ;;  %v16919_v58 = vld [vmem:[#allocation141_spill] sm:$0xff] }
 0x716   : > { %8698 = vst [vmem:[%s15375_s30 + $0x48] sm:$0xff] %v8598_v35  ;;  %v8619_v30 = vadd.f32 %v10537_v19, %v8458_v8  ;;  %v8490_v8 = vadd.f32 %v10311_v59, %v8329_v9  ;;  %v10333_v19 = vpop.f32.mrf.mxu0 }
 0x717   : > { %v8610_v25 = vpop.f32.mrf.mxu1 }
 0x718   : > { %8703 = vst [vmem:[%s15375_s30 + $0x70] sm:$0xff] %v8619_v30  ;;  %v8611_v7 = vadd.f32 %v8610_v25, %v8450_v14  ;;  %v8332_v30 = vadd.f32 %v16907_v17, %v15230_v44  ;;  %v16908_v14 = vld [vmem:[#allocation49_spill] sm:$0xff]  ;;  %v16909_v25 = vld [vmem:[#allocation106_spill] sm:$0xff] }
 0x719   : > { %v10538_v23 = vpop.f32.mrf.mxu1  ;;  %v10308_v37 = vadd.f32 %v16909_v25, %v16908_v14  ;;  %v16920_v14 = vld [vmem:[#allocation95_spill] sm:$0xff] }
 0x71a   : > { %8701 = vst [vmem:[%s15375_s30 + $0x60] sm:$0xff] %v8611_v7  ;;  %v8622_v48 = vadd.f32 %v10538_v23, %v8461_v24  ;;  %v8482_v7 = vadd.f32 %v10305_v0, %v8321_v6  ;;  %v16910_v23 = vld [vmem:[#allocation139_spill] sm:$0xff]  ;;  %v8356_v25 = vadd.f32 %v16920_v14, %v15230_v44 }
 0x71b   : > { %v8613_v47 = vpop.f32.mrf.mxu1  ;;  %v8324_v45 = vadd.f32 %v16910_v23, %v15230_v44 }
 0x71c   : > { %8704 = vst [vmem:[%s15375_s30 + $0x78] sm:$0xff] %v8622_v48  ;;  %v8614_v54 = vadd.f32 %v8613_v47, %v8453_v40  ;;  %v8493_v40 = vadd.f32 %v10314_v18, %v8332_v30  ;;  %v10334_v47 = vpop.f32.mrf.mxu0  ;;  %v8353_v18 = vadd.f32 %v16919_v58, %v15230_v44 }
 0x71d   : > { %v10541_v29 = vpop.f32.mrf.mxu1  ;;  %v8485_v22 = vadd.f32 %v10308_v37, %v8324_v45  ;;  %v10335_v9 = vadd.f32 %v10334_v47, %v10333_v19 }
 0x71e   : > { %8702 = vst [vmem:[%s15375_s30 + $0x68] sm:$0xff] %v8614_v54  ;;  %v8635_v3 = vadd.f32 %v10541_v29, %v8474_v34  ;;  %v8345_v54 = vadd.f32 %v16911_v61, %v15230_v44  ;;  %v16912_v34 = vld [vmem:[#allocation90_spill] sm:$0xff]  ;;  %v10336_v57 = vpop.f32.mrf.mxu0 }
 0x71f   : > { %v8626_v36 = vpop.f32.mrf.mxu1  ;;  %v10317_v29 = vadd.f32 %v15361_v39, %v16912_v34  ;;  %v16916_v39 = vld [vmem:[#allocation58_spill] sm:$0xff] }
 0x720   : > { %8707 = vst [vmem:[%s15375_s30 + $0x90] sm:$0xff] %v8635_v3  ;;  %v8627_v26 = vadd.f32 %v8626_v36, %v8466_v5  ;;  %v8337_v3 = vadd.f32 %v16913_v2, %v15230_v44  ;;  %v8506_v5 = vadd.f32 %v10323_v16, %v8345_v54  ;;  %v16914_v36 = vld [vmem:[#allocation51_spill] sm:$0xff]  ;;  %v8348_v59 = vadd.f32 %v16916_v39, %v15230_v44 }
 0x721   : > { %v10542_v21 = vpop.f32.mrf.mxu1  ;;  %v10223_v42 = vadd.f32 %v16915_v13, %v16914_v36 }
 0x722   : > { %8705 = vst [vmem:[%s15375_s30 + $0x80] sm:$0xff] %v8627_v26  ;;  %v8638_v10 = vadd.f32 %v10542_v21, %v8477_v50  ;;  %v10320_v26 = vadd.f32 %v15379_v51, %v15369_v55  ;;  %v8498_v21 = vadd.f32 %v10317_v29, %v8337_v3  ;;  %v8509_v46 = vadd.f32 %v10326_v1, %v8348_v59 }
 0x723   : > { %v8629_v56 = vpop.f32.mrf.mxu1  ;;  %v8361_v0 = vadd.f32 %v10223_v42, %v15230_v44  ;;  %v10329_v51 = vadd.f32 %v15452_v38, %v15440_v27  ;;  %v10332_v27 = vadd.f32 %v15476_v15, %v15464_v11 }
 0x724   : > { %8708 = vst [vmem:[%s15375_s30 + $0x98] sm:$0xff] %v8638_v10  ;;  %v8630_v35 = vadd.f32 %v8629_v56, %v8469_v60  ;;  %v10337_v10 = vpop.f32.mrf.mxu0  ;;  %v16918_v56 = vld [vmem:[#allocation69_spill] sm:$0xff]  ;;  %v8501_v6 = vadd.f32 %v10320_v26, %v8340_v31 }
 0x725   : > { %v10545_v41 = vpop.f32.mrf.mxu1  ;;  %v10226_v55 = vadd.f32 %v15365_v52, %v16918_v56  ;;  %v8522_v19 = vadd.f32 %v10335_v9, %v8361_v0  ;;  %v8514_v17 = vadd.f32 %v10329_v51, %v8353_v18  ;;  %v8517_v23 = vadd.f32 %v10332_v27, %v8356_v25 }
 0x726   : > { %8706 = vst [vmem:[%s15375_s30 + $0x88] sm:$0xff] %v8630_v35  ;;  %v8651_v28 = vadd.f32 %v10545_v41, %v8490_v8  ;;  %v10338_v35 = vadd.f32 %v10337_v10, %v10336_v57 }
 0x727   : > { %v8642_v24 = vpop.f32.mrf.mxu1  ;;  %v8364_v52 = vadd.f32 %v10226_v55, %v15230_v44 }
 0x728   : > { %8711 = vst [vmem:[%s15375_s30 + $0xb0] sm:$0xff] %v8651_v28  ;;  %v8643_v48 = vadd.f32 %v8642_v24, %v8482_v7 }
 0x729   : > { %v10546_v62 = vpop.f32.mrf.mxu1  ;;  %v8525_v28 = vadd.f32 %v10338_v35, %v8364_v52 }
 0x72a   : > { %8709 = vst [vmem:[%s15375_s30 + $0xa0] sm:$0xff] %v8643_v48  ;;  %v8654_v49 = vadd.f32 %v10546_v62, %v8493_v40 }
 0x72b   : > { %v8645_v20 = vpop.f32.mrf.mxu1 }
 0x72c   : > { %8712 = vst [vmem:[%s15375_s30 + $0xb8] sm:$0xff] %v8654_v49  ;;  %v8646_v32 = vadd.f32 %v8645_v20, %v8485_v22 }
 0x72d   : > { %v10549_v53 = vpop.f32.mrf.mxu1 }
 0x72e   : > { %8710 = vst [vmem:[%s15375_s30 + $0xa8] sm:$0xff] %v8646_v32  ;;  %v8667_v50 = vadd.f32 %v10549_v53, %v8506_v5 }
 0x72f   : > { %v8658_v33 = vpop.f32.mrf.mxu1 }
 0x730   : > { %8715 = vst [vmem:[%s15375_s30 + $0xd0] sm:$0xff] %v8667_v50  ;;  %v8659_v43 = vadd.f32 %v8658_v33, %v8498_v21 }
 0x731   : > { %v10550_v60 = vpop.f32.mrf.mxu1 }
 0x732   : > { %8713 = vst [vmem:[%s15375_s30 + $0xc0] sm:$0xff] %v8659_v43  ;;  %v8670_v4 = vadd.f32 %v10550_v60, %v8509_v46 }
 0x733   : > { %v8661_v63 = vpop.f32.mrf.mxu1 }
 0x734   : > { %8716 = vst [vmem:[%s15375_s30 + $0xd8] sm:$0xff] %v8670_v4  ;;  %v8662_v8 = vadd.f32 %v8661_v63, %v8501_v6 }
 0x735   : > { %v10553_v41 = vpop.f32.mrf.mxu1 }
 0x736   : > { %8714 = vst [vmem:[%s15375_s30 + $0xc8] sm:$0xff] %v8662_v8  ;;  %v8683_v38 = vadd.f32 %v10553_v41, %v8522_v19 }
 0x737   : > { %v8674_v30 = vpop.f32.mrf.mxu1 }
 0x738   : > { %8719 = vst [vmem:[%s15375_s30 + $0xf0] sm:$0xff] %v8683_v38  ;;  %v8675_v37 = vadd.f32 %v8674_v30, %v8514_v17 }
 0x739   : > { %v10554_v7 = vpop.f32.mrf.mxu1 }
 0x73a   : > { %8717 = vst [vmem:[%s15375_s30 + $0xe0] sm:$0xff] %v8675_v37  ;;  %v8686_v24 = vadd.f32 %v10554_v7, %v8525_v28  ;;  %8727 = sbr.rel (!%p11556_p4) target bundleno = 1903 (0x76f), region = 68 }
 0x73b   : > { %v8677_v45 = vpop.f32.mrf.mxu1 }
 0x73c   : > { %8720 = vst [vmem:[%s15375_s30 + $0xf8] sm:$0xff] %v8686_v24  ;;  %v8678_v16 = vadd.f32 %v8677_v45, %v8517_v23 }
 0x73e   : > { %8718 = vst [vmem:[%s15375_s30 + $0xe8] sm:$0xff] %v8678_v16 }
 0x73f   : > { %s16930_s20 = smov (!%p8730_p9, %s8729_s20), 32 }
 0x740   : > { %s9577_s25 = sshll.u32 %s16930_s20, 7 }
 0x741   : > { %p9580_p3 = scmp.eq.s32.totalorder %s9577_s25, 0 }
 0x742   : > { %s15550_s26 = sshrl.u32 (!%p9580_p3), %s16930_s20, 5 }
 0x743   : > { %8738 = sbr.rel (%p9580_p3) target bundleno = 1903 (0x76f), region = 72  ;;  %p9581_p4 = scmp.le.s32.totalorder (!%p9580_p3), %s15550_s26, 0 }
 0x748   : > { %9021 = sbr.rel (%p9581_p4) target bundleno = 1886 (0x75e), region = 149  ;;  %s16921_s12 = smov (!%p9581_p4), %s15544_s23 }
 0x749   : > { %s16922_s17 = smov (!%p9581_p4), %s15375_s30  ;;  %s15559_s15 = smov (!%p9581_p4), 0  }
 0x74a   : > { %s15561_s28 = smov (!%p9581_p4), 0  }
 0x74d LB: >> { %v8863_v44 = vld [vmem:[%s11450_s17] sm:$0xff]  ;;  %v8865_v11 = vld [vmem:[%s11450_s17 + $0x8] sm:$0xff]  ;;  %v8867_v15 = vld [vmem:[%s11450_s17 + $0x10] sm:$0xff]  ;;  %s8927_s29 = sadd.s32 1, %s11454_s15  ;;  %s8857_s28 = sadd.s32 1, %s11458_s28   ;;  %s11458_s28 = sphi %s15561_s28, %s8857_s28   ;;  %s11454_s15 = sphi %s15559_s15, %s16925_s15   ;;  %s11450_s17 = sphi %s16922_s17, %s16924_s17   ;;  %s11446_s12 = sphi %s16921_s12, %s16923_s12  }
 0x74e   : >> { %8864 = vst [vmem:[%s11446_s12] sm:$0xff] %v8863_v44  ;;  %8866 = vst [vmem:[%s11446_s12 + $0x8] sm:$0xff] %v8865_v11  ;;  %v8869_v48 = vld [vmem:[%s11450_s17 + $0x18] sm:$0xff]  ;;  %v8871_v40 = vld [vmem:[%s11450_s17 + $0x20] sm:$0xff]  ;;  %p8928_p5 = scmp.ge.s32.totalorder %s8927_s29, %s15550_s26  ;;  %p8856_p8 = scmp.ge.s32.totalorder %s8857_s28, %s15550_s26 }
 0x74f   : >> { %8868 = vst [vmem:[%s11446_s12 + $0x10] sm:$0xff] %v8867_v15  ;;  %v8873_v47 = vld [vmem:[%s11450_s17 + $0x28] sm:$0xff]  ;;  %8870 = vst [vmem:[%s11446_s12 + $0x18] sm:$0xff] %v8869_v48  ;;  %v8875_v62 = vld [vmem:[%s11450_s17 + $0x30] sm:$0xff] }
 0x750   : >> { %8872 = vst [vmem:[%s11446_s12 + $0x20] sm:$0xff] %v8871_v40  ;;  %8874 = vst [vmem:[%s11446_s12 + $0x28] sm:$0xff] %v8873_v47  ;;  %v8877_v61 = vld [vmem:[%s11450_s17 + $0x38] sm:$0xff]  ;;  %v8879_v54 = vld [vmem:[%s11450_s17 + $0x40] sm:$0xff]  ;;  %s16932_s29 = smov (%p8928_p5, %s8927_s29), 0 }
 0x751   : >> { %8876 = vst [vmem:[%s11446_s12 + $0x30] sm:$0xff] %v8875_v62  ;;  %8878 = vst [vmem:[%s11446_s12 + $0x38] sm:$0xff] %v8877_v61  ;;  %v8881_v34 = vld [vmem:[%s11450_s17 + $0x48] sm:$0xff]  ;;  %v8883_v29 = vld [vmem:[%s11450_s17 + $0x50] sm:$0xff]  ;;  %s9582_s27 = sshll.u32 %s16932_s29, 8  ;;  %s16925_s15 = smov %s16932_s29 }
 0x752   : >> { %8880 = vst [vmem:[%s11446_s12 + $0x40] sm:$0xff] %v8879_v54  ;;  %v8885_v49 = vld [vmem:[%s11450_s17 + $0x58] sm:$0xff]  ;;  %8882 = vst [vmem:[%s11446_s12 + $0x48] sm:$0xff] %v8881_v34  ;;  %v8887_v22 = vld [vmem:[%s11450_s17 + $0x60] sm:$0xff]  ;;  %s15617_s11 = scalar_lea.vmem %s15375_s30, %s9582_s27 [#allocation6]   ;;  %s8933_s14 = scalar_lea.vmem %s15544_s23, %s9582_s27  }
 0x753   : >> { %8884 = vst [vmem:[%s11446_s12 + $0x50] sm:$0xff] %v8883_v29  ;;  %8886 = vst [vmem:[%s11446_s12 + $0x58] sm:$0xff] %v8885_v49  ;;  %v8889_v20 = vld [vmem:[%s11450_s17 + $0x68] sm:$0xff]  ;;  %v8891_v2 = vld [vmem:[%s11450_s17 + $0x70] sm:$0xff] }
 0x754   : >> { %8888 = vst [vmem:[%s11446_s12 + $0x60] sm:$0xff] %v8887_v22  ;;  %8890 = vst [vmem:[%s11446_s12 + $0x68] sm:$0xff] %v8889_v20  ;;  %v8893_v3 = vld [vmem:[%s11450_s17 + $0x78] sm:$0xff]  ;;  %v8895_v1 = vld [vmem:[%s11450_s17 + $0x80] sm:$0xff] }
 0x755   : >> { %8892 = vst [vmem:[%s11446_s12 + $0x70] sm:$0xff] %v8891_v2  ;;  %v8897_v32 = vld [vmem:[%s11450_s17 + $0x88] sm:$0xff]  ;;  %8894 = vst [vmem:[%s11446_s12 + $0x78] sm:$0xff] %v8893_v3  ;;  %v8899_v5 = vld [vmem:[%s11450_s17 + $0x90] sm:$0xff] }
 0x756   : >> { %8896 = vst [vmem:[%s11446_s12 + $0x80] sm:$0xff] %v8895_v1  ;;  %8898 = vst [vmem:[%s11446_s12 + $0x88] sm:$0xff] %v8897_v32  ;;  %v8901_v36 = vld [vmem:[%s11450_s17 + $0x98] sm:$0xff]  ;;  %v8903_v13 = vld [vmem:[%s11450_s17 + $0xa0] sm:$0xff] }
 0x757   : >> { %8900 = vst [vmem:[%s11446_s12 + $0x90] sm:$0xff] %v8899_v5  ;;  %8902 = vst [vmem:[%s11446_s12 + $0x98] sm:$0xff] %v8901_v36  ;;  %v8905_v42 = vld [vmem:[%s11450_s17 + $0xa8] sm:$0xff]  ;;  %v8907_v57 = vld [vmem:[%s11450_s17 + $0xb0] sm:$0xff] }
 0x758   : >> { %8904 = vst [vmem:[%s11446_s12 + $0xa0] sm:$0xff] %v8903_v13  ;;  %v8909_v53 = vld [vmem:[%s11450_s17 + $0xb8] sm:$0xff]  ;;  %8906 = vst [vmem:[%s11446_s12 + $0xa8] sm:$0xff] %v8905_v42  ;;  %v8911_v39 = vld [vmem:[%s11450_s17 + $0xc0] sm:$0xff] }
 0x759   : >> { %8908 = vst [vmem:[%s11446_s12 + $0xb0] sm:$0xff] %v8907_v57  ;;  %8910 = vst [vmem:[%s11446_s12 + $0xb8] sm:$0xff] %v8909_v53  ;;  %v8913_v59 = vld [vmem:[%s11450_s17 + $0xc8] sm:$0xff]  ;;  %v8915_v26 = vld [vmem:[%s11450_s17 + $0xd0] sm:$0xff]  ;;  %8859 = sbr.rel (!%p8856_p8) target bundleno = 1869 (0x74d), region = 155 }
 0x75a   : >> { %8912 = vst [vmem:[%s11446_s12 + $0xc0] sm:$0xff] %v8911_v39  ;;  %8914 = vst [vmem:[%s11446_s12 + $0xc8] sm:$0xff] %v8913_v59  ;;  %v8917_v50 = vld [vmem:[%s11450_s17 + $0xd8] sm:$0xff]  ;;  %v8919_v21 = vld [vmem:[%s11450_s17 + $0xe0] sm:$0xff] }
 0x75b   : >> { %8916 = vst [vmem:[%s11446_s12 + $0xd0] sm:$0xff] %v8915_v26  ;;  %v8921_v33 = vld [vmem:[%s11450_s17 + $0xe8] sm:$0xff]  ;;  %8918 = vst [vmem:[%s11446_s12 + $0xd8] sm:$0xff] %v8917_v50  ;;  %v8923_v12 = vld [vmem:[%s11450_s17 + $0xf0] sm:$0xff] }
 0x75c   : >> { %8920 = vst [vmem:[%s11446_s12 + $0xe0] sm:$0xff] %v8919_v21  ;;  %8922 = vst [vmem:[%s11446_s12 + $0xe8] sm:$0xff] %v8921_v33  ;;  %v8925_v31 = vld [vmem:[%s11450_s17 + $0xf8] sm:$0xff]  ;;  %s16924_s17 = smov %s15617_s11 }
 0x75d   : >> { %8924 = vst [vmem:[%s11446_s12 + $0xf0] sm:$0xff] %v8923_v12  ;;  %8926 = vst [vmem:[%s11446_s12 + $0xf8] sm:$0xff] %v8925_v31  ;;  %s16923_s12 = smov %s8933_s14 }
 0x75e PF: > { %s15658_s24 = sand.u32 31, %s16930_s20   ;;  %s9593_s19 = sshll.u32 %s15550_s26, 8 }
 0x75f   : > { %s8938_s21 = scalar_lea.vmem %s15375_s30, %s9593_s19 [#allocation6]   ;;  %s8940_s22 = scalar_lea.vmem %s15544_s23, %s9593_s19  }
 0x760   : > { %p9587_p11 = scmp.le.s32.totalorder %s15658_s24, 0 }
 0x761   : > { %s11460_s18 = smov (!%p9587_p11), %s8940_s22   ;;  %s11464_s25 = smov (!%p9587_p11), %s8938_s21  }
 0x762   : > { %9035 = sbr.rel (%p9587_p11) target bundleno = 1903 (0x76f), region = 160  ;;  %s11468_s27 = smov (!%p9587_p11), 0  }
 0x763   : > { %s11472_s29 = smov (!%p9587_p11), 0  }
 0x767 LB: >> { %v8950_v9 = vld [vmem:[%s11466_s25] sm:$0xff]  ;;  %s8952_s20 = sadd.s32 1, %s11470_s27  ;;  %s8944_s29 = sadd.s32 1, %s11474_s29   ;;  %s11474_s29 = sphi %s11472_s29, %s8944_s29   ;;  %s11470_s27 = sphi %s11468_s27, %s11469_s27   ;;  %s11466_s25 = sphi %s11464_s25, %s8957_s25   ;;  %s11462_s18 = sphi %s11460_s18, %s8958_s18  }
 0x768   : >> { %8951 = vst [vmem:[%s11462_s18] sm:$0xff] %v8950_v9  ;;  %p8953_p12 = scmp.ge.s32.totalorder %s8952_s20, %s15658_s24  ;;  %p8943_p0 = scmp.ge.s32.totalorder %s8944_s29, %s15658_s24 }
 0x76a   : >> { %s16934_s20 = smov (%p8953_p12, %s8952_s20), 0  ;;  %8946 = sbr.rel (!%p8943_p0) target bundleno = 1895 (0x767), region = 166 }
 0x76b   : >> { %s9588_s30 = sshll.u32 %s16934_s20, 3  ;;  %s11469_s27 = smov %s16934_s20  }
 0x76c   : >> { %s8957_s25 = scalar_lea.vmem %s8938_s21, %s9588_s30 [#allocation6]   ;;  %s8958_s18 = scalar_lea.vmem %s8940_s22, %s9588_s30  }
 0x76f PF: > { %p18_p13 = scmp.ge.s32.totalorder %s11546_s13, 4   ;;  %s16926_s30 = smov %s11438_s10 }
 0x770   : > { %s16927_s10 = smov %s11554_s16  ;;  %s16928_s11 = smov %s11546_s13 }
 0x771   :  { %20 = sbr.rel (!%p18_p13) target bundleno = 3 (0x3), region = 177 }
 0x776   :  { %8974 = vsyncpa [#allocation3], 1 }
 0x777   :  { %8976 = vsyncpa [#allocation3 + $0x1], 1 }
 0x778   :  { %8977 = vsyncpa [#allocation5], 1 }

</bundles_post_ra>
